<compile_context>
chip_gen: v5e
topology: v5e:2x2
jax: 0.10.0
libtpu: 0.0.40
codegen_flags: <defaults>
</compile_context>

<pallas_src>
import numpy as np
import jax
import jax.numpy as jnp
from jax.experimental import pallas as pl
from jax.experimental.pallas import tpu as pltpu

PREC = jnp.float32

# ------------- configuration (mirrors DescrptSeR.__init__ defaults) -------------
RCUT = 3.0
RCUT_SMTH = 1.0
SEL = [6, 10]                      # per-type neighbour selection
NEURON = [25, 50, 100]             # embedding net widths (default)
ENV_PROTECTION = 0.0
RES_RESCALE = 1.0 / 5.0
NTYPES = len(SEL)
NNEI = sum(SEL)
SEC = [0] + list(np.cumsum(SEL))
NG = NEURON[-1]
NG_PAD = ((NG + 127) // 128) * 128  # lane-dense output width


def _round_up(x, m):
    return ((x + m - 1) // m) * m


def _res_flags():
    flags, in_dim = [], 1
    for n_out in NEURON:
        flags.append(n_out == in_dim or n_out == 2 * in_dim)
        in_dim = n_out
    return tuple(flags)


RES_FLAGS = _res_flags()                              # (False, True, True) for defaults
PER_TYPE_NMATS = sum(2 + int(f) for f in RES_FLAGS) + 1


# --------------------- host-side weight expansion (per type) ---------------------
def _expand_embedding_weights(wb, type_idx):
    """Expand the tiny per-neighbour EmbeddingNet weights into block-diagonal
    matrices acting on the interleaved (neighbour x feature) lane layout.
    The per-type neighbour selection is folded into the first layer, and the
    neighbour mean / (sel/nnei) / res_rescale into the final matrix."""
    sel_i = SEL[type_idx]
    lo, hi = SEC[type_idx], SEC[type_idx + 1]
    eye_sel = jnp.eye(sel_i, dtype=PREC)
    P = jnp.zeros((NNEI, sel_i), PREC).at[lo:hi, :].set(eye_sel)   # neighbour-column selector

    mats = []
    in_dim = 1
    for li, n_out in enumerate(NEURON):
        w = wb[2 * li].astype(PREC)          # (in_dim, n_out)
        b = wb[2 * li + 1].astype(PREC)      # (1, n_out)
        We = jnp.kron(eye_sel, w)            # (sel*in, sel*out)
        if li == 0:
            We = P @ We                      # (NNEI, sel*n_out)
        Be = jnp.tile(b, (1, sel_i))         # (1, sel*n_out)
        mats += [We, Be]
        if RES_FLAGS[li]:
            if n_out == in_dim:
                blk = jnp.eye(in_dim, dtype=PREC)
            else:  # n_out == 2 * in_dim  -> concat([h, h]) residual
                blk = jnp.concatenate([jnp.eye(in_dim, dtype=PREC)] * 2, axis=1)
            De = jnp.kron(eye_sel, blk)
            if li == 0:
                De = P @ De
            mats.append(De)
        in_dim = n_out

    # neighbour mean + (sel_i/nnei) + res_rescale, padded to NG_PAD lanes
    eye_pad = jnp.zeros((NG, NG_PAD), PREC).at[:, :NG].set(jnp.eye(NG, dtype=PREC))
    Me = jnp.tile(eye_pad, (sel_i, 1)) * (RES_RESCALE / NNEI)      # (sel_i*NG, NG_PAD)
    mats.append(Me)
    assert len(mats) == PER_TYPE_NMATS
    return mats


# ------------------------------- fused Pallas kernel ------------------------------
def _make_fused_kernel(nnei, n_types, per_type, res_flags, rcut, rcut_smth, env_prot):
    def kernel(*refs):
        dxyz_ref, onehot_ref, avg_ref, std_ref = refs[:4]
        wrefs = refs[4:4 + n_types * per_type]
        out_ref = refs[4 + n_types * per_type]
        sw_ref = refs[4 + n_types * per_type + 1]

        # ---- radial env matrix + smooth switch (prod_env_mat, radial_only=True) ----
        d = dxyz_ref[...]                               # (TR, 3*nnei) = [dx | dy | dz]
        dx = d[:, 0 * nnei:1 * nnei]
        dy = d[:, 1 * nnei:2 * nnei]
        dz = d[:, 2 * nnei:3 * nnei]
        length = jnp.sqrt(dx * dx + dy * dy + dz * dz)  # invalid neighbours encoded as > rcut
        t0 = 1.0 / (length + env_prot)
        uu = (length - rcut_smth) / (rcut - rcut_smth)
        vv = uu * uu * uu * (-6.0 * uu * uu + 15.0 * uu - 10.0) + 1.0
        sw = jnp.where(length <= rcut_smth, 1.0,
                       jnp.where(length >= rcut, 0.0, vv))

        onehot = onehot_ref[...]                        # (TR, ntypes)
        avg = jnp.dot(onehot, avg_ref[...], preferred_element_type=jnp.float32)
        std = jnp.dot(onehot, std_ref[...], preferred_element_type=jnp.float32)
        sr = (t0 * sw - avg) / std                      # (TR, nnei), stays in VMEM only

        sw_ref[...] = sw.astype(sw_ref.dtype)

        # ---- per-type embedding nets (interleaved block-diagonal form) + type sum ----
        acc = None
        for tt in range(n_types):
            ws = wrefs[tt * per_type:(tt + 1) * per_type]
            k = 0
            h = sr                                      # (TR, nnei)
            for flag in res_flags:
                we = ws[k][...]
                be = ws[k + 1][...]
                k += 2
                y = jnp.tanh(jnp.dot(h, we, preferred_element_type=jnp.float32) + be)
                if flag:
                    y = y + jnp.dot(h, ws[k][...], preferred_element_type=jnp.float32)
                    k += 1
                h = y                                   # (TR, sel_t * n_out)
            gg = jnp.dot(h, ws[k][...], preferred_element_type=jnp.float32)  # (TR, NG_PAD)
            acc = gg if acc is None else acc + gg
        out_ref[...] = acc.astype(out_ref.dtype)

    return kernel


# --------------------------- wrapper (forward) -----------------------------------
def descrpt_se_r_forward(coord_ext, atype_ext, nlist, mean, stddev, weights):
    nf, nloc, nnei = nlist.shape
    assert nnei == NNEI
    nall = atype_ext.shape[1]
    coord = coord_ext.reshape(nf, nall, 3).astype(PREC)

    R = nf * nloc
    TR = min(256, _round_up(max(R, 8), 8))      # adaptive row tile (sweepable 256..1024)
    R_pad = _round_up(R, TR)
    pad = R_pad - R

    # ----- neighbour gather + relative displacements (glue, fused by XLA) -----
    valid = nlist >= 0
    nlist_safe = jnp.where(valid, nlist, 0)
    idx = nlist_safe.reshape(nf, nloc * nnei, 1)
    coord_r = jnp.take_along_axis(coord, idx, axis=1).reshape(nf, nloc, nnei, 3)
    diff = coord_r - coord[:, :nloc, None, :]                     # (nf, nloc, nnei, 3)
    # encode invalid neighbours as an out-of-range displacement -> switch == 0,
    # sr == -avg/std, exactly as with the reference masking.
    far = jnp.asarray([2.0 * RCUT, 0.0, 0.0], PREC)
    diff = jnp.where(valid[..., None], diff, far)

    dxyz = diff.reshape(R, nnei, 3).transpose(0, 2, 1).reshape(R, 3 * nnei)  # [dx|dy|dz]
    atype_flat = atype_ext[:, :nloc].reshape(R)

    if pad:
        dxyz = jnp.concatenate(
            [dxyz, jnp.full((pad, 3 * nnei), 2.0 * RCUT, PREC)], axis=0)
        atype_flat = jnp.concatenate(
            [atype_flat, jnp.zeros((pad,), atype_flat.dtype)], axis=0)

    onehot = (atype_flat[:, None] == jnp.arange(NTYPES)[None, :]).astype(PREC)  # (R_pad, ntypes)
    avg_tbl = mean[..., 0].astype(PREC)          # (ntypes, nnei), resident in VMEM
    std_tbl = stddev[..., 0].astype(PREC)

    # expanded embedding weights (done once per call; in a real model: precompute once)
    wflat = []
    for ii in range(NTYPES):
        wflat += _expand_embedding_weights(weights[ii], ii)

    # NOTE: exclude_types = [] -> PairExcludeMask is all ones, so the mask multiply
    # from the reference module is a no-op and is skipped here.

    grid = (R_pad // TR,)
    row_spec3 = pl.BlockSpec((TR, 3 * nnei), lambda i: (i, 0))
    row_spec_oh = pl.BlockSpec((TR, NTYPES), lambda i: (i, 0))

    def _const_spec(arr):
        return pl.BlockSpec(arr.shape, lambda i: (0, 0))

    in_specs = [row_spec3, row_spec_oh, _const_spec(avg_tbl), _const_spec(std_tbl)]
    in_specs += [_const_spec(w) for w in wflat]
    out_specs = [pl.BlockSpec((TR, NG_PAD), lambda i: (i, 0)),
                 pl.BlockSpec((TR, nnei), lambda i: (i, 0))]
    out_shape = [jax.ShapeDtypeStruct((R_pad, NG_PAD), PREC),
                 jax.ShapeDtypeStruct((R_pad, nnei), PREC)]

    kernel = _make_fused_kernel(nnei, NTYPES, PER_TYPE_NMATS, RES_FLAGS,
                                RCUT, RCUT_SMTH, ENV_PROTECTION)
    out_pad, sw_pad = pl.pallas_call(
        kernel,
        grid=grid,
        in_specs=in_specs,
        out_specs=out_specs,
        out_shape=out_shape,
        compiler_params=pltpu.CompilerParams(
            dimension_semantics=("parallel",),
            vmem_limit_bytes=48 * 1024 * 1024),
    )(dxyz, onehot, avg_tbl, std_tbl, *wflat)

    result = out_pad[:R, :NG].reshape(nf, nloc, NG)
    sw = sw_pad[:R].reshape(nf, nloc, nnei, 1)
    # (descriptor, gr=None, g2=None, h2=None, sw) as in DescrptSeR.forward
    return result, None, None, None, sw


# --------------------------- pure-JAX reference ----------------------------------
def reference_forward(coord_ext, atype_ext, nlist, mean, stddev, weights):
    nf, nloc, nnei = nlist.shape
    nall = atype_ext.shape[1]
    coord = coord_ext.reshape(nf, nall, 3).astype(PREC)
    atype = atype_ext[:, :nloc]
    valid = nlist >= 0
    nlist_safe = jnp.where(valid, nlist, nall - 1)
    idx = nlist_safe.reshape(nf, nloc * nnei, 1)
    coord_r = jnp.take_along_axis(coord, idx, axis=1).reshape(nf, nloc, nnei, 3)
    diff = coord_r - coord[:, :nloc, None, :]
    length = jnp.linalg.norm(diff, axis=-1)
    mask = valid.astype(PREC)
    length = length + (1.0 - mask) * RCUT
    t0 = 1.0 / (length + ENV_PROTECTION)
    uu = (length - RCUT_SMTH) / (RCUT - RCUT_SMTH)
    vv = uu ** 3 * (-6 * uu ** 2 + 15 * uu - 10) + 1
    weight = jnp.where(length <= RCUT_SMTH, 1.0,
                       jnp.where(length >= RCUT, 0.0, vv)) * mask
    sr = (t0 * weight - mean[atype][..., 0]) / stddev[atype][..., 0]
    R = nf * nloc
    sr = sr.reshape(R, nnei)
    out = jnp.zeros((R, NG), PREC)
    for ii in range(NTYPES):
        ss = sr[:, SEC[ii]:SEC[ii + 1]].reshape(-1, 1)
        h, in_dim, wb = ss, 1, weights[ii]
        for li, n_out in enumerate(NEURON):
            w, b = wb[2 * li], wb[2 * li + 1]
            y = jnp.tanh(h @ w + b)
            if n_out == in_dim:
                y = y + h
            elif n_out == 2 * in_dim:
                y = y + jnp.concatenate([h, h], axis=-1)
            h, in_dim = y, n_out
        gg = h.reshape(R, SEL[ii], NG).mean(axis=1)
        out = out + gg * (SEL[ii] / NNEI)
    result = (out * RES_RESCALE).reshape(nf, nloc, NG)
    return result, weight.reshape(nf, nloc, nnei, 1)


# --------------------------------- main -------------------------------------------
if __name__ == "__main__":
    key = jax.random.PRNGKey(0)
    nf, nloc, nall = 2, 8, 12
    k1, k2, k3, k4, kw = jax.random.split(key, 5)

    coord_ext = jax.random.uniform(k1, (nf, nall * 3), dtype=PREC, minval=0.0, maxval=3.0)
    atype_ext = jax.random.randint(k2, (nf, nall), 0, NTYPES)
    nlist = jax.random.randint(k3, (nf, nloc, NNEI), 0, nall)
    # a physical neighbour list never contains the centre atom itself; mark such
    # entries (and a random 25%) as invalid (-1).
    self_idx = jnp.arange(nloc)[None, :, None]
    nlist = jnp.where(nlist == self_idx, -1, nlist)
    drop = jax.random.uniform(k4, (nf, nloc, NNEI)) < 0.25
    nlist = jnp.where(drop, -1, nlist).astype(jnp.int32)

    # buffers as in __init__: mean = 0, stddev = 1, shape (ntypes, nnei, 1)
    mean = jnp.zeros((NTYPES, NNEI, 1), PREC)
    stddev = jnp.ones((NTYPES, NNEI, 1), PREC)

    # deterministic EmbeddingNet parameters per type: 1 -> 25 -> 50 -> 100
    weights = []
    wkeys = jax.random.split(kw, NTYPES)
    for ii in range(NTYPES):
        lk = jax.random.split(wkeys[ii], 2 * len(NEURON))
        wb, in_dim = [], 1
        for li, n_out in enumerate(NEURON):
            w = 0.1 * jax.random.normal(lk[2 * li], (in_dim, n_out), PREC)
            b = 0.1 * jax.random.normal(lk[2 * li + 1], (1, n_out), PREC)
            wb += [w, b]
            in_dim = n_out
        weights.append(wb)

    res, _, _, _, sw = descrpt_se_r_forward(coord_ext, atype_ext, nlist, mean, stddev, weights)
    jax.block_until_ready(res)
    jax.block_until_ready(sw)

    res_ref, sw_ref = reference_forward(coord_ext, atype_ext, nlist, mean, stddev, weights)
    assert res.shape == (nf, nloc, NG)
    assert sw.shape == (nf, nloc, NNEI, 1)
    assert jnp.allclose(res, res_ref, atol=1e-4, rtol=1e-4), "descriptor mismatch"
    assert jnp.allclose(sw, sw_ref, atol=1e-5, rtol=1e-5), "switch mismatch"
    print("KERNEL_OK")
</pallas_src>

<mosaic_0001>
module attributes {stable_mosaic.version = 11 : i64} {
  func.func @kernel(%arg0: i32, %arg1: memref<16x48xf32, #tpu.memory_space<vmem>>, %arg2: memref<16x2xf32, #tpu.memory_space<vmem>>, %arg3: memref<2x16xf32, #tpu.memory_space<vmem>>, %arg4: memref<2x16xf32, #tpu.memory_space<vmem>>, %arg5: memref<16x150xf32, #tpu.memory_space<vmem>>, %arg6: memref<1x150xf32, #tpu.memory_space<vmem>>, %arg7: memref<150x300xf32, #tpu.memory_space<vmem>>, %arg8: memref<1x300xf32, #tpu.memory_space<vmem>>, %arg9: memref<150x300xf32, #tpu.memory_space<vmem>>, %arg10: memref<300x600xf32, #tpu.memory_space<vmem>>, %arg11: memref<1x600xf32, #tpu.memory_space<vmem>>, %arg12: memref<300x600xf32, #tpu.memory_space<vmem>>, %arg13: memref<600x128xf32, #tpu.memory_space<vmem>>, %arg14: memref<16x250xf32, #tpu.memory_space<vmem>>, %arg15: memref<1x250xf32, #tpu.memory_space<vmem>>, %arg16: memref<250x500xf32, #tpu.memory_space<vmem>>, %arg17: memref<1x500xf32, #tpu.memory_space<vmem>>, %arg18: memref<250x500xf32, #tpu.memory_space<vmem>>, %arg19: memref<500x1000xf32, #tpu.memory_space<vmem>>, %arg20: memref<1x1000xf32, #tpu.memory_space<vmem>>, %arg21: memref<500x1000xf32, #tpu.memory_space<vmem>>, %arg22: memref<1000x128xf32, #tpu.memory_space<vmem>>, %arg23: memref<16x128xf32, #tpu.memory_space<vmem>>, %arg24: memref<16x16xf32, #tpu.memory_space<vmem>>) attributes {dimension_semantics = [#tpu.dimension_semantics<parallel>], iteration_bounds = array<i64: 1>, scalar_prefetch = 0 : i64, scratch_operands = 0 : i64, tpu.core_type = #tpu.core_type<tc>, window_params = [{transform_indices = @transform_0, window_bounds = array<i64: 16, 48>}, {transform_indices = @transform_1, window_bounds = array<i64: 16, 2>}, {pipeline_mode = #tpu.pipeline_mode<synchronous>, transform_indices = @transform_2, window_bounds = array<i64: 2, 16>}, {pipeline_mode = #tpu.pipeline_mode<synchronous>, transform_indices = @transform_3, window_bounds = array<i64: 2, 16>}, {pipeline_mode = #tpu.pipeline_mode<synchronous>, transform_indices = @transform_4, window_bounds = array<i64: 16, 150>}, {pipeline_mode = #tpu.pipeline_mode<synchronous>, transform_indices = @transform_5, window_bounds = array<i64: 1, 150>}, {pipeline_mode = #tpu.pipeline_mode<synchronous>, transform_indices = @transform_6, window_bounds = array<i64: 150, 300>}, {pipeline_mode = #tpu.pipeline_mode<synchronous>, transform_indices = @transform_7, window_bounds = array<i64: 1, 300>}, {pipeline_mode = #tpu.pipeline_mode<synchronous>, transform_indices = @transform_8, window_bounds = array<i64: 150, 300>}, {pipeline_mode = #tpu.pipeline_mode<synchronous>, transform_indices = @transform_9, window_bounds = array<i64: 300, 600>}, {pipeline_mode = #tpu.pipeline_mode<synchronous>, transform_indices = @transform_10, window_bounds = array<i64: 1, 600>}, {pipeline_mode = #tpu.pipeline_mode<synchronous>, transform_indices = @transform_11, window_bounds = array<i64: 300, 600>}, {pipeline_mode = #tpu.pipeline_mode<synchronous>, transform_indices = @transform_12, window_bounds = array<i64: 600, 128>}, {pipeline_mode = #tpu.pipeline_mode<synchronous>, transform_indices = @transform_13, window_bounds = array<i64: 16, 250>}, {pipeline_mode = #tpu.pipeline_mode<synchronous>, transform_indices = @transform_14, window_bounds = array<i64: 1, 250>}, {pipeline_mode = #tpu.pipeline_mode<synchronous>, transform_indices = @transform_15, window_bounds = array<i64: 250, 500>}, {pipeline_mode = #tpu.pipeline_mode<synchronous>, transform_indices = @transform_16, window_bounds = array<i64: 1, 500>}, {pipeline_mode = #tpu.pipeline_mode<synchronous>, transform_indices = @transform_17, window_bounds = array<i64: 250, 500>}, {pipeline_mode = #tpu.pipeline_mode<synchronous>, transform_indices = @transform_18, window_bounds = array<i64: 500, 1000>}, {pipeline_mode = #tpu.pipeline_mode<synchronous>, transform_indices = @transform_19, window_bounds = array<i64: 1, 1000>}, {pipeline_mode = #tpu.pipeline_mode<synchronous>, transform_indices = @transform_20, window_bounds = array<i64: 500, 1000>}, {pipeline_mode = #tpu.pipeline_mode<synchronous>, transform_indices = @transform_21, window_bounds = array<i64: 1000, 128>}, {transform_indices = @transform_22, window_bounds = array<i64: 16, 128>}, {transform_indices = @transform_23, window_bounds = array<i64: 16, 16>}]} {
    %c0 = arith.constant 0 : index
    %c0_0 = arith.constant 0 : index
    %0 = vector.load %arg1[%c0, %c0_0] : memref<16x48xf32, #tpu.memory_space<vmem>>, vector<16x48xf32>
    %1 = vector.extract_strided_slice %0 {offsets = [0, 0], sizes = [16, 16], strides = [1, 1]} : vector<16x48xf32> to vector<16x16xf32>
    %2 = vector.extract_strided_slice %0 {offsets = [0, 16], sizes = [16, 16], strides = [1, 1]} : vector<16x48xf32> to vector<16x16xf32>
    %3 = vector.extract_strided_slice %0 {offsets = [0, 32], sizes = [16, 16], strides = [1, 1]} : vector<16x48xf32> to vector<16x16xf32>
    %4 = arith.mulf %1, %1 : vector<16x16xf32>
    %5 = arith.mulf %2, %2 : vector<16x16xf32>
    %6 = arith.addf %4, %5 : vector<16x16xf32>
    %7 = arith.mulf %3, %3 : vector<16x16xf32>
    %8 = arith.addf %6, %7 : vector<16x16xf32>
    %9 = math.sqrt %8 : vector<16x16xf32>
    %cst = arith.constant 0.000000e+00 : f32
    %10 = vector.broadcast %cst : f32 to vector<16x16xf32>
    %11 = arith.addf %9, %10 : vector<16x16xf32>
    %cst_1 = arith.constant 1.000000e+00 : f32
    %12 = vector.broadcast %cst_1 : f32 to vector<16x16xf32>
    %13 = arith.divf %12, %11 : vector<16x16xf32>
    %cst_2 = arith.constant 1.000000e+00 : f32
    %14 = vector.broadcast %cst_2 : f32 to vector<16x16xf32>
    %15 = arith.subf %9, %14 : vector<16x16xf32>
    %cst_3 = arith.constant 2.000000e+00 : f32
    %16 = vector.broadcast %cst_3 : f32 to vector<16x16xf32>
    %17 = arith.divf %15, %16 : vector<16x16xf32>
    %18 = arith.mulf %17, %17 : vector<16x16xf32>
    %19 = arith.mulf %18, %17 : vector<16x16xf32>
    %cst_4 = arith.constant -6.000000e+00 : f32
    %20 = vector.broadcast %cst_4 : f32 to vector<16x16xf32>
    %21 = arith.mulf %20, %17 : vector<16x16xf32>
    %22 = arith.mulf %21, %17 : vector<16x16xf32>
    %cst_5 = arith.constant 1.500000e+01 : f32
    %23 = vector.broadcast %cst_5 : f32 to vector<16x16xf32>
    %24 = arith.mulf %23, %17 : vector<16x16xf32>
    %25 = arith.addf %22, %24 : vector<16x16xf32>
    %cst_6 = arith.constant 1.000000e+01 : f32
    %26 = vector.broadcast %cst_6 : f32 to vector<16x16xf32>
    %27 = arith.subf %25, %26 : vector<16x16xf32>
    %28 = arith.mulf %19, %27 : vector<16x16xf32>
    %cst_7 = arith.constant 1.000000e+00 : f32
    %29 = vector.broadcast %cst_7 : f32 to vector<16x16xf32>
    %30 = arith.addf %28, %29 : vector<16x16xf32>
    %cst_8 = arith.constant 1.000000e+00 : f32
    %31 = vector.broadcast %cst_8 : f32 to vector<16x16xf32>
    %32 = arith.cmpf ole, %9, %31 : vector<16x16xf32>
    %cst_9 = arith.constant 3.000000e+00 : f32
    %33 = vector.broadcast %cst_9 : f32 to vector<16x16xf32>
    %34 = arith.cmpf oge, %9, %33 : vector<16x16xf32>
    %cst_10 = arith.constant 0.000000e+00 : f32
    %35 = vector.broadcast %cst_10 : f32 to vector<16x16xf32>
    %36 = arith.select %34, %35, %30 : vector<16x16xi1>, vector<16x16xf32>
    %cst_11 = arith.constant 1.000000e+00 : f32
    %37 = vector.broadcast %cst_11 : f32 to vector<16x16xf32>
    %38 = arith.select %32, %37, %36 : vector<16x16xi1>, vector<16x16xf32>
    %c0_12 = arith.constant 0 : index
    %c0_13 = arith.constant 0 : index
    %39 = vector.load %arg2[%c0_12, %c0_13] : memref<16x2xf32, #tpu.memory_space<vmem>>, vector<16x2xf32>
    %c0_14 = arith.constant 0 : index
    %c0_15 = arith.constant 0 : index
    %40 = vector.load %arg3[%c0_14, %c0_15] : memref<2x16xf32, #tpu.memory_space<vmem>>, vector<2x16xf32>
    %cst_16 = arith.constant dense<0.000000e+00> : vector<16x16xf32>
    %41 = tpu.matmul %39, %40, %cst_16 {dimension_numbers = #tpu.dot_dimension_numbers<[1], [0], [0], [1], [0, 0, 1, 1], [], []>} : vector<16x2xf32>, vector<2x16xf32>, vector<16x16xf32> -> vector<16x16xf32>
    %c0_17 = arith.constant 0 : index
    %c0_18 = arith.constant 0 : index
    %42 = vector.load %arg4[%c0_17, %c0_18] : memref<2x16xf32, #tpu.memory_space<vmem>>, vector<2x16xf32>
    %cst_19 = arith.constant dense<0.000000e+00> : vector<16x16xf32>
    %43 = tpu.matmul %39, %42, %cst_19 {dimension_numbers = #tpu.dot_dimension_numbers<[1], [0], [0], [1], [0, 0, 1, 1], [], []>} : vector<16x2xf32>, vector<2x16xf32>, vector<16x16xf32> -> vector<16x16xf32>
    %44 = arith.mulf %13, %38 : vector<16x16xf32>
    %45 = arith.subf %44, %41 : vector<16x16xf32>
    %46 = arith.divf %45, %43 : vector<16x16xf32>
    %c0_20 = arith.constant 0 : index
    %c0_21 = arith.constant 0 : index
    %47 = vector.load %arg24[%c0_20, %c0_21] : memref<16x16xf32, #tpu.memory_space<vmem>>, vector<16x16xf32>
    tpu.vector_store %arg24[%c0_20, %c0_21], %38 {strides = array<i32>} : memref<16x16xf32, #tpu.memory_space<vmem>>, vector<16x16xf32>,
    %c0_22 = arith.constant 0 : index
    %c0_23 = arith.constant 0 : index
    %48 = vector.load %arg5[%c0_22, %c0_23] : memref<16x150xf32, #tpu.memory_space<vmem>>, vector<16x150xf32>
    %c0_24 = arith.constant 0 : index
    %c0_25 = arith.constant 0 : index
    %49 = vector.load %arg6[%c0_24, %c0_25] : memref<1x150xf32, #tpu.memory_space<vmem>>, vector<1x150xf32>
    %cst_26 = arith.constant dense<0.000000e+00> : vector<16x150xf32>
    %50 = tpu.matmul %46, %48, %cst_26 {dimension_numbers = #tpu.dot_dimension_numbers<[1], [0], [0], [1], [0, 0, 1, 1], [], []>} : vector<16x16xf32>, vector<16x150xf32>, vector<16x150xf32> -> vector<16x150xf32>
    %51 = vector.broadcast %49 : vector<1x150xf32> to vector<16x150xf32>
    %52 = arith.addf %50, %51 : vector<16x150xf32>
    %53 = math.tanh %52 : vector<16x150xf32>
    %c0_27 = arith.constant 0 : index
    %c0_28 = arith.constant 0 : index
    %54 = vector.load %arg7[%c0_27, %c0_28] : memref<150x300xf32, #tpu.memory_space<vmem>>, vector<150x300xf32>
    %c0_29 = arith.constant 0 : index
    %c0_30 = arith.constant 0 : index
    %55 = vector.load %arg8[%c0_29, %c0_30] : memref<1x300xf32, #tpu.memory_space<vmem>>, vector<1x300xf32>
    %cst_31 = arith.constant dense<0.000000e+00> : vector<16x300xf32>
    %56 = tpu.matmul %53, %54, %cst_31 {dimension_numbers = #tpu.dot_dimension_numbers<[1], [0], [0], [1], [0, 0, 1, 1], [], []>} : vector<16x150xf32>, vector<150x300xf32>, vector<16x300xf32> -> vector<16x300xf32>
    %57 = vector.broadcast %55 : vector<1x300xf32> to vector<16x300xf32>
    %58 = arith.addf %56, %57 : vector<16x300xf32>
    %59 = math.tanh %58 : vector<16x300xf32>
    %c0_32 = arith.constant 0 : index
    %c0_33 = arith.constant 0 : index
    %60 = vector.load %arg9[%c0_32, %c0_33] : memref<150x300xf32, #tpu.memory_space<vmem>>, vector<150x300xf32>
    %cst_34 = arith.constant dense<0.000000e+00> : vector<16x300xf32>
    %61 = tpu.matmul %53, %60, %cst_34 {dimension_numbers = #tpu.dot_dimension_numbers<[1], [0], [0], [1], [0, 0, 1, 1], [], []>} : vector<16x150xf32>, vector<150x300xf32>, vector<16x300xf32> -> vector<16x300xf32>
    %62 = arith.addf %59, %61 : vector<16x300xf32>
    %c0_35 = arith.constant 0 : index
    %c0_36 = arith.constant 0 : index
    %63 = vector.load %arg10[%c0_35, %c0_36] : memref<300x600xf32, #tpu.memory_space<vmem>>, vector<300x600xf32>
    %c0_37 = arith.constant 0 : index
    %c0_38 = arith.constant 0 : index
    %64 = vector.load %arg11[%c0_37, %c0_38] : memref<1x600xf32, #tpu.memory_space<vmem>>, vector<1x600xf32>
    %cst_39 = arith.constant dense<0.000000e+00> : vector<16x600xf32>
    %65 = tpu.matmul %62, %63, %cst_39 {dimension_numbers = #tpu.dot_dimension_numbers<[1], [0], [0], [1], [0, 0, 1, 1], [], []>} : vector<16x300xf32>, vector<300x600xf32>, vector<16x600xf32> -> vector<16x600xf32>
    %66 = vector.broadcast %64 : vector<1x600xf32> to vector<16x600xf32>
    %67 = arith.addf %65, %66 : vector<16x600xf32>
    %68 = math.tanh %67 : vector<16x600xf32>
    %c0_40 = arith.constant 0 : index
    %c0_41 = arith.constant 0 : index
    %69 = vector.load %arg12[%c0_40, %c0_41] : memref<300x600xf32, #tpu.memory_space<vmem>>, vector<300x600xf32>
    %cst_42 = arith.constant dense<0.000000e+00> : vector<16x600xf32>
    %70 = tpu.matmul %62, %69, %cst_42 {dimension_numbers = #tpu.dot_dimension_numbers<[1], [0], [0], [1], [0, 0, 1, 1], [], []>} : vector<16x300xf32>, vector<300x600xf32>, vector<16x600xf32> -> vector<16x600xf32>
    %71 = arith.addf %68, %70 : vector<16x600xf32>
    %c0_43 = arith.constant 0 : index
    %c0_44 = arith.constant 0 : index
    %72 = vector.load %arg13[%c0_43, %c0_44] : memref<600x128xf32, #tpu.memory_space<vmem>>, vector<600x128xf32>
    %cst_45 = arith.constant dense<0.000000e+00> : vector<16x128xf32>
    %73 = tpu.matmul %71, %72, %cst_45 {dimension_numbers = #tpu.dot_dimension_numbers<[1], [0], [0], [1], [0, 0, 1, 1], [], []>} : vector<16x600xf32>, vector<600x128xf32>, vector<16x128xf32> -> vector<16x128xf32>
    %c0_46 = arith.constant 0 : index
    %c0_47 = arith.constant 0 : index
    %74 = vector.load %arg14[%c0_46, %c0_47] : memref<16x250xf32, #tpu.memory_space<vmem>>, vector<16x250xf32>
    %c0_48 = arith.constant 0 : index
    %c0_49 = arith.constant 0 : index
    %75 = vector.load %arg15[%c0_48, %c0_49] : memref<1x250xf32, #tpu.memory_space<vmem>>, vector<1x250xf32>
    %cst_50 = arith.constant dense<0.000000e+00> : vector<16x250xf32>
    %76 = tpu.matmul %46, %74, %cst_50 {dimension_numbers = #tpu.dot_dimension_numbers<[1], [0], [0], [1], [0, 0, 1, 1], [], []>} : vector<16x16xf32>, vector<16x250xf32>, vector<16x250xf32> -> vector<16x250xf32>
    %77 = vector.broadcast %75 : vector<1x250xf32> to vector<16x250xf32>
    %78 = arith.addf %76, %77 : vector<16x250xf32>
    %79 = math.tanh %78 : vector<16x250xf32>
    %c0_51 = arith.constant 0 : index
    %c0_52 = arith.constant 0 : index
    %80 = vector.load %arg16[%c0_51, %c0_52] : memref<250x500xf32, #tpu.memory_space<vmem>>, vector<250x500xf32>
    %c0_53 = arith.constant 0 : index
    %c0_54 = arith.constant 0 : index
    %81 = vector.load %arg17[%c0_53, %c0_54] : memref<1x500xf32, #tpu.memory_space<vmem>>, vector<1x500xf32>
    %cst_55 = arith.constant dense<0.000000e+00> : vector<16x500xf32>
    %82 = tpu.matmul %79, %80, %cst_55 {dimension_numbers = #tpu.dot_dimension_numbers<[1], [0], [0], [1], [0, 0, 1, 1], [], []>} : vector<16x250xf32>, vector<250x500xf32>, vector<16x500xf32> -> vector<16x500xf32>
    %83 = vector.broadcast %81 : vector<1x500xf32> to vector<16x500xf32>
    %84 = arith.addf %82, %83 : vector<16x500xf32>
    %85 = math.tanh %84 : vector<16x500xf32>
    %c0_56 = arith.constant 0 : index
    %c0_57 = arith.constant 0 : index
    %86 = vector.load %arg18[%c0_56, %c0_57] : memref<250x500xf32, #tpu.memory_space<vmem>>, vector<250x500xf32>
    %cst_58 = arith.constant dense<0.000000e+00> : vector<16x500xf32>
    %87 = tpu.matmul %79, %86, %cst_58 {dimension_numbers = #tpu.dot_dimension_numbers<[1], [0], [0], [1], [0, 0, 1, 1], [], []>} : vector<16x250xf32>, vector<250x500xf32>, vector<16x500xf32> -> vector<16x500xf32>
    %88 = arith.addf %85, %87 : vector<16x500xf32>
    %c0_59 = arith.constant 0 : index
    %c0_60 = arith.constant 0 : index
    %89 = vector.load %arg19[%c0_59, %c0_60] : memref<500x1000xf32, #tpu.memory_space<vmem>>, vector<500x1000xf32>
    %c0_61 = arith.constant 0 : index
    %c0_62 = arith.constant 0 : index
    %90 = vector.load %arg20[%c0_61, %c0_62] : memref<1x1000xf32, #tpu.memory_space<vmem>>, vector<1x1000xf32>
    %cst_63 = arith.constant dense<0.000000e+00> : vector<16x1000xf32>
    %91 = tpu.matmul %88, %89, %cst_63 {dimension_numbers = #tpu.dot_dimension_numbers<[1], [0], [0], [1], [0, 0, 1, 1], [], []>} : vector<16x500xf32>, vector<500x1000xf32>, vector<16x1000xf32> -> vector<16x1000xf32>
    %92 = vector.broadcast %90 : vector<1x1000xf32> to vector<16x1000xf32>
    %93 = arith.addf %91, %92 : vector<16x1000xf32>
    %94 = math.tanh %93 : vector<16x1000xf32>
    %c0_64 = arith.constant 0 : index
    %c0_65 = arith.constant 0 : index
    %95 = vector.load %arg21[%c0_64, %c0_65] : memref<500x1000xf32, #tpu.memory_space<vmem>>, vector<500x1000xf32>
    %cst_66 = arith.constant dense<0.000000e+00> : vector<16x1000xf32>
    %96 = tpu.matmul %88, %95, %cst_66 {dimension_numbers = #tpu.dot_dimension_numbers<[1], [0], [0], [1], [0, 0, 1, 1], [], []>} : vector<16x500xf32>, vector<500x1000xf32>, vector<16x1000xf32> -> vector<16x1000xf32>
    %97 = arith.addf %94, %96 : vector<16x1000xf32>
    %c0_67 = arith.constant 0 : index
    %c0_68 = arith.constant 0 : index
    %98 = vector.load %arg22[%c0_67, %c0_68] : memref<1000x128xf32, #tpu.memory_space<vmem>>, vector<1000x128xf32>
    %cst_69 = arith.constant dense<0.000000e+00> : vector<16x128xf32>
    %99 = tpu.matmul %97, %98, %cst_69 {dimension_numbers = #tpu.dot_dimension_numbers<[1], [0], [0], [1], [0, 0, 1, 1], [], []>} : vector<16x1000xf32>, vector<1000x128xf32>, vector<16x128xf32> -> vector<16x128xf32>
    %100 = arith.addf %73, %99 : vector<16x128xf32>
    %c0_70 = arith.constant 0 : index
    %c0_71 = arith.constant 0 : index
    %101 = vector.load %arg23[%c0_70, %c0_71] : memref<16x128xf32, #tpu.memory_space<vmem>>, vector<16x128xf32>
    tpu.vector_store %arg23[%c0_70, %c0_71], %100 {strides = array<i32>} : memref<16x128xf32, #tpu.memory_space<vmem>>, vector<16x128xf32>,
    return
  }
  func.func @transform_0(%arg0: i32) -> (i32, i32) {
    %c0_i32 = arith.constant 0 : i32
    %c0_i32_0 = arith.constant 0 : i32
    return %arg0, %c0_i32 : i32, i32
  }
  func.func @transform_1(%arg0: i32) -> (i32, i32) {
    %c0_i32 = arith.constant 0 : i32
    %c0_i32_0 = arith.constant 0 : i32
    return %arg0, %c0_i32 : i32, i32
  }
  func.func @transform_2(%arg0: i32) -> (i32, i32) {
    %c0_i32 = arith.constant 0 : i32
    %c0_i32_0 = arith.constant 0 : i32
    %c0_i32_1 = arith.constant 0 : i32
    return %c0_i32, %c0_i32_0 : i32, i32
  }
  func.func @transform_3(%arg0: i32) -> (i32, i32) {
    %c0_i32 = arith.constant 0 : i32
    %c0_i32_0 = arith.constant 0 : i32
    %c0_i32_1 = arith.constant 0 : i32
    return %c0_i32, %c0_i32_0 : i32, i32
  }
  func.func @transform_4(%arg0: i32) -> (i32, i32) {
    %c0_i32 = arith.constant 0 : i32
    %c0_i32_0 = arith.constant 0 : i32
    %c0_i32_1 = arith.constant 0 : i32
    return %c0_i32, %c0_i32_0 : i32, i32
  }
  func.func @transform_5(%arg0: i32) -> (i32, i32) {
    %c0_i32 = arith.constant 0 : i32
    %c0_i32_0 = arith.constant 0 : i32
    %c0_i32_1 = arith.constant 0 : i32
    return %c0_i32, %c0_i32_0 : i32, i32
  }
  func.func @transform_6(%arg0: i32) -> (i32, i32) {
    %c0_i32 = arith.constant 0 : i32
    %c0_i32_0 = arith.constant 0 : i32
    %c0_i32_1 = arith.constant 0 : i32
    return %c0_i32, %c0_i32_0 : i32, i32
  }
  func.func @transform_7(%arg0: i32) -> (i32, i32) {
    %c0_i32 = arith.constant 0 : i32
    %c0_i32_0 = arith.constant 0 : i32
    %c0_i32_1 = arith.constant 0 : i32
    return %c0_i32, %c0_i32_0 : i32, i32
  }
  func.func @transform_8(%arg0: i32) -> (i32, i32) {
    %c0_i32 = arith.constant 0 : i32
    %c0_i32_0 = arith.constant 0 : i32
    %c0_i32_1 = arith.constant 0 : i32
    return %c0_i32, %c0_i32_0 : i32, i32
  }
  func.func @transform_9(%arg0: i32) -> (i32, i32) {
    %c0_i32 = arith.constant 0 : i32
    %c0_i32_0 = arith.constant 0 : i32
    %c0_i32_1 = arith.constant 0 : i32
    return %c0_i32, %c0_i32_0 : i32, i32
  }
  func.func @transform_10(%arg0: i32) -> (i32, i32) {
    %c0_i32 = arith.constant 0 : i32
    %c0_i32_0 = arith.constant 0 : i32
    %c0_i32_1 = arith.constant 0 : i32
    return %c0_i32, %c0_i32_0 : i32, i32
  }
  func.func @transform_11(%arg0: i32) -> (i32, i32) {
    %c0_i32 = arith.constant 0 : i32
    %c0_i32_0 = arith.constant 0 : i32
    %c0_i32_1 = arith.constant 0 : i32
    return %c0_i32, %c0_i32_0 : i32, i32
  }
  func.func @transform_12(%arg0: i32) -> (i32, i32) {
    %c0_i32 = arith.constant 0 : i32
    %c0_i32_0 = arith.constant 0 : i32
    %c0_i32_1 = arith.constant 0 : i32
    return %c0_i32, %c0_i32_0 : i32, i32
  }
  func.func @transform_13(%arg0: i32) -> (i32, i32) {
    %c0_i32 = arith.constant 0 : i32
    %c0_i32_0 = arith.constant 0 : i32
    %c0_i32_1 = arith.constant 0 : i32
    return %c0_i32, %c0_i32_0 : i32, i32
  }
  func.func @transform_14(%arg0: i32) -> (i32, i32) {
    %c0_i32 = arith.constant 0 : i32
    %c0_i32_0 = arith.constant 0 : i32
    %c0_i32_1 = arith.constant 0 : i32
    return %c0_i32, %c0_i32_0 : i32, i32
  }
  func.func @transform_15(%arg0: i32) -> (i32, i32) {
    %c0_i32 = arith.constant 0 : i32
    %c0_i32_0 = arith.constant 0 : i32
    %c0_i32_1 = arith.constant 0 : i32
    return %c0_i32, %c0_i32_0 : i32, i32
  }
  func.func @transform_16(%arg0: i32) -> (i32, i32) {
    %c0_i32 = arith.constant 0 : i32
    %c0_i32_0 = arith.constant 0 : i32
    %c0_i32_1 = arith.constant 0 : i32
    return %c0_i32, %c0_i32_0 : i32, i32
  }
  func.func @transform_17(%arg0: i32) -> (i32, i32) {
    %c0_i32 = arith.constant 0 : i32
    %c0_i32_0 = arith.constant 0 : i32
    %c0_i32_1 = arith.constant 0 : i32
    return %c0_i32, %c0_i32_0 : i32, i32
  }
  func.func @transform_18(%arg0: i32) -> (i32, i32) {
    %c0_i32 = arith.constant 0 : i32
    %c0_i32_0 = arith.constant 0 : i32
    %c0_i32_1 = arith.constant 0 : i32
    return %c0_i32, %c0_i32_0 : i32, i32
  }
  func.func @transform_19(%arg0: i32) -> (i32, i32) {
    %c0_i32 = arith.constant 0 : i32
    %c0_i32_0 = arith.constant 0 : i32
    %c0_i32_1 = arith.constant 0 : i32
    return %c0_i32, %c0_i32_0 : i32, i32
  }
  func.func @transform_20(%arg0: i32) -> (i32, i32) {
    %c0_i32 = arith.constant 0 : i32
    %c0_i32_0 = arith.constant 0 : i32
    %c0_i32_1 = arith.constant 0 : i32
    return %c0_i32, %c0_i32_0 : i32, i32
  }
  func.func @transform_21(%arg0: i32) -> (i32, i32) {
    %c0_i32 = arith.constant 0 : i32
    %c0_i32_0 = arith.constant 0 : i32
    %c0_i32_1 = arith.constant 0 : i32
    return %c0_i32, %c0_i32_0 : i32, i32
  }
  func.func @transform_22(%arg0: i32) -> (i32, i32) {
    %c0_i32 = arith.constant 0 : i32
    %c0_i32_0 = arith.constant 0 : i32
    return %arg0, %c0_i32 : i32, i32
  }
  func.func @transform_23(%arg0: i32) -> (i32, i32) {
    %c0_i32 = arith.constant 0 : i32
    %c0_i32_0 = arith.constant 0 : i32
    return %arg0, %c0_i32 : i32, i32
  }
}

</mosaic_0001>

<bundles_post_ra>
// kernel: tpu_custom_call.1
= control target key start
LH: loop header
LB: loop body
LE: loop exit
PB: predicated region body
PF: predicated region fallthrough
CT: control target
= control target key end

     0   :  { %s13296_s0 = inlined_call_operand.vmem [shape: f32[16,48], index: 0, kind: input, shape index: {}]   ;;  %s13297_s1 = inlined_call_operand.vmem [shape: f32[16,2], index: 1, kind: input, shape index: {}]   ;;  %s13298_s2 = inlined_call_operand.vmem [shape: f32[2,16], index: 2, kind: input, shape index: {}]   ;;  %s13299_s3 = inlined_call_operand.vmem [shape: f32[2,16], index: 3, kind: input, shape index: {}]   ;;  %s13300_s4 = inlined_call_operand.vmem [shape: f32[16,150], index: 4, kind: input, shape index: {}]   ;;  %s13301_s5 = inlined_call_operand.vmem [shape: f32[1,150], index: 5, kind: input, shape index: {}]   ;;  %s13302_s6 = inlined_call_operand.vmem [shape: f32[150,300], index: 6, kind: input, shape index: {}]   ;;  %s13303_s7 = inlined_call_operand.vmem [shape: f32[1,300], index: 7, kind: input, shape index: {}]   ;;  %s13304_s8 = inlined_call_operand.vmem [shape: f32[150,300], index: 8, kind: input, shape index: {}]   ;;  %s13305_s9 = inlined_call_operand.vmem [shape: f32[300,600], index: 9, kind: input, shape index: {}]   ;;  %s13306_s10 = inlined_call_operand.vmem [shape: f32[1,600], index: 10, kind: input, shape index: {}]   ;;  %s13307_s11 = inlined_call_operand.vmem [shape: f32[300,600], index: 11, kind: input, shape index: {}]   ;;  %s13308_s12 = inlined_call_operand.vmem [shape: f32[600,128], index: 12, kind: input, shape index: {}]   ;;  %s13309_s13 = inlined_call_operand.vmem [shape: f32[16,250], index: 13, kind: input, shape index: {}]   ;;  %s13310_s14 = inlined_call_operand.vmem [shape: f32[1,250], index: 14, kind: input, shape index: {}]   ;;  %s13311_s15 = inlined_call_operand.vmem [shape: f32[250,500], index: 15, kind: input, shape index: {}]   ;;  %s13312_s16 = inlined_call_operand.vmem [shape: f32[1,500], index: 16, kind: input, shape index: {}]   ;;  %s13313_s17 = inlined_call_operand.vmem [shape: f32[250,500], index: 17, kind: input, shape index: {}]   ;;  %s13314_s18 = inlined_call_operand.vmem [shape: f32[500,1000], index: 18, kind: input, shape index: {}]   ;;  %s13315_s19 = inlined_call_operand.vmem [shape: f32[1,1000], index: 19, kind: input, shape index: {}]   ;;  %s13316_s20 = inlined_call_operand.vmem [shape: f32[500,1000], index: 20, kind: input, shape index: {}]   ;;  %s13317_s21 = inlined_call_operand.vmem [shape: f32[1000,128], index: 21, kind: input, shape index: {}]   ;;  %s13318_s22 = inlined_call_operand.hbm [shape: f32[16,128], index: 22, kind: output, shape index: {0}]   ;;  %s13319_s23 = inlined_call_operand.hbm [shape: f32[16,16], index: 23, kind: output, shape index: {1}]  }
   0x1   :  { %13324 = sst [smem:[#allocation97_spill]] %s13296_s0 }
   0x2   :  { %13325 = sst [smem:[#allocation98_spill]] %s13297_s1 }
   0x3   :  { %13326 = sst [smem:[#allocation99_spill]] %s13298_s2 }
   0x4   :  { %13327 = sst [smem:[#allocation100_spill]] %s13299_s3 }
   0x5   :  { %13328 = sst [smem:[#allocation101_spill]] %s13300_s4 }
   0x6   :  { %13329 = sst [smem:[#allocation102_spill]] %s13301_s5 }
   0x7   :  { %13330 = sst [smem:[#allocation103_spill]] %s13302_s6 }
   0x8   :  { %13331 = sst [smem:[#allocation104_spill]] %s13303_s7 }
   0x9   :  { %29 = vsyncpa [#allocation3], 0  ;;  %s13332_s24 = sld [smem:[#allocation97_spill]]  ;;  %vm200_vm0 = vcmask 1041408   ;;  %vm193_vm1 = vcmask 15360  }
   0xa   :  { %s13333_s2 = sld [smem:[#allocation100_spill]] }
   0xb   :  { %s13334_s7 = sld [smem:[#allocation98_spill]] }
   0xc   :  { %s13335_s4 = sld [smem:[#allocation99_spill]] }
   0xf   :  { %v76_v0 = vld [vmem:[%s13332_s24 + $0x8] sm:$0xff]  ;;  %v75_v1 = vld [vmem:[%s13332_s24] sm:$0xff] }
  0x10   :  { %v227_v2 = vld [vmem:[%s13333_s2] sm:$0x3]  ;;  %v78_v3 = vmul.f32 %v76_v0, %v76_v0  ;;  %v77_v4 = vmul.f32 %v75_v1, %v75_v1 }
  0x11   :  { %5817 = vmatpush.msk.msra.mxu2 %vm200_vm0, %v227_v2  ;;  %v190_v5 = vld [vmem:[%s13334_s7] sm:$0xff]  ;;  %5952 = vmatpush.msk.msra.mxu3 %vm200_vm0, %v227_v2  ;;  %v191_v6 = vld [vmem:[%s13334_s7 + $0x8] sm:$0xff] }
  0x12   :  { %v192_v7 = vld [vmem:[%s13335_s4] sm:$0x3]  ;;  %5818 = vmatmul.msk.f32.vlgmr.msra.gmra.mxu2 %vm193_vm1, %v190_v5  ;;  %5819 = vmatmul.msk.f32.vlgmr.msra.gmra.mxu3 %vm193_vm1, %v191_v6 }
  0x13   :  { %30 = vsyncpa [#allocation5], 0  ;;  %s6123_s30 = smov 112   ;;  %5814 = vmatpush.msk.msra.mxu0 %vm200_vm0, %v192_v7  ;;  %s6124_s24 = smov 96   ;;  %v6125_v12 = vmov 2.0   ;;  %vm429_vm8 = vcmask 1045504  }
  0x14   :  { %83 = vrot.lane.b32.xlu1 %v78_v3, %s6123_s30  ;;  %81 = vrot.lane.b32.xlu0 %v77_v4, %s6123_s30  ;;  %5960 = vrcp.f32 %v6125_v12  ;;  %s13336_s1 = sld [smem:[#allocation101_spill]]  ;;  %s6128_s26 = smov 8  }
  0x15   :  { %5815 = vmatmul.msk.f32.vlgmr.msra.gmra.mxu0 %vm193_vm1, %v190_v5  ;;  %s13337_s0 = sld [smem:[#allocation103_spill]] }
  0x16   :  { %s13348_s6 = sld [smem:[#allocation102_spill]] }
  0x1a   :  { %v5961_v17 = vpop.eup %5960  ;;  %v293_v33 = vld [vmem:[%s13336_s1 + $0x10] sm:$0xff]  ;;  %v294_v34 = vld [vmem:[%s13336_s1 + $0x18] sm:$0xff]  ;;  %v291_v37 = vld [vmem:[%s13336_s1] sm:$0xff] }
  0x1b   :  { %v156_v18 = vmul.f32 2.0, %v5961_v17  ;;  %321 = vmatpush.msrb.mxu2 %v293_v33  ;;  %344 = vmatpush.msrb.mxu3 %v294_v34  ;;  %v292_v38 = vld [vmem:[%s13336_s1 + $0x8] sm:$0xff]  ;;  %vm160_vm3 = vweird.f32 %v5961_v17  ;;  %v399_v54 = vld [vmem:[%s13337_s0 + $0x150] sm:$0xff]  ;;  %v396_v59 = vld [vmem:[%s13337_s0 + $0x138] sm:$0xff]  ;;  %s5793_s1 = sshll.u32 %s13319_s23, 4  ;;  %s6129_s23 = smov [#allocation2]   ;;  %s5794_s1 = int_to_ptr.hbm [resolvable:$true] %s5793_s1 }
  0x1c   :  { %91 = vrot.lane.b32.xlu1 %v78_v3, %s6124_s24  ;;  %89 = vrot.lane.b32.xlu0 %v77_v4, %s6124_s24  ;;  %v402_v53 = vld [vmem:[%s13337_s0 + $0x168] sm:$0xff]  ;;  %v403_v60 = vld [vmem:[%s13337_s0 + $0x170] sm:$0xff]  ;;  %s5778_s2 = sshll.u32 %s6129_s23, 4  ;;  %s5779_s2 = int_to_ptr.vmem [resolvable:$true] %s5778_s2 }
  0x1d   :  { %5816 = vmatmul.msk.f32.gmra.mxu0 %vm193_vm1, %v191_v6  ;;  %v157_v25 = vsub.f32 1.0, %v156_v18  ;;  %322 = vmatpush.msrb.mxu2 %v291_v37  ;;  %v400_v61 = vld [vmem:[%s13337_s0 + $0x158] sm:$0xff]  ;;  %v393_v2 = vld [vmem:[%s13337_s0 + $0x120] sm:$0xff] }
  0x1e   :  { %345 = vmatpush.msrb.mxu3 %v292_v38  ;;  %439 = vmatpush.msrb.mxu0 %v402_v53  ;;  %v360_v34 = vld [vmem:[%s13337_s0 + $0x18] sm:$0xff] }
  0x1f   :  { %v158_v31 = vmul.f32 %v5961_v17, %v157_v25  ;;  %485 = vmatpush.msra.mxu2 %v403_v60 }
  0x20   :  { %440 = vmatpush.msrb.mxu0 %v399_v54 }
  0x21   :  { %v159_v41 = vadd.f32 %v5961_v17, %v158_v31  ;;  %486 = vmatpush.msra.mxu2 %v400_v61  ;;  %v378_v61 = vld [vmem:[%s13337_s0 + $0xa8] sm:$0xff] }
  0x22   :  { %441 = vmatpush.msrb.mxu0 %v396_v59  ;;  %v386_v59 = vld [vmem:[%s13337_s0 + $0xe8] sm:$0xff] }
  0x23   :  { %v161_v51 = vsel %vm160_vm3, %v5961_v17, %v159_v41 }
  0x24   :  { %442 = vmatpush.msrb.mxu0 %v393_v2 }
  0x86   :  { %v84_v8 = vpop.permute.xlu1 %83  ;;  %v82_v9 = vpop.permute.xlu0 %81 }
  0x87   :  { %v88_v10 = vadd.f32 %v84_v8, %v78_v3  ;;  %v87_v11 = vadd.f32 %v82_v9, %v77_v4  ;;  %v397_v3 = vld [vmem:[%s13337_s0 + $0x140] sm:$0xff] }
  0x88   :  { %487 = vmatpush.msra.mxu2 %v397_v3  ;;  %v401_v3 = vld [vmem:[%s13337_s0 + $0x160] sm:$0xff] }
  0x8e   :  { %v92_v13 = vpop.permute.xlu1 %91  ;;  %v90_v14 = vpop.permute.xlu0 %89 }
  0x8f   :  { %v96_v15 = vadd.f32 %v92_v13, %v88_v10  ;;  %v95_v16 = vadd.f32 %v90_v14, %v87_v11  ;;  %v390_v13 = vld [vmem:[%s13337_s0 + $0x108] sm:$0xff] }
  0x90   :  { %v394_v14 = vld [vmem:[%s13337_s0 + $0x128] sm:$0xff]  ;;  %443 = vmatpush.msrb.mxu0 %v390_v13 }
  0x91   :  { %5962 = vrsqrt.f32 %v96_v15  ;;  %vm116_vm2 = vcmp.eq.f32.partialorder %v96_v15, inf  ;;  %v119_v42 = vand.u32 2147483648, %v96_v15  ;;  %vm104_vm4 = vcmp.eq.f32.partialorder %v95_v16, inf  ;;  %488 = vmatpush.msra.mxu2 %v394_v14 }
  0x92   :  { %5964 = vrsqrt.f32 %v95_v16  ;;  %v107_v44 = vand.u32 2147483648, %v95_v16  ;;  %vm118_vm5 = vcmp.eq.f32.partialorder %v96_v15, 0.0  ;;  %vm106_vm6 = vcmp.eq.f32.partialorder %v95_v16, 0.0 }
  0x95   :  { %v6271_v23 = vpop.f32.mrf.mxu2  ;;  %v6274_v29 = vpop.f32.mrf.mxu3 }
  0x96   :  { %5966 = vrcp.f32 %v6271_v23  ;;  %vm263_vm7 = vweird.f32 %v6271_v23  ;;  %v267_v0 = vand.u32 2147483647, %v6271_v23  ;;  %v269_v7 = vand.u32 2147483648, %v6271_v23 }
  0x97   :  { %v5963_v19 = vpop.eup %5962  ;;  %5968 = vrcp.f32 %v6274_v29 }
  0x98   :  { %v5965_v20 = vpop.eup %5964  ;;  %v110_v21 = vmul.f32 %v5963_v19, %v96_v15  ;;  %vm6365_vm11 = vcmp.eq.f32.partialorder %v267_v0, 8.507059e+37 }
  0x99   :  { %v98_v22 = vmul.f32 %v5965_v20, %v95_v16 }
  0x9a   :  { %v111_v24 = vmul.f32 %v5963_v19, %v110_v21  ;;  %v387_v21 = vld [vmem:[%s13337_s0 + $0xf0] sm:$0xff] }
  0x9b   :  { %v99_v26 = vmul.f32 %v5965_v20, %v98_v22  ;;  %v391_v22 = vld [vmem:[%s13337_s0 + $0x110] sm:$0xff]  ;;  %444 = vmatpush.msrb.mxu0 %v387_v21 }
  0x9c   :  { %v112_v27 = vmul.f32 0.5, %v111_v24  ;;  %v6289_v39 = vpop.eup %5966  ;;  %v411_v24 = vld [vmem:[%s13337_s0 + $0x1b0] sm:$0x3f]  ;;  %489 = vmatpush.msra.mxu2 %v391_v22 }
  0x9d   :  { %v100_v28 = vmul.f32 0.5, %v99_v26  ;;  %v259_v46 = vmul.f32 %v6289_v39, %v6271_v23  ;;  %v6295_v49 = vpop.eup %5968  ;;  %vm264_vm9 = vweird.f32 %v6289_v39  ;;  %5824 = vmatpush.msk.msra.mxu1 %vm429_vm8, %v411_v24  ;;  %v282_v24 = vand.u32 2147483647, %v6274_v29 }
  0x9e   :  { %v113_v30 = vsub.f32 1.5, %v112_v27  ;;  %v6310_v56 = vmul.f32 %v6295_v49, %v6274_v29 }
  0x9f   :  { %v101_v32 = vsub.f32 1.5, %v100_v28  ;;  %v260_v55 = vsub.f32 1.0, %v259_v46  ;;  %v409_v46 = vld [vmem:[%s13337_s0 + $0x1a0] sm:$0xff] }
  0xa0   :  { %v114_v35 = vmul.f32 %v5963_v19, %v113_v30  ;;  %v275_v5 = vsub.f32 1.0, %v6310_v56  ;;  %v408_v30 = vld [vmem:[%s13337_s0 + $0x198] sm:$0xff] }
  0xa1   :  { %v102_v36 = vmul.f32 %v5965_v20, %v101_v32  ;;  %v261_v6 = vmul.f32 %v6289_v39, %v260_v55  ;;  %476 = vmatpush.msra.mxu1 %v408_v30  ;;  %v404_v55 = vld [vmem:[%s13337_s0 + $0x178] sm:$0xff]  ;;  %v363_v30 = vld [vmem:[%s13337_s0 + $0x30] sm:$0xff] }
  0xa2   :  { %v115_v40 = vmul.f32 %v114_v35, %v96_v15  ;;  %v384_v35 = vld [vmem:[%s13337_s0 + $0xd8] sm:$0xff]  ;;  %v276_v23 = vmul.f32 %v6295_v49, %v275_v5 }
  0xa3   :  { %v103_v43 = vmul.f32 %v102_v36, %v95_v16  ;;  %v388_v36 = vld [vmem:[%s13337_s0 + $0xf8] sm:$0xff]  ;;  %v6378_v37 = vadd.f32 %v6289_v39, %v261_v6  ;;  %445 = vmatpush.msrb.mxu0 %v384_v35  ;;  %v270_v6 = vor.u32 1.1754944e-38, %v269_v7  ;;  %v357_v35 = vld [vmem:[%s13337_s0] sm:$0xff] }
  0xa4   :  { %v117_v45 = vsel %vm116_vm2, %v96_v15, %v115_v40  ;;  %v405_v40 = vld [vmem:[%s13337_s0 + $0x180] sm:$0xff]  ;;  %490 = vmatpush.msra.mxu2 %v388_v36  ;;  %vm6412_vm2 = vmor %vm263_vm7, %vm264_vm9  ;;  %v372_v56 = vld [vmem:[%s13337_s0 + $0x78] sm:$0xff]  ;;  %v277_v22 = vadd.f32 %v6295_v49, %v276_v23 }
  0xa5   :  { %v105_v47 = vsel %vm104_vm4, %v95_v16, %v103_v43  ;;  %v6293_v48 = vsel %vm118_vm5, %v119_v42, %v117_v45  ;;  %v385_v45 = vld [vmem:[%s13337_s0 + $0xe0] sm:$0xff]  ;;  %477 = vmatpush.msra.mxu1 %v405_v40  ;;  %vm288_vm4 = vcmask 130048   ;;  %v266_v13 = vsel %vm6412_vm2, %v6289_v39, %v6378_v37  ;;  %v376_v5 = vld [vmem:[%s13337_s0 + $0x98] sm:$0xff] }
  0xa6   :  { %v6297_v50 = vsel %vm106_vm6, %v107_v44, %v105_v47  ;;  %5970 = vrcp.f32 %v6293_v48  ;;  %v5811_v58 = vadd.f32 -1.0, %v6293_v48  ;;  %vm143_vm13 = vweird.f32 %v6293_v48  ;;  %v381_v44 = vld [vmem:[%s13337_s0 + $0xc0] sm:$0xff]  ;;  %491 = vmatpush.msra.mxu2 %v385_v45  ;;  %v622_v40 = vld [vmem:[%s13304_s8 + $0x138] sm:$0xff] }
  0xa7   :  { %5972 = vrcp.f32 %v6297_v50  ;;  %v5810_v52 = vadd.f32 -1.0, %v6297_v50  ;;  %v132_v15 = vand.u32 2147483647, %v6297_v50  ;;  %v134_v19 = vand.u32 2147483648, %v6297_v50  ;;  %446 = vmatpush.msrb.mxu0 %v381_v44  ;;  %531 = vmatpush.msrb.mxu1 %v404_v55  ;;  %v619_v44 = vld [vmem:[%s13304_s8 + $0x120] sm:$0xff]  ;;  %v613_v55 = vld [vmem:[%s13304_s8 + $0xf0] sm:$0xff] }
  0xa8   :  { %v163_v1 = vmul.f32 %v5811_v58, %v161_v51  ;;  %vm128_vm12 = vweird.f32 %v6297_v50  ;;  %v147_v60 = vand.u32 2147483647, %v6293_v48  ;;  %vm184_vm3 = vcmp.ge.f32.partialorder %v6297_v50, 3.0  ;;  %v361_v45 = vld [vmem:[%s13337_s0 + $0x20] sm:$0xff]  ;;  %v368_v23 = vld [vmem:[%s13337_s0 + $0x58] sm:$0xff] }
  0xa9   :  { %v162_v57 = vmul.f32 %v5810_v52, %v161_v51  ;;  %v135_v47 = vor.u32 1.1754944e-38, %v134_v19  ;;  %v6399_v51 = vpop.f32.mrf.mxu0  ;;  %v149_v52 = vand.u32 2147483648, %v6293_v48  ;;  %vm133_vm1 = vcmp.eq.f32.partialorder %v132_v15, 8.507059e+37  ;;  %447 = vmatpush.msrb.mxu0 %v378_v61  ;;  %532 = vmatpush.msrb.mxu1 %v401_v3  ;;  %v410_v61 = vld [vmem:[%s13337_s0 + $0x1a8] sm:$0xff]  ;;  %v631_v3 = vld [vmem:[%s13304_s8 + $0x180] sm:$0xff] }
  0xaa   :  { %v169_v17 = vmul.f32 -6.0, %v163_v1  ;;  %v165_v26 = vmul.f32 %v163_v1, %v163_v1  ;;  %v173_v28 = vmul.f32 15.0, %v163_v1  ;;  %vm182_vm6 = vcmp.le.f32.partialorder %v6297_v50, 1.0 }
  0xab   :  { %v168_v63 = vmul.f32 -6.0, %v162_v57  ;;  %v164_v10 = vmul.f32 %v162_v57, %v162_v57  ;;  %v172_v12 = vmul.f32 15.0, %v162_v57  ;;  %vm148_vm7 = vcmp.eq.f32.partialorder %v147_v60, 8.507059e+37  ;;  %v610_v60 = vld [vmem:[%s13304_s8 + $0xd8] sm:$0xff] }
  0xac   :  { %v6322_v62 = vpop.eup %5970  ;;  %v171_v27 = vmul.f32 %v169_v17, %v163_v1  ;;  %v167_v53 = vmul.f32 %v165_v26, %v163_v1  ;;  %vm185_vm9 = vcmp.ge.f32.partialorder %v6293_v48, 3.0  ;;  %v369_v17 = vld [vmem:[%s13337_s0 + $0x60] sm:$0xff]  ;;  %v284_v19 = vand.u32 2147483648, %v6274_v29  ;;  %v370_v26 = vld [vmem:[%s13337_s0 + $0x68] sm:$0xff] }
  0xad   :  { %v6332_v4 = vpop.eup %5972  ;;  %v139_v8 = vmul.f32 %v6322_v62, %v6293_v48  ;;  %v170_v11 = vmul.f32 %v168_v63, %v162_v57  ;;  %v166_v32 = vmul.f32 %v164_v10, %v162_v57  ;;  %vm144_vm14 = vweird.f32 %v6322_v62  ;;  %v382_v63 = vld [vmem:[%s13337_s0 + $0xc8] sm:$0xff]  ;;  %v379_v10 = vld [vmem:[%s13337_s0 + $0xb0] sm:$0xff]  ;;  %v607_v1 = vld [vmem:[%s13304_s8 + $0xc0] sm:$0xff] }
  0xae   :  { %v124_v9 = vmul.f32 %v6332_v4, %v6297_v50  ;;  %vm129_vm10 = vweird.f32 %v6332_v4  ;;  %v175_v38 = vadd.f32 %v173_v28, %v171_v27  ;;  %vm6428_vm5 = vmor %vm143_vm13, %vm144_vm14  ;;  %492 = vmatpush.msra.mxu2 %v382_v63  ;;  %vm279_vm13 = vweird.f32 %v6295_v49  ;;  %v634_v63 = vld [vmem:[%s13304_s8 + $0x198] sm:$0xff]  ;;  %v629_v28 = vld [vmem:[%s13304_s8 + $0x170] sm:$0xff] }
  0xaf   :  { %v140_v16 = vsub.f32 1.0, %v139_v8  ;;  %v174_v20 = vadd.f32 %v172_v12, %v170_v11  ;;  %vm6395_vm15 = vmor %vm128_vm12, %vm129_vm10  ;;  %v150_v12 = vor.u32 1.1754944e-38, %v149_v52  ;;  %vm183_vm10 = vcmp.le.f32.partialorder %v6293_v48, 1.0  ;;  %v358_v52 = vld [vmem:[%s13337_s0 + $0x8] sm:$0xff] }
  0xb0   :  { %v125_v18 = vsub.f32 1.0, %v124_v9  ;;  %v5813_v54 = vadd.f32 -10.0, %v175_v38  ;;  %v375_v9 = vld [vmem:[%s13337_s0 + $0x90] sm:$0xff]  ;;  %493 = vmatpush.msra.mxu2 %v379_v10  ;;  %vm278_vm12 = vweird.f32 %v6274_v29  ;;  %v271_v48 = vsel %vm6365_vm11, %v270_v6, %v266_v13  ;;  %v628_v38 = vld [vmem:[%s13304_s8 + $0x168] sm:$0xff] }
  0xb1   :  { %v141_v25 = vmul.f32 %v6322_v62, %v140_v16  ;;  %v5812_v33 = vadd.f32 -10.0, %v174_v20  ;;  %448 = vmatpush.msrb.mxu0 %v375_v9  ;;  %v224_v27 = vpop.f32.mrf.mxu0  ;;  %vm6493_vm11 = vmor %vm278_vm12, %vm279_vm13  ;;  %v367_v29 = vld [vmem:[%s13337_s0 + $0x50] sm:$0xff]  ;;  %vm283_vm14 = vcmp.eq.f32.partialorder %v282_v24, 8.507059e+37  ;;  %v604_v6 = vld [vmem:[%s13304_s8 + $0xa8] sm:$0xff]  ;;  %vm2206_vm2 = vcmask 998400  }
  0xb2   :  { %v126_v31 = vmul.f32 %v6332_v4, %v125_v18  ;;  %v179_v2 = vmul.f32 %v5813_v54, %v167_v53  ;;  %v373_v18 = vld [vmem:[%s13337_s0 + $0x80] sm:$0xff]  ;;  %494 = vmatpush.msra.mxu2 %v376_v5  ;;  %v406_v53 = vld [vmem:[%s13337_s0 + $0x188] sm:$0xff]  ;;  %v601_v9 = vld [vmem:[%s13304_s8 + $0x90] sm:$0xff] }
  0xb3   :  { %v178_v42 = vmul.f32 %v5812_v33, %v166_v32  ;;  %v142_v43 = vadd.f32 %v6322_v62, %v141_v25  ;;  %449 = vmatpush.msrb.mxu0 %v372_v56  ;;  %v366_v25 = vld [vmem:[%s13337_s0 + $0x48] sm:$0xff]  ;;  %v281_v33 = vsel %vm6493_vm11, %v6295_v49, %v277_v22  ;;  %v625_v49 = vld [vmem:[%s13304_s8 + $0x150] sm:$0xff]  ;;  %v389_v54 = vld [vmem:[%s13337_s0 + $0x100] sm:$0xff] }
  0xb4   :  { %v127_v41 = vadd.f32 %v6332_v4, %v126_v31  ;;  %v181_v50 = vadd.f32 1.0, %v179_v2  ;;  %495 = vmatpush.msra.mxu2 %v373_v18  ;;  %v285_v31 = vor.u32 1.1754944e-38, %v284_v19  ;;  %v407_v2 = vld [vmem:[%s13337_s0 + $0x190] sm:$0xff]  ;;  %v374_v10 = vld [vmem:[%s13337_s0 + $0x88] sm:$0xff]  ;;  %v586_v5 = vld [vmem:[%s13304_s8 + $0x18] sm:$0xff] }
  0xb5   :  { %v180_v58 = vadd.f32 1.0, %v178_v42  ;;  %v146_v8 = vsel %vm6428_vm5, %v6322_v62, %v142_v43  ;;  %v398_v62 = vld [vmem:[%s13337_s0 + $0x148] sm:$0xff]  ;;  %450 = vmatpush.msrb.mxu0 %v369_v17  ;;  %v412_v42 = vld [vmem:[%s13337_s0 + $0x1b8] sm:$0x3f]  ;;  %v395_v43 = vld [vmem:[%s13337_s0 + $0x130] sm:$0xff] }
  0xb6   :  { %v131_v57 = vsel %vm6395_vm15, %v6332_v4, %v127_v41  ;;  %v151_v14 = vsel %vm148_vm7, %v150_v12, %v146_v8  ;;  %v187_v15 = vsel %vm185_vm9, 0.0, %v181_v50  ;;  %533 = vmatpush.msrb.mxu1 %v398_v62  ;;  %496 = vmatpush.msra.mxu2 %v370_v26  ;;  %v286_v36 = vsel %vm283_vm14, %v285_v31, %v281_v33  ;;  %v364_v41 = vld [vmem:[%s13337_s0 + $0x38] sm:$0xff]  ;;  %v377_v8 = vld [vmem:[%s13337_s0 + $0xa0] sm:$0xff]  ;;  %v371_v12 = vld [vmem:[%s13337_s0 + $0x70] sm:$0xff] }
  0xb7   :  { %v136_v0 = vsel %vm133_vm1, %v135_v47, %v131_v57  ;;  %v186_v4 = vsel %vm184_vm3, 0.0, %v180_v58  ;;  %v189_v16 = vsel %vm183_vm10, 1.0, %v187_v15  ;;  %451 = vmatpush.msrb.mxu0 %v366_v25  ;;  %5827 = vmatpush.msk.msra.mxu3 %vm429_vm8, %v412_v42  ;;  %v392_v47 = vld [vmem:[%s13337_s0 + $0x118] sm:$0xff]  ;;  %v413_v57 = vld [vmem:[%s13337_s0 + $0x1c0] sm:$0x3f]  ;;  %v592_v62 = vld [vmem:[%s13304_s8 + $0x48] sm:$0xff] }
  0xb8   :  { %v188_v11 = vsel %vm182_vm6, 1.0, %v186_v4  ;;  %290 = vst.msk [vmem:[#allocation4 + $0x8] sm:$0xff] %vm288_vm4, %v189_v16  ;;  %v255_v21 = vmul.f32 %v189_v16, %v151_v14  ;;  %497 = vmatpush.msra.mxu2 %v367_v29  ;;  %534 = vmatpush.msrb.mxu1 %v395_v43  ;;  %v637_v58 = vld [vmem:[%s13304_s8 + $0x1b0] sm:$0x3f]  ;;  %v380_v4 = vld [vmem:[%s13337_s0 + $0xb8] sm:$0xff]  ;;  %v595_v50 = vld [vmem:[%s13304_s8 + $0x60] sm:$0xff] }
  0xb9   :  { %v254_v7 = vmul.f32 %v188_v11, %v136_v0  ;;  %289 = vst.msk [vmem:[#allocation4] sm:$0xff] %vm288_vm4, %v188_v11  ;;  %452 = vmatpush.msrb.mxu0 %v363_v30  ;;  %522 = vmatpush.msra.mxu3 %v409_v46  ;;  %v383_v0 = vld [vmem:[%s13337_s0 + $0xd0] sm:$0xff]  ;;  %v598_v11 = vld [vmem:[%s13304_s8 + $0x78] sm:$0xff]  ;;  %v362_v56 = vld [vmem:[%s13337_s0 + $0x28] sm:$0xff]  ;;  %vm422_vm15 = vcmask 179200   ;;  %vm995_vm1 = vcmask 359424  }
  0xba   :  { %v257_v32 = vsub.f32 %v255_v21, %v224_v27  ;;  %498 = vmatpush.msra.mxu2 %v364_v41  ;;  %535 = vmatpush.msrb.mxu1 %v392_v47  ;;  %v589_v13 = vld [vmem:[%s13304_s8 + $0x30] sm:$0xff]  ;;  %v295_v14 = vld [vmem:[%s13348_s6] sm:$0x3]  ;;  %v630_v30 = vld [vmem:[%s13304_s8 + $0x178] sm:$0xff]  ;;  %vm5459_vm3 = vcmask 850944   ;;  %s5780_s6 = sshll.u32 %s13318_s22, 4  ;;  %s5781_s6 = int_to_ptr.hbm [resolvable:$true] %s5780_s6 }
  0xbb   :  { %v256_v39 = vsub.f32 %v254_v7, %v6399_v51  ;;  %453 = vmatpush.msrb.mxu0 %v360_v34  ;;  %v616_v51 = vld [vmem:[%s13304_s8 + $0x108] sm:$0xff]  ;;  %523 = vmatpush.msra.mxu3 %v406_v53  ;;  %v365_v7 = vld [vmem:[%s13337_s0 + $0x40] sm:$0xff]  ;;  %v359_v15 = vld [vmem:[%s13337_s0 + $0x10] sm:$0xff]  ;;  %v297_v16 = vperm.slane %v295_v14, 0  ;;  %v298_v17 = vperm.slane %v295_v14, 1  ;;  %s13349_s0 = sld [smem:[#allocation104_spill]] }
  0xbc   :  { %v6516_v37 = vmul.f32 %v286_v36, %v257_v32  ;;  %499 = vmatpush.msra.mxu2 %v361_v45  ;;  %536 = vmatpush.msrb.mxu1 %v389_v54  ;;  %v638_v31 = vld [vmem:[%s13304_s8 + $0x1b8] sm:$0x3f]  ;;  %v639_v32 = vld [vmem:[%s13304_s8 + $0x1c0] sm:$0x3f]  ;;  %v636_v36 = vld [vmem:[%s13304_s8 + $0x1a8] sm:$0xff] }
  0xbd   :  { %v6479_v20 = vmul.f32 %v271_v48, %v256_v39  ;;  %454 = vmatpush.msrb.mxu0 %v357_v35  ;;  %v583_v39 = vld [vmem:[%s13304_s8] sm:$0xff]  ;;  %v626_v33 = vld [vmem:[%s13304_s8 + $0x158] sm:$0xff]  ;;  %v633_v41 = vld [vmem:[%s13304_s8 + $0x190] sm:$0xff] }
  0xbe   :  { %500 = vmatpush.msra.mxu2 %v358_v52  ;;  %537 = vmatpush.msrb.mxu1 %v386_v59  ;;  %v627_v34 = vld [vmem:[%s13304_s8 + $0x160] sm:$0xff]  ;;  %v620_v42 = vld [vmem:[%s13304_s8 + $0x128] sm:$0xff]  ;;  %v621_v43 = vld [vmem:[%s13304_s8 + $0x130] sm:$0xff] }
  0xbf   :  { %5820 = vmatmul.msk.f32.vlgmr.msrb.gmra.mxu2 %vm288_vm4, %v6479_v20  ;;  %5822 = vmatmul.msk.f32.vlgmr.msrb.gmra.mxu3 %vm288_vm4, %v6479_v20  ;;  %v635_v35 = vld [vmem:[%s13304_s8 + $0x1a0] sm:$0xff]  ;;  %v617_v46 = vld [vmem:[%s13304_s8 + $0x110] sm:$0xff]  ;;  %v618_v47 = vld [vmem:[%s13304_s8 + $0x118] sm:$0xff] }
  0xc0   :  { %649 = vmatpush.msra.mxu0 %v628_v38  ;;  %5830 = vmatpush.msk.msrb.mxu3 %vm429_vm8, %v413_v57  ;;  %v623_v38 = vld [vmem:[%s13304_s8 + $0x140] sm:$0xff]  ;;  %v612_v54 = vld [vmem:[%s13304_s8 + $0xe8] sm:$0xff]  ;;  %v609_v57 = vld [vmem:[%s13304_s8 + $0xd0] sm:$0xff] }
  0xc1   :  { %5833 = vmatpush.msk.msrb.mxu2 %vm429_vm8, %v637_v58  ;;  %538 = vmatpush.msrb.mxu1 %v383_v0  ;;  %v615_v52 = vld [vmem:[%s13304_s8 + $0x100] sm:$0xff]  ;;  %v605_v58 = vld [vmem:[%s13304_s8 + $0xb0] sm:$0xff]  ;;  %v606_v59 = vld [vmem:[%s13304_s8 + $0xb8] sm:$0xff] }
  0xc2   :  { %650 = vmatpush.msra.mxu0 %v625_v49  ;;  %568 = vmatpush.msrb.mxu3 %v410_v61  ;;  %v624_v49 = vld [vmem:[%s13304_s8 + $0x148] sm:$0xff]  ;;  %v611_v53 = vld [vmem:[%s13304_s8 + $0xe0] sm:$0xff]  ;;  %v602_v61 = vld [vmem:[%s13304_s8 + $0x98] sm:$0xff] }
  0xc3   :  { %686 = vmatpush.msrb.mxu2 %v634_v63  ;;  %539 = vmatpush.msrb.mxu1 %v380_v4  ;;  %v603_v63 = vld [vmem:[%s13304_s8 + $0xa0] sm:$0xff]  ;;  %v863_v0 = vld [vmem:[%s13305_s9 + $0x230] sm:$0xff]  ;;  %v596_v4 = vld [vmem:[%s13304_s8 + $0x68] sm:$0xff] }
  0xc4   :  { %651 = vmatpush.msra.mxu0 %v622_v40  ;;  %569 = vmatpush.msrb.mxu3 %v407_v2  ;;  %v632_v40 = vld [vmem:[%s13304_s8 + $0x188] sm:$0xff]  ;;  %v948_v14 = vld [vmem:[%s13305_s9 + $0x4d8] sm:$0xff] }
  0xc5   :  { %687 = vmatpush.msrb.mxu2 %v631_v3  ;;  %540 = vmatpush.msrb.mxu1 %v377_v8  ;;  %v600_v2 = vld [vmem:[%s13304_s8 + $0x88] sm:$0xff]  ;;  %v593_v8 = vld [vmem:[%s13304_s8 + $0x50] sm:$0xff] }
  0xc6   :  { %652 = vmatpush.msra.mxu0 %v619_v44  ;;  %v858_v3 = vld [vmem:[%s13305_s9 + $0x208] sm:$0xff] }
  0xc7   :  { %5821 = vmatmul.msk.f32.gmra.mxu2 %vm288_vm4, %v6516_v37  ;;  %5823 = vmatmul.msk.f32.gmra.mxu3 %vm288_vm4, %v6516_v37 }
  0xc8   :  { %653 = vmatpush.msra.mxu0 %v616_v51  ;;  %541 = vmatpush.msrb.mxu1 %v374_v10  ;;  %v614_v51 = vld [vmem:[%s13304_s8 + $0xf8] sm:$0xff]  ;;  %v853_v10 = vld [vmem:[%s13305_s9 + $0x1e0] sm:$0xff] }
  0xca   :  { %654 = vmatpush.msra.mxu0 %v613_v55  ;;  %542 = vmatpush.msrb.mxu1 %v371_v12  ;;  %v608_v55 = vld [vmem:[%s13304_s8 + $0xc8] sm:$0xff]  ;;  %v591_v12 = vld [vmem:[%s13304_s8 + $0x40] sm:$0xff] }
  0xcc   :  { %655 = vmatpush.msra.mxu0 %v610_v60  ;;  %543 = vmatpush.msrb.mxu1 %v368_v23  ;;  %v868_v60 = vld [vmem:[%s13305_s9 + $0x258] sm:$0xff]  ;;  %v587_v23 = vld [vmem:[%s13304_s8 + $0x20] sm:$0xff] }
  0xce   :  { %656 = vmatpush.msra.mxu0 %v607_v1  ;;  %544 = vmatpush.msrb.mxu1 %v365_v7  ;;  %v599_v1 = vld [vmem:[%s13304_s8 + $0x80] sm:$0xff]  ;;  %v843_v7 = vld [vmem:[%s13305_s9 + $0x190] sm:$0xff] }
  0xd0   :  { %657 = vmatpush.msra.mxu0 %v604_v6  ;;  %545 = vmatpush.msrb.mxu1 %v362_v56  ;;  %v597_v6 = vld [vmem:[%s13304_s8 + $0x70] sm:$0xff] }
  0xd1   :  { %v585_v56 = vld [vmem:[%s13304_s8 + $0x10] sm:$0xff] }
  0xd2   :  { %658 = vmatpush.msra.mxu0 %v601_v9  ;;  %546 = vmatpush.msrb.mxu1 %v359_v15  ;;  %v594_v9 = vld [vmem:[%s13304_s8 + $0x58] sm:$0xff]  ;;  %v838_v15 = vld [vmem:[%s13305_s9 + $0x168] sm:$0xff] }
  0xd4   :  { %659 = vmatpush.msra.mxu0 %v598_v11  ;;  %v590_v11 = vld [vmem:[%s13304_s8 + $0x38] sm:$0xff] }
  0xd6   :  { %660 = vmatpush.msra.mxu0 %v595_v50  ;;  %v848_v50 = vld [vmem:[%s13305_s9 + $0x1b8] sm:$0xff] }
  0xd8   :  { %661 = vmatpush.msra.mxu0 %v592_v62  ;;  %v588_v62 = vld [vmem:[%s13304_s8 + $0x28] sm:$0xff] }
  0xda   :  { %662 = vmatpush.msra.mxu0 %v589_v13  ;;  %v584_v13 = vld [vmem:[%s13304_s8 + $0x8] sm:$0xff] }
  0xdc   :  { %663 = vmatpush.msra.mxu0 %v586_v5  ;;  %v869_v5 = vld [vmem:[%s13305_s9 + $0x260] sm:$0xff] }
  0xde   :  { %664 = vmatpush.msra.mxu0 %v583_v39  ;;  %v864_v39 = vld [vmem:[%s13305_s9 + $0x238] sm:$0xff] }
 0x142   :  { %v324_v18 = vpop.f32.mrf.mxu2  ;;  %v347_v48 = vpop.f32.mrf.mxu3 }
 0x143   :  { %v325_v19 = vadd.f32 %v324_v18, %v297_v16  ;;  %v348_v21 = vadd.f32 %v347_v48, %v298_v17  ;;  %v859_v18 = vld [vmem:[%s13305_s9 + $0x210] sm:$0xff]  ;;  %v938_v48 = vld [vmem:[%s13305_s9 + $0x488] sm:$0xff] }
 0x145   :  { %5974 = vtanh.f32 %v325_v19  ;;  %v854_v19 = vld [vmem:[%s13305_s9 + $0x1e8] sm:$0xff] }
 0x146   :  { %5976 = vtanh.f32 %v348_v21  ;;  %v933_v21 = vld [vmem:[%s13305_s9 + $0x460] sm:$0xff] }
 0x14a   :  { %v327_v22 = vpop.f32.mrf.mxu2  ;;  %v350_v24 = vpop.f32.mrf.mxu3 }
 0x14b   :  { %v6651_v25 = vpop.eup %5974  ;;  %v328_v26 = vadd.f32 %v327_v22, %v297_v16  ;;  %v351_v27 = vadd.f32 %v350_v24, %v298_v17  ;;  %v943_v16 = vld [vmem:[%s13305_s9 + $0x4b0] sm:$0xff]  ;;  %v833_v17 = vld [vmem:[%s13305_s9 + $0x140] sm:$0xff]  ;;  %v928_v24 = vld [vmem:[%s13305_s9 + $0x438] sm:$0xff] }
 0x14c   :  { %v6659_v29 = vpop.eup %5976  ;;  %455 = vmatmul.f32.vlgmr.msrb.gmra.mxu0 %v6651_v25  ;;  %501 = vmatmul.f32.vlgmr.msra.gmra.mxu2 %v6651_v25  ;;  %v849_v22 = vld [vmem:[%s13305_s9 + $0x1c0] sm:$0xff] }
 0x14d   :  { %5978 = vtanh.f32 %v328_v26  ;;  %5825 = vmatmul.msk.f32.vlgmr.msra.gmra.mxu1 %vm422_vm15, %v6659_v29  ;;  %5828 = vmatmul.msk.f32.vlgmr.msra.gmra.mxu3 %vm422_vm15, %v6659_v29  ;;  %v923_v26 = vld [vmem:[%s13305_s9 + $0x410] sm:$0xff] }
 0x14e   :  { %5980 = vtanh.f32 %v351_v27  ;;  %695 = vmatpush.msra.mxu3 %v629_v28  ;;  %741 = vmatpush.msra.mxu2 %v630_v30  ;;  %v839_v27 = vld [vmem:[%s13305_s9 + $0x170] sm:$0xff]  ;;  %v918_v28 = vld [vmem:[%s13305_s9 + $0x3e8] sm:$0xff] }
 0x14f   :  { %5836 = vmatpush.msk.msra.mxu1 %vm429_vm8, %v638_v31  ;;  %5839 = vmatpush.msk.msrb.mxu0 %vm429_vm8, %v639_v32  ;;  %v834_v30 = vld [vmem:[%s13305_s9 + $0x148] sm:$0xff]  ;;  %v828_v31 = vld [vmem:[%s13305_s9 + $0x118] sm:$0xff]  ;;  %vm1002_vm8 = vcmask 1043456  }
 0x150   :  { %696 = vmatpush.msra.mxu3 %v626_v33  ;;  %742 = vmatpush.msra.mxu2 %v627_v34  ;;  %v978_v32 = vld [vmem:[%s13305_s9 + $0x5c8] sm:$0xf]  ;;  %v829_v33 = vld [vmem:[%s13305_s9 + $0x120] sm:$0xff]  ;;  %v908_v34 = vld [vmem:[%s13305_s9 + $0x398] sm:$0xff] }
 0x151   :  { %732 = vmatpush.msra.mxu1 %v635_v35  ;;  %778 = vmatpush.msrb.mxu0 %v636_v36  ;;  %v823_v35 = vld [vmem:[%s13305_s9 + $0xf0] sm:$0xff]  ;;  %v973_v36 = vld [vmem:[%s13305_s9 + $0x5a0] sm:$0xff] }
 0x152   :  { %697 = vmatpush.msra.mxu3 %v623_v38  ;;  %743 = vmatpush.msra.mxu2 %v624_v49  ;;  %v824_v38 = vld [vmem:[%s13305_s9 + $0xf8] sm:$0xff]  ;;  %v903_v49 = vld [vmem:[%s13305_s9 + $0x370] sm:$0xff] }
 0x153   :  { %v6705_v44 = vpop.eup %5978  ;;  %733 = vmatpush.msra.mxu1 %v632_v40  ;;  %779 = vmatpush.msrb.mxu0 %v633_v41  ;;  %v818_v40 = vld [vmem:[%s13305_s9 + $0xc8] sm:$0xff]  ;;  %v968_v41 = vld [vmem:[%s13305_s9 + $0x578] sm:$0xff] }
 0x154   :  { %v6707_v45 = vpop.eup %5980  ;;  %698 = vmatpush.msra.mxu3 %v620_v42  ;;  %744 = vmatpush.msra.mxu2 %v621_v43  ;;  %v819_v42 = vld [vmem:[%s13305_s9 + $0xd0] sm:$0xff]  ;;  %v898_v43 = vld [vmem:[%s13305_s9 + $0x348] sm:$0xff] }
 0x155   :  { %458 = vmatmul.f32.gmra.mxu0 %v6705_v44  ;;  %5826 = vmatmul.msk.f32.gmra.mxu1 %vm422_vm15, %v6707_v45 }
 0x156   :  { %504 = vmatmul.f32.gmra.mxu2 %v6705_v44  ;;  %5829 = vmatmul.msk.f32.gmra.mxu3 %vm422_vm15, %v6707_v45 }
 0x157   :  { %699 = vmatpush.msra.mxu3 %v617_v46  ;;  %745 = vmatpush.msra.mxu2 %v618_v47  ;;  %v814_v46 = vld [vmem:[%s13305_s9 + $0xa8] sm:$0xff]  ;;  %v893_v47 = vld [vmem:[%s13305_s9 + $0x320] sm:$0xff] }
 0x159   :  { %700 = vmatpush.msra.mxu3 %v614_v51  ;;  %746 = vmatpush.msra.mxu2 %v615_v52  ;;  %v808_v51 = vld [vmem:[%s13305_s9 + $0x78] sm:$0xff]  ;;  %v958_v52 = vld [vmem:[%s13305_s9 + $0x528] sm:$0xff] }
 0x15b   :  { %701 = vmatpush.msra.mxu3 %v611_v53  ;;  %747 = vmatpush.msra.mxu2 %v612_v54  ;;  %v809_v53 = vld [vmem:[%s13305_s9 + $0x80] sm:$0xff]  ;;  %v888_v54 = vld [vmem:[%s13305_s9 + $0x2f8] sm:$0xff] }
 0x15d   :  { %702 = vmatpush.msra.mxu3 %v608_v55  ;;  %748 = vmatpush.msra.mxu2 %v609_v57  ;;  %v803_v55 = vld [vmem:[%s13305_s9 + $0x50] sm:$0xff]  ;;  %v953_v57 = vld [vmem:[%s13305_s9 + $0x500] sm:$0xff] }
 0x15e   :  { %547 = vmatmul.f32.vlgmr.msrb.gmra.mxu1 %v6651_v25  ;;  %5831 = vmatmul.msk.f32.vlgmr.msrb.gmra.mxu3 %vm422_vm15, %v6659_v29 }
 0x15f   :  { %665 = vmatmul.f32.vlgmr.msra.gmra.mxu0 %v6651_v25  ;;  %5834 = vmatmul.msk.f32.vlgmr.msrb.gmra.mxu2 %vm422_vm15, %v6659_v29 }
 0x160   :  { %703 = vmatpush.msra.mxu3 %v605_v58  ;;  %749 = vmatpush.msra.mxu2 %v606_v59  ;;  %v804_v58 = vld [vmem:[%s13305_s9 + $0x58] sm:$0xff]  ;;  %v883_v59 = vld [vmem:[%s13305_s9 + $0x2d0] sm:$0xff] }
 0x161   :  { %1018 = vmatpush.msrb.mxu1 %v868_v60  ;;  %5842 = vmatpush.msk.msra.mxu0 %vm1002_vm8, %v978_v32  ;;  %v949_v60 = vld [vmem:[%s13305_s9 + $0x4e0] sm:$0xff]  ;;  %v830_v32 = vld [vmem:[%s13305_s9 + $0x128] sm:$0xff] }
 0x162   :  { %704 = vmatpush.msra.mxu3 %v602_v61  ;;  %750 = vmatpush.msra.mxu2 %v603_v63  ;;  %v798_v61 = vld [vmem:[%s13305_s9 + $0x28] sm:$0xff]  ;;  %v799_v63 = vld [vmem:[%s13305_s9 + $0x30] sm:$0xff] }
 0x163   :  { %1019 = vmatpush.msrb.mxu1 %v863_v0  ;;  %1075 = vmatpush.msra.mxu0 %v973_v36  ;;  %v878_v0 = vld [vmem:[%s13305_s9 + $0x2a8] sm:$0xff] }
 0x164   :  { %705 = vmatpush.msra.mxu3 %v599_v1  ;;  %751 = vmatpush.msra.mxu2 %v600_v2  ;;  %v944_v1 = vld [vmem:[%s13305_s9 + $0x4b8] sm:$0xff]  ;;  %v793_v2 = vld [vmem:[%s13305_s9] sm:$0xff] }
 0x165   :  { %1020 = vmatpush.msrb.mxu1 %v858_v3  ;;  %1076 = vmatpush.msra.mxu0 %v968_v41  ;;  %v794_v3 = vld [vmem:[%s13305_s9 + $0x8] sm:$0xff] }
 0x166   :  { %706 = vmatpush.msra.mxu3 %v596_v4  ;;  %752 = vmatpush.msra.mxu2 %v597_v6  ;;  %v873_v4 = vld [vmem:[%s13305_s9 + $0x280] sm:$0xff]  ;;  %v939_v6 = vld [vmem:[%s13305_s9 + $0x490] sm:$0xff] }
 0x167   :  { %550 = vmatmul.f32.gmra.mxu1 %v6705_v44  ;;  %5832 = vmatmul.msk.f32.gmra.mxu3 %vm422_vm15, %v6707_v45 }
 0x168   :  { %668 = vmatmul.f32.gmra.mxu0 %v6705_v44  ;;  %5835 = vmatmul.msk.f32.gmra.mxu2 %vm422_vm15, %v6707_v45 }
 0x169   :  { %707 = vmatpush.msra.mxu3 %v593_v8  ;;  %753 = vmatpush.msra.mxu2 %v594_v9  ;;  %v979_v8 = vld [vmem:[%s13305_s9 + $0x5d0] sm:$0xf]  ;;  %v980_v9 = vld [vmem:[%s13305_s9 + $0x5d8] sm:$0xf] }
 0x16a   :  { %1021 = vmatpush.msrb.mxu1 %v853_v10  ;;  %v870_v10 = vld [vmem:[%s13305_s9 + $0x268] sm:$0xff] }
 0x16b   :  { %708 = vmatpush.msra.mxu3 %v590_v11  ;;  %754 = vmatpush.msra.mxu2 %v591_v12  ;;  %v934_v11 = vld [vmem:[%s13305_s9 + $0x468] sm:$0xff] }
 0x16c   :  { %1022 = vmatpush.msrb.mxu1 %v848_v50  ;;  %v974_v12 = vld [vmem:[%s13305_s9 + $0x5a8] sm:$0xff]  ;;  %v975_v50 = vld [vmem:[%s13305_s9 + $0x5b0] sm:$0xff] }
 0x16d   :  { %709 = vmatpush.msra.mxu3 %v587_v23  ;;  %755 = vmatpush.msra.mxu2 %v588_v62  ;;  %v865_v23 = vld [vmem:[%s13305_s9 + $0x240] sm:$0xff] }
 0x16e   :  { %1023 = vmatpush.msrb.mxu1 %v843_v7  ;;  %v929_v62 = vld [vmem:[%s13305_s9 + $0x440] sm:$0xff] }
 0x16f   :  { %710 = vmatpush.msra.mxu3 %v584_v13  ;;  %756 = vmatpush.msra.mxu2 %v585_v56  ;;  %v969_v7 = vld [vmem:[%s13305_s9 + $0x580] sm:$0xff]  ;;  %v970_v13 = vld [vmem:[%s13305_s9 + $0x588] sm:$0xff]  ;;  %v860_v56 = vld [vmem:[%s13305_s9 + $0x218] sm:$0xff] }
 0x170   :  { %711 = vmatmul.f32.vlgmr.msra.gmra.mxu3 %v6651_v25  ;;  %5837 = vmatmul.msk.f32.vlgmr.msra.gmra.mxu1 %vm422_vm15, %v6659_v29 }
 0x171   :  { %757 = vmatmul.f32.vlgmr.msra.gmra.mxu2 %v6651_v25  ;;  %5840 = vmatmul.msk.f32.vlgmr.msrb.gmra.mxu0 %vm422_vm15, %v6659_v29  ;;  %v844_v25 = vld [vmem:[%s13305_s9 + $0x198] sm:$0xff]  ;;  %v913_v29 = vld [vmem:[%s13305_s9 + $0x3c0] sm:$0xff] }
 0x172   :  { %1087 = vmatpush.msrb.mxu2 %v869_v5  ;;  %1041 = vmatpush.msrb.mxu3 %v948_v14  ;;  %v924_v5 = vld [vmem:[%s13305_s9 + $0x418] sm:$0xff] }
 0x173   :  { %1024 = vmatpush.msrb.mxu1 %v838_v15  ;;  %v964_v14 = vld [vmem:[%s13305_s9 + $0x558] sm:$0xff]  ;;  %v965_v15 = vld [vmem:[%s13305_s9 + $0x560] sm:$0xff] }
 0x174   :  { %1088 = vmatpush.msrb.mxu2 %v864_v39  ;;  %1042 = vmatpush.msrb.mxu3 %v943_v16  ;;  %v855_v39 = vld [vmem:[%s13305_s9 + $0x1f0] sm:$0xff] }
 0x175   :  { %1025 = vmatpush.msrb.mxu1 %v833_v17  ;;  %v919_v16 = vld [vmem:[%s13305_s9 + $0x3f0] sm:$0xff] }
 0x176   :  { %1089 = vmatpush.msrb.mxu2 %v859_v18  ;;  %1043 = vmatpush.msrb.mxu3 %v938_v48  ;;  %v959_v17 = vld [vmem:[%s13305_s9 + $0x530] sm:$0xff]  ;;  %v960_v18 = vld [vmem:[%s13305_s9 + $0x538] sm:$0xff]  ;;  %v850_v48 = vld [vmem:[%s13305_s9 + $0x1c8] sm:$0xff] }
 0x177   :  { %1026 = vmatpush.msrb.mxu1 %v828_v31  ;;  %v899_v31 = vld [vmem:[%s13305_s9 + $0x350] sm:$0xff] }
 0x178   :  { %714 = vmatmul.f32.gmra.mxu3 %v6705_v44  ;;  %5838 = vmatmul.msk.f32.gmra.mxu1 %vm422_vm15, %v6707_v45 }
 0x179   :  { %760 = vmatmul.f32.gmra.mxu2 %v6705_v44  ;;  %5841 = vmatmul.msk.f32.gmra.mxu0 %vm422_vm15, %v6707_v45  ;;  %v813_v44 = vld [vmem:[%s13305_s9 + $0xa0] sm:$0xff]  ;;  %v963_v45 = vld [vmem:[%s13305_s9 + $0x550] sm:$0xff] }
 0x17a   :  { %1090 = vmatpush.msrb.mxu2 %v854_v19  ;;  %1044 = vmatpush.msrb.mxu3 %v933_v21  ;;  %v914_v19 = vld [vmem:[%s13305_s9 + $0x3c8] sm:$0xff] }
 0x17b   :  { %1027 = vmatpush.msrb.mxu1 %v823_v35  ;;  %1077 = vmatpush.msra.mxu0 %v963_v45  ;;  %v954_v21 = vld [vmem:[%s13305_s9 + $0x508] sm:$0xff]  ;;  %v815_v45 = vld [vmem:[%s13305_s9 + $0xb0] sm:$0xff] }
 0x17c   :  { %1091 = vmatpush.msrb.mxu2 %v849_v22  ;;  %1045 = vmatpush.msrb.mxu3 %v928_v24  ;;  %v955_v22 = vld [vmem:[%s13305_s9 + $0x510] sm:$0xff]  ;;  %v845_v24 = vld [vmem:[%s13305_s9 + $0x1a0] sm:$0xff]  ;;  %v894_v35 = vld [vmem:[%s13305_s9 + $0x328] sm:$0xff] }
 0x17d   :  { %1028 = vmatpush.msrb.mxu1 %v818_v40  ;;  %1078 = vmatpush.msra.mxu0 %v958_v52  ;;  %v820_v40 = vld [vmem:[%s13305_s9 + $0xd8] sm:$0xff]  ;;  %v874_v52 = vld [vmem:[%s13305_s9 + $0x288] sm:$0xff] }
 0x17e   :  { %1092 = vmatpush.msrb.mxu2 %v844_v25  ;;  %1046 = vmatpush.msrb.mxu3 %v923_v26  ;;  %v909_v25 = vld [vmem:[%s13305_s9 + $0x3a0] sm:$0xff]  ;;  %v840_v26 = vld [vmem:[%s13305_s9 + $0x178] sm:$0xff] }
 0x17f   :  { %1029 = vmatpush.msrb.mxu1 %v813_v44  ;;  %1079 = vmatpush.msra.mxu0 %v953_v57 }
 0x180   :  { %1093 = vmatpush.msrb.mxu2 %v839_v27  ;;  %1047 = vmatpush.msrb.mxu3 %v918_v28 }
 0x181   :  { %1030 = vmatpush.msrb.mxu1 %v808_v51  ;;  %1110 = vmatpush.msrb.mxu0 %v949_v60  ;;  %v810_v51 = vld [vmem:[%s13305_s9 + $0x88] sm:$0xff] }
 0x182   :  { %1094 = vmatpush.msrb.mxu2 %v834_v30  ;;  %1048 = vmatpush.msrb.mxu3 %v913_v29  ;;  %v904_v30 = vld [vmem:[%s13305_s9 + $0x378] sm:$0xff]  ;;  %v835_v29 = vld [vmem:[%s13305_s9 + $0x150] sm:$0xff] }
 0x183   :  { %1031 = vmatpush.msrb.mxu1 %v803_v55  ;;  %1111 = vmatpush.msrb.mxu0 %v944_v1 }
 0x184   :  { %1095 = vmatpush.msrb.mxu2 %v829_v33  ;;  %1049 = vmatpush.msrb.mxu3 %v908_v34  ;;  %v7075_v33 = vld [vmem:[%s13349_s0] sm:$0x7] }
 0x185   :  { %1032 = vmatpush.msrb.mxu1 %v798_v61  ;;  %1112 = vmatpush.msrb.mxu0 %v939_v6  ;;  %v416_v41 = vperm.slane %v7075_v33, 0  ;;  %v795_v61 = vld [vmem:[%s13305_s9 + $0x10] sm:$0xff] }
 0x186   :  { %1096 = vmatpush.msrb.mxu2 %v824_v38  ;;  %1050 = vmatpush.msrb.mxu3 %v903_v49  ;;  %v825_v38 = vld [vmem:[%s13305_s9 + $0x100] sm:$0xff] }
 0x187   :  { %1033 = vmatpush.msrb.mxu1 %v793_v2  ;;  %1113 = vmatpush.msrb.mxu0 %v934_v11  ;;  %v889_v49 = vld [vmem:[%s13305_s9 + $0x300] sm:$0xff]  ;;  %v417_v2 = vperm.slane %v7075_v33, 1  ;;  %v418_v11 = vperm.slane %v7075_v33, 2 }
 0x188   :  { %1097 = vmatpush.msrb.mxu2 %v819_v42  ;;  %1051 = vmatpush.msrb.mxu3 %v898_v43  ;;  %v884_v43 = vld [vmem:[%s13305_s9 + $0x2d8] sm:$0xff] }
 0x189   :  { %5845 = vmatpush.msk.msra.mxu1 %vm1002_vm8, %v979_v8  ;;  %1114 = vmatpush.msrb.mxu0 %v929_v62  ;;  %v946_v62 = vld [vmem:[%s13305_s9 + $0x4c8] sm:$0xff] }
 0x18a   :  { %1098 = vmatpush.msrb.mxu2 %v814_v46  ;;  %1052 = vmatpush.msrb.mxu3 %v893_v47  ;;  %v879_v46 = vld [vmem:[%s13305_s9 + $0x2b0] sm:$0xff] }
 0x18b   :  { %1144 = vmatpush.msra.mxu1 %v974_v12  ;;  %1115 = vmatpush.msrb.mxu0 %v924_v5 }
 0x18c   :  { %1099 = vmatpush.msrb.mxu2 %v809_v53  ;;  %1053 = vmatpush.msrb.mxu3 %v888_v54  ;;  %v805_v53 = vld [vmem:[%s13305_s9 + $0x60] sm:$0xff] }
 0x18d   :  { %1145 = vmatpush.msra.mxu1 %v969_v7  ;;  %1116 = vmatpush.msrb.mxu0 %v919_v16  ;;  %v935_v16 = vld [vmem:[%s13305_s9 + $0x470] sm:$0xff] }
 0x18e   :  { %1100 = vmatpush.msrb.mxu2 %v804_v58  ;;  %1054 = vmatpush.msrb.mxu3 %v883_v59  ;;  %v800_v58 = vld [vmem:[%s13305_s9 + $0x38] sm:$0xff] }
 0x18f   :  { %1146 = vmatpush.msra.mxu1 %v964_v14  ;;  %1117 = vmatpush.msrb.mxu0 %v914_v19 }
 0x190   :  { %1101 = vmatpush.msrb.mxu2 %v799_v63  ;;  %1055 = vmatpush.msrb.mxu3 %v878_v0 }
 0x191   :  { %1147 = vmatpush.msra.mxu1 %v959_v17  ;;  %1118 = vmatpush.msrb.mxu0 %v909_v25  ;;  %v936_v17 = vld [vmem:[%s13305_s9 + $0x478] sm:$0xff] }
 0x192   :  { %1102 = vmatpush.msrb.mxu2 %v794_v3  ;;  %1056 = vmatpush.msrb.mxu3 %v873_v4 }
 0x193   :  { %1148 = vmatpush.msra.mxu1 %v954_v21  ;;  %1119 = vmatpush.msrb.mxu0 %v904_v30 }
 0x194   :  { %5848 = vmatpush.msk.msra.mxu2 %vm1002_vm8, %v980_v9  ;;  %1156 = vmatpush.msra.mxu3 %v870_v10  ;;  %v950_v9 = vld [vmem:[%s13305_s9 + $0x4e8] sm:$0xff]  ;;  %v951_v10 = vld [vmem:[%s13305_s9 + $0x4f0] sm:$0xff] }
 0x195   :  { %1120 = vmatpush.msrb.mxu0 %v899_v31  ;;  %v920_v31 = vld [vmem:[%s13305_s9 + $0x3f8] sm:$0xff] }
 0x196   :  { %1213 = vmatpush.msra.mxu2 %v975_v50  ;;  %1157 = vmatpush.msra.mxu3 %v865_v23  ;;  %v945_v23 = vld [vmem:[%s13305_s9 + $0x4c0] sm:$0xff] }
 0x197   :  { %1121 = vmatpush.msrb.mxu0 %v894_v35 }
 0x198   :  { %1214 = vmatpush.msra.mxu2 %v970_v13  ;;  %1158 = vmatpush.msra.mxu3 %v860_v56  ;;  %v940_v13 = vld [vmem:[%s13305_s9 + $0x498] sm:$0xff]  ;;  %v941_v56 = vld [vmem:[%s13305_s9 + $0x4a0] sm:$0xff] }
 0x199   :  { %1122 = vmatpush.msrb.mxu0 %v889_v49  ;;  %v915_v49 = vld [vmem:[%s13305_s9 + $0x3d0] sm:$0xff] }
 0x19a   :  { %1215 = vmatpush.msra.mxu2 %v965_v15  ;;  %1159 = vmatpush.msra.mxu3 %v855_v39 }
 0x19b   :  { %1123 = vmatpush.msrb.mxu0 %v884_v43 }
 0x19c   :  { %1216 = vmatpush.msra.mxu2 %v960_v18  ;;  %1160 = vmatpush.msra.mxu3 %v850_v48 }
 0x19d   :  { %1124 = vmatpush.msrb.mxu0 %v879_v46  ;;  %v910_v46 = vld [vmem:[%s13305_s9 + $0x3a8] sm:$0xff] }
 0x19e   :  { %1217 = vmatpush.msra.mxu2 %v955_v22  ;;  %1161 = vmatpush.msra.mxu3 %v845_v24  ;;  %v930_v22 = vld [vmem:[%s13305_s9 + $0x448] sm:$0xff]  ;;  %v931_v24 = vld [vmem:[%s13305_s9 + $0x450] sm:$0xff] }
 0x19f   :  { %1125 = vmatpush.msrb.mxu0 %v874_v52  ;;  %v905_v52 = vld [vmem:[%s13305_s9 + $0x380] sm:$0xff] }
 0x1a0   :  { %1162 = vmatpush.msra.mxu3 %v840_v26  ;;  %v925_v26 = vld [vmem:[%s13305_s9 + $0x420] sm:$0xff] }
 0x1a2   :  { %1163 = vmatpush.msra.mxu3 %v835_v29 }
 0x1a4   :  { %1164 = vmatpush.msra.mxu3 %v830_v32  ;;  %v921_v32 = vld [vmem:[%s13305_s9 + $0x400] sm:$0xff] }
 0x1a6   :  { %1165 = vmatpush.msra.mxu3 %v825_v38 }
 0x1a8   :  { %1166 = vmatpush.msra.mxu3 %v820_v40  ;;  %v916_v40 = vld [vmem:[%s13305_s9 + $0x3d8] sm:$0xff] }
 0x1aa   :  { %1167 = vmatpush.msra.mxu3 %v815_v45 }
 0x1ac   :  { %1168 = vmatpush.msra.mxu3 %v810_v51  ;;  %v911_v51 = vld [vmem:[%s13305_s9 + $0x3b0] sm:$0xff] }
 0x1ae   :  { %1169 = vmatpush.msra.mxu3 %v805_v53  ;;  %v981_v53 = vld [vmem:[%s13305_s9 + $0x5e0] sm:$0xf] }
 0x1b0   :  { %1170 = vmatpush.msra.mxu3 %v800_v58 }
 0x1b2   :  { %1171 = vmatpush.msra.mxu3 %v795_v61 }
 0x1c9   :  { %v456_v27 = vpop.f32.mrf.mxu0 }
 0x1ca   :  { %v479_v28 = vpop.f32.mrf.mxu1  ;;  %v457_v47 = vadd.f32 %v456_v27, %v416_v41  ;;  %v926_v27 = vld [vmem:[%s13305_s9 + $0x428] sm:$0xff] }
 0x1cc   :  { %v480_v57 = vadd.f32 %v479_v28, %v457_v47  ;;  %v871_v47 = vld [vmem:[%s13305_s9 + $0x270] sm:$0xff] }
 0x1ce   :  { %5982 = vtanh.f32 %v480_v57 }
 0x1cf   :  { %v502_v34 = vpop.f32.mrf.mxu2 }
 0x1d0   :  { %v525_v36 = vpop.f32.mrf.mxu3  ;;  %v503_v12 = vadd.f32 %v502_v34, %v417_v2 }
 0x1d2   :  { %v482_v42 = vpop.f32.mrf.mxu1  ;;  %v459_v44 = vpop.f32.mrf.mxu0  ;;  %v526_v15 = vadd.f32 %v525_v36, %v503_v12  ;;  %v896_v12 = vld [vmem:[%s13305_s9 + $0x338] sm:$0xff] }
 0x1d3   :  { %v460_v63 = vadd.f32 %v459_v44, %v416_v41 }
 0x1d4   :  { %v5983_v6 = vpop.eup %5982 }
 0x1d5   :  { %v483_v3 = vadd.f32 %v482_v42, %v460_v63 }
 0x1d7   :  { %5984 = vtanh.f32 %v483_v3 }
 0x1d8   :  { %5986 = vtanh.f32 %v526_v15  ;;  %v966_v15 = vld [vmem:[%s13305_s9 + $0x568] sm:$0xff] }
 0x1d9   :  { %v505_v54 = vpop.f32.mrf.mxu2  ;;  %v7108_v55 = vpop.f32.mrf.mxu3 }
 0x1da   :  { %v506_v25 = vadd.f32 %v505_v54, %v417_v2  ;;  %v866_v54 = vld [vmem:[%s13305_s9 + $0x248] sm:$0xff]  ;;  %v901_v2 = vld [vmem:[%s13305_s9 + $0x360] sm:$0xff] }
 0x1db   :  { %v548_v59 = vpop.f32.mrf.mxu1 }
 0x1dc   :  { %v666_v60 = vpop.f32.mrf.mxu0  ;;  %v549_v5 = vadd.f32 %v548_v59, %v418_v11  ;;  %v529_v33 = vadd.f32 %v7108_v55, %v506_v25  ;;  %v906_v55 = vld [vmem:[%s13305_s9 + $0x388] sm:$0xff]  ;;  %v900_v59 = vld [vmem:[%s13305_s9 + $0x358] sm:$0xff] }
 0x1dd   :  { %v5985_v19 = vpop.eup %5984  ;;  %v872_v25 = vld [vmem:[%s13305_s9 + $0x278] sm:$0xff] }
 0x1de   :  { %v5987_v41 = vpop.eup %5986 }
 0x1e1   :  { %v571_v0 = vpop.f32.mrf.mxu3 }
 0x1e2   :  { %v689_v1 = vpop.f32.mrf.mxu2  ;;  %v572_v18 = vadd.f32 %v571_v0, %v549_v5  ;;  %v846_v5 = vld [vmem:[%s13305_s9 + $0x1a8] sm:$0xff] }
 0x1e3   :  { %v690_v4 = vadd.f32 %v689_v1, %v666_v60  ;;  %v976_v60 = vld [vmem:[%s13305_s9 + $0x5b8] sm:$0xff]  ;;  %v861_v1 = vld [vmem:[%s13305_s9 + $0x220] sm:$0xff] }
 0x1e4   :  { %v551_v50 = vpop.f32.mrf.mxu1  ;;  %5988 = vtanh.f32 %v572_v18  ;;  %v961_v18 = vld [vmem:[%s13305_s9 + $0x540] sm:$0xff] }
 0x1e5   :  { %v7117_v8 = vadd.f32 %v5983_v6, %v690_v4  ;;  %v669_v7 = vpop.f32.mrf.mxu0  ;;  %v552_v30 = vadd.f32 %v551_v50, %v418_v11  ;;  %5990 = vtanh.f32 %v529_v33  ;;  %v895_v6 = vld [vmem:[%s13305_s9 + $0x330] sm:$0xff]  ;;  %v856_v11 = vld [vmem:[%s13305_s9 + $0x1f8] sm:$0xff]  ;;  %v862_v33 = vld [vmem:[%s13305_s9 + $0x228] sm:$0xff] }
 0x1e7   :  { %1034 = vmatmul.f32.vlgmr.msrb.gmra.mxu1 %v7117_v8  ;;  %1103 = vmatmul.f32.vlgmr.msrb.gmra.mxu2 %v7117_v8 }
 0x1e8   :  { %1179 = vmatpush.msrb.mxu1 %v950_v9  ;;  %1248 = vmatpush.msrb.mxu2 %v951_v10 }
 0x1ea   :  { %1180 = vmatpush.msrb.mxu1 %v945_v23  ;;  %1249 = vmatpush.msrb.mxu2 %v946_v62  ;;  %v574_v14 = vpop.f32.mrf.mxu3  ;;  %v5989_v43 = vpop.eup %5988  ;;  %v890_v23 = vld [vmem:[%s13305_s9 + $0x308] sm:$0xff]  ;;  %v851_v62 = vld [vmem:[%s13305_s9 + $0x1d0] sm:$0xff] }
 0x1eb   :  { %v692_v39 = vpop.f32.mrf.mxu2  ;;  %v575_v35 = vadd.f32 %v574_v14, %v552_v30  ;;  %v5991_v3 = vpop.eup %5990  ;;  %v886_v14 = vld [vmem:[%s13305_s9 + $0x2e8] sm:$0xff]  ;;  %v867_v30 = vld [vmem:[%s13305_s9 + $0x250] sm:$0xff] }
 0x1ec   :  { %v693_v48 = vadd.f32 %v692_v39, %v669_v7  ;;  %1181 = vmatpush.msrb.mxu1 %v940_v13  ;;  %1250 = vmatpush.msrb.mxu2 %v941_v56  ;;  %v891_v7 = vld [vmem:[%s13305_s9 + $0x310] sm:$0xff]  ;;  %v885_v56 = vld [vmem:[%s13305_s9 + $0x2e0] sm:$0xff]  ;;  %v880_v39 = vld [vmem:[%s13305_s9 + $0x2b8] sm:$0xff] }
 0x1ed   :  { %v735_v28 = vpop.f32.mrf.mxu1  ;;  %5992 = vtanh.f32 %v575_v35  ;;  %v971_v13 = vld [vmem:[%s13305_s9 + $0x590] sm:$0xff]  ;;  %v821_v35 = vld [vmem:[%s13305_s9 + $0xe0] sm:$0xff] }
 0x1ee   :  { %v7146_v21 = vadd.f32 %v5985_v19, %v693_v48  ;;  %1182 = vmatpush.msrb.mxu1 %v935_v16  ;;  %1251 = vmatpush.msrb.mxu2 %v936_v17  ;;  %v781_v29 = vpop.f32.mrf.mxu0  ;;  %v841_v16 = vld [vmem:[%s13305_s9 + $0x180] sm:$0xff]  ;;  %v875_v48 = vld [vmem:[%s13305_s9 + $0x290] sm:$0xff]  ;;  %v836_v19 = vld [vmem:[%s13305_s9 + $0x158] sm:$0xff] }
 0x1ef   :  { %v881_v17 = vld [vmem:[%s13305_s9 + $0x2c0] sm:$0xff] }
 0x1f0   :  { %1037 = vmatmul.f32.gmra.mxu1 %v7146_v21  ;;  %1106 = vmatmul.f32.gmra.mxu2 %v7146_v21 }
 0x1f1   :  { %1183 = vmatpush.msrb.mxu1 %v930_v22  ;;  %1252 = vmatpush.msrb.mxu2 %v931_v24  ;;  %v876_v22 = vld [vmem:[%s13305_s9 + $0x298] sm:$0xff] }
 0x1f2   :  { %v956_v24 = vld [vmem:[%s13305_s9 + $0x518] sm:$0xff] }
 0x1f3   :  { %1184 = vmatpush.msrb.mxu1 %v925_v26  ;;  %1253 = vmatpush.msrb.mxu2 %v926_v27  ;;  %v712_v34 = vpop.f32.mrf.mxu3  ;;  %v5993_v9 = vpop.eup %5992  ;;  %v1448_v26 = vld [vmem:[%s13307_s11 + $0x258] sm:$0xff]  ;;  %v831_v27 = vld [vmem:[%s13305_s9 + $0x130] sm:$0xff] }
 0x1f4   :  { %v736_v36 = vadd.f32 %v735_v28, %v712_v34  ;;  %v758_v38 = vpop.f32.mrf.mxu2  ;;  %v952_v28 = vld [vmem:[%s13305_s9 + $0x4f8] sm:$0xff]  ;;  %v1438_v34 = vld [vmem:[%s13307_s11 + $0x208] sm:$0xff] }
 0x1f5   :  { %v782_v42 = vadd.f32 %v781_v29, %v758_v38  ;;  %1185 = vmatpush.msrb.mxu1 %v920_v31  ;;  %1254 = vmatpush.msrb.mxu2 %v921_v32  ;;  %v738_v57 = vpop.f32.mrf.mxu1  ;;  %v1443_v29 = vld [vmem:[%s13307_s11 + $0x230] sm:$0xff]  ;;  %v826_v31 = vld [vmem:[%s13305_s9 + $0x108] sm:$0xff]  ;;  %v857_v38 = vld [vmem:[%s13305_s9 + $0x200] sm:$0xff] }
 0x1f6   :  { %v7175_v44 = vadd.f32 %v5987_v41, %v736_v36  ;;  %v784_v61 = vpop.f32.mrf.mxu0  ;;  %v947_v32 = vld [vmem:[%s13305_s9 + $0x4d0] sm:$0xff]  ;;  %v942_v36 = vld [vmem:[%s13305_s9 + $0x4a8] sm:$0xff]  ;;  %v937_v41 = vld [vmem:[%s13305_s9 + $0x480] sm:$0xff] }
 0x1f7   :  { %v7177_v45 = vadd.f32 %v5989_v43, %v782_v42  ;;  %1186 = vmatpush.msrb.mxu1 %v915_v49  ;;  %1255 = vmatpush.msrb.mxu2 %v916_v40  ;;  %v1433_v49 = vld [vmem:[%s13307_s11 + $0x1e0] sm:$0xff]  ;;  %v816_v40 = vld [vmem:[%s13305_s9 + $0xb8] sm:$0xff] }
 0x1f8   :  { %1057 = vmatmul.f32.vlgmr.msrb.gmra.mxu3 %v7175_v44  ;;  %v852_v42 = vld [vmem:[%s13305_s9 + $0x1d8] sm:$0xff] }
 0x1f9   :  { %5843 = vmatmul.msk.f32.vlgmr.msra.gmra.mxu0 %vm995_vm1, %v7177_v45  ;;  %5846 = vmatmul.msk.f32.vlgmr.msra.gmra.mxu1 %vm995_vm1, %v7177_v45  ;;  %v1428_v43 = vld [vmem:[%s13307_s11 + $0x1b8] sm:$0xff] }
 0x1fa   :  { %1187 = vmatpush.msrb.mxu1 %v910_v46  ;;  %5849 = vmatmul.msk.f32.vlgmr.msra.gmra.mxu2 %vm995_vm1, %v7177_v45  ;;  %v811_v46 = vld [vmem:[%s13305_s9 + $0x90] sm:$0xff] }
 0x1fb   :  { %1225 = vmatpush.msra.mxu0 %v871_v47  ;;  %1256 = vmatpush.msrb.mxu2 %v911_v51  ;;  %v715_v58 = vpop.f32.mrf.mxu3  ;;  %v932_v47 = vld [vmem:[%s13305_s9 + $0x458] sm:$0xff]  ;;  %v847_v51 = vld [vmem:[%s13305_s9 + $0x1b0] sm:$0xff] }
 0x1fc   :  { %1188 = vmatpush.msrb.mxu1 %v905_v52  ;;  %v739_v63 = vadd.f32 %v738_v57, %v715_v58  ;;  %v761_v0 = vpop.f32.mrf.mxu2  ;;  %5851 = vmatpush.msk.msrb.mxu3 %vm1002_vm8, %v981_v53  ;;  %v1423_v52 = vld [vmem:[%s13307_s11 + $0x190] sm:$0xff]  ;;  %v806_v53 = vld [vmem:[%s13305_s9 + $0x68] sm:$0xff]  ;;  %v801_v58 = vld [vmem:[%s13305_s9 + $0x40] sm:$0xff] }
 0x1fd   :  { %1226 = vmatpush.msra.mxu0 %v866_v54  ;;  %1257 = vmatpush.msrb.mxu2 %v906_v55  ;;  %v785_v4 = vadd.f32 %v784_v61, %v761_v0  ;;  %v927_v54 = vld [vmem:[%s13305_s9 + $0x430] sm:$0xff]  ;;  %v842_v55 = vld [vmem:[%s13305_s9 + $0x188] sm:$0xff]  ;;  %v1413_v61 = vld [vmem:[%s13307_s11 + $0x140] sm:$0xff] }
 0x1fe   :  { %v7223_v10 = vadd.f32 %v5991_v3, %v739_v63  ;;  %1189 = vmatpush.msrb.mxu1 %v900_v59  ;;  %1282 = vmatpush.msrb.mxu3 %v976_v60  ;;  %v1418_v57 = vld [vmem:[%s13307_s11 + $0x168] sm:$0xff]  ;;  %v837_v60 = vld [vmem:[%s13305_s9 + $0x160] sm:$0xff]  ;;  %v796_v63 = vld [vmem:[%s13305_s9 + $0x18] sm:$0xff] }
 0x1ff   :  { %v7231_v50 = vadd.f32 %v5993_v9, %v785_v4  ;;  %1227 = vmatpush.msra.mxu0 %v861_v1  ;;  %1258 = vmatpush.msrb.mxu2 %v901_v2  ;;  %v922_v59 = vld [vmem:[%s13305_s9 + $0x408] sm:$0xff]  ;;  %v917_v0 = vld [vmem:[%s13305_s9 + $0x3e0] sm:$0xff]  ;;  %v832_v1 = vld [vmem:[%s13305_s9 + $0x138] sm:$0xff] }
 0x200   :  { %1190 = vmatpush.msrb.mxu1 %v895_v6  ;;  %1060 = vmatmul.f32.gmra.mxu3 %v7223_v10  ;;  %v982_v2 = vld [vmem:[%s13305_s9 + $0x5e8] sm:$0xf]  ;;  %v1408_v3 = vld [vmem:[%s13307_s11 + $0x118] sm:$0xff]  ;;  %v827_v6 = vld [vmem:[%s13305_s9 + $0x110] sm:$0xff] }
 0x201   :  { %1228 = vmatpush.msra.mxu0 %v856_v11  ;;  %1259 = vmatpush.msrb.mxu2 %v896_v12  ;;  %v912_v4 = vld [vmem:[%s13305_s9 + $0x3b8] sm:$0xff]  ;;  %v977_v9 = vld [vmem:[%s13305_s9 + $0x5c0] sm:$0xff]  ;;  %v1403_v11 = vld [vmem:[%s13307_s11 + $0xf0] sm:$0xff] }
 0x202   :  { %5844 = vmatmul.msk.f32.gmra.mxu0 %vm995_vm1, %v7231_v50  ;;  %5847 = vmatmul.msk.f32.gmra.mxu1 %vm995_vm1, %v7231_v50  ;;  %v907_v12 = vld [vmem:[%s13305_s9 + $0x390] sm:$0xff] }
 0x203   :  { %1191 = vmatpush.msrb.mxu1 %v890_v23  ;;  %5850 = vmatmul.msk.f32.gmra.mxu2 %vm995_vm1, %v7231_v50  ;;  %v822_v23 = vld [vmem:[%s13305_s9 + $0xe8] sm:$0xff] }
 0x204   :  { %1229 = vmatpush.msra.mxu0 %v851_v62  ;;  %1260 = vmatpush.msrb.mxu2 %v891_v7  ;;  %v972_v62 = vld [vmem:[%s13305_s9 + $0x598] sm:$0xff]  ;;  %v1398_v7 = vld [vmem:[%s13307_s11 + $0xc8] sm:$0xff] }
 0x205   :  { %1283 = vmatpush.msrb.mxu3 %v971_v13  ;;  %1192 = vmatpush.msrb.mxu1 %v885_v56  ;;  %v902_v13 = vld [vmem:[%s13305_s9 + $0x368] sm:$0xff]  ;;  %v817_v56 = vld [vmem:[%s13305_s9 + $0xc0] sm:$0xff] }
 0x206   :  { %1230 = vmatpush.msra.mxu0 %v846_v5  ;;  %1261 = vmatpush.msrb.mxu2 %v886_v14  ;;  %v967_v5 = vld [vmem:[%s13305_s9 + $0x570] sm:$0xff]  ;;  %v1393_v14 = vld [vmem:[%s13307_s11 + $0xa0] sm:$0xff] }
 0x207   :  { %1284 = vmatpush.msrb.mxu3 %v966_v15  ;;  %1193 = vmatpush.msrb.mxu1 %v880_v39  ;;  %v897_v15 = vld [vmem:[%s13305_s9 + $0x340] sm:$0xff]  ;;  %v812_v39 = vld [vmem:[%s13305_s9 + $0x98] sm:$0xff] }
 0x208   :  { %1231 = vmatpush.msra.mxu0 %v841_v16  ;;  %1262 = vmatpush.msrb.mxu2 %v881_v17  ;;  %v962_v16 = vld [vmem:[%s13305_s9 + $0x548] sm:$0xff]  ;;  %v1388_v17 = vld [vmem:[%s13307_s11 + $0x78] sm:$0xff] }
 0x209   :  { %1285 = vmatpush.msrb.mxu3 %v961_v18  ;;  %1194 = vmatpush.msrb.mxu1 %v875_v48  ;;  %v892_v18 = vld [vmem:[%s13305_s9 + $0x318] sm:$0xff]  ;;  %v807_v48 = vld [vmem:[%s13305_s9 + $0x70] sm:$0xff] }
 0x20a   :  { %1232 = vmatpush.msra.mxu0 %v836_v19  ;;  %1263 = vmatpush.msrb.mxu2 %v876_v22  ;;  %v957_v19 = vld [vmem:[%s13305_s9 + $0x520] sm:$0xff]  ;;  %v1383_v22 = vld [vmem:[%s13307_s11 + $0x50] sm:$0xff] }
 0x20b   :  { %1286 = vmatpush.msrb.mxu3 %v956_v24  ;;  %1294 = vmatpush.msra.mxu1 %v872_v25  ;;  %v887_v24 = vld [vmem:[%s13305_s9 + $0x2f0] sm:$0xff]  ;;  %v1528_v25 = vld [vmem:[%s13307_s11 + $0x4d8] sm:$0xff] }
 0x20c   :  { %1578 = vmatpush.msra.mxu2 %v1448_v26  ;;  %1126 = vmatmul.f32.vlgmr.msrb.gmra.mxu0 %v7175_v44  ;;  %v802_v26 = vld [vmem:[%s13305_s9 + $0x48] sm:$0xff] }
 0x20d   :  { %1172 = vmatmul.f32.vlgmr.msra.gmra.mxu3 %v7117_v8  ;;  %1195 = vmatmul.f32.vlgmr.msrb.gmra.mxu1 %v7175_v44 }
 0x20e   :  { %1233 = vmatpush.msra.mxu0 %v831_v27  ;;  %1264 = vmatmul.f32.vlgmr.msrb.gmra.mxu2 %v7175_v44  ;;  %v1378_v27 = vld [vmem:[%s13307_s11 + $0x28] sm:$0xff] }
 0x20f   :  { %1317 = vmatpush.msra.mxu3 %v952_v28  ;;  %1295 = vmatpush.msra.mxu1 %v867_v30  ;;  %v882_v28 = vld [vmem:[%s13305_s9 + $0x2c8] sm:$0xff]  ;;  %v1523_v30 = vld [vmem:[%s13307_s11 + $0x4b0] sm:$0xff] }
 0x210   :  { %1579 = vmatpush.msra.mxu2 %v1443_v29  ;;  %1234 = vmatpush.msra.mxu0 %v826_v31  ;;  %v797_v29 = vld [vmem:[%s13305_s9 + $0x20] sm:$0xff] }
 0x211   :  { %1318 = vmatpush.msra.mxu3 %v947_v32  ;;  %1296 = vmatpush.msra.mxu1 %v862_v33  ;;  %v1373_v31 = vld [vmem:[%s13307_s11] sm:$0xff]  ;;  %v1518_v33 = vld [vmem:[%s13307_s11 + $0x488] sm:$0xff] }
 0x212   :  { %1580 = vmatpush.msra.mxu2 %v1438_v34  ;;  %1235 = vmatpush.msra.mxu0 %v821_v35  ;;  %v877_v32 = vld [vmem:[%s13305_s9 + $0x2a0] sm:$0xff]  ;;  %v1558_v34 = vld [vmem:[%s13307_s11 + $0x5c8] sm:$0xf]  ;;  %v1559_v35 = vld [vmem:[%s13307_s11 + $0x5d0] sm:$0xf] }
 0x213   :  { %1319 = vmatpush.msra.mxu3 %v942_v36  ;;  %1297 = vmatpush.msra.mxu1 %v857_v38  ;;  %v1449_v36 = vld [vmem:[%s13307_s11 + $0x260] sm:$0xff] }
 0x214   :  { %1581 = vmatpush.msra.mxu2 %v1433_v49  ;;  %1236 = vmatpush.msra.mxu0 %v816_v40  ;;  %v1513_v38 = vld [vmem:[%s13307_s11 + $0x460] sm:$0xff]  ;;  %v1554_v40 = vld [vmem:[%s13307_s11 + $0x5a8] sm:$0xff] }
 0x215   :  { %1320 = vmatpush.msra.mxu3 %v937_v41  ;;  %1298 = vmatpush.msra.mxu1 %v852_v42  ;;  %v1553_v49 = vld [vmem:[%s13307_s11 + $0x5a0] sm:$0xff]  ;;  %v1444_v41 = vld [vmem:[%s13307_s11 + $0x238] sm:$0xff] }
 0x216   :  { %1582 = vmatpush.msra.mxu2 %v1428_v43  ;;  %1129 = vmatmul.f32.gmra.mxu0 %v7223_v10  ;;  %v1508_v42 = vld [vmem:[%s13307_s11 + $0x438] sm:$0xff] }
 0x217   :  { %1175 = vmatmul.f32.gmra.mxu3 %v7146_v21  ;;  %1198 = vmatmul.f32.gmra.mxu1 %v7223_v10  ;;  %v1548_v43 = vld [vmem:[%s13307_s11 + $0x578] sm:$0xff] }
 0x218   :  { %1237 = vmatpush.msra.mxu0 %v811_v46  ;;  %1267 = vmatmul.f32.gmra.mxu2 %v7223_v10  ;;  %v1549_v46 = vld [vmem:[%s13307_s11 + $0x580] sm:$0xff] }
 0x219   :  { %1321 = vmatpush.msra.mxu3 %v932_v47  ;;  %1299 = vmatpush.msra.mxu1 %v847_v51  ;;  %v1439_v47 = vld [vmem:[%s13307_s11 + $0x210] sm:$0xff] }
 0x21a   :  { %1583 = vmatpush.msra.mxu2 %v1423_v52  ;;  %1238 = vmatpush.msra.mxu0 %v806_v53  ;;  %v1503_v51 = vld [vmem:[%s13307_s11 + $0x410] sm:$0xff]  ;;  %v1544_v53 = vld [vmem:[%s13307_s11 + $0x558] sm:$0xff] }
 0x21b   :  { %1322 = vmatpush.msra.mxu3 %v927_v54  ;;  %1300 = vmatpush.msra.mxu1 %v842_v55  ;;  %v1543_v52 = vld [vmem:[%s13307_s11 + $0x550] sm:$0xff]  ;;  %v1434_v54 = vld [vmem:[%s13307_s11 + $0x1e8] sm:$0xff] }
 0x21c   :  { %1584 = vmatpush.msra.mxu2 %v1418_v57  ;;  %1239 = vmatpush.msra.mxu0 %v801_v58  ;;  %v1498_v55 = vld [vmem:[%s13307_s11 + $0x3e8] sm:$0xff]  ;;  %v1539_v58 = vld [vmem:[%s13307_s11 + $0x530] sm:$0xff] }
 0x21d   :  { %1323 = vmatpush.msra.mxu3 %v922_v59  ;;  %1301 = vmatpush.msra.mxu1 %v837_v60  ;;  %v1538_v57 = vld [vmem:[%s13307_s11 + $0x528] sm:$0xff]  ;;  %v1429_v59 = vld [vmem:[%s13307_s11 + $0x1c0] sm:$0xff] }
 0x21e   :  { %1585 = vmatpush.msra.mxu2 %v1413_v61  ;;  %1240 = vmatpush.msra.mxu0 %v796_v63  ;;  %v1493_v60 = vld [vmem:[%s13307_s11 + $0x3c0] sm:$0xff]  ;;  %v1534_v63 = vld [vmem:[%s13307_s11 + $0x508] sm:$0xff] }
 0x21f   :  { %1324 = vmatpush.msra.mxu3 %v917_v0  ;;  %1302 = vmatpush.msra.mxu1 %v832_v1  ;;  %v1533_v61 = vld [vmem:[%s13307_s11 + $0x500] sm:$0xff]  ;;  %v1424_v0 = vld [vmem:[%s13307_s11 + $0x198] sm:$0xff] }
 0x220   :  { %5854 = vmatpush.msk.msrb.mxu0 %vm1002_vm8, %v982_v2  ;;  %1586 = vmatpush.msra.mxu2 %v1408_v3  ;;  %v1529_v1 = vld [vmem:[%s13307_s11 + $0x4e0] sm:$0xff]  ;;  %v1530_v2 = vld [vmem:[%s13307_s11 + $0x4e8] sm:$0xff]  ;;  %v1488_v3 = vld [vmem:[%s13307_s11 + $0x398] sm:$0xff] }
 0x221   :  { %1241 = vmatmul.f32.vlgmr.msra.gmra.mxu0 %v7117_v8  ;;  %5852 = vmatmul.msk.f32.vlgmr.msrb.gmra.mxu3 %vm995_vm1, %v7177_v45 }
 0x222   :  { %1325 = vmatpush.msra.mxu3 %v912_v4  ;;  %1303 = vmatpush.msra.mxu1 %v827_v6  ;;  %v1419_v4 = vld [vmem:[%s13307_s11 + $0x170] sm:$0xff]  ;;  %v1524_v6 = vld [vmem:[%s13307_s11 + $0x4b8] sm:$0xff] }
 0x223   :  { %1351 = vmatpush.msrb.mxu0 %v977_v9  ;;  %1587 = vmatpush.msra.mxu2 %v1403_v11  ;;  %v1525_v9 = vld [vmem:[%s13307_s11 + $0x4c0] sm:$0xff]  ;;  %v1483_v11 = vld [vmem:[%s13307_s11 + $0x370] sm:$0xff] }
 0x224   :  { %1326 = vmatpush.msra.mxu3 %v907_v12  ;;  %1304 = vmatpush.msra.mxu1 %v822_v23  ;;  %v1414_v12 = vld [vmem:[%s13307_s11 + $0x148] sm:$0xff]  ;;  %v1519_v23 = vld [vmem:[%s13307_s11 + $0x490] sm:$0xff] }
 0x225   :  { %1352 = vmatpush.msrb.mxu0 %v972_v62  ;;  %1588 = vmatpush.msra.mxu2 %v1398_v7  ;;  %v1520_v62 = vld [vmem:[%s13307_s11 + $0x498] sm:$0xff]  ;;  %v1478_v7 = vld [vmem:[%s13307_s11 + $0x348] sm:$0xff] }
 0x226   :  { %1327 = vmatpush.msra.mxu3 %v902_v13  ;;  %1305 = vmatpush.msra.mxu1 %v817_v56  ;;  %v1409_v13 = vld [vmem:[%s13307_s11 + $0x120] sm:$0xff]  ;;  %v1514_v56 = vld [vmem:[%s13307_s11 + $0x468] sm:$0xff] }
 0x227   :  { %1353 = vmatpush.msrb.mxu0 %v967_v5  ;;  %1589 = vmatpush.msra.mxu2 %v1393_v14  ;;  %v1515_v5 = vld [vmem:[%s13307_s11 + $0x470] sm:$0xff]  ;;  %v1473_v14 = vld [vmem:[%s13307_s11 + $0x320] sm:$0xff] }
 0x228   :  { %1328 = vmatpush.msra.mxu3 %v897_v15  ;;  %1306 = vmatpush.msra.mxu1 %v812_v39  ;;  %v1404_v15 = vld [vmem:[%s13307_s11 + $0xf8] sm:$0xff]  ;;  %v1509_v39 = vld [vmem:[%s13307_s11 + $0x440] sm:$0xff] }
 0x229   :  { %1354 = vmatpush.msrb.mxu0 %v962_v16  ;;  %1590 = vmatpush.msra.mxu2 %v1388_v17  ;;  %v1510_v16 = vld [vmem:[%s13307_s11 + $0x448] sm:$0xff]  ;;  %v1468_v17 = vld [vmem:[%s13307_s11 + $0x2f8] sm:$0xff] }
 0x22a   :  { %1244 = vmatmul.f32.gmra.mxu0 %v7146_v21  ;;  %5853 = vmatmul.msk.f32.gmra.mxu3 %vm995_vm1, %v7231_v50 }
 0x22b   :  { %1329 = vmatpush.msra.mxu3 %v892_v18  ;;  %1307 = vmatpush.msra.mxu1 %v807_v48  ;;  %v1399_v18 = vld [vmem:[%s13307_s11 + $0xd0] sm:$0xff]  ;;  %v1504_v48 = vld [vmem:[%s13307_s11 + $0x418] sm:$0xff] }
 0x22c   :  { %1355 = vmatpush.msrb.mxu0 %v957_v19  ;;  %1591 = vmatpush.msra.mxu2 %v1383_v22  ;;  %v1505_v19 = vld [vmem:[%s13307_s11 + $0x420] sm:$0xff]  ;;  %v1463_v22 = vld [vmem:[%s13307_s11 + $0x2d0] sm:$0xff] }
 0x22d   :  { %1330 = vmatpush.msra.mxu3 %v887_v24  ;;  %1308 = vmatpush.msra.mxu1 %v802_v26  ;;  %v1394_v24 = vld [vmem:[%s13307_s11 + $0xa8] sm:$0xff]  ;;  %v1500_v26 = vld [vmem:[%s13307_s11 + $0x3f8] sm:$0xff] }
 0x22e   :  { %1601 = vmatpush.msra.mxu0 %v1528_v25  ;;  %1592 = vmatpush.msra.mxu2 %v1378_v27  ;;  %v1499_v25 = vld [vmem:[%s13307_s11 + $0x3f0] sm:$0xff]  ;;  %v1458_v27 = vld [vmem:[%s13307_s11 + $0x2a8] sm:$0xff] }
 0x22f   :  { %1331 = vmatpush.msra.mxu3 %v882_v28  ;;  %1309 = vmatpush.msra.mxu1 %v797_v29  ;;  %v1389_v28 = vld [vmem:[%s13307_s11 + $0x80] sm:$0xff]  ;;  %v1495_v29 = vld [vmem:[%s13307_s11 + $0x3d0] sm:$0xff] }
 0x230   :  { %1602 = vmatpush.msra.mxu0 %v1523_v30  ;;  %1593 = vmatpush.msra.mxu2 %v1373_v31  ;;  %v1494_v30 = vld [vmem:[%s13307_s11 + $0x3c8] sm:$0xff]  ;;  %v1453_v31 = vld [vmem:[%s13307_s11 + $0x280] sm:$0xff] }
 0x231   :  { %1310 = vmatmul.f32.vlgmr.msra.gmra.mxu1 %v7117_v8  ;;  %1332 = vmatpush.msra.mxu3 %v877_v32  ;;  %v1384_v32 = vld [vmem:[%s13307_s11 + $0x58] sm:$0xff] }
 0x232   :  { %1594 = vmatmul.f32.vlgmr.msra.gmra.mxu2 %v7117_v8  ;;  %1603 = vmatpush.msra.mxu0 %v1518_v33  ;;  %v1489_v33 = vld [vmem:[%s13307_s11 + $0x3a0] sm:$0xff] }
 0x233   :  { %5857 = vmatpush.msk.msrb.mxu1 %vm1002_vm8, %v1558_v34  ;;  %5860 = vmatpush.msk.msrb.mxu2 %vm1002_vm8, %v1559_v35  ;;  %v1450_v34 = vld [vmem:[%s13307_s11 + $0x268] sm:$0xff] }
 0x234   :  { %1647 = vmatpush.msrb.mxu3 %v1449_v36  ;;  %5855 = vmatmul.msk.f32.vlgmr.msrb.gmra.mxu0 %vm995_vm1, %v7177_v45  ;;  %v1490_v35 = vld [vmem:[%s13307_s11 + $0x3a8] sm:$0xff]  ;;  %v1379_v36 = vld [vmem:[%s13307_s11 + $0x30] sm:$0xff] }
 0x235   :  { %1333 = vmatmul.f32.vlgmr.msra.gmra.mxu3 %v7175_v44  ;;  %1604 = vmatpush.msra.mxu0 %v1513_v38  ;;  %v1484_v38 = vld [vmem:[%s13307_s11 + $0x378] sm:$0xff] }
 0x236   :  { %1635 = vmatpush.msrb.mxu1 %v1553_v49  ;;  %1704 = vmatpush.msrb.mxu2 %v1554_v40  ;;  %v1445_v49 = vld [vmem:[%s13307_s11 + $0x240] sm:$0xff] }
 0x237   :  { %1648 = vmatpush.msrb.mxu3 %v1444_v41  ;;  %1605 = vmatpush.msra.mxu0 %v1508_v42  ;;  %v1485_v40 = vld [vmem:[%s13307_s11 + $0x380] sm:$0xff]  ;;  %v1374_v41 = vld [vmem:[%s13307_s11 + $0x8] sm:$0xff]  ;;  %v1479_v42 = vld [vmem:[%s13307_s11 + $0x350] sm:$0xff] }
 0x238   :  { %1636 = vmatpush.msrb.mxu1 %v1548_v43  ;;  %1705 = vmatpush.msrb.mxu2 %v1549_v46  ;;  %v1440_v43 = vld [vmem:[%s13307_s11 + $0x218] sm:$0xff] }
 0x239   :  { %1649 = vmatpush.msrb.mxu3 %v1439_v47  ;;  %1606 = vmatpush.msra.mxu0 %v1503_v51  ;;  %v1480_v46 = vld [vmem:[%s13307_s11 + $0x358] sm:$0xff]  ;;  %v1474_v51 = vld [vmem:[%s13307_s11 + $0x328] sm:$0xff] }
 0x23a   :  { %1637 = vmatpush.msrb.mxu1 %v1543_v52  ;;  %1706 = vmatpush.msrb.mxu2 %v1544_v53  ;;  %v1560_v47 = vld [vmem:[%s13307_s11 + $0x5d8] sm:$0xf]  ;;  %v1435_v52 = vld [vmem:[%s13307_s11 + $0x1f0] sm:$0xff] }
 0x23b   :  { %1650 = vmatpush.msrb.mxu3 %v1434_v54  ;;  %1313 = vmatmul.f32.gmra.mxu1 %v7146_v21  ;;  %v1475_v53 = vld [vmem:[%s13307_s11 + $0x330] sm:$0xff] }
 0x23c   :  { %1597 = vmatmul.f32.gmra.mxu2 %v7146_v21  ;;  %1607 = vmatpush.msra.mxu0 %v1498_v55  ;;  %v1555_v54 = vld [vmem:[%s13307_s11 + $0x5b0] sm:$0xff]  ;;  %v1469_v55 = vld [vmem:[%s13307_s11 + $0x300] sm:$0xff] }
 0x23d   :  { %1638 = vmatpush.msrb.mxu1 %v1538_v57  ;;  %1707 = vmatpush.msrb.mxu2 %v1539_v58  ;;  %v1430_v57 = vld [vmem:[%s13307_s11 + $0x1c8] sm:$0xff] }
 0x23e   :  { %1651 = vmatpush.msrb.mxu3 %v1429_v59  ;;  %5856 = vmatmul.msk.f32.gmra.mxu0 %vm995_vm1, %v7231_v50  ;;  %v1470_v58 = vld [vmem:[%s13307_s11 + $0x308] sm:$0xff] }
 0x23f   :  { %1336 = vmatmul.f32.gmra.mxu3 %v7223_v10  ;;  %1608 = vmatpush.msra.mxu0 %v1493_v60  ;;  %v1550_v59 = vld [vmem:[%s13307_s11 + $0x588] sm:$0xff]  ;;  %v1464_v60 = vld [vmem:[%s13307_s11 + $0x2d8] sm:$0xff] }
 0x240   :  { %1639 = vmatpush.msrb.mxu1 %v1533_v61  ;;  %1708 = vmatpush.msrb.mxu2 %v1534_v63  ;;  %v1425_v61 = vld [vmem:[%s13307_s11 + $0x1a0] sm:$0xff] }
 0x241   :  { %1652 = vmatpush.msrb.mxu3 %v1424_v0  ;;  %1609 = vmatpush.msra.mxu0 %v1488_v3  ;;  %v1465_v63 = vld [vmem:[%s13307_s11 + $0x2e0] sm:$0xff]  ;;  %v1460_v3 = vld [vmem:[%s13307_s11 + $0x2b8] sm:$0xff] }
 0x242   :  { %1670 = vmatpush.msra.mxu1 %v1529_v1  ;;  %1739 = vmatpush.msra.mxu2 %v1530_v2  ;;  %v1545_v0 = vld [vmem:[%s13307_s11 + $0x560] sm:$0xff]  ;;  %v1459_v1 = vld [vmem:[%s13307_s11 + $0x2b0] sm:$0xff]  ;;  %v1420_v2 = vld [vmem:[%s13307_s11 + $0x178] sm:$0xff] }
 0x243   :  { %1653 = vmatpush.msrb.mxu3 %v1419_v4  ;;  %1610 = vmatpush.msra.mxu0 %v1483_v11  ;;  %v1540_v4 = vld [vmem:[%s13307_s11 + $0x538] sm:$0xff]  ;;  %v1455_v11 = vld [vmem:[%s13307_s11 + $0x290] sm:$0xff] }
 0x244   :  { %1671 = vmatpush.msra.mxu1 %v1524_v6  ;;  %1740 = vmatpush.msra.mxu2 %v1525_v9  ;;  %v1454_v6 = vld [vmem:[%s13307_s11 + $0x288] sm:$0xff]  ;;  %v1415_v9 = vld [vmem:[%s13307_s11 + $0x150] sm:$0xff] }
 0x245   :  { %1654 = vmatpush.msrb.mxu3 %v1414_v12  ;;  %1611 = vmatpush.msra.mxu0 %v1478_v7  ;;  %v1535_v12 = vld [vmem:[%s13307_s11 + $0x510] sm:$0xff]  ;;  %v1410_v7 = vld [vmem:[%s13307_s11 + $0x128] sm:$0xff] }
 0x246   :  { %1672 = vmatpush.msra.mxu1 %v1519_v23  ;;  %1741 = vmatpush.msra.mxu2 %v1520_v62  ;;  %v1451_v23 = vld [vmem:[%s13307_s11 + $0x270] sm:$0xff]  ;;  %v1452_v62 = vld [vmem:[%s13307_s11 + $0x278] sm:$0xff] }
 0x247   :  { %5858 = vmatmul.msk.f32.vlgmr.msrb.gmra.mxu1 %vm995_vm1, %v7177_v45  ;;  %5861 = vmatmul.msk.f32.vlgmr.msrb.gmra.mxu2 %vm995_vm1, %v7177_v45 }
 0x248   :  { %1655 = vmatpush.msrb.mxu3 %v1409_v13  ;;  %1673 = vmatpush.msra.mxu1 %v1514_v56  ;;  %v1531_v13 = vld [vmem:[%s13307_s11 + $0x4f0] sm:$0xff]  ;;  %v1446_v56 = vld [vmem:[%s13307_s11 + $0x248] sm:$0xff] }
 0x249   :  { %1742 = vmatpush.msra.mxu2 %v1515_v5  ;;  %1612 = vmatpush.msra.mxu0 %v1473_v14  ;;  %v1447_v5 = vld [vmem:[%s13307_s11 + $0x250] sm:$0xff]  ;;  %v1405_v14 = vld [vmem:[%s13307_s11 + $0x100] sm:$0xff] }
 0x24a   :  { %1656 = vmatpush.msrb.mxu3 %v1404_v15  ;;  %1674 = vmatpush.msra.mxu1 %v1509_v39  ;;  %v1526_v15 = vld [vmem:[%s13307_s11 + $0x4c8] sm:$0xff]  ;;  %v1441_v39 = vld [vmem:[%s13307_s11 + $0x220] sm:$0xff] }
 0x24b   :  { %1743 = vmatpush.msra.mxu2 %v1510_v16  ;;  %1613 = vmatpush.msra.mxu0 %v1468_v17  ;;  %v1442_v16 = vld [vmem:[%s13307_s11 + $0x228] sm:$0xff]  ;;  %v1400_v17 = vld [vmem:[%s13307_s11 + $0xd8] sm:$0xff] }
 0x24c   :  { %1657 = vmatpush.msrb.mxu3 %v1399_v18  ;;  %1675 = vmatpush.msra.mxu1 %v1504_v48  ;;  %v1521_v18 = vld [vmem:[%s13307_s11 + $0x4a0] sm:$0xff]  ;;  %v1436_v48 = vld [vmem:[%s13307_s11 + $0x1f8] sm:$0xff] }
 0x24d   :  { %1744 = vmatpush.msra.mxu2 %v1505_v19  ;;  %1614 = vmatpush.msra.mxu0 %v1463_v22  ;;  %v1437_v19 = vld [vmem:[%s13307_s11 + $0x200] sm:$0xff]  ;;  %v1395_v22 = vld [vmem:[%s13307_s11 + $0xb0] sm:$0xff] }
 0x24e   :  { %1658 = vmatpush.msrb.mxu3 %v1394_v24  ;;  %1676 = vmatpush.msra.mxu1 %v1499_v25  ;;  %v1516_v24 = vld [vmem:[%s13307_s11 + $0x478] sm:$0xff]  ;;  %v1431_v25 = vld [vmem:[%s13307_s11 + $0x1d0] sm:$0xff] }
 0x24f   :  { %1745 = vmatpush.msra.mxu2 %v1500_v26  ;;  %1615 = vmatpush.msra.mxu0 %v1458_v27  ;;  %v1432_v26 = vld [vmem:[%s13307_s11 + $0x1d8] sm:$0xff]  ;;  %v1390_v27 = vld [vmem:[%s13307_s11 + $0x88] sm:$0xff] }
 0x250   :  { %5859 = vmatmul.msk.f32.gmra.mxu1 %vm995_vm1, %v7231_v50  ;;  %5862 = vmatmul.msk.f32.gmra.mxu2 %vm995_vm1, %v7231_v50 }
 0x251   :  { %1659 = vmatpush.msrb.mxu3 %v1389_v28  ;;  %1677 = vmatpush.msra.mxu1 %v1494_v30  ;;  %v1511_v28 = vld [vmem:[%s13307_s11 + $0x450] sm:$0xff]  ;;  %v1426_v30 = vld [vmem:[%s13307_s11 + $0x1a8] sm:$0xff] }
 0x252   :  { %1746 = vmatpush.msra.mxu2 %v1495_v29  ;;  %1616 = vmatpush.msra.mxu0 %v1453_v31  ;;  %v1427_v29 = vld [vmem:[%s13307_s11 + $0x1b0] sm:$0xff]  ;;  %v1385_v31 = vld [vmem:[%s13307_s11 + $0x60] sm:$0xff] }
 0x253   :  { %1617 = vmatmul.f32.vlgmr.msra.gmra.mxu0 %v7175_v44  ;;  %1660 = vmatpush.msrb.mxu3 %v1384_v32  ;;  %v1506_v32 = vld [vmem:[%s13307_s11 + $0x428] sm:$0xff] }
 0x254   :  { %1678 = vmatpush.msra.mxu1 %v1489_v33  ;;  %1716 = vmatpush.msrb.mxu0 %v1450_v34  ;;  %v1421_v33 = vld [vmem:[%s13307_s11 + $0x180] sm:$0xff]  ;;  %v1422_v34 = vld [vmem:[%s13307_s11 + $0x188] sm:$0xff] }
 0x255   :  { %1747 = vmatpush.msra.mxu2 %v1490_v35  ;;  %1661 = vmatpush.msrb.mxu3 %v1379_v36  ;;  %v1380_v35 = vld [vmem:[%s13307_s11 + $0x38] sm:$0xff]  ;;  %v1501_v36 = vld [vmem:[%s13307_s11 + $0x400] sm:$0xff] }
 0x256   :  { %1679 = vmatpush.msra.mxu1 %v1484_v38  ;;  %1717 = vmatpush.msrb.mxu0 %v1445_v49  ;;  %v1416_v38 = vld [vmem:[%s13307_s11 + $0x158] sm:$0xff]  ;;  %v1417_v49 = vld [vmem:[%s13307_s11 + $0x160] sm:$0xff] }
 0x257   :  { %1748 = vmatpush.msra.mxu2 %v1485_v40  ;;  %1662 = vmatpush.msrb.mxu3 %v1374_v41  ;;  %v1375_v40 = vld [vmem:[%s13307_s11 + $0x10] sm:$0xff]  ;;  %v1496_v41 = vld [vmem:[%s13307_s11 + $0x3d8] sm:$0xff] }
 0x258   :  { %1680 = vmatpush.msra.mxu1 %v1479_v42  ;;  %1718 = vmatpush.msrb.mxu0 %v1440_v43  ;;  %v1411_v42 = vld [vmem:[%s13307_s11 + $0x130] sm:$0xff]  ;;  %v1561_v43 = vld [vmem:[%s13307_s11 + $0x5e0] sm:$0xf] }
 0x259   :  { %1749 = vmatpush.msra.mxu2 %v1480_v46  ;;  %1663 = vmatmul.f32.vlgmr.msrb.gmra.mxu3 %v7117_v8  ;;  %v1412_v46 = vld [vmem:[%s13307_s11 + $0x138] sm:$0xff] }
 0x25a   :  { %5863 = vmatpush.msk.msra.mxu3 %vm1002_vm8, %v1560_v47  ;;  %1681 = vmatpush.msra.mxu1 %v1474_v51  ;;  %v1491_v47 = vld [vmem:[%s13307_s11 + $0x3b0] sm:$0xff]  ;;  %v1406_v51 = vld [vmem:[%s13307_s11 + $0x108] sm:$0xff] }
 0x25b   :  { %1719 = vmatpush.msrb.mxu0 %v1435_v52  ;;  %1750 = vmatpush.msra.mxu2 %v1475_v53  ;;  %v1556_v52 = vld [vmem:[%s13307_s11 + $0x5b8] sm:$0xff]  ;;  %v1407_v53 = vld [vmem:[%s13307_s11 + $0x110] sm:$0xff] }
 0x25c   :  { %1773 = vmatpush.msra.mxu3 %v1555_v54  ;;  %1620 = vmatmul.f32.gmra.mxu0 %v7223_v10  ;;  %v1486_v54 = vld [vmem:[%s13307_s11 + $0x388] sm:$0xff] }
 0x25d   :  { %1682 = vmatpush.msra.mxu1 %v1469_v55  ;;  %1720 = vmatpush.msrb.mxu0 %v1430_v57  ;;  %v1401_v55 = vld [vmem:[%s13307_s11 + $0xe0] sm:$0xff]  ;;  %v1551_v57 = vld [vmem:[%s13307_s11 + $0x590] sm:$0xff] }
 0x25e   :  { %1751 = vmatpush.msra.mxu2 %v1470_v58  ;;  %1774 = vmatpush.msra.mxu3 %v1550_v59  ;;  %v1402_v58 = vld [vmem:[%s13307_s11 + $0xe8] sm:$0xff]  ;;  %v1481_v59 = vld [vmem:[%s13307_s11 + $0x360] sm:$0xff] }
 0x25f   :  { %1683 = vmatpush.msra.mxu1 %v1464_v60  ;;  %1721 = vmatpush.msrb.mxu0 %v1425_v61  ;;  %v1396_v60 = vld [vmem:[%s13307_s11 + $0xb8] sm:$0xff]  ;;  %v1546_v61 = vld [vmem:[%s13307_s11 + $0x568] sm:$0xff] }
 0x260   :  { %1752 = vmatpush.msra.mxu2 %v1465_v63  ;;  %1775 = vmatpush.msra.mxu3 %v1545_v0  ;;  %v1397_v63 = vld [vmem:[%s13307_s11 + $0xc0] sm:$0xff]  ;;  %v1476_v0 = vld [vmem:[%s13307_s11 + $0x338] sm:$0xff] }
 0x261   :  { %1684 = vmatpush.msra.mxu1 %v1459_v1  ;;  %1722 = vmatpush.msrb.mxu0 %v1420_v2  ;;  %v1391_v1 = vld [vmem:[%s13307_s11 + $0x90] sm:$0xff]  ;;  %v1541_v2 = vld [vmem:[%s13307_s11 + $0x540] sm:$0xff] }
 0x262   :  { %1753 = vmatpush.msra.mxu2 %v1460_v3  ;;  %1666 = vmatmul.f32.gmra.mxu3 %v7146_v21  ;;  %v1392_v3 = vld [vmem:[%s13307_s11 + $0x98] sm:$0xff] }
 0x263   :  { %1776 = vmatpush.msra.mxu3 %v1540_v4  ;;  %1685 = vmatpush.msra.mxu1 %v1454_v6  ;;  %v1471_v4 = vld [vmem:[%s13307_s11 + $0x310] sm:$0xff]  ;;  %v1386_v6 = vld [vmem:[%s13307_s11 + $0x68] sm:$0xff] }
 0x264   :  { %1723 = vmatpush.msrb.mxu0 %v1415_v9  ;;  %1754 = vmatpush.msra.mxu2 %v1455_v11  ;;  %v1536_v9 = vld [vmem:[%s13307_s11 + $0x518] sm:$0xff]  ;;  %v1387_v11 = vld [vmem:[%s13307_s11 + $0x70] sm:$0xff] }
 0x265   :  { %1686 = vmatmul.f32.vlgmr.msra.gmra.mxu1 %v7175_v44  ;;  %1755 = vmatmul.f32.vlgmr.msra.gmra.mxu2 %v7175_v44 }
 0x266   :  { %1777 = vmatpush.msra.mxu3 %v1535_v12  ;;  %1785 = vmatpush.msrb.mxu1 %v1451_v23  ;;  %v1466_v12 = vld [vmem:[%s13307_s11 + $0x2e8] sm:$0xff]  ;;  %v1532_v23 = vld [vmem:[%s13307_s11 + $0x4f8] sm:$0xff] }
 0x267   :  { %1854 = vmatpush.msrb.mxu2 %v1452_v62  ;;  %1724 = vmatpush.msrb.mxu0 %v1410_v7  ;;  %v1381_v62 = vld [vmem:[%s13307_s11 + $0x40] sm:$0xff]  ;;  %v1382_v7 = vld [vmem:[%s13307_s11 + $0x48] sm:$0xff] }
 0x268   :  { %1808 = vmatpush.msrb.mxu3 %v1531_v13  ;;  %1786 = vmatpush.msrb.mxu1 %v1446_v56  ;;  %v1461_v13 = vld [vmem:[%s13307_s11 + $0x2c0] sm:$0xff]  ;;  %v1527_v56 = vld [vmem:[%s13307_s11 + $0x4d0] sm:$0xff] }
 0x269   :  { %1855 = vmatpush.msrb.mxu2 %v1447_v5  ;;  %1725 = vmatpush.msrb.mxu0 %v1405_v14  ;;  %v1376_v5 = vld [vmem:[%s13307_s11 + $0x18] sm:$0xff]  ;;  %v1377_v14 = vld [vmem:[%s13307_s11 + $0x20] sm:$0xff] }
 0x26a   :  { %1809 = vmatpush.msrb.mxu3 %v1526_v15  ;;  %1787 = vmatpush.msrb.mxu1 %v1441_v39  ;;  %v1456_v15 = vld [vmem:[%s13307_s11 + $0x298] sm:$0xff]  ;;  %v1522_v39 = vld [vmem:[%s13307_s11 + $0x4a8] sm:$0xff] }
 0x26b   :  { %1856 = vmatpush.msrb.mxu2 %v1442_v16  ;;  %1726 = vmatpush.msrb.mxu0 %v1400_v17  ;;  %v1517_v16 = vld [vmem:[%s13307_s11 + $0x480] sm:$0xff]  ;;  %v1562_v17 = vld [vmem:[%s13307_s11 + $0x5e8] sm:$0xf] }
 0x26c   :  { %1810 = vmatpush.msrb.mxu3 %v1521_v18  ;;  %1788 = vmatpush.msrb.mxu1 %v1436_v48  ;;  %v2010_v18 = vld [vmem:[%s13309_s13 + $0x10] sm:$0xff]  ;;  %v1512_v48 = vld [vmem:[%s13307_s11 + $0x458] sm:$0xff] }
 0x26d   :  { %5864 = vmatmul.msk.f32.vlgmr.msra.gmra.mxu3 %vm995_vm1, %v7177_v45  ;;  %1857 = vmatpush.msrb.mxu2 %v1437_v19  ;;  %v1557_v19 = vld [vmem:[%s13307_s11 + $0x5c0] sm:$0xff] }
 0x26e   :  { %1727 = vmatpush.msrb.mxu0 %v1395_v22  ;;  %1811 = vmatpush.msrb.mxu3 %v1516_v24  ;;  %v1507_v22 = vld [vmem:[%s13307_s11 + $0x430] sm:$0xff]  ;;  %v1552_v24 = vld [vmem:[%s13307_s11 + $0x598] sm:$0xff] }
 0x26f   :  { %1689 = vmatmul.f32.gmra.mxu1 %v7223_v10  ;;  %1758 = vmatmul.f32.gmra.mxu2 %v7223_v10 }
 0x270   :  { %1789 = vmatpush.msrb.mxu1 %v1431_v25  ;;  %1858 = vmatpush.msrb.mxu2 %v1432_v26  ;;  %v1502_v25 = vld [vmem:[%s13307_s11 + $0x408] sm:$0xff]  ;;  %v1497_v26 = vld [vmem:[%s13307_s11 + $0x3e0] sm:$0xff] }
 0x271   :  { %1728 = vmatpush.msrb.mxu0 %v1390_v27  ;;  %1812 = vmatpush.msrb.mxu3 %v1511_v28  ;;  %v1547_v27 = vld [vmem:[%s13307_s11 + $0x570] sm:$0xff]  ;;  %v1492_v28 = vld [vmem:[%s13307_s11 + $0x3b8] sm:$0xff] }
 0x272   :  { %1790 = vmatpush.msrb.mxu1 %v1426_v30  ;;  %1859 = vmatpush.msrb.mxu2 %v1427_v29  ;;  %v1542_v30 = vld [vmem:[%s13307_s11 + $0x548] sm:$0xff]  ;;  %v8040_v29 = vpop.f32.mrf.mxu1 }
 0x273   :  { %1729 = vmatpush.msrb.mxu0 %v1385_v31  ;;  %1813 = vmatpush.msrb.mxu3 %v1506_v32  ;;  %13350 = vst [vmem:[#allocation8_spill] sm:$0xff] %v8040_v29  ;;  %v1537_v31 = vld [vmem:[%s13307_s11 + $0x520] sm:$0xff]  ;;  %v1482_v32 = vld [vmem:[%s13307_s11 + $0x368] sm:$0xff] }
 0x274   :  { %1791 = vmatpush.msrb.mxu1 %v1421_v33  ;;  %1860 = vmatpush.msrb.mxu2 %v1422_v34  ;;  %v2011_v33 = vld [vmem:[%s13309_s13 + $0x18] sm:$0xff]  ;;  %v1477_v34 = vld [vmem:[%s13307_s11 + $0x340] sm:$0xff] }
 0x275   :  { %1730 = vmatpush.msrb.mxu0 %v1380_v35  ;;  %1814 = vmatpush.msrb.mxu3 %v1501_v36  ;;  %v2009_v35 = vld [vmem:[%s13309_s13 + $0x8] sm:$0xff]  ;;  %v4054_v29 = vld [vmem:[%s13316_s20] sm:$0xff] }
 0x276   :  { %5865 = vmatmul.msk.f32.gmra.mxu3 %vm995_vm1, %v7231_v50  ;;  %1792 = vmatpush.msrb.mxu1 %v1416_v38  ;;  %v1472_v38 = vld [vmem:[%s13307_s11 + $0x318] sm:$0xff] }
 0x277   :  { %1861 = vmatpush.msrb.mxu2 %v1417_v49  ;;  %1731 = vmatpush.msrb.mxu0 %v1375_v40  ;;  %v1462_v40 = vld [vmem:[%s13307_s11 + $0x2c8] sm:$0xff] }
 0x278   :  { %1815 = vmatpush.msrb.mxu3 %v1496_v41  ;;  %1732 = vmatmul.f32.vlgmr.msrb.gmra.mxu0 %v7117_v8  ;;  %v1457_v41 = vld [vmem:[%s13307_s11 + $0x2a0] sm:$0xff] }
 0x279   :  { %1793 = vmatpush.msrb.mxu1 %v1411_v42  ;;  %5866 = vmatpush.msk.msra.mxu0 %vm1002_vm8, %v1561_v43 }
 0x27a   :  { %1862 = vmatpush.msrb.mxu2 %v1412_v46  ;;  %1816 = vmatpush.msrb.mxu3 %v1491_v47  ;;  %v8072_v49 = vpop.f32.mrf.mxu1 }
 0x27b   :  { %1794 = vmatpush.msrb.mxu1 %v1406_v51  ;;  %1842 = vmatpush.msra.mxu0 %v1556_v52  ;;  %v8062_v36 = vpop.f32.mrf.mxu3  ;;  %13352 = vst [vmem:[#allocation10_spill] sm:$0xff] %v8072_v49  ;;  %v3182_v49 = vld [vmem:[%s13314_s18 + $0xd88] sm:$0xff] }
 0x27c   :  { %1863 = vmatpush.msrb.mxu2 %v1407_v53  ;;  %1817 = vmatpush.msrb.mxu3 %v1486_v54  ;;  %13351 = vst [vmem:[#allocation9_spill] sm:$0xff] %v8062_v36  ;;  %v2125_v53 = vld [vmem:[%s13311_s15 + $0x1c8] sm:$0xff]  ;;  %v2120_v54 = vld [vmem:[%s13311_s15 + $0x1a0] sm:$0xff] }
 0x27d   :  { %1795 = vmatpush.msrb.mxu1 %v1401_v55  ;;  %1843 = vmatpush.msra.mxu0 %v1551_v57  ;;  %v2121_v55 = vld [vmem:[%s13311_s15 + $0x1a8] sm:$0xff] }
 0x27e   :  { %1864 = vmatpush.msrb.mxu2 %v1402_v58  ;;  %1818 = vmatpush.msrb.mxu3 %v1481_v59  ;;  %v2116_v59 = vld [vmem:[%s13311_s15 + $0x180] sm:$0xff] }
 0x27f   :  { %1796 = vmatpush.msrb.mxu1 %v1396_v60  ;;  %1844 = vmatpush.msra.mxu0 %v1546_v61  ;;  %v2117_v60 = vld [vmem:[%s13311_s15 + $0x188] sm:$0xff]  ;;  %v2112_v61 = vld [vmem:[%s13311_s15 + $0x160] sm:$0xff] }
 0x280   :  { %1865 = vmatpush.msrb.mxu2 %v1397_v63  ;;  %1819 = vmatpush.msrb.mxu3 %v1476_v0  ;;  %v2113_v63 = vld [vmem:[%s13311_s15 + $0x168] sm:$0xff]  ;;  %v2192_v0 = vld [vmem:[%s13311_s15 + $0x3e0] sm:$0x3] }
 0x281   :  { %1735 = vmatmul.f32.gmra.mxu0 %v7146_v21  ;;  %1797 = vmatpush.msrb.mxu1 %v1391_v1  ;;  %v2193_v1 = vld [vmem:[%s13311_s15 + $0x3e8] sm:$0x3] }
 0x282   :  { %1845 = vmatpush.msra.mxu0 %v1541_v2  ;;  %1866 = vmatpush.msrb.mxu2 %v1392_v3  ;;  %v8087_v43 = vpop.f32.mrf.mxu1  ;;  %v2108_v2 = vld [vmem:[%s13311_s15 + $0x140] sm:$0xff]  ;;  %v2109_v3 = vld [vmem:[%s13311_s15 + $0x148] sm:$0xff] }
 0x283   :  { %1820 = vmatpush.msrb.mxu3 %v1471_v4  ;;  %1798 = vmatpush.msrb.mxu1 %v1386_v6  ;;  %v8084_v42 = vpop.f32.mrf.mxu3  ;;  %13354 = vst [vmem:[#allocation12_spill] sm:$0xff] %v8087_v43  ;;  %v2188_v4 = vld [vmem:[%s13311_s15 + $0x3c0] sm:$0xff]  ;;  %v2189_v6 = vld [vmem:[%s13311_s15 + $0x3c8] sm:$0xff]  ;;  %v4488_v43 = vld [vmem:[%s13316_s20 + $0xd90] sm:$0xff] }
 0x284   :  { %1846 = vmatpush.msra.mxu0 %v1536_v9  ;;  %1867 = vmatpush.msrb.mxu2 %v1387_v11  ;;  %13353 = vst [vmem:[#allocation11_spill] sm:$0xff] %v8084_v42  ;;  %v2104_v9 = vld [vmem:[%s13311_s15 + $0x120] sm:$0xff]  ;;  %v2105_v11 = vld [vmem:[%s13311_s15 + $0x128] sm:$0xff] }
 0x285   :  { %1821 = vmatpush.msrb.mxu3 %v1466_v12  ;;  %1799 = vmatpush.msrb.mxu1 %v1381_v62  ;;  %v2184_v12 = vld [vmem:[%s13311_s15 + $0x3a0] sm:$0xff] }
 0x286   :  { %1877 = vmatpush.msrb.mxu0 %v1532_v23  ;;  %1868 = vmatpush.msrb.mxu2 %v1382_v7  ;;  %v2185_v23 = vld [vmem:[%s13311_s15 + $0x3a8] sm:$0xff]  ;;  %v2100_v7 = vld [vmem:[%s13311_s15 + $0x100] sm:$0xff] }
 0x287   :  { %1822 = vmatpush.msrb.mxu3 %v1461_v13  ;;  %1800 = vmatpush.msrb.mxu1 %v1376_v5  ;;  %v2101_v13 = vld [vmem:[%s13311_s15 + $0x108] sm:$0xff]  ;;  %v2180_v5 = vld [vmem:[%s13311_s15 + $0x380] sm:$0xff] }
 0x288   :  { %1878 = vmatpush.msrb.mxu0 %v1527_v56  ;;  %1869 = vmatpush.msrb.mxu2 %v1377_v14  ;;  %v2181_v14 = vld [vmem:[%s13311_s15 + $0x388] sm:$0xff] }
 0x289   :  { %1801 = vmatmul.f32.vlgmr.msrb.gmra.mxu1 %v7117_v8  ;;  %1823 = vmatpush.msrb.mxu3 %v1456_v15  ;;  %v2096_v15 = vld [vmem:[%s13311_s15 + $0xe0] sm:$0xff] }
 0x28a   :  { %1870 = vmatmul.f32.vlgmr.msrb.gmra.mxu2 %v7117_v8  ;;  %1879 = vmatpush.msrb.mxu0 %v1522_v39  ;;  %v2008_v8 = vld [vmem:[%s13309_s13] sm:$0xff]  ;;  %v8096_v46 = vpop.f32.mrf.mxu1  ;;  %v2097_v39 = vld [vmem:[%s13311_s15 + $0xe8] sm:$0xff] }
 0x28b   :  { %1824 = vmatmul.f32.vlgmr.msrb.gmra.mxu3 %v7175_v44  ;;  %5867 = vmatmul.msk.f32.vlgmr.msra.gmra.mxu0 %vm995_vm1, %v7177_v45  ;;  %13356 = vst [vmem:[#allocation14_spill] sm:$0xff] %v8096_v46 }
 0x28c   :  { %1880 = vmatpush.msrb.mxu0 %v1517_v16  ;;  %5869 = vmatpush.msk.msra.mxu1 %vm1002_vm8, %v1562_v17  ;;  %v2176_v16 = vld [vmem:[%s13311_s15 + $0x360] sm:$0xff]  ;;  %v2177_v17 = vld [vmem:[%s13311_s15 + $0x368] sm:$0xff] }
 0x28d   :  { %2032 = vmatpush.msra.mxu3 %v2010_v18  ;;  %v2092_v18 = vld [vmem:[%s13311_s15 + $0xc0] sm:$0xff] }
 0x28e   :  { %1881 = vmatpush.msrb.mxu0 %v1512_v48  ;;  %1911 = vmatpush.msra.mxu1 %v1557_v19  ;;  %v2093_v48 = vld [vmem:[%s13311_s15 + $0xc8] sm:$0xff]  ;;  %v2172_v19 = vld [vmem:[%s13311_s15 + $0x340] sm:$0xff] }
 0x28f   :  { %2033 = vmatpush.msra.mxu3 %v2008_v8  ;;  %v2173_v8 = vld [vmem:[%s13311_s15 + $0x348] sm:$0xff] }
 0x290   :  { %1882 = vmatpush.msrb.mxu0 %v1507_v22  ;;  %1912 = vmatpush.msra.mxu1 %v1552_v24  ;;  %v2088_v22 = vld [vmem:[%s13311_s15 + $0xa0] sm:$0xff]  ;;  %v2089_v24 = vld [vmem:[%s13311_s15 + $0xa8] sm:$0xff] }
 0x291   :  { %1804 = vmatmul.f32.gmra.mxu1 %v7146_v21  ;;  %5876 = vmatpush.msk.msrb.mxu3 %vm200_vm0, %v2192_v0  ;;  %v2130_v0 = vld [vmem:[%s13311_s15 + $0x1f0] sm:$0xff] }
 0x292   :  { %1873 = vmatmul.f32.gmra.mxu2 %v7146_v21  ;;  %1883 = vmatpush.msrb.mxu0 %v1502_v25  ;;  %v1487_v21 = vld [vmem:[%s13307_s11 + $0x390] sm:$0xff]  ;;  %v8100_v51 = vpop.f32.mrf.mxu1  ;;  %v2168_v25 = vld [vmem:[%s13311_s15 + $0x320] sm:$0xff] }
 0x293   :  { %1827 = vmatmul.f32.gmra.mxu3 %v7223_v10  ;;  %5868 = vmatmul.msk.f32.gmra.mxu0 %vm995_vm1, %v7231_v50  ;;  %13358 = vst [vmem:[#allocation16_spill] sm:$0xff] %v8100_v51  ;;  %v4376_v51 = vld [vmem:[%s13316_s20 + $0xa10] sm:$0xff] }
 0x294   :  { %1884 = vmatpush.msrb.mxu0 %v1497_v26  ;;  %1913 = vmatpush.msra.mxu1 %v1547_v27  ;;  %v2169_v26 = vld [vmem:[%s13311_s15 + $0x328] sm:$0xff]  ;;  %v2084_v27 = vld [vmem:[%s13311_s15 + $0x80] sm:$0xff] }
 0x295   :  { %2249 = vmatpush.msrb.mxu3 %v2188_v4  ;;  %v2126_v4 = vld [vmem:[%s13311_s15 + $0x1d0] sm:$0xff] }
 0x296   :  { %1885 = vmatpush.msrb.mxu0 %v1492_v28  ;;  %1914 = vmatpush.msra.mxu1 %v1542_v30  ;;  %v2085_v28 = vld [vmem:[%s13311_s15 + $0x88] sm:$0xff] }
 0x297   :  { %2250 = vmatpush.msrb.mxu3 %v2184_v12  ;;  %v2141_v12 = vld [vmem:[%s13311_s15 + $0x248] sm:$0xff] }
 0x298   :  { %1886 = vmatpush.msrb.mxu0 %v1487_v21  ;;  %1915 = vmatpush.msra.mxu1 %v1537_v31  ;;  %v2164_v21 = vld [vmem:[%s13311_s15 + $0x300] sm:$0xff]  ;;  %v2165_v31 = vld [vmem:[%s13311_s15 + $0x308] sm:$0xff] }
 0x299   :  { %5870 = vmatmul.msk.f32.vlgmr.msra.gmra.mxu1 %vm995_vm1, %v7177_v45  ;;  %v1467_v45 = vld [vmem:[%s13307_s11 + $0x2f0] sm:$0xff]  ;;  %2251 = vmatpush.msrb.mxu3 %v2180_v5  ;;  %v2137_v5 = vld [vmem:[%s13311_s15 + $0x228] sm:$0xff] }
 0x29a   :  { %1887 = vmatpush.msrb.mxu0 %v1482_v32  ;;  %2055 = vmatpush.msrb.mxu1 %v2011_v33  ;;  %v2080_v32 = vld [vmem:[%s13311_s15 + $0x60] sm:$0xff]  ;;  %v2081_v33 = vld [vmem:[%s13311_s15 + $0x68] sm:$0xff] }
 0x29b   :  { %5872 = vmatmul.msk.f32.vlgmr.msra.gmra.mxu3 %vm288_vm4, %v6479_v20 }
 0x29c   :  { %1888 = vmatpush.msrb.mxu0 %v1477_v34  ;;  %2056 = vmatpush.msrb.mxu1 %v2009_v35  ;;  %v2160_v34 = vld [vmem:[%s13311_s15 + $0x2e0] sm:$0xff] }
 0x29d   :  { %2252 = vmatpush.msrb.mxu3 %v2176_v16  ;;  %v2133_v16 = vld [vmem:[%s13311_s15 + $0x208] sm:$0xff] }
 0x29e   :  { %1889 = vmatpush.msrb.mxu0 %v1472_v38  ;;  %5879 = vmatpush.msk.msra.mxu1 %vm200_vm0, %v2193_v1  ;;  %v2161_v38 = vld [vmem:[%s13311_s15 + $0x2e8] sm:$0xff]  ;;  %v2131_v1 = vld [vmem:[%s13311_s15 + $0x1f8] sm:$0xff] }
 0x29f   :  { %2253 = vmatpush.msrb.mxu3 %v2172_v19  ;;  %v2195_v19 = vld [vmem:[%s13311_s15 + $0x3f8] sm:$0x3] }
 0x2a0   :  { %1890 = vmatpush.msrb.mxu0 %v1467_v45  ;;  %2295 = vmatpush.msra.mxu1 %v2189_v6  ;;  %v2076_v45 = vld [vmem:[%s13311_s15 + $0x40] sm:$0xff]  ;;  %v2127_v6 = vld [vmem:[%s13311_s15 + $0x1d8] sm:$0xff] }
 0x2a1   :  { %5871 = vmatmul.msk.f32.gmra.mxu1 %vm995_vm1, %v7231_v50  ;;  %v8092_v50 = vpop.f32.mrf.mxu3  ;;  %2254 = vmatpush.msrb.mxu3 %v2168_v25  ;;  %v2190_v25 = vld [vmem:[%s13311_s15 + $0x3d0] sm:$0xff] }
 0x2a2   :  { %1891 = vmatpush.msrb.mxu0 %v1462_v40  ;;  %13355 = vst [vmem:[#allocation13_spill] sm:$0xff] %v8092_v50  ;;  %2296 = vmatpush.msra.mxu1 %v2185_v23  ;;  %v2077_v40 = vld [vmem:[%s13311_s15 + $0x48] sm:$0xff]  ;;  %v2122_v23 = vld [vmem:[%s13311_s15 + $0x1b0] sm:$0xff]  ;;  %v4249_v50 = vld [vmem:[%s13316_s20 + $0x618] sm:$0xff] }
 0x2a3   :  { %5873 = vmatmul.msk.f32.gmra.mxu3 %vm288_vm4, %v6516_v37 }
 0x2a4   :  { %1892 = vmatpush.msrb.mxu0 %v1457_v41  ;;  %2297 = vmatpush.msra.mxu1 %v2181_v14  ;;  %v2156_v41 = vld [vmem:[%s13311_s15 + $0x2c0] sm:$0xff]  ;;  %v2118_v14 = vld [vmem:[%s13311_s15 + $0x190] sm:$0xff] }
 0x2a5   :  { %1893 = vmatmul.f32.vlgmr.msrb.gmra.mxu0 %v7175_v44  ;;  %v8104_v44 = vpop.f32.mrf.mxu1  ;;  %2255 = vmatpush.msrb.mxu3 %v2164_v21  ;;  %v2107_v21 = vld [vmem:[%s13311_s15 + $0x138] sm:$0xff] }
 0x2a6   :  { %13360 = vst [vmem:[#allocation18_spill] sm:$0xff] %v8104_v44  ;;  %2298 = vmatpush.msra.mxu1 %v2177_v17  ;;  %v2114_v17 = vld [vmem:[%s13311_s15 + $0x170] sm:$0xff]  ;;  %v4463_v44 = vld [vmem:[%s13316_s20 + $0xcc8] sm:$0xff] }
 0x2a7   :  { %2256 = vmatpush.msrb.mxu3 %v2160_v34  ;;  %v2103_v34 = vld [vmem:[%s13311_s15 + $0x118] sm:$0xff] }
 0x2a8   :  { %2299 = vmatpush.msra.mxu1 %v2173_v8 }
 0x2a9   :  { %5874 = vmatmul.msk.f32.vlgmr.msrb.gmra.mxu1 %vm288_vm4, %v6479_v20  ;;  %v8098_v47 = vpop.f32.mrf.mxu3  ;;  %v2128_v20 = vld [vmem:[%s13311_s15 + $0x1e0] sm:$0xff]  ;;  %2257 = vmatpush.msrb.mxu3 %v2156_v41  ;;  %v2099_v41 = vld [vmem:[%s13311_s15 + $0xf8] sm:$0xff] }
 0x2aa   :  { %13357 = vst [vmem:[#allocation15_spill] sm:$0xff] %v8098_v47  ;;  %2225 = vmatpush.msra.mxu2 %v2128_v20  ;;  %2300 = vmatpush.msra.mxu1 %v2169_v26  ;;  %v2157_v20 = vld [vmem:[%s13311_s15 + $0x2c8] sm:$0xff]  ;;  %v2191_v26 = vld [vmem:[%s13311_s15 + $0x3d8] sm:$0xff]  ;;  %v4056_v47 = vld [vmem:[%s13316_s20 + $0x10] sm:$0xff] }
 0x2ac   :  { %2301 = vmatpush.msra.mxu1 %v2165_v31  ;;  %v2186_v31 = vld [vmem:[%s13311_s15 + $0x3b0] sm:$0xff] }
 0x2ad   :  { %1896 = vmatmul.f32.gmra.mxu0 %v7223_v10  ;;  %v2129_v10 = vld [vmem:[%s13311_s15 + $0x1e8] sm:$0xff] }
 0x2ae   :  { %2271 = vmatpush.msra.mxu0 %v2129_v10  ;;  %v8126_v58 = vpop.f32.mrf.mxu1  ;;  %2302 = vmatpush.msra.mxu1 %v2161_v38  ;;  %v2072_v10 = vld [vmem:[%s13311_s15 + $0x20] sm:$0xff]  ;;  %v2182_v38 = vld [vmem:[%s13311_s15 + $0x390] sm:$0xff] }
 0x2af   :  { %13362 = vst [vmem:[#allocation20_spill] sm:$0xff] %v8126_v58  ;;  %v3070_v58 = vld [vmem:[%s13314_s18 + $0xa08] sm:$0xff] }
 0x2b0   :  { %2272 = vmatpush.msra.mxu0 %v2125_v53  ;;  %2303 = vmatpush.msra.mxu1 %v2157_v20  ;;  %v2152_v53 = vld [vmem:[%s13311_s15 + $0x2a0] sm:$0xff]  ;;  %v2178_v20 = vld [vmem:[%s13311_s15 + $0x370] sm:$0xff] }
 0x2b1   :  { %5875 = vmatmul.msk.f32.gmra.mxu1 %vm288_vm4, %v6516_v37  ;;  %v8102_v52 = vpop.f32.mrf.mxu3  ;;  %v2124_v37 = vld [vmem:[%s13311_s15 + $0x1c0] sm:$0xff]  ;;  %2258 = vmatpush.msrb.mxu3 %v2152_v53  ;;  %v2095_v53 = vld [vmem:[%s13311_s15 + $0xd8] sm:$0xff]  ;;  %vm5650_vm4 = vcmask 719872  }
 0x2b2   :  { %13359 = vst [vmem:[#allocation17_spill] sm:$0xff] %v8102_v52  ;;  %2226 = vmatpush.msra.mxu2 %v2124_v37  ;;  %2273 = vmatpush.msra.mxu0 %v2121_v55  ;;  %v2073_v37 = vld [vmem:[%s13311_s15 + $0x28] sm:$0xff]  ;;  %v2068_v55 = vld [vmem:[%s13311_s15] sm:$0xff] }
 0x2b3   :  { %v4318_v52 = vld [vmem:[%s13316_s20 + $0x840] sm:$0xff] }
 0x2b4   :  { %2227 = vmatpush.msra.mxu2 %v2120_v54  ;;  %2274 = vmatpush.msra.mxu0 %v2117_v60  ;;  %v2153_v54 = vld [vmem:[%s13311_s15 + $0x2a8] sm:$0xff] }
 0x2b5   :  { %2304 = vmatpush.msra.mxu1 %v2153_v54  ;;  %v2174_v54 = vld [vmem:[%s13311_s15 + $0x350] sm:$0xff] }
 0x2b6   :  { %2228 = vmatpush.msra.mxu2 %v2116_v59  ;;  %2275 = vmatpush.msra.mxu0 %v2113_v63  ;;  %v2069_v59 = vld [vmem:[%s13311_s15 + $0x8] sm:$0xff] }
 0x2b7   :  { %v2149_v63 = vld [vmem:[%s13311_s15 + $0x288] sm:$0xff] }
 0x2b8   :  { %2229 = vmatpush.msra.mxu2 %v2112_v61  ;;  %2276 = vmatpush.msra.mxu0 %v2109_v3  ;;  %v8180_v56 = vpop.f32.mrf.mxu1  ;;  %v2148_v61 = vld [vmem:[%s13311_s15 + $0x280] sm:$0xff]  ;;  %v2145_v3 = vld [vmem:[%s13311_s15 + $0x268] sm:$0xff] }
 0x2b9   :  { %v8124_v57 = vpop.f32.mrf.mxu3  ;;  %13364 = vst [vmem:[#allocation22_spill] sm:$0xff] %v8180_v56  ;;  %2259 = vmatpush.msrb.mxu3 %v2148_v61  ;;  %2305 = vmatpush.msra.mxu1 %v2149_v63  ;;  %v2091_v61 = vld [vmem:[%s13311_s15 + $0xb8] sm:$0xff]  ;;  %v2774_v56 = vld [vmem:[%s13314_s18 + $0xc8] sm:$0xff] }
 0x2ba   :  { %13361 = vst [vmem:[#allocation19_spill] sm:$0xff] %v8124_v57  ;;  %2230 = vmatpush.msra.mxu2 %v2108_v2  ;;  %2277 = vmatpush.msra.mxu0 %v2105_v11  ;;  %v2144_v2 = vld [vmem:[%s13311_s15 + $0x260] sm:$0xff] }
 0x2bb   :  { %2260 = vmatpush.msrb.mxu3 %v2144_v2  ;;  %2306 = vmatpush.msra.mxu1 %v2145_v3  ;;  %v2140_v11 = vld [vmem:[%s13311_s15 + $0x240] sm:$0xff]  ;;  %v2086_v3 = vld [vmem:[%s13311_s15 + $0x90] sm:$0xff] }
 0x2bc   :  { %2231 = vmatpush.msra.mxu2 %v2104_v9  ;;  %2278 = vmatpush.msra.mxu0 %v2101_v13  ;;  %v2136_v13 = vld [vmem:[%s13311_s15 + $0x220] sm:$0xff] }
 0x2bd   :  { %2261 = vmatpush.msrb.mxu3 %v2140_v11  ;;  %2307 = vmatpush.msra.mxu1 %v2141_v12  ;;  %v2167_v11 = vld [vmem:[%s13311_s15 + $0x318] sm:$0xff]  ;;  %v2082_v12 = vld [vmem:[%s13311_s15 + $0x70] sm:$0xff]  ;;  %v4374_v57 = vld [vmem:[%s13316_s20 + $0xa00] sm:$0xff] }
 0x2be   :  { %2232 = vmatpush.msra.mxu2 %v2100_v7  ;;  %2279 = vmatpush.msra.mxu0 %v2097_v39  ;;  %v2123_v7 = vld [vmem:[%s13311_s15 + $0x1b8] sm:$0xff]  ;;  %v2132_v39 = vld [vmem:[%s13311_s15 + $0x200] sm:$0xff] }
 0x2bf   :  { %2262 = vmatpush.msrb.mxu3 %v2136_v13  ;;  %2308 = vmatpush.msra.mxu1 %v2137_v5  ;;  %v2163_v13 = vld [vmem:[%s13311_s15 + $0x2f8] sm:$0xff]  ;;  %v2078_v5 = vld [vmem:[%s13311_s15 + $0x50] sm:$0xff] }
 0x2c0   :  { %2233 = vmatpush.msra.mxu2 %v2096_v15  ;;  %2280 = vmatpush.msra.mxu0 %v2093_v48  ;;  %v2119_v15 = vld [vmem:[%s13311_s15 + $0x198] sm:$0xff]  ;;  %v2194_v48 = vld [vmem:[%s13311_s15 + $0x3f0] sm:$0x3] }
 0x2c1   :  { %v8172_v62 = vpop.f32.mrf.mxu3  ;;  %2263 = vmatpush.msrb.mxu3 %v2132_v39  ;;  %2309 = vmatpush.msra.mxu1 %v2133_v16  ;;  %v2159_v39 = vld [vmem:[%s13311_s15 + $0x2d8] sm:$0xff]  ;;  %v2074_v16 = vld [vmem:[%s13311_s15 + $0x30] sm:$0xff] }
 0x2c2   :  { %13363 = vst [vmem:[#allocation21_spill] sm:$0xff] %v8172_v62  ;;  %2234 = vmatpush.msra.mxu2 %v2092_v18  ;;  %2281 = vmatpush.msra.mxu0 %v2089_v24  ;;  %v2115_v18 = vld [vmem:[%s13311_s15 + $0x178] sm:$0xff]  ;;  %v3094_v62 = vld [vmem:[%s13314_s18 + $0xac8] sm:$0xff] }
 0x2c3   :  { %v2111_v24 = vld [vmem:[%s13311_s15 + $0x158] sm:$0xff]  ;;  %5882 = vmatpush.msk.msra.mxu3 %vm200_vm0, %v2194_v48  ;;  %5885 = vmatpush.msk.msrb.mxu1 %vm200_vm0, %v2195_v19 }
 0x2c4   :  { %2235 = vmatpush.msra.mxu2 %v2088_v22  ;;  %2282 = vmatpush.msra.mxu0 %v2085_v28  ;;  %v8247_v35 = vpop.f32.mrf.mxu1  ;;  %v2110_v22 = vld [vmem:[%s13311_s15 + $0x150] sm:$0xff]  ;;  %v2155_v48 = vld [vmem:[%s13311_s15 + $0x2b8] sm:$0xff] }
 0x2c5   :  { %13366 = vst [vmem:[#allocation24_spill] sm:$0xff] %v8247_v35  ;;  %v2106_v28 = vld [vmem:[%s13311_s15 + $0x130] sm:$0xff]  ;;  %2341 = vmatpush.msra.mxu3 %v2190_v25  ;;  %2387 = vmatpush.msrb.mxu1 %v2191_v26  ;;  %v2071_v25 = vld [vmem:[%s13311_s15 + $0x18] sm:$0xff] }
 0x2c6   :  { %2236 = vmatpush.msra.mxu2 %v2084_v27  ;;  %2283 = vmatpush.msra.mxu0 %v2081_v33  ;;  %v2102_v33 = vld [vmem:[%s13311_s15 + $0x110] sm:$0xff] }
 0x2c7   :  { %2342 = vmatpush.msra.mxu3 %v2186_v31  ;;  %v2150_v26 = vld [vmem:[%s13311_s15 + $0x290] sm:$0xff]  ;;  %v2147_v31 = vld [vmem:[%s13311_s15 + $0x278] sm:$0xff] }
 0x2c8   :  { %2237 = vmatpush.msra.mxu2 %v2080_v32  ;;  %2284 = vmatpush.msra.mxu0 %v2077_v40  ;;  %v2187_v32 = vld [vmem:[%s13311_s15 + $0x3b8] sm:$0xff]  ;;  %v2098_v40 = vld [vmem:[%s13311_s15 + $0xf0] sm:$0xff] }
 0x2c9   :  { %v8230_v30 = vpop.f32.mrf.mxu3  ;;  %2388 = vmatpush.msrb.mxu1 %v2187_v32  ;;  %2343 = vmatpush.msra.mxu3 %v2182_v38  ;;  %v2142_v32 = vld [vmem:[%s13311_s15 + $0x250] sm:$0xff] }
 0x2ca   :  { %13365 = vst [vmem:[#allocation23_spill] sm:$0xff] %v8230_v30  ;;  %2238 = vmatpush.msra.mxu2 %v2076_v45  ;;  %2285 = vmatpush.msra.mxu0 %v2073_v37  ;;  %v2183_v45 = vld [vmem:[%s13311_s15 + $0x398] sm:$0xff]  ;;  %v2094_v37 = vld [vmem:[%s13311_s15 + $0xd0] sm:$0xff] }
 0x2cb   :  { %2389 = vmatpush.msrb.mxu1 %v2183_v45  ;;  %2344 = vmatpush.msra.mxu3 %v2178_v20  ;;  %v2138_v45 = vld [vmem:[%s13311_s15 + $0x230] sm:$0xff]  ;;  %v2135_v20 = vld [vmem:[%s13311_s15 + $0x218] sm:$0xff] }
 0x2cc   :  { %2239 = vmatpush.msra.mxu2 %v2072_v10  ;;  %2286 = vmatpush.msra.mxu0 %v2069_v59  ;;  %v2179_v10 = vld [vmem:[%s13311_s15 + $0x378] sm:$0xff]  ;;  %v2090_v59 = vld [vmem:[%s13311_s15 + $0xb0] sm:$0xff] }
 0x2cd   :  { %v8308_v9 = vpop.f32.mrf.mxu1  ;;  %2390 = vmatpush.msrb.mxu1 %v2179_v10  ;;  %2345 = vmatpush.msra.mxu3 %v2174_v54  ;;  %v2012_v54 = vld [vmem:[%s13310_s14] sm:$0x3] }
 0x2ce   :  { %2240 = vmatpush.msra.mxu2 %v2068_v55  ;;  %2363 = vmatpush.msrb.mxu0 %v2131_v1  ;;  %13368 = vst [vmem:[#allocation26_spill] sm:$0xff] %v8308_v9  ;;  %v2175_v55 = vld [vmem:[%s13311_s15 + $0x358] sm:$0xff]  ;;  %v2766_v9 = vld [vmem:[%s13314_s18 + $0x88] sm:$0xff] }
 0x2cf   :  { %2391 = vmatpush.msrb.mxu1 %v2175_v55  ;;  %v2171_v1 = vld [vmem:[%s13311_s15 + $0x338] sm:$0xff]  ;;  %v2014_v55 = vperm.slane %v2012_v54, 0 }
 0x2d0   :  { %2317 = vmatpush.msrb.mxu2 %v2130_v0  ;;  %2364 = vmatpush.msrb.mxu0 %v2127_v6  ;;  %v2170_v0 = vld [vmem:[%s13311_s15 + $0x330] sm:$0xff] }
 0x2d1   :  { %2346 = vmatpush.msra.mxu3 %v2170_v0  ;;  %2392 = vmatpush.msrb.mxu1 %v2171_v1  ;;  %v2166_v6 = vld [vmem:[%s13311_s15 + $0x310] sm:$0xff] }
 0x2d2   :  { %2318 = vmatpush.msrb.mxu2 %v2126_v4  ;;  %2365 = vmatpush.msrb.mxu0 %v2123_v7  ;;  %v2087_v4 = vld [vmem:[%s13311_s15 + $0x98] sm:$0xff]  ;;  %v2162_v7 = vld [vmem:[%s13311_s15 + $0x2f0] sm:$0xff] }
 0x2d3   :  { %2347 = vmatpush.msra.mxu3 %v2166_v6  ;;  %2393 = vmatpush.msrb.mxu1 %v2167_v11  ;;  %v2477_v11 = vld [vmem:[%s13313_s17 + $0x1e0] sm:$0xff] }
 0x2d4   :  { %2319 = vmatpush.msrb.mxu2 %v2122_v23  ;;  %2366 = vmatpush.msrb.mxu0 %v2119_v15  ;;  %v2083_v23 = vld [vmem:[%s13311_s15 + $0x78] sm:$0xff]  ;;  %v2158_v15 = vld [vmem:[%s13311_s15 + $0x2d0] sm:$0xff] }
 0x2d5   :  { %2348 = vmatpush.msra.mxu3 %v2162_v7  ;;  %2394 = vmatpush.msrb.mxu1 %v2163_v13 }
 0x2d6   :  { %2320 = vmatpush.msrb.mxu2 %v2118_v14  ;;  %2367 = vmatpush.msrb.mxu0 %v2115_v18  ;;  %v2079_v14 = vld [vmem:[%s13311_s15 + $0x58] sm:$0xff]  ;;  %v2154_v18 = vld [vmem:[%s13311_s15 + $0x2b0] sm:$0xff] }
 0x2d7   :  { %2349 = vmatpush.msra.mxu3 %v2158_v15  ;;  %2395 = vmatpush.msrb.mxu1 %v2159_v39  ;;  %v2469_v15 = vld [vmem:[%s13313_s17 + $0x1a0] sm:$0xff]  ;;  %v2470_v39 = vld [vmem:[%s13313_s17 + $0x1a8] sm:$0xff] }
 0x2d8   :  { %2321 = vmatpush.msrb.mxu2 %v2114_v17  ;;  %2368 = vmatpush.msrb.mxu0 %v2111_v24  ;;  %v2075_v17 = vld [vmem:[%s13311_s15 + $0x38] sm:$0xff]  ;;  %v2070_v24 = vld [vmem:[%s13311_s15 + $0x10] sm:$0xff] }
 0x2d9   :  { %2350 = vmatpush.msra.mxu3 %v2154_v18  ;;  %2396 = vmatpush.msrb.mxu1 %v2155_v48  ;;  %v2466_v18 = vld [vmem:[%s13313_s17 + $0x188] sm:$0xff] }
 0x2da   :  { %2322 = vmatpush.msrb.mxu2 %v2110_v22  ;;  %2369 = vmatpush.msrb.mxu0 %v2107_v21  ;;  %v2146_v21 = vld [vmem:[%s13311_s15 + $0x270] sm:$0xff] }
 0x2db   :  { %2351 = vmatpush.msra.mxu3 %v2150_v26 }
 0x2dc   :  { %v8282_v60 = vpop.f32.mrf.mxu3  ;;  %2323 = vmatpush.msrb.mxu2 %v2106_v28  ;;  %2370 = vmatpush.msrb.mxu0 %v2103_v34  ;;  %v2151_v28 = vld [vmem:[%s13311_s15 + $0x298] sm:$0xff] }
 0x2dd   :  { %13367 = vst [vmem:[#allocation25_spill] sm:$0xff] %v8282_v60  ;;  %2397 = vmatpush.msrb.mxu1 %v2151_v28  ;;  %2352 = vmatpush.msra.mxu3 %v2146_v21  ;;  %v4520_v60 = vld [vmem:[%s13316_s20 + $0xe90] sm:$0xff] }
 0x2de   :  { %2324 = vmatpush.msrb.mxu2 %v2102_v33  ;;  %2371 = vmatpush.msrb.mxu0 %v2099_v41  ;;  %v2143_v33 = vld [vmem:[%s13311_s15 + $0x258] sm:$0xff]  ;;  %v2134_v41 = vld [vmem:[%s13311_s15 + $0x210] sm:$0xff] }
 0x2df   :  { %2398 = vmatpush.msrb.mxu1 %v2147_v31  ;;  %2353 = vmatpush.msra.mxu3 %v2142_v32  ;;  %v2541_v31 = vld [vmem:[%s13313_s17 + $0x3e0] sm:$0x3]  ;;  %v2542_v32 = vld [vmem:[%s13313_s17 + $0x3e8] sm:$0x3] }
 0x2e0   :  { %2325 = vmatpush.msrb.mxu2 %v2098_v40  ;;  %2372 = vmatpush.msrb.mxu0 %v2095_v53  ;;  %v2139_v40 = vld [vmem:[%s13311_s15 + $0x238] sm:$0xff]  ;;  %v8530_v53 = vpop.f32.mrf.mxu0  ;;  %s6127_s15 = smov 128  }
 0x2e1   :  { %2399 = vmatpush.msrb.mxu1 %v2143_v33  ;;  %2354 = vmatpush.msra.mxu3 %v2138_v45  ;;  %13379 = vst [vmem:[#allocation37_spill] sm:$0xff] %v8530_v53  ;;  %v8587_v33 = vpop.f32.mrf.mxu2  ;;  %v2457_v45 = vld [vmem:[%s13313_s17 + $0x140] sm:$0xff] }
 0x2e2   :  { %v8368_v27 = vpop.f32.mrf.mxu1  ;;  %2326 = vmatpush.msrb.mxu2 %v2094_v37  ;;  %2373 = vmatpush.msrb.mxu0 %v2091_v61  ;;  %13383 = vst [vmem:[#allocation41_spill] sm:$0xff] %v8587_v33  ;;  %v4257_v33 = vld [vmem:[%s13316_s20 + $0x658] sm:$0xff] }
 0x2e3   :  { %13370 = vst [vmem:[#allocation28_spill] sm:$0xff] %v8368_v27  ;;  %2400 = vmatpush.msrb.mxu1 %v2139_v40  ;;  %2355 = vmatpush.msra.mxu3 %v2134_v41  ;;  %v2458_v40 = vld [vmem:[%s13313_s17 + $0x148] sm:$0xff]  ;;  %v2537_v41 = vld [vmem:[%s13313_s17 + $0x3c0] sm:$0xff] }
 0x2e4   :  { %2327 = vmatpush.msrb.mxu2 %v2090_v59  ;;  %2374 = vmatpush.msrb.mxu0 %v2087_v4 }
 0x2e5   :  { %v8352_v8 = vpop.f32.mrf.mxu3  ;;  %2401 = vmatpush.msrb.mxu1 %v2135_v20  ;;  %v2538_v20 = vld [vmem:[%s13313_s17 + $0x3c8] sm:$0xff] }
 0x2e6   :  { %13369 = vst [vmem:[#allocation27_spill] sm:$0xff] %v8352_v8  ;;  %2328 = vmatpush.msrb.mxu2 %v2086_v3  ;;  %2375 = vmatpush.msrb.mxu0 %v2083_v23  ;;  %v2015_v3 = vperm.slane %v2012_v54, 1  ;;  %v2453_v54 = vld [vmem:[%s13313_s17 + $0x120] sm:$0xff] }
 0x2e8   :  { %2329 = vmatpush.msrb.mxu2 %v2082_v12  ;;  %2376 = vmatpush.msrb.mxu0 %v2079_v14  ;;  %v8537_v1 = vpop.f32.mrf.mxu0  ;;  %v2478_v12 = vld [vmem:[%s13313_s17 + $0x1e8] sm:$0xff] }
 0x2e9   :  { %13381 = vst [vmem:[#allocation39_spill] sm:$0xff] %v8537_v1  ;;  %v2474_v14 = vld [vmem:[%s13313_s17 + $0x1c8] sm:$0xff] }
 0x2ea   :  { %2330 = vmatpush.msrb.mxu2 %v2078_v5  ;;  %2377 = vmatpush.msrb.mxu0 %v2075_v17  ;;  %v2473_v5 = vld [vmem:[%s13313_s17 + $0x1c0] sm:$0xff] }
 0x2eb   :  { %v2465_v17 = vld [vmem:[%s13313_s17 + $0x180] sm:$0xff] }
 0x2ec   :  { %v8432_v2 = vpop.f32.mrf.mxu1  ;;  %2331 = vmatpush.msrb.mxu2 %v2074_v16  ;;  %2378 = vmatpush.msrb.mxu0 %v2071_v25  ;;  %v2462_v25 = vld [vmem:[%s13313_s17 + $0x168] sm:$0xff] }
 0x2ed   :  { %13372 = vst [vmem:[#allocation30_spill] sm:$0xff] %v8432_v2  ;;  %v4351_v2 = vld [vmem:[%s13316_s20 + $0x948] sm:$0xff] }
 0x2ee   :  { %2332 = vmatpush.msrb.mxu2 %v2070_v24  ;;  %v2461_v24 = vld [vmem:[%s13313_s17 + $0x160] sm:$0xff] }
 0x2f0   :  { %v8424_v63 = vpop.f32.mrf.mxu3  ;;  %v8561_v16 = vpop.f32.mrf.mxu0 }
 0x2f1   :  { %13371 = vst [vmem:[#allocation29_spill] sm:$0xff] %v8424_v63  ;;  %v4495_v63 = vld [vmem:[%s13316_s20 + $0xdc8] sm:$0xff] }
 0x2f2   :  { %13382 = vst [vmem:[#allocation40_spill] sm:$0xff] %v8561_v16  ;;  %v4153_v16 = vld [vmem:[%s13316_s20 + $0x318] sm:$0xff] }
 0x2f9   :  { %v8482_v19 = vpop.f32.mrf.mxu3 }
 0x2fa   :  { %13373 = vst [vmem:[#allocation31_spill] sm:$0xff] %v8482_v19  ;;  %v4055_v19 = vld [vmem:[%s13316_s20 + $0x8] sm:$0xff] }
 0x306   :  { %v8484_v22 = vpop.f32.mrf.mxu1 }
 0x307   :  { %13374 = vst [vmem:[#allocation32_spill] sm:$0xff] %v8484_v22  ;;  %v4111_v22 = vld [vmem:[%s13316_s20 + $0x1c8] sm:$0xff] }
 0x30e   :  { %v8510_v34 = vpop.f32.mrf.mxu3  ;;  %v8512_v38 = vpop.f32.mrf.mxu1 }
 0x30f   :  { %13375 = vst [vmem:[#allocation33_spill] sm:$0xff] %v8510_v34  ;;  %v4223_v34 = vld [vmem:[%s13316_s20 + $0x548] sm:$0xff] }
 0x310   :  { %13376 = vst [vmem:[#allocation34_spill] sm:$0xff] %v8512_v38  ;;  %v4151_v38 = vld [vmem:[%s13316_s20 + $0x308] sm:$0xff] }
 0x316   :  { %v8526_v10 = vpop.f32.mrf.mxu3  ;;  %v8528_v37 = vpop.f32.mrf.mxu1 }
 0x317   :  { %13377 = vst [vmem:[#allocation35_spill] sm:$0xff] %v8526_v10 }
 0x318   :  { %13378 = vst [vmem:[#allocation36_spill] sm:$0xff] %v8528_v37  ;;  %v3085_v37 = vld [vmem:[%s13314_s18 + $0xa80] sm:$0xff] }
 0x31e   :  { %v2035_v59 = vpop.f32.mrf.mxu3  ;;  %v8535_v61 = vpop.f32.mrf.mxu1 }
 0x31f   :  { %13380 = vst [vmem:[#allocation38_spill] sm:$0xff] %v8535_v61  ;;  %v2036_v0 = vadd.f32 %v2035_v59, %v2014_v55  ;;  %v2533_v59 = vld [vmem:[%s13313_s17 + $0x3a0] sm:$0xff] }
 0x320   :  { %v3221_v61 = vld [vmem:[%s13314_s18 + $0xec0] sm:$0xff] }
 0x321   :  { %5994 = vtanh.f32 %v2036_v0  ;;  %v2534_v0 = vld [vmem:[%s13313_s17 + $0x3a8] sm:$0xff] }
 0x326   :  { %v2038_v4 = vpop.f32.mrf.mxu3  ;;  %v2058_v6 = vpop.f32.mrf.mxu1 }
 0x327   :  { %v8545_v23 = vpop.eup %5994  ;;  %v2039_v7 = vadd.f32 %v2038_v4, %v2014_v55  ;;  %v2059_v13 = vadd.f32 %v2058_v6, %v2015_v3  ;;  %v2454_v55 = vld [vmem:[%s13313_s17 + $0x128] sm:$0xff]  ;;  %v2449_v4 = vld [vmem:[%s13313_s17 + $0x100] sm:$0xff] }
 0x328   :  { %2241 = vmatmul.f32.vlgmr.msra.gmra.mxu2 %v8545_v23  ;;  %2287 = vmatmul.f32.vlgmr.msra.gmra.mxu0 %v8545_v23  ;;  %v2450_v6 = vld [vmem:[%s13313_s17 + $0x108] sm:$0xff] }
 0x329   :  { %5996 = vtanh.f32 %v2039_v7  ;;  %2557 = vmatpush.msra.mxu2 %v2477_v11  ;;  %2603 = vmatpush.msra.mxu0 %v2478_v12  ;;  %v2529_v11 = vld [vmem:[%s13313_s17 + $0x380] sm:$0xff]  ;;  %v2530_v12 = vld [vmem:[%s13313_s17 + $0x388] sm:$0xff] }
 0x32a   :  { %5998 = vtanh.f32 %v2059_v13  ;;  %v2445_v7 = vld [vmem:[%s13313_s17 + $0xe0] sm:$0xff]  ;;  %v2446_v13 = vld [vmem:[%s13313_s17 + $0xe8] sm:$0xff] }
 0x32b   :  { %2558 = vmatpush.msra.mxu2 %v2473_v5  ;;  %2604 = vmatpush.msra.mxu0 %v2474_v14  ;;  %v2525_v14 = vld [vmem:[%s13313_s17 + $0x360] sm:$0xff] }
 0x32d   :  { %2559 = vmatpush.msra.mxu2 %v2469_v15  ;;  %2605 = vmatpush.msra.mxu0 %v2470_v39  ;;  %v2526_v15 = vld [vmem:[%s13313_s17 + $0x368] sm:$0xff]  ;;  %v8649_v39 = vpop.f32.mrf.mxu2 }
 0x32e   :  { %v2061_v48 = vpop.f32.mrf.mxu1  ;;  %13385 = vst [vmem:[#allocation43_spill] sm:$0xff] %v8649_v39 }
 0x32f   :  { %v8575_v26 = vpop.eup %5996  ;;  %2560 = vmatpush.msra.mxu2 %v2465_v17  ;;  %2606 = vmatpush.msra.mxu0 %v2466_v18  ;;  %v2062_v28 = vadd.f32 %v2061_v48, %v2015_v3  ;;  %v8619_v3 = vpop.f32.mrf.mxu0  ;;  %v2441_v17 = vld [vmem:[%s13313_s17 + $0xc0] sm:$0xff]  ;;  %v2442_v18 = vld [vmem:[%s13313_s17 + $0xc8] sm:$0xff] }
 0x330   :  { %v8577_v21 = vpop.eup %5998  ;;  %2244 = vmatmul.f32.gmra.mxu2 %v8575_v26  ;;  %2290 = vmatmul.f32.gmra.mxu0 %v8575_v26  ;;  %13384 = vst [vmem:[#allocation42_spill] sm:$0xff] %v8619_v3  ;;  %v2521_v48 = vld [vmem:[%s13313_s17 + $0x340] sm:$0xff]  ;;  %v4439_v3 = vld [vmem:[%s13316_s20 + $0xc08] sm:$0xff] }
 0x331   :  { %2561 = vmatpush.msra.mxu2 %v2461_v24  ;;  %2607 = vmatpush.msra.mxu0 %v2462_v25  ;;  %6000 = vtanh.f32 %v2062_v28  ;;  %v2522_v24 = vld [vmem:[%s13313_s17 + $0x348] sm:$0xff]  ;;  %v2437_v25 = vld [vmem:[%s13313_s17 + $0xa0] sm:$0xff] }
 0x332   :  { %5877 = vmatmul.msk.f32.vlgmr.msrb.gmra.mxu3 %vm2206_vm2, %v8577_v21  ;;  %5880 = vmatmul.msk.f32.vlgmr.msra.gmra.mxu1 %vm2206_vm2, %v8577_v21  ;;  %v2438_v28 = vld [vmem:[%s13313_s17 + $0xa8] sm:$0xff] }
 0x333   :  { %5888 = vmatpush.msk.msrb.mxu3 %vm200_vm0, %v2541_v31  ;;  %5891 = vmatpush.msk.msra.mxu1 %vm200_vm0, %v2542_v32  ;;  %v2517_v31 = vld [vmem:[%s13313_s17 + $0x320] sm:$0xff]  ;;  %v2518_v32 = vld [vmem:[%s13313_s17 + $0x328] sm:$0xff] }
 0x334   :  { %2562 = vmatpush.msra.mxu2 %v2457_v45  ;;  %2608 = vmatpush.msra.mxu0 %v2458_v40  ;;  %v2433_v40 = vld [vmem:[%s13313_s17 + $0x80] sm:$0xff] }
 0x335   :  { %2581 = vmatpush.msrb.mxu3 %v2537_v41  ;;  %2627 = vmatpush.msra.mxu1 %v2538_v20  ;;  %v2434_v41 = vld [vmem:[%s13313_s17 + $0x88] sm:$0xff]  ;;  %v2513_v20 = vld [vmem:[%s13313_s17 + $0x300] sm:$0xff] }
 0x336   :  { %2563 = vmatpush.msra.mxu2 %v2453_v54  ;;  %2609 = vmatpush.msra.mxu0 %v2454_v55  ;;  %v2514_v54 = vld [vmem:[%s13313_s17 + $0x308] sm:$0xff]  ;;  %v2429_v55 = vld [vmem:[%s13313_s17 + $0x60] sm:$0xff] }
 0x337   :  { %2582 = vmatpush.msrb.mxu3 %v2533_v59  ;;  %2628 = vmatpush.msra.mxu1 %v2534_v0  ;;  %v8639_v5 = vpop.eup %6000  ;;  %v8679_v45 = vpop.f32.mrf.mxu0  ;;  %v2430_v59 = vld [vmem:[%s13313_s17 + $0x68] sm:$0xff]  ;;  %v2509_v0 = vld [vmem:[%s13313_s17 + $0x2e0] sm:$0xff] }
 0x338   :  { %2564 = vmatpush.msra.mxu2 %v2449_v4  ;;  %2610 = vmatpush.msra.mxu0 %v2450_v6  ;;  %13386 = vst [vmem:[#allocation44_spill] sm:$0xff] %v8679_v45  ;;  %v2510_v4 = vld [vmem:[%s13313_s17 + $0x2e8] sm:$0xff]  ;;  %v8707_v6 = vpop.f32.mrf.mxu2 }
 0x339   :  { %2583 = vmatpush.msrb.mxu3 %v2529_v11  ;;  %2629 = vmatpush.msra.mxu1 %v2530_v12  ;;  %13387 = vst [vmem:[#allocation45_spill] sm:$0xff] %v8707_v6  ;;  %v2425_v11 = vld [vmem:[%s13313_s17 + $0x40] sm:$0xff]  ;;  %v2426_v12 = vld [vmem:[%s13313_s17 + $0x48] sm:$0xff] }
 0x33a   :  { %2333 = vmatmul.f32.vlgmr.msrb.gmra.mxu2 %v8545_v23  ;;  %2379 = vmatmul.f32.vlgmr.msrb.gmra.mxu0 %v8545_v23  ;;  %v4079_v45 = vld [vmem:[%s13316_s20 + $0xc8] sm:$0xff] }
 0x33b   :  { %2565 = vmatpush.msra.mxu2 %v2445_v7  ;;  %2611 = vmatpush.msra.mxu0 %v2446_v13  ;;  %v2505_v7 = vld [vmem:[%s13313_s17 + $0x2c0] sm:$0xff]  ;;  %v2506_v13 = vld [vmem:[%s13313_s17 + $0x2c8] sm:$0xff] }
 0x33c   :  { %5878 = vmatmul.msk.f32.gmra.mxu3 %vm2206_vm2, %v8639_v5  ;;  %5881 = vmatmul.msk.f32.gmra.mxu1 %vm2206_vm2, %v8639_v5 }
 0x33d   :  { %2584 = vmatpush.msrb.mxu3 %v2525_v14  ;;  %2630 = vmatpush.msra.mxu1 %v2526_v15  ;;  %v2421_v14 = vld [vmem:[%s13313_s17 + $0x20] sm:$0xff]  ;;  %v2422_v15 = vld [vmem:[%s13313_s17 + $0x28] sm:$0xff] }
 0x33e   :  { %2566 = vmatpush.msra.mxu2 %v2441_v17  ;;  %2612 = vmatpush.msra.mxu0 %v2442_v18  ;;  %v2501_v17 = vld [vmem:[%s13313_s17 + $0x2a0] sm:$0xff]  ;;  %v2502_v18 = vld [vmem:[%s13313_s17 + $0x2a8] sm:$0xff] }
 0x33f   :  { %2585 = vmatpush.msrb.mxu3 %v2521_v48  ;;  %2631 = vmatpush.msra.mxu1 %v2522_v24  ;;  %v8737_v48 = vpop.f32.mrf.mxu0  ;;  %v2417_v24 = vld [vmem:[%s13313_s17] sm:$0xff] }
 0x340   :  { %2567 = vmatpush.msra.mxu2 %v2437_v25  ;;  %2613 = vmatpush.msra.mxu0 %v2438_v28  ;;  %13388 = vst [vmem:[#allocation46_spill] sm:$0xff] %v8737_v48  ;;  %v2418_v25 = vld [vmem:[%s13313_s17 + $0x8] sm:$0xff]  ;;  %v2497_v28 = vld [vmem:[%s13313_s17 + $0x280] sm:$0xff] }
 0x341   :  { %2586 = vmatpush.msrb.mxu3 %v2517_v31  ;;  %2632 = vmatpush.msra.mxu1 %v2518_v32  ;;  %v2498_v31 = vld [vmem:[%s13313_s17 + $0x288] sm:$0xff]  ;;  %v2479_v32 = vld [vmem:[%s13313_s17 + $0x1f0] sm:$0xff] }
 0x342   :  { %2568 = vmatpush.msra.mxu2 %v2433_v40  ;;  %2614 = vmatpush.msra.mxu0 %v2434_v41  ;;  %v2480_v40 = vld [vmem:[%s13313_s17 + $0x1f8] sm:$0xff]  ;;  %v2493_v41 = vld [vmem:[%s13313_s17 + $0x260] sm:$0xff] }
 0x343   :  { %2587 = vmatpush.msrb.mxu3 %v2513_v20  ;;  %2633 = vmatpush.msra.mxu1 %v2514_v54  ;;  %v2494_v20 = vld [vmem:[%s13313_s17 + $0x268] sm:$0xff]  ;;  %v8763_v54 = vpop.f32.mrf.mxu2 }
 0x344   :  { %2336 = vmatmul.f32.gmra.mxu2 %v8575_v26  ;;  %2382 = vmatmul.f32.gmra.mxu0 %v8575_v26  ;;  %13389 = vst [vmem:[#allocation47_spill] sm:$0xff] %v8763_v54  ;;  %v4152_v54 = vld [vmem:[%s13316_s20 + $0x310] sm:$0xff] }
 0x345   :  { %2569 = vmatpush.msra.mxu2 %v2429_v55  ;;  %2615 = vmatpush.msra.mxu0 %v2430_v59  ;;  %v2475_v55 = vld [vmem:[%s13313_s17 + $0x1d0] sm:$0xff]  ;;  %v2476_v59 = vld [vmem:[%s13313_s17 + $0x1d8] sm:$0xff] }
 0x346   :  { %5883 = vmatmul.msk.f32.vlgmr.msra.gmra.mxu3 %vm2206_vm2, %v8577_v21  ;;  %5886 = vmatmul.msk.f32.vlgmr.msrb.gmra.mxu1 %vm2206_vm2, %v8577_v21 }
 0x347   :  { %2588 = vmatpush.msrb.mxu3 %v2509_v0  ;;  %2634 = vmatpush.msra.mxu1 %v2510_v4  ;;  %v2489_v0 = vld [vmem:[%s13313_s17 + $0x240] sm:$0xff]  ;;  %v2490_v4 = vld [vmem:[%s13313_s17 + $0x248] sm:$0xff] }
 0x348   :  { %2570 = vmatpush.msra.mxu2 %v2425_v11  ;;  %2616 = vmatpush.msra.mxu0 %v2426_v12  ;;  %v2471_v11 = vld [vmem:[%s13313_s17 + $0x1b0] sm:$0xff]  ;;  %v2472_v12 = vld [vmem:[%s13313_s17 + $0x1b8] sm:$0xff] }
 0x349   :  { %2589 = vmatpush.msrb.mxu3 %v2505_v7  ;;  %2635 = vmatpush.msra.mxu1 %v2506_v13  ;;  %v2485_v7 = vld [vmem:[%s13313_s17 + $0x220] sm:$0xff]  ;;  %v2486_v13 = vld [vmem:[%s13313_s17 + $0x228] sm:$0xff] }
 0x34a   :  { %2571 = vmatpush.msra.mxu2 %v2421_v14  ;;  %2617 = vmatpush.msra.mxu0 %v2422_v15  ;;  %v8795_v14 = vpop.f32.mrf.mxu0  ;;  %v2467_v15 = vld [vmem:[%s13313_s17 + $0x190] sm:$0xff] }
 0x34b   :  { %2590 = vmatpush.msrb.mxu3 %v2501_v17  ;;  %2636 = vmatpush.msra.mxu1 %v2502_v18  ;;  %13390 = vst [vmem:[#allocation48_spill] sm:$0xff] %v8795_v14  ;;  %v2468_v17 = vld [vmem:[%s13313_s17 + $0x198] sm:$0xff]  ;;  %v2481_v18 = vld [vmem:[%s13313_s17 + $0x200] sm:$0xff] }
 0x34c   :  { %2572 = vmatpush.msra.mxu2 %v2417_v24  ;;  %2618 = vmatpush.msra.mxu0 %v2418_v25  ;;  %v2482_v24 = vld [vmem:[%s13313_s17 + $0x208] sm:$0xff]  ;;  %v2463_v25 = vld [vmem:[%s13313_s17 + $0x170] sm:$0xff]  ;;  %v3029_v14 = vld [vmem:[%s13314_s18 + $0x8c0] sm:$0xff] }
 0x34d   :  { %2591 = vmatpush.msrb.mxu3 %v2497_v28  ;;  %2637 = vmatpush.msra.mxu1 %v2498_v31  ;;  %v2464_v28 = vld [vmem:[%s13313_s17 + $0x178] sm:$0xff]  ;;  %v2543_v31 = vld [vmem:[%s13313_s17 + $0x3f0] sm:$0x3] }
 0x34e   :  { %2649 = vmatpush.msrb.mxu2 %v2479_v32  ;;  %2695 = vmatpush.msrb.mxu0 %v2480_v40  ;;  %v2544_v32 = vld [vmem:[%s13313_s17 + $0x3f8] sm:$0x3]  ;;  %v8821_v40 = vpop.f32.mrf.mxu2 }
 0x34f   :  { %2573 = vmatmul.f32.vlgmr.msra.gmra.mxu2 %v8545_v23  ;;  %2619 = vmatmul.f32.vlgmr.msra.gmra.mxu0 %v8545_v23  ;;  %13391 = vst [vmem:[#allocation49_spill] sm:$0xff] %v8821_v40  ;;  %v4407_v40 = vld [vmem:[%s13316_s20 + $0xb08] sm:$0xff] }
 0x350   :  { %5884 = vmatmul.msk.f32.gmra.mxu3 %vm2206_vm2, %v8639_v5  ;;  %5887 = vmatmul.msk.f32.gmra.mxu1 %vm2206_vm2, %v8639_v5 }
 0x351   :  { %2592 = vmatpush.msrb.mxu3 %v2493_v41  ;;  %2638 = vmatpush.msra.mxu1 %v2494_v20  ;;  %v2459_v41 = vld [vmem:[%s13313_s17 + $0x150] sm:$0xff]  ;;  %v2460_v20 = vld [vmem:[%s13313_s17 + $0x158] sm:$0xff] }
 0x352   :  { %2650 = vmatpush.msrb.mxu2 %v2475_v55  ;;  %2696 = vmatpush.msrb.mxu0 %v2476_v59  ;;  %v2539_v55 = vld [vmem:[%s13313_s17 + $0x3d0] sm:$0xff]  ;;  %v2540_v59 = vld [vmem:[%s13313_s17 + $0x3d8] sm:$0xff] }
 0x353   :  { %2593 = vmatpush.msrb.mxu3 %v2489_v0  ;;  %2639 = vmatpush.msra.mxu1 %v2490_v4  ;;  %v2455_v0 = vld [vmem:[%s13313_s17 + $0x130] sm:$0xff]  ;;  %v2456_v4 = vld [vmem:[%s13313_s17 + $0x138] sm:$0xff] }
 0x354   :  { %2651 = vmatpush.msrb.mxu2 %v2471_v11  ;;  %2697 = vmatpush.msrb.mxu0 %v2472_v12  ;;  %v2535_v11 = vld [vmem:[%s13313_s17 + $0x3b0] sm:$0xff]  ;;  %v2536_v12 = vld [vmem:[%s13313_s17 + $0x3b8] sm:$0xff] }
 0x355   :  { %2594 = vmatpush.msrb.mxu3 %v2485_v7  ;;  %2640 = vmatpush.msra.mxu1 %v2486_v13  ;;  %v8855_v7 = vpop.f32.mrf.mxu0  ;;  %v2451_v13 = vld [vmem:[%s13313_s17 + $0x110] sm:$0xff] }
 0x356   :  { %2652 = vmatpush.msrb.mxu2 %v2467_v15  ;;  %2698 = vmatpush.msrb.mxu0 %v2468_v17  ;;  %13392 = vst [vmem:[#allocation50_spill] sm:$0xff] %v8855_v7  ;;  %v2452_v15 = vld [vmem:[%s13313_s17 + $0x118] sm:$0xff]  ;;  %v2531_v17 = vld [vmem:[%s13313_s17 + $0x390] sm:$0xff] }
 0x357   :  { %2595 = vmatpush.msrb.mxu3 %v2481_v18  ;;  %2641 = vmatpush.msra.mxu1 %v2482_v24  ;;  %v2532_v18 = vld [vmem:[%s13313_s17 + $0x398] sm:$0xff]  ;;  %v2447_v24 = vld [vmem:[%s13313_s17 + $0xf0] sm:$0xff] }
 0x358   :  { %2653 = vmatpush.msrb.mxu2 %v2463_v25  ;;  %2699 = vmatpush.msrb.mxu0 %v2464_v28  ;;  %v2448_v25 = vld [vmem:[%s13313_s17 + $0xf8] sm:$0xff]  ;;  %v2527_v28 = vld [vmem:[%s13313_s17 + $0x370] sm:$0xff] }
 0x359   :  { %2576 = vmatmul.f32.gmra.mxu2 %v8575_v26  ;;  %2622 = vmatmul.f32.gmra.mxu0 %v8575_v26 }
 0x35a   :  { %5894 = vmatpush.msk.msra.mxu3 %vm200_vm0, %v2543_v31  ;;  %5897 = vmatpush.msk.msrb.mxu1 %vm200_vm0, %v2544_v32  ;;  %v2528_v31 = vld [vmem:[%s13313_s17 + $0x378] sm:$0xff]  ;;  %v2443_v32 = vld [vmem:[%s13313_s17 + $0xd0] sm:$0xff]  ;;  %vm3271_vm0 = vcmask 949248  }
 0x35b   :  { %5889 = vmatmul.msk.f32.vlgmr.msrb.gmra.mxu3 %vm2206_vm2, %v8577_v21  ;;  %5892 = vmatmul.msk.f32.vlgmr.msra.gmra.mxu1 %vm2206_vm2, %v8577_v21 }
 0x35c   :  { %2654 = vmatpush.msrb.mxu2 %v2459_v41  ;;  %2700 = vmatpush.msrb.mxu0 %v2460_v20  ;;  %v2444_v41 = vld [vmem:[%s13313_s17 + $0xd8] sm:$0xff]  ;;  %v8887_v20 = vpop.f32.mrf.mxu2 }
 0x35d   :  { %2673 = vmatpush.msra.mxu3 %v2539_v55  ;;  %2719 = vmatpush.msrb.mxu1 %v2540_v59  ;;  %13393 = vst [vmem:[#allocation51_spill] sm:$0xff] %v8887_v20  ;;  %v2523_v55 = vld [vmem:[%s13313_s17 + $0x350] sm:$0xff]  ;;  %v2524_v59 = vld [vmem:[%s13313_s17 + $0x358] sm:$0xff] }
 0x35e   :  { %2655 = vmatpush.msrb.mxu2 %v2455_v0  ;;  %2701 = vmatpush.msrb.mxu0 %v2456_v4  ;;  %v2439_v0 = vld [vmem:[%s13313_s17 + $0xb0] sm:$0xff]  ;;  %v2440_v4 = vld [vmem:[%s13313_s17 + $0xb8] sm:$0xff] }
 0x35f   :  { %2674 = vmatpush.msra.mxu3 %v2535_v11  ;;  %2720 = vmatpush.msrb.mxu1 %v2536_v12  ;;  %v8905_v11 = vpop.f32.mrf.mxu0  ;;  %v2519_v12 = vld [vmem:[%s13313_s17 + $0x330] sm:$0xff] }
 0x360   :  { %2656 = vmatpush.msrb.mxu2 %v2451_v13  ;;  %2702 = vmatpush.msrb.mxu0 %v2452_v15  ;;  %13394 = vst [vmem:[#allocation52_spill] sm:$0xff] %v8905_v11  ;;  %v2520_v13 = vld [vmem:[%s13313_s17 + $0x338] sm:$0xff]  ;;  %v2435_v15 = vld [vmem:[%s13313_s17 + $0x90] sm:$0xff] }
 0x361   :  { %2675 = vmatpush.msra.mxu3 %v2531_v17  ;;  %2721 = vmatpush.msrb.mxu1 %v2532_v18  ;;  %v2436_v17 = vld [vmem:[%s13313_s17 + $0x98] sm:$0xff]  ;;  %v2515_v18 = vld [vmem:[%s13313_s17 + $0x310] sm:$0xff] }
 0x362   :  { %2657 = vmatpush.msrb.mxu2 %v2447_v24  ;;  %2703 = vmatpush.msrb.mxu0 %v2448_v25  ;;  %v2516_v24 = vld [vmem:[%s13313_s17 + $0x318] sm:$0xff]  ;;  %v2431_v25 = vld [vmem:[%s13313_s17 + $0x70] sm:$0xff] }
 0x363   :  { %2676 = vmatpush.msra.mxu3 %v2527_v28  ;;  %2722 = vmatpush.msrb.mxu1 %v2528_v31  ;;  %v2432_v28 = vld [vmem:[%s13313_s17 + $0x78] sm:$0xff]  ;;  %v2511_v31 = vld [vmem:[%s13313_s17 + $0x2f0] sm:$0xff] }
 0x364   :  { %5890 = vmatmul.msk.f32.gmra.mxu3 %vm2206_vm2, %v8639_v5  ;;  %5893 = vmatmul.msk.f32.gmra.mxu1 %vm2206_vm2, %v8639_v5 }
 0x365   :  { %2658 = vmatpush.msrb.mxu2 %v2443_v32  ;;  %2704 = vmatpush.msrb.mxu0 %v2444_v41  ;;  %v2512_v32 = vld [vmem:[%s13313_s17 + $0x2f8] sm:$0xff]  ;;  %v2427_v41 = vld [vmem:[%s13313_s17 + $0x50] sm:$0xff] }
 0x366   :  { %2677 = vmatpush.msra.mxu3 %v2523_v55  ;;  %2723 = vmatpush.msrb.mxu1 %v2524_v59  ;;  %v2428_v55 = vld [vmem:[%s13313_s17 + $0x58] sm:$0xff]  ;;  %v8943_v59 = vpop.f32.mrf.mxu2 }
 0x367   :  { %2659 = vmatpush.msrb.mxu2 %v2439_v0  ;;  %2705 = vmatpush.msrb.mxu0 %v2440_v4  ;;  %13395 = vst [vmem:[#allocation53_spill] sm:$0xff] %v8943_v59  ;;  %v2507_v0 = vld [vmem:[%s13313_s17 + $0x2d0] sm:$0xff]  ;;  %v2508_v4 = vld [vmem:[%s13313_s17 + $0x2d8] sm:$0xff]  ;;  %v3206_v59 = vld [vmem:[%s13314_s18 + $0xe48] sm:$0xff] }
 0x368   :  { %2678 = vmatpush.msra.mxu3 %v2519_v12  ;;  %2724 = vmatpush.msrb.mxu1 %v2520_v13  ;;  %v2423_v12 = vld [vmem:[%s13313_s17 + $0x30] sm:$0xff]  ;;  %v2424_v13 = vld [vmem:[%s13313_s17 + $0x38] sm:$0xff] }
 0x369   :  { %2660 = vmatpush.msrb.mxu2 %v2435_v15  ;;  %2706 = vmatpush.msrb.mxu0 %v2436_v17  ;;  %v2503_v15 = vld [vmem:[%s13313_s17 + $0x2b0] sm:$0xff]  ;;  %v2504_v17 = vld [vmem:[%s13313_s17 + $0x2b8] sm:$0xff] }
 0x36a   :  { %2679 = vmatpush.msra.mxu3 %v2515_v18  ;;  %2725 = vmatpush.msrb.mxu1 %v2516_v24  ;;  %v2419_v18 = vld [vmem:[%s13313_s17 + $0x10] sm:$0xff]  ;;  %v2420_v24 = vld [vmem:[%s13313_s17 + $0x18] sm:$0xff] }
 0x36b   :  { %2661 = vmatpush.msrb.mxu2 %v2431_v25  ;;  %2707 = vmatpush.msrb.mxu0 %v2432_v28  ;;  %v8969_v25 = vpop.f32.mrf.mxu0  ;;  %v2499_v28 = vld [vmem:[%s13313_s17 + $0x290] sm:$0xff] }
 0x36c   :  { %2680 = vmatpush.msra.mxu3 %v2511_v31  ;;  %2726 = vmatpush.msrb.mxu1 %v2512_v32  ;;  %13396 = vst [vmem:[#allocation54_spill] sm:$0xff] %v8969_v25  ;;  %v2500_v31 = vld [vmem:[%s13313_s17 + $0x298] sm:$0xff]  ;;  %v2495_v32 = vld [vmem:[%s13313_s17 + $0x270] sm:$0xff] }
 0x36d   :  { %2662 = vmatpush.msrb.mxu2 %v2427_v41  ;;  %2708 = vmatpush.msrb.mxu0 %v2428_v55  ;;  %v2869_v41 = vld [vmem:[%s13314_s18 + $0x3c0] sm:$0xff]  ;;  %v2496_v55 = vld [vmem:[%s13313_s17 + $0x278] sm:$0xff] }
 0x36e   :  { %2681 = vmatpush.msra.mxu3 %v2507_v0  ;;  %2727 = vmatpush.msrb.mxu1 %v2508_v4  ;;  %v2491_v0 = vld [vmem:[%s13313_s17 + $0x250] sm:$0xff]  ;;  %v2861_v4 = vld [vmem:[%s13314_s18 + $0x380] sm:$0xff] }
 0x36f   :  { %2663 = vmatpush.msrb.mxu2 %v2423_v12  ;;  %2709 = vmatpush.msrb.mxu0 %v2424_v13  ;;  %v2492_v12 = vld [vmem:[%s13313_s17 + $0x258] sm:$0xff]  ;;  %v8997_v13 = vpop.f32.mrf.mxu2 }
 0x370   :  { %2682 = vmatpush.msra.mxu3 %v2503_v15  ;;  %2728 = vmatpush.msrb.mxu1 %v2504_v17  ;;  %13397 = vst [vmem:[#allocation55_spill] sm:$0xff] %v8997_v13  ;;  %v2853_v15 = vld [vmem:[%s13314_s18 + $0x340] sm:$0xff]  ;;  %v2488_v17 = vld [vmem:[%s13313_s17 + $0x238] sm:$0xff] }
 0x371   :  { %2664 = vmatpush.msrb.mxu2 %v2419_v18  ;;  %2710 = vmatpush.msrb.mxu0 %v2420_v24  ;;  %v2483_v24 = vld [vmem:[%s13313_s17 + $0x210] sm:$0xff] }
 0x372   :  { %2665 = vmatmul.f32.vlgmr.msrb.gmra.mxu2 %v8545_v23  ;;  %2683 = vmatpush.msra.mxu3 %v2499_v28  ;;  %v2484_v28 = vld [vmem:[%s13313_s17 + $0x218] sm:$0xff] }
 0x373   :  { %2711 = vmatmul.f32.vlgmr.msrb.gmra.mxu0 %v8545_v23  ;;  %2729 = vmatpush.msrb.mxu1 %v2500_v31  ;;  %v2487_v23 = vld [vmem:[%s13313_s17 + $0x230] sm:$0xff]  ;;  %v9008_v18 = vpop.f32.mrf.mxu0  ;;  %v2997_v31 = vld [vmem:[%s13314_s18 + $0x7c0] sm:$0xff] }
 0x374   :  { %2684 = vmatpush.msra.mxu3 %v2495_v32  ;;  %3302 = vmatpush.msra.mxu2 %v2869_v41  ;;  %13398 = vst [vmem:[#allocation56_spill] sm:$0xff] %v9008_v18  ;;  %v2845_v32 = vld [vmem:[%s13314_s18 + $0x300] sm:$0xff]  ;;  %v4096_v18 = vld [vmem:[%s13316_s20 + $0x150] sm:$0xff] }
 0x375   :  { %2730 = vmatpush.msrb.mxu1 %v2496_v55  ;;  %v2989_v41 = vld [vmem:[%s13314_s18 + $0x780] sm:$0xff] }
 0x376   :  { %2685 = vmatpush.msra.mxu3 %v2491_v0  ;;  %3303 = vmatpush.msra.mxu2 %v2861_v4  ;;  %v2837_v55 = vld [vmem:[%s13314_s18 + $0x2c0] sm:$0xff] }
 0x377   :  { %2731 = vmatpush.msrb.mxu1 %v2492_v12  ;;  %v9037_v0 = vpop.f32.mrf.mxu2  ;;  %v2965_v12 = vld [vmem:[%s13314_s18 + $0x6c0] sm:$0xff] }
 0x378   :  { %2686 = vmatpush.msra.mxu3 %v2487_v23  ;;  %3304 = vmatpush.msra.mxu2 %v2853_v15  ;;  %13399 = vst [vmem:[#allocation57_spill] sm:$0xff] %v9037_v0  ;;  %v2957_v23 = vld [vmem:[%s13314_s18 + $0x680] sm:$0xff]  ;;  %v4319_v0 = vld [vmem:[%s13316_s20 + $0x848] sm:$0xff] }
 0x379   :  { %2732 = vmatpush.msrb.mxu1 %v2488_v17  ;;  %v2949_v15 = vld [vmem:[%s13314_s18 + $0x640] sm:$0xff] }
 0x37a   :  { %2668 = vmatmul.f32.gmra.mxu2 %v8575_v26  ;;  %2687 = vmatpush.msra.mxu3 %v2483_v24  ;;  %v2829_v17 = vld [vmem:[%s13314_s18 + $0x280] sm:$0xff] }
 0x37b   :  { %2714 = vmatmul.f32.gmra.mxu0 %v8575_v26  ;;  %2733 = vmatpush.msrb.mxu1 %v2484_v28  ;;  %v2981_v26 = vld [vmem:[%s13314_s18 + $0x740] sm:$0xff]  ;;  %v9042_v4 = vpop.f32.mrf.mxu0 }
 0x37c   :  { %5895 = vmatmul.msk.f32.vlgmr.msra.gmra.mxu3 %vm2206_vm2, %v8577_v21  ;;  %5898 = vmatmul.msk.f32.vlgmr.msrb.gmra.mxu1 %vm2206_vm2, %v8577_v21  ;;  %v2973_v21 = vld [vmem:[%s13314_s18 + $0x700] sm:$0xff]  ;;  %13400 = vst [vmem:[#allocation58_spill] sm:$0xff] %v9042_v4 }
 0x37d   :  { %3325 = vmatpush.msrb.mxu3 %v2997_v31  ;;  %3305 = vmatpush.msra.mxu2 %v2845_v32  ;;  %v2821_v24 = vld [vmem:[%s13314_s18 + $0x240] sm:$0xff] }
 0x37e   :  { %v2813_v28 = vld [vmem:[%s13314_s18 + $0x200] sm:$0xff] }
 0x37f   :  { %3326 = vmatpush.msrb.mxu3 %v2989_v41  ;;  %3306 = vmatpush.msra.mxu2 %v2837_v55  ;;  %v9069_v31 = vpop.f32.mrf.mxu2  ;;  %v2933_v32 = vld [vmem:[%s13314_s18 + $0x5c0] sm:$0xff] }
 0x380   :  { %13401 = vst [vmem:[#allocation59_spill] sm:$0xff] %v9069_v31  ;;  %v2925_v55 = vld [vmem:[%s13314_s18 + $0x580] sm:$0xff] }
 0x381   :  { %3327 = vmatpush.msrb.mxu3 %v2981_v26  ;;  %3307 = vmatpush.msra.mxu2 %v2829_v17  ;;  %v2805_v26 = vld [vmem:[%s13314_s18 + $0x1c0] sm:$0xff] }
 0x382   :  { %v2901_v17 = vld [vmem:[%s13314_s18 + $0x4c0] sm:$0xff] }
 0x383   :  { %3328 = vmatpush.msrb.mxu3 %v2973_v21  ;;  %3308 = vmatpush.msra.mxu2 %v2821_v24  ;;  %v9074_v41 = vpop.f32.mrf.mxu0  ;;  %v2917_v21 = vld [vmem:[%s13314_s18 + $0x540] sm:$0xff] }
 0x384   :  { %5896 = vmatmul.msk.f32.gmra.mxu3 %vm2206_vm2, %v8639_v5  ;;  %5899 = vmatmul.msk.f32.gmra.mxu1 %vm2206_vm2, %v8639_v5  ;;  %v2941_v5 = vld [vmem:[%s13314_s18 + $0x600] sm:$0xff]  ;;  %13402 = vst [vmem:[#allocation60_spill] sm:$0xff] %v9074_v41  ;;  %v4247_v41 = vld [vmem:[%s13316_s20 + $0x608] sm:$0xff] }
 0x385   :  { %3329 = vmatpush.msrb.mxu3 %v2965_v12  ;;  %3309 = vmatpush.msra.mxu2 %v2813_v28  ;;  %v2797_v12 = vld [vmem:[%s13314_s18 + $0x180] sm:$0xff] }
 0x386   :  { %v2789_v24 = vld [vmem:[%s13314_s18 + $0x140] sm:$0xff] }
 0x387   :  { %3330 = vmatpush.msrb.mxu3 %v2957_v23  ;;  %3310 = vmatpush.msra.mxu2 %v2805_v26  ;;  %v2909_v23 = vld [vmem:[%s13314_s18 + $0x500] sm:$0xff] }
 0x388   :  { %v2893_v28 = vld [vmem:[%s13314_s18 + $0x480] sm:$0xff] }
 0x389   :  { %3331 = vmatpush.msrb.mxu3 %v2949_v15  ;;  %3311 = vmatpush.msra.mxu2 %v2797_v12  ;;  %v9091_v15 = vpop.f32.mrf.mxu2  ;;  %v2885_v26 = vld [vmem:[%s13314_s18 + $0x440] sm:$0xff] }
 0x38a   :  { %13403 = vst [vmem:[#allocation61_spill] sm:$0xff] %v9091_v15  ;;  %v2765_v12 = vld [vmem:[%s13314_s18 + $0x80] sm:$0xff] }
 0x38b   :  { %3332 = vmatpush.msrb.mxu3 %v2941_v5  ;;  %v2781_v5 = vld [vmem:[%s13314_s18 + $0x100] sm:$0xff]  ;;  %3312 = vmatpush.msra.mxu2 %v2789_v24 }
 0x38d   :  { %3333 = vmatpush.msrb.mxu3 %v2933_v32  ;;  %v2773_v32 = vld [vmem:[%s13314_s18 + $0xc0] sm:$0xff]  ;;  %3313 = vmatpush.msra.mxu2 %v2781_v5  ;;  %v2990_v5 = vld [vmem:[%s13314_s18 + $0x788] sm:$0xff] }
 0x38f   :  { %3334 = vmatpush.msrb.mxu3 %v2925_v55  ;;  %v9108_v55 = vpop.f32.mrf.mxu0  ;;  %3314 = vmatpush.msra.mxu2 %v2773_v32  ;;  %v3237_v32 = vld [vmem:[%s13314_s18 + $0xf40] sm:$0xff] }
 0x390   :  { %13404 = vst [vmem:[#allocation62_spill] sm:$0xff] %v9108_v55  ;;  %v4502_v55 = vld [vmem:[%s13316_s20 + $0xe00] sm:$0xff] }
 0x391   :  { %3335 = vmatpush.msrb.mxu3 %v2917_v21  ;;  %v2877_v21 = vld [vmem:[%s13314_s18 + $0x400] sm:$0xff]  ;;  %3315 = vmatpush.msra.mxu2 %v2765_v12  ;;  %v9126_v24 = vpop.f32.mrf.mxu2 }
 0x392   :  { %13405 = vst [vmem:[#allocation63_spill] sm:$0xff] %v9126_v24  ;;  %v2749_v12 = vld [vmem:[%s13314_s18] sm:$0xff]  ;;  %v4527_v24 = vld [vmem:[%s13316_s20 + $0xec8] sm:$0xff] }
 0x393   :  { %3336 = vmatpush.msrb.mxu3 %v2909_v23  ;;  %v3245_v23 = vld [vmem:[%s13314_s18 + $0xf80] sm:$0xf] }
 0x394   :  { %5900 = vmatpush.msk.msra.mxu1 %vm1002_vm8, %v3245_v23  ;;  %v3229_v23 = vld [vmem:[%s13314_s18 + $0xf00] sm:$0xff] }
 0x395   :  { %3337 = vmatpush.msrb.mxu3 %v2901_v17  ;;  %v2998_v17 = vld [vmem:[%s13314_s18 + $0x7c8] sm:$0xff] }
 0x396   :  { %3373 = vmatpush.msra.mxu1 %v3237_v32  ;;  %v2974_v32 = vld [vmem:[%s13314_s18 + $0x708] sm:$0xff] }
 0x397   :  { %3338 = vmatpush.msrb.mxu3 %v2893_v28  ;;  %v2757_v28 = vld [vmem:[%s13314_s18 + $0x40] sm:$0xff] }
 0x398   :  { %3316 = vmatpush.msra.mxu2 %v2757_v28  ;;  %v3125_v28 = vld [vmem:[%s13314_s18 + $0xbc0] sm:$0xff]  ;;  %3374 = vmatpush.msra.mxu1 %v3229_v23 }
 0x399   :  { %3339 = vmatpush.msrb.mxu3 %v2885_v26  ;;  %v9137_v26 = vpop.f32.mrf.mxu0  ;;  %3348 = vmatpush.msra.mxu0 %v3125_v28  ;;  %v3117_v23 = vld [vmem:[%s13314_s18 + $0xb80] sm:$0xff]  ;;  %v9169_v7 = vpop.f32.mrf.mxu2 }
 0x39a   :  { %13406 = vst [vmem:[#allocation64_spill] sm:$0xff] %v9137_v26  ;;  %3317 = vmatpush.msra.mxu2 %v2749_v12  ;;  %3375 = vmatpush.msra.mxu1 %v3221_v61  ;;  %v2966_v12 = vld [vmem:[%s13314_s18 + $0x6c8] sm:$0xff]  ;;  %v3213_v61 = vld [vmem:[%s13314_s18 + $0xe80] sm:$0xff] }
 0x39b   :  { %3340 = vmatpush.msrb.mxu3 %v2877_v21  ;;  %v2982_v21 = vld [vmem:[%s13314_s18 + $0x748] sm:$0xff]  ;;  %13407 = vst [vmem:[#allocation65_spill] sm:$0xff] %v9169_v7  ;;  %3349 = vmatpush.msra.mxu0 %v3117_v23  ;;  %v3109_v28 = vld [vmem:[%s13314_s18 + $0xb40] sm:$0xff] }
 0x39c   :  { %3376 = vmatpush.msra.mxu1 %v3213_v61  ;;  %v2950_v23 = vld [vmem:[%s13314_s18 + $0x648] sm:$0xff]  ;;  %v3101_v61 = vld [vmem:[%s13314_s18 + $0xb00] sm:$0xff] }
 0x39d   :  { %3417 = vmatpush.msra.mxu3 %v2998_v17  ;;  %v2870_v17 = vld [vmem:[%s13314_s18 + $0x3c8] sm:$0xff]  ;;  %3350 = vmatpush.msra.mxu0 %v3109_v28  ;;  %v3093_v28 = vld [vmem:[%s13314_s18 + $0xac0] sm:$0xff] }
 0x39e   :  { %3394 = vmatpush.msrb.mxu2 %v2870_v17  ;;  %v2958_v17 = vld [vmem:[%s13314_s18 + $0x688] sm:$0xff] }
 0x39f   :  { %3418 = vmatpush.msra.mxu3 %v2990_v5  ;;  %v2862_v5 = vld [vmem:[%s13314_s18 + $0x388] sm:$0xff]  ;;  %3351 = vmatpush.msra.mxu0 %v3101_v61 }
 0x3a0   :  { %3395 = vmatpush.msrb.mxu2 %v2862_v5  ;;  %v3205_v5 = vld [vmem:[%s13314_s18 + $0xe40] sm:$0xff]  ;;  %v2902_v7 = vld [vmem:[%s13314_s18 + $0x4c8] sm:$0xff] }
 0x3a1   :  { %3419 = vmatpush.msra.mxu3 %v2982_v21  ;;  %v2854_v21 = vld [vmem:[%s13314_s18 + $0x348] sm:$0xff]  ;;  %3377 = vmatpush.msra.mxu1 %v3205_v5  ;;  %v3189_v5 = vld [vmem:[%s13314_s18 + $0xdc0] sm:$0xff]  ;;  %v9221_v30 = vpop.f32.mrf.mxu2 }
 0x3a2   :  { %3396 = vmatpush.msrb.mxu2 %v2854_v21  ;;  %v3197_v21 = vld [vmem:[%s13314_s18 + $0xe00] sm:$0xff]  ;;  %3352 = vmatpush.msra.mxu0 %v3093_v28  ;;  %13409 = vst [vmem:[#allocation67_spill] sm:$0xff] %v9221_v30  ;;  %v2926_v28 = vld [vmem:[%s13314_s18 + $0x588] sm:$0xff] }
 0x3a3   :  { %3420 = vmatpush.msra.mxu3 %v2974_v32  ;;  %v9183_v32 = vpop.f32.mrf.mxu0  ;;  %3378 = vmatpush.msra.mxu1 %v3197_v21  ;;  %v2910_v30 = vld [vmem:[%s13314_s18 + $0x508] sm:$0xff] }
 0x3a4   :  { %13408 = vst [vmem:[#allocation66_spill] sm:$0xff] %v9183_v32  ;;  %v2942_v32 = vld [vmem:[%s13314_s18 + $0x608] sm:$0xff]  ;;  %3353 = vmatpush.msra.mxu0 %v3085_v37  ;;  %v3173_v37 = vld [vmem:[%s13314_s18 + $0xd40] sm:$0xff] }
 0x3a5   :  { %3421 = vmatpush.msra.mxu3 %v2966_v12  ;;  %v2846_v12 = vld [vmem:[%s13314_s18 + $0x308] sm:$0xff]  ;;  %3379 = vmatpush.msra.mxu1 %v3189_v5  ;;  %v3077_v5 = vld [vmem:[%s13314_s18 + $0xa40] sm:$0xff] }
 0x3a6   :  { %3397 = vmatpush.msrb.mxu2 %v2846_v12  ;;  %v2830_v12 = vld [vmem:[%s13314_s18 + $0x288] sm:$0xff]  ;;  %3354 = vmatpush.msra.mxu0 %v3077_v5  ;;  %v3061_v5 = vld [vmem:[%s13314_s18 + $0x9c0] sm:$0xff] }
 0x3a7   :  { %3422 = vmatpush.msra.mxu3 %v2958_v17  ;;  %v2838_v17 = vld [vmem:[%s13314_s18 + $0x2c8] sm:$0xff] }
 0x3a8   :  { %3398 = vmatpush.msrb.mxu2 %v2838_v17  ;;  %v2822_v17 = vld [vmem:[%s13314_s18 + $0x248] sm:$0xff] }
 0x3a9   :  { %3423 = vmatpush.msra.mxu3 %v2950_v23  ;;  %v2934_v23 = vld [vmem:[%s13314_s18 + $0x5c8] sm:$0xff] }
 0x3aa   :  { %3399 = vmatpush.msrb.mxu2 %v2830_v12  ;;  %v2814_v12 = vld [vmem:[%s13314_s18 + $0x208] sm:$0xff] }
 0x3ab   :  { %3424 = vmatpush.msra.mxu3 %v2942_v32  ;;  %v3181_v32 = vld [vmem:[%s13314_s18 + $0xd80] sm:$0xff]  ;;  %v9226_v61 = vpop.f32.mrf.mxu0  ;;  %v9266_v26 = vpop.f32.mrf.mxu2 }
 0x3ac   :  { %3380 = vmatpush.msra.mxu1 %v3181_v32  ;;  %3400 = vmatpush.msrb.mxu2 %v2822_v17  ;;  %v3069_v32 = vld [vmem:[%s13314_s18 + $0xa00] sm:$0xff] }
 0x3ad   :  { %3425 = vmatpush.msra.mxu3 %v2934_v23  ;;  %v2918_v23 = vld [vmem:[%s13314_s18 + $0x548] sm:$0xff]  ;;  %v3165_v17 = vld [vmem:[%s13314_s18 + $0xd00] sm:$0xff]  ;;  %3355 = vmatpush.msra.mxu0 %v3069_v32 }
 0x3ae   :  { %3381 = vmatpush.msra.mxu1 %v3173_v37  ;;  %3401 = vmatpush.msrb.mxu2 %v2814_v12  ;;  %v3157_v37 = vld [vmem:[%s13314_s18 + $0xcc0] sm:$0xff] }
 0x3af   :  { %v9228_v21 = vpop.f32.mrf.mxu1  ;;  %3426 = vmatpush.msra.mxu3 %v2926_v28  ;;  %v2806_v28 = vld [vmem:[%s13314_s18 + $0x1c8] sm:$0xff]  ;;  %3356 = vmatpush.msra.mxu0 %v3061_v5  ;;  %v3053_v32 = vld [vmem:[%s13314_s18 + $0x980] sm:$0xff] }
 0x3b0   :  { %3382 = vmatpush.msra.mxu1 %v3165_v17  ;;  %3402 = vmatpush.msrb.mxu2 %v2806_v28  ;;  %v2790_v5 = vld [vmem:[%s13314_s18 + $0x148] sm:$0xff] }
 0x3b1   :  { %3427 = vmatpush.msra.mxu3 %v2918_v23  ;;  %v2798_v23 = vld [vmem:[%s13314_s18 + $0x188] sm:$0xff]  ;;  %3357 = vmatpush.msra.mxu0 %v3053_v32 }
 0x3b2   :  { %3383 = vmatpush.msra.mxu1 %v3157_v37  ;;  %3403 = vmatpush.msrb.mxu2 %v2798_v23  ;;  %v2894_v37 = vld [vmem:[%s13314_s18 + $0x488] sm:$0xff]  ;;  %v3141_v23 = vld [vmem:[%s13314_s18 + $0xc40] sm:$0xff] }
 0x3b3   :  { %3428 = vmatpush.msra.mxu3 %v2910_v30  ;;  %v3149_v30 = vld [vmem:[%s13314_s18 + $0xc80] sm:$0xff]  ;;  %v9282_v17 = vpop.f32.mrf.mxu0  ;;  %v2782_v32 = vld [vmem:[%s13314_s18 + $0x108] sm:$0xff] }
 0x3b4   :  { %3384 = vmatpush.msra.mxu1 %v3149_v30  ;;  %3404 = vmatpush.msrb.mxu2 %v2790_v5  ;;  %v2886_v30 = vld [vmem:[%s13314_s18 + $0x448] sm:$0xff]  ;;  %v3037_v5 = vld [vmem:[%s13314_s18 + $0x900] sm:$0xff] }
 0x3b5   :  { %v9268_v12 = vpop.f32.mrf.mxu3  ;;  %3429 = vmatpush.msra.mxu3 %v2902_v7  ;;  %v3045_v7 = vld [vmem:[%s13314_s18 + $0x940] sm:$0xff] }
 0x3b6   :  { %3358 = vmatpush.msra.mxu0 %v3045_v7  ;;  %3385 = vmatpush.msra.mxu1 %v3141_v23  ;;  %v2878_v7 = vld [vmem:[%s13314_s18 + $0x408] sm:$0xff] }
 0x3b7   :  { %3430 = vmatpush.msra.mxu3 %v2894_v37  ;;  %v3133_v37 = vld [vmem:[%s13314_s18 + $0xc00] sm:$0xff]  ;;  %3405 = vmatpush.msrb.mxu2 %v2782_v32  ;;  %v3126_v23 = vld [vmem:[%s13314_s18 + $0xbc8] sm:$0xff]  ;;  %v9322_v32 = vpop.f32.mrf.mxu2 }
 0x3b8   :  { %3359 = vmatpush.msra.mxu0 %v3037_v5  ;;  %3386 = vmatpush.msra.mxu1 %v3133_v37  ;;  %v3118_v5 = vld [vmem:[%s13314_s18 + $0xb88] sm:$0xff]  ;;  %v3021_v37 = vld [vmem:[%s13314_s18 + $0x880] sm:$0xff] }
 0x3b9   :  { %v9284_v28 = vpop.f32.mrf.mxu1  ;;  %3431 = vmatpush.msra.mxu3 %v2886_v30  ;;  %3406 = vmatpush.msrb.mxu2 %v2774_v56  ;;  %v2758_v56 = vld [vmem:[%s13314_s18 + $0x48] sm:$0xff] }
 0x3ba   :  { %3440 = vmatpush.msrb.mxu1 %v3126_v23  ;;  %3360 = vmatpush.msra.mxu0 %v3029_v14  ;;  %v3110_v14 = vld [vmem:[%s13314_s18 + $0xb48] sm:$0xff] }
 0x3bb   :  { %3432 = vmatpush.msra.mxu3 %v2878_v7  ;;  %3407 = vmatpush.msrb.mxu2 %v2766_v9  ;;  %v9341_v7 = vpop.f32.mrf.mxu0  ;;  %v3013_v9 = vld [vmem:[%s13314_s18 + $0x840] sm:$0xff] }
 0x3bc   :  { %3441 = vmatpush.msrb.mxu1 %v3118_v5  ;;  %3361 = vmatpush.msra.mxu0 %v3021_v37  ;;  %v2750_v5 = vld [vmem:[%s13314_s18 + $0x8] sm:$0xff] }
 0x3bd   :  { %3408 = vmatpush.msrb.mxu2 %v2758_v56  ;;  %v3102_v37 = vld [vmem:[%s13314_s18 + $0xb08] sm:$0xff]  ;;  %v3005_v56 = vld [vmem:[%s13314_s18 + $0x800] sm:$0xff] }
 0x3be   :  { %3442 = vmatpush.msrb.mxu1 %v3110_v14  ;;  %3362 = vmatpush.msra.mxu0 %v3013_v9  ;;  %v3246_v14 = vld [vmem:[%s13314_s18 + $0xf88] sm:$0xf]  ;;  %v9366_v9 = vld [vmem:[%s13312_s16] sm:$0xf] }
 0x3bf   :  { %v9324_v30 = vpop.f32.mrf.mxu3  ;;  %3409 = vmatpush.msrb.mxu2 %v2750_v5  ;;  %v3086_v5 = vld [vmem:[%s13314_s18 + $0xa88] sm:$0xff]  ;;  %v2199_v25 = vperm.slane %v9366_v9, 1  ;;  %v2198_v11 = vperm.slane %v9366_v9, 0 }
 0x3c0   :  { %3443 = vmatpush.msrb.mxu1 %v3102_v37  ;;  %3363 = vmatpush.msra.mxu0 %v3005_v56  ;;  %v3238_v37 = vld [vmem:[%s13314_s18 + $0xf48] sm:$0xff]  ;;  %v9375_v56 = vpop.f32.mrf.mxu2 }
 0x3c1   :  { %v2289_v35 = vadd.f32 %v9226_v61, %v2199_v25  ;;  %v3046_v61 = vld [vmem:[%s13314_s18 + $0x948] sm:$0xff]  ;;  %v2292_v53 = vadd.f32 %v9282_v17, %v2199_v25 }
 0x3c2   :  { %5903 = vmatpush.msk.msrb.mxu0 %vm1002_vm8, %v3246_v14  ;;  %3444 = vmatpush.msrb.mxu1 %v3094_v62  ;;  %v3078_v62 = vld [vmem:[%s13314_s18 + $0xa48] sm:$0xff] }
 0x3c3   :  { %v9346_v23 = vpop.f32.mrf.mxu1  ;;  %v3230_v14 = vld [vmem:[%s13314_s18 + $0xf08] sm:$0xff]  ;;  %v9392_v1 = vpop.f32.mrf.mxu0 }
 0x3c4   :  { %3465 = vmatpush.msrb.mxu0 %v3238_v37  ;;  %3445 = vmatpush.msrb.mxu1 %v3086_v5  ;;  %v3222_v37 = vld [vmem:[%s13314_s18 + $0xec8] sm:$0xff] }
 0x3c5   :  { %v3062_v5 = vld [vmem:[%s13314_s18 + $0x9c8] sm:$0xff] }
 0x3c6   :  { %3466 = vmatpush.msrb.mxu0 %v3230_v14  ;;  %3446 = vmatpush.msrb.mxu1 %v3078_v62  ;;  %v3214_v14 = vld [vmem:[%s13314_s18 + $0xe88] sm:$0xff]  ;;  %v2312_v62 = vadd.f32 %v9228_v21, %v2289_v35 }
 0x3c7   :  { %v3038_v21 = vld [vmem:[%s13314_s18 + $0x908] sm:$0xff] }
 0x3c8   :  { %3467 = vmatpush.msrb.mxu0 %v3222_v37  ;;  %3447 = vmatpush.msrb.mxu1 %v3070_v58  ;;  %v3054_v37 = vld [vmem:[%s13314_s18 + $0x988] sm:$0xff]  ;;  %v9417_v35 = vpop.f32.mrf.mxu2  ;;  %6002 = vtanh.f32 %v2312_v62 }
 0x3c9   :  { %v9378_v13 = vpop.f32.mrf.mxu3  ;;  %v3198_v58 = vld [vmem:[%s13314_s18 + $0xe08] sm:$0xff] }
 0x3ca   :  { %3468 = vmatpush.msrb.mxu0 %v3214_v14  ;;  %3448 = vmatpush.msrb.mxu1 %v3062_v5  ;;  %v2243_v5 = vadd.f32 %v9266_v26, %v2198_v11  ;;  %v3022_v62 = vld [vmem:[%s13314_s18 + $0x888] sm:$0xff] }
 0x3cb   :  { %v3166_v25 = vld [vmem:[%s13314_s18 + $0xd08] sm:$0xff] }
 0x3cc   :  { %3469 = vmatpush.msrb.mxu0 %v3206_v59  ;;  %3449 = vmatpush.msrb.mxu1 %v3054_v37  ;;  %v3190_v59 = vld [vmem:[%s13314_s18 + $0xdc8] sm:$0xff]  ;;  %v2620_v36 = vpop.f32.mrf.mxu0 }
 0x3cd   :  { %v9401_v42 = vpop.f32.mrf.mxu1  ;;  %v3030_v37 = vld [vmem:[%s13314_s18 + $0x8c8] sm:$0xff] }
 0x3ce   :  { %3470 = vmatpush.msrb.mxu0 %v3198_v58  ;;  %3450 = vmatpush.msrb.mxu1 %v3046_v61  ;;  %v2266_v58 = vadd.f32 %v9268_v12, %v2243_v5  ;;  %v3174_v61 = vld [vmem:[%s13314_s18 + $0xd48] sm:$0xff]  ;;  %v2315_v12 = vadd.f32 %v9284_v28, %v2292_v53  ;;  %v2999_v5 = vld [vmem:[%s13314_s18 + $0x7d0] sm:$0xff]  ;;  %v2246_v28 = vadd.f32 %v9322_v32, %v2198_v11 }
 0x3cf   :  { %v3158_v53 = vld [vmem:[%s13314_s18 + $0xcc8] sm:$0xff] }
 0x3d0   :  { %3471 = vmatpush.msrb.mxu0 %v3190_v59  ;;  %3451 = vmatpush.msrb.mxu1 %v3038_v21  ;;  %v6003_v59 = vpop.eup %6002  ;;  %6004 = vtanh.f32 %v2266_v58  ;;  %v2991_v58 = vld [vmem:[%s13314_s18 + $0x790] sm:$0xff]  ;;  %v3150_v11 = vld [vmem:[%s13314_s18 + $0xc88] sm:$0xff] }
 0x3d1   :  { %6006 = vtanh.f32 %v2315_v12 }
 0x3d2   :  { %3472 = vmatpush.msrb.mxu0 %v3182_v49  ;;  %3452 = vmatpush.msrb.mxu1 %v3030_v37  ;;  %v3014_v49 = vld [vmem:[%s13314_s18 + $0x848] sm:$0xff]  ;;  %v2574_v37 = vpop.f32.mrf.mxu2 }
 0x3d3   :  { %v9426_v14 = vpop.f32.mrf.mxu3 }
 0x3d4   :  { %3473 = vmatpush.msrb.mxu0 %v3174_v61  ;;  %3453 = vmatpush.msrb.mxu1 %v3022_v62  ;;  %v2269_v62 = vadd.f32 %v9324_v30, %v2246_v28  ;;  %v2871_v30 = vld [vmem:[%s13314_s18 + $0x3d0] sm:$0xff] }
 0x3d5   :  { %v2863_v28 = vld [vmem:[%s13314_s18 + $0x390] sm:$0xff] }
 0x3d6   :  { %3474 = vmatpush.msrb.mxu0 %v3166_v25  ;;  %3454 = vmatpush.msrb.mxu1 %v3014_v49  ;;  %v6005_v32 = vpop.eup %6004  ;;  %v2623_v12 = vpop.f32.mrf.mxu0  ;;  %v2975_v25 = vld [vmem:[%s13314_s18 + $0x710] sm:$0xff]  ;;  %6008 = vtanh.f32 %v2269_v62 }
 0x3d7   :  { %v2855_v62 = vld [vmem:[%s13314_s18 + $0x350] sm:$0xff] }
 0x3d8   :  { %v2643_v26 = vpop.f32.mrf.mxu1  ;;  %3475 = vmatpush.msrb.mxu0 %v3158_v53  ;;  %v6007_v53 = vpop.eup %6006 }
 0x3d9   :  { %v2644_v21 = vadd.f32 %v2643_v26, %v2620_v36  ;;  %v3006_v36 = vld [vmem:[%s13314_s18 + $0x808] sm:$0xff] }
 0x3da   :  { %3455 = vmatpush.msrb.mxu1 %v3006_v36  ;;  %3476 = vmatpush.msrb.mxu0 %v3150_v11 }
 0x3db   :  { %v9449_v17 = vadd.f32 %v6003_v59, %v2644_v21  ;;  %v2983_v21 = vld [vmem:[%s13314_s18 + $0x750] sm:$0xff] }
 0x3dd   :  { %3341 = vmatmul.f32.vlgmr.msrb.gmra.mxu3 %v9449_v17 }
 0x3de   :  { %3509 = vmatpush.msrb.mxu3 %v2999_v5  ;;  %v2597_v26 = vpop.f32.mrf.mxu3  ;;  %v3142_v5 = vld [vmem:[%s13314_s18 + $0xc48] sm:$0xff] }
 0x3df   :  { %v2598_v61 = vadd.f32 %v2597_v26, %v2574_v37  ;;  %3477 = vmatpush.msrb.mxu0 %v3142_v5  ;;  %v3134_v37 = vld [vmem:[%s13314_s18 + $0xc08] sm:$0xff]  ;;  %v2967_v26 = vld [vmem:[%s13314_s18 + $0x6d0] sm:$0xff] }
 0x3e0   :  { %3510 = vmatpush.msrb.mxu3 %v2991_v58  ;;  %v2839_v5 = vld [vmem:[%s13314_s18 + $0x2d0] sm:$0xff] }
 0x3e1   :  { %v9472_v59 = vadd.f32 %v6005_v32, %v2598_v61  ;;  %v2646_v49 = vpop.f32.mrf.mxu1  ;;  %3478 = vmatpush.msrb.mxu0 %v3134_v37  ;;  %v2959_v61 = vld [vmem:[%s13314_s18 + $0x690] sm:$0xff] }
 0x3e2   :  { %v2647_v36 = vadd.f32 %v2646_v49, %v2623_v12  ;;  %3511 = vmatpush.msrb.mxu3 %v2983_v21  ;;  %v2577_v21 = vpop.f32.mrf.mxu2  ;;  %v2847_v32 = vld [vmem:[%s13314_s18 + $0x310] sm:$0xff] }
 0x3e3   :  { %3318 = vmatmul.f32.vlgmr.msra.gmra.mxu2 %v9472_v59  ;;  %v2951_v49 = vld [vmem:[%s13314_s18 + $0x650] sm:$0xff] }
 0x3e4   :  { %v9490_v58 = vadd.f32 %v6007_v53, %v2647_v36  ;;  %3486 = vmatpush.msra.mxu2 %v2871_v30  ;;  %3512 = vmatpush.msrb.mxu3 %v2975_v25  ;;  %v6009_v30 = vpop.eup %6008  ;;  %v2943_v36 = vld [vmem:[%s13314_s18 + $0x610] sm:$0xff]  ;;  %v2201_v53 = vperm.slane %v9366_v9, 3 }
 0x3e5   :  { %v2935_v37 = vld [vmem:[%s13314_s18 + $0x5d0] sm:$0xff] }
 0x3e6   :  { %3344 = vmatmul.f32.gmra.mxu3 %v9490_v58  ;;  %3487 = vmatpush.msra.mxu2 %v2863_v28  ;;  %v2831_v28 = vld [vmem:[%s13314_s18 + $0x290] sm:$0xff] }
 0x3e7   :  { %3513 = vmatpush.msrb.mxu3 %v2967_v26  ;;  %v2600_v11 = vpop.f32.mrf.mxu3  ;;  %v2823_v26 = vld [vmem:[%s13314_s18 + $0x250] sm:$0xff] }
 0x3e8   :  { %v2601_v12 = vadd.f32 %v2600_v11, %v2577_v21  ;;  %3488 = vmatpush.msra.mxu2 %v2855_v62  ;;  %v2927_v62 = vld [vmem:[%s13314_s18 + $0x590] sm:$0xff] }
 0x3e9   :  { %3514 = vmatpush.msrb.mxu3 %v2959_v61  ;;  %v2381_v61 = vadd.f32 %v9341_v7, %v2201_v53  ;;  %v2815_v21 = vld [vmem:[%s13314_s18 + $0x210] sm:$0xff] }
 0x3ea   :  { %v9508_v25 = vadd.f32 %v6009_v30, %v2601_v12  ;;  %3489 = vmatpush.msra.mxu2 %v2847_v32  ;;  %v2919_v11 = vld [vmem:[%s13314_s18 + $0x550] sm:$0xff]  ;;  %v2200_v32 = vperm.slane %v9366_v9, 2 }
 0x3eb   :  { %3515 = vmatpush.msrb.mxu3 %v2951_v49  ;;  %v2404_v12 = vadd.f32 %v9346_v23, %v2381_v61  ;;  %v2807_v7 = vld [vmem:[%s13314_s18 + $0x1d0] sm:$0xff] }
 0x3ec   :  { %3321 = vmatmul.f32.gmra.mxu2 %v9508_v25  ;;  %v2911_v49 = vld [vmem:[%s13314_s18 + $0x510] sm:$0xff]  ;;  %v2335_v30 = vadd.f32 %v9375_v56, %v2200_v32 }
 0x3ed   :  { %3490 = vmatpush.msra.mxu2 %v2839_v5  ;;  %3516 = vmatpush.msrb.mxu3 %v2943_v36  ;;  %v2799_v9 = vld [vmem:[%s13314_s18 + $0x190] sm:$0xff]  ;;  %6010 = vtanh.f32 %v2404_v12 }
 0x3ee   :  { %3433 = vmatmul.f32.vlgmr.msra.gmra.mxu3 %v9449_v17  ;;  %v2903_v23 = vld [vmem:[%s13314_s18 + $0x4d0] sm:$0xff] }
 0x3ef   :  { %3491 = vmatpush.msra.mxu2 %v2831_v28  ;;  %3517 = vmatpush.msrb.mxu3 %v2935_v37  ;;  %v2791_v5 = vld [vmem:[%s13314_s18 + $0x150] sm:$0xff]  ;;  %v2384_v28 = vadd.f32 %v9392_v1, %v2201_v53  ;;  %v2358_v37 = vadd.f32 %v9378_v13, %v2335_v30 }
 0x3f0   :  { %v2895_v36 = vld [vmem:[%s13314_s18 + $0x490] sm:$0xff] }
 0x3f1   :  { %3492 = vmatpush.msra.mxu2 %v2823_v26  ;;  %3518 = vmatpush.msrb.mxu3 %v2927_v62  ;;  %v2712_v26 = vpop.f32.mrf.mxu0  ;;  %v2783_v56 = vld [vmem:[%s13314_s18 + $0x110] sm:$0xff]  ;;  %v2407_v61 = vadd.f32 %v9401_v42, %v2384_v28  ;;  %6012 = vtanh.f32 %v2358_v37  ;;  %v3000_v42 = vld [vmem:[%s13314_s18 + $0x7d8] sm:$0xff] }
 0x3f2   :  { %v2887_v62 = vld [vmem:[%s13314_s18 + $0x450] sm:$0xff] }
 0x3f3   :  { %3493 = vmatpush.msra.mxu2 %v2815_v21  ;;  %3519 = vmatpush.msrb.mxu3 %v2919_v11  ;;  %v2775_v1 = vld [vmem:[%s13314_s18 + $0xd0] sm:$0xff]  ;;  %v6011_v53 = vpop.eup %6010  ;;  %6014 = vtanh.f32 %v2407_v61 }
 0x3f4   :  { %3410 = vmatmul.f32.vlgmr.msrb.gmra.mxu2 %v9472_v59  ;;  %v2879_v13 = vld [vmem:[%s13314_s18 + $0x410] sm:$0xff] }
 0x3f5   :  { %3494 = vmatpush.msra.mxu2 %v2807_v7  ;;  %3520 = vmatpush.msrb.mxu3 %v2911_v49  ;;  %v3247_v7 = vld [vmem:[%s13314_s18 + $0xf90] sm:$0xf] }
 0x3f6   :  { %3436 = vmatmul.f32.gmra.mxu3 %v9490_v58  ;;  %v2767_v49 = vld [vmem:[%s13314_s18 + $0x90] sm:$0xff] }
 0x3f7   :  { %3495 = vmatpush.msra.mxu2 %v2799_v9  ;;  %3521 = vmatpush.msrb.mxu3 %v2903_v23  ;;  %v2338_v9 = vadd.f32 %v9417_v35, %v2200_v32  ;;  %v2666_v23 = vpop.f32.mrf.mxu2  ;;  %v3239_v30 = vld [vmem:[%s13314_s18 + $0xf50] sm:$0xff] }
 0x3f8   :  { %v2759_v32 = vld [vmem:[%s13314_s18 + $0x50] sm:$0xff] }
 0x3f9   :  { %v2735_v21 = vpop.f32.mrf.mxu1  ;;  %3496 = vmatpush.msra.mxu2 %v2791_v5  ;;  %3522 = vmatpush.msrb.mxu3 %v2895_v36  ;;  %v2992_v5 = vld [vmem:[%s13314_s18 + $0x798] sm:$0xff]  ;;  %v2361_v36 = vadd.f32 %v9426_v14, %v2338_v9  ;;  %v3231_v37 = vld [vmem:[%s13314_s18 + $0xf10] sm:$0xff]  ;;  %v6013_v14 = vpop.eup %6012 }
 0x3fa   :  { %v2736_v11 = vadd.f32 %v2735_v21, %v2712_v26  ;;  %v2984_v26 = vld [vmem:[%s13314_s18 + $0x758] sm:$0xff]  ;;  %v2751_v61 = vld [vmem:[%s13314_s18 + $0x10] sm:$0xff] }
 0x3fb   :  { %3497 = vmatpush.msra.mxu2 %v2783_v56  ;;  %3523 = vmatpush.msrb.mxu3 %v2887_v62  ;;  %v2715_v56 = vpop.f32.mrf.mxu0  ;;  %6016 = vtanh.f32 %v2361_v36  ;;  %v3119_v9 = vld [vmem:[%s13314_s18 + $0xb90] sm:$0xff] }
 0x3fc   :  { %v9579_v12 = vadd.f32 %v6011_v53, %v2736_v11  ;;  %3413 = vmatmul.f32.gmra.mxu2 %v9508_v25  ;;  %v6015_v53 = vpop.eup %6014 }
 0x3fd   :  { %3498 = vmatpush.msra.mxu2 %v2775_v1  ;;  %3524 = vmatpush.msrb.mxu3 %v2879_v13  ;;  %v3127_v1 = vld [vmem:[%s13314_s18 + $0xbd0] sm:$0xff] }
 0x3fe   :  { %5901 = vmatmul.msk.f32.vlgmr.msra.gmra.mxu1 %vm3271_vm0, %v9579_v12  ;;  %3525 = vmatmul.f32.vlgmr.msrb.gmra.mxu3 %v9449_v17  ;;  %v3223_v13 = vld [vmem:[%s13314_s18 + $0xed0] sm:$0xff] }
 0x3ff   :  { %3601 = vmatpush.msra.mxu3 %v3000_v42  ;;  %5906 = vmatpush.msk.msra.mxu1 %vm1002_vm8, %v3247_v7  ;;  %v2689_v35 = vpop.f32.mrf.mxu3  ;;  %v2872_v42 = vld [vmem:[%s13314_s18 + $0x3d8] sm:$0xff]  ;;  %v2669_v36 = vpop.f32.mrf.mxu2 }
 0x400   :  { %3499 = vmatpush.msra.mxu2 %v2767_v49  ;;  %v2690_v28 = vadd.f32 %v2689_v35, %v2666_v23  ;;  %v2976_v7 = vld [vmem:[%s13314_s18 + $0x718] sm:$0xff]  ;;  %v3215_v23 = vld [vmem:[%s13314_s18 + $0xe90] sm:$0xff] }
 0x401   :  { %3557 = vmatpush.msra.mxu1 %v3239_v30  ;;  %v2738_v62 = vpop.f32.mrf.mxu1  ;;  %3602 = vmatpush.msra.mxu3 %v2992_v5  ;;  %v2864_v30 = vld [vmem:[%s13314_s18 + $0x398] sm:$0xff] }
 0x402   :  { %v9612_v21 = vadd.f32 %v6013_v14, %v2690_v28  ;;  %v2739_v11 = vadd.f32 %v2738_v62, %v2715_v56  ;;  %3500 = vmatpush.msra.mxu2 %v2759_v32  ;;  %v2968_v5 = vld [vmem:[%s13314_s18 + $0x6d8] sm:$0xff]  ;;  %v3111_v32 = vld [vmem:[%s13314_s18 + $0xb50] sm:$0xff]  ;;  %v6017_v14 = vpop.eup %6016 }
 0x403   :  { %3558 = vmatpush.msra.mxu1 %v3231_v37  ;;  %3603 = vmatpush.msra.mxu3 %v2984_v26  ;;  %v3207_v37 = vld [vmem:[%s13314_s18 + $0xe50] sm:$0xff]  ;;  %v2856_v26 = vld [vmem:[%s13314_s18 + $0x358] sm:$0xff] }
 0x404   :  { %v9626_v49 = vadd.f32 %v6015_v53, %v2739_v11  ;;  %3364 = vmatmul.f32.vlgmr.msra.gmra.mxu0 %v9612_v21  ;;  %3501 = vmatpush.msra.mxu2 %v2751_v61  ;;  %v2960_v56 = vld [vmem:[%s13314_s18 + $0x698] sm:$0xff]  ;;  %v3103_v62 = vld [vmem:[%s13314_s18 + $0xb10] sm:$0xff] }
 0x405   :  { %3532 = vmatpush.msra.mxu0 %v3127_v1  ;;  %3559 = vmatpush.msra.mxu1 %v3223_v13  ;;  %v3199_v11 = vld [vmem:[%s13314_s18 + $0xe10] sm:$0xff]  ;;  %v2848_v1 = vld [vmem:[%s13314_s18 + $0x318] sm:$0xff] }
 0x406   :  { %3578 = vmatpush.msrb.mxu2 %v2872_v42  ;;  %3604 = vmatpush.msra.mxu3 %v2976_v7  ;;  %v2952_v13 = vld [vmem:[%s13314_s18 + $0x658] sm:$0xff]  ;;  %v3095_v53 = vld [vmem:[%s13314_s18 + $0xad0] sm:$0xff] }
 0x407   :  { %5902 = vmatmul.msk.f32.gmra.mxu1 %vm3271_vm0, %v9626_v49  ;;  %3502 = vmatmul.f32.vlgmr.msra.gmra.mxu2 %v9472_v59  ;;  %v2692_v35 = vpop.f32.mrf.mxu3  ;;  %v3191_v42 = vld [vmem:[%s13314_s18 + $0xdd0] sm:$0xff]  ;;  %v2840_v7 = vld [vmem:[%s13314_s18 + $0x2d8] sm:$0xff] }
 0x408   :  { %3533 = vmatpush.msra.mxu0 %v3119_v9  ;;  %3560 = vmatpush.msra.mxu1 %v3215_v23  ;;  %v2693_v28 = vadd.f32 %v2692_v35, %v2669_v36  ;;  %v2944_v9 = vld [vmem:[%s13314_s18 + $0x618] sm:$0xff]  ;;  %v3087_v23 = vld [vmem:[%s13314_s18 + $0xa90] sm:$0xff] }
 0x409   :  { %3579 = vmatpush.msrb.mxu2 %v2864_v30  ;;  %3605 = vmatpush.msra.mxu3 %v2968_v5  ;;  %v3183_v30 = vld [vmem:[%s13314_s18 + $0xd90] sm:$0xff]  ;;  %v2832_v5 = vld [vmem:[%s13314_s18 + $0x298] sm:$0xff] }
 0x40a   :  { %v9659_v61 = vadd.f32 %v6017_v14, %v2693_v28  ;;  %3528 = vmatmul.f32.gmra.mxu3 %v9490_v58  ;;  %3534 = vmatpush.msra.mxu0 %v3111_v32  ;;  %v2936_v36 = vld [vmem:[%s13314_s18 + $0x5d8] sm:$0xff]  ;;  %v3079_v35 = vld [vmem:[%s13314_s18 + $0xa50] sm:$0xff] }
 0x40b   :  { %3561 = vmatpush.msra.mxu1 %v3207_v37  ;;  %3580 = vmatpush.msrb.mxu2 %v2856_v26  ;;  %v3175_v32 = vld [vmem:[%s13314_s18 + $0xd50] sm:$0xff]  ;;  %v2824_v28 = vld [vmem:[%s13314_s18 + $0x258] sm:$0xff] }
 0x40c   :  { %3606 = vmatpush.msra.mxu3 %v2960_v56  ;;  %3535 = vmatpush.msra.mxu0 %v3103_v62  ;;  %v2928_v37 = vld [vmem:[%s13314_s18 + $0x598] sm:$0xff]  ;;  %v3071_v26 = vld [vmem:[%s13314_s18 + $0xa10] sm:$0xff] }
 0x40d   :  { %3562 = vmatpush.msra.mxu1 %v3199_v11  ;;  %3581 = vmatpush.msrb.mxu2 %v2848_v1  ;;  %v3167_v14 = vld [vmem:[%s13314_s18 + $0xd10] sm:$0xff]  ;;  %v2816_v56 = vld [vmem:[%s13314_s18 + $0x218] sm:$0xff] }
 0x40e   :  { %3607 = vmatpush.msra.mxu3 %v2952_v13  ;;  %3367 = vmatmul.f32.gmra.mxu0 %v9659_v61  ;;  %v2920_v62 = vld [vmem:[%s13314_s18 + $0x558] sm:$0xff]  ;;  %v3159_v11 = vld [vmem:[%s13314_s18 + $0xcd0] sm:$0xff] }
 0x40f   :  { %3536 = vmatpush.msra.mxu0 %v3095_v53  ;;  %3563 = vmatpush.msra.mxu1 %v3191_v42  ;;  %v3063_v1 = vld [vmem:[%s13314_s18 + $0x9d0] sm:$0xff]  ;;  %v2808_v13 = vld [vmem:[%s13314_s18 + $0x1d8] sm:$0xff] }
 0x410   :  { %3582 = vmatpush.msrb.mxu2 %v2840_v7  ;;  %3608 = vmatpush.msra.mxu3 %v2944_v9  ;;  %v2912_v53 = vld [vmem:[%s13314_s18 + $0x518] sm:$0xff]  ;;  %v3055_v42 = vld [vmem:[%s13314_s18 + $0x990] sm:$0xff] }
 0x411   :  { %3456 = vmatmul.f32.vlgmr.msrb.gmra.mxu1 %v9612_v21  ;;  %3505 = vmatmul.f32.gmra.mxu2 %v9508_v25  ;;  %v3151_v7 = vld [vmem:[%s13314_s18 + $0xc90] sm:$0xff]  ;;  %v2800_v9 = vld [vmem:[%s13314_s18 + $0x198] sm:$0xff] }
 0x412   :  { %3537 = vmatpush.msra.mxu0 %v3087_v23  ;;  %3564 = vmatpush.msra.mxu1 %v3183_v30  ;;  %v2904_v23 = vld [vmem:[%s13314_s18 + $0x4d8] sm:$0xff]  ;;  %v3047_v30 = vld [vmem:[%s13314_s18 + $0x950] sm:$0xff] }
 0x413   :  { %3583 = vmatpush.msrb.mxu2 %v2832_v5  ;;  %3609 = vmatpush.msra.mxu3 %v2936_v36  ;;  %v3143_v5 = vld [vmem:[%s13314_s18 + $0xc50] sm:$0xff]  ;;  %v2792_v36 = vld [vmem:[%s13314_s18 + $0x158] sm:$0xff] }
 0x414   :  { %3538 = vmatpush.msra.mxu0 %v3079_v35  ;;  %3565 = vmatpush.msra.mxu1 %v3175_v32  ;;  %v2896_v35 = vld [vmem:[%s13314_s18 + $0x498] sm:$0xff]  ;;  %v3039_v32 = vld [vmem:[%s13314_s18 + $0x910] sm:$0xff] }
 0x415   :  { %3584 = vmatpush.msrb.mxu2 %v2824_v28  ;;  %3610 = vmatpush.msra.mxu3 %v2928_v37  ;;  %v3135_v28 = vld [vmem:[%s13314_s18 + $0xc10] sm:$0xff]  ;;  %v2784_v37 = vld [vmem:[%s13314_s18 + $0x118] sm:$0xff] }
 0x416   :  { %3539 = vmatpush.msra.mxu0 %v3071_v26  ;;  %3566 = vmatpush.msra.mxu1 %v3167_v14  ;;  %v2888_v26 = vld [vmem:[%s13314_s18 + $0x458] sm:$0xff] }
 0x417   :  { %3585 = vmatpush.msrb.mxu2 %v2816_v56  ;;  %3611 = vmatpush.msra.mxu3 %v2920_v62  ;;  %v3128_v14 = vld [vmem:[%s13314_s18 + $0xbd8] sm:$0xff]  ;;  %v3031_v56 = vld [vmem:[%s13314_s18 + $0x8d0] sm:$0xff] }
 0x418   :  { %5904 = vmatmul.msk.f32.vlgmr.msrb.gmra.mxu0 %vm3271_vm0, %v9579_v12  ;;  %3567 = vmatpush.msra.mxu1 %v3159_v11  ;;  %v2776_v62 = vld [vmem:[%s13314_s18 + $0xd8] sm:$0xff] }
 0x419   :  { %3540 = vmatpush.msra.mxu0 %v3063_v1  ;;  %3586 = vmatpush.msrb.mxu2 %v2808_v13  ;;  %v2880_v11 = vld [vmem:[%s13314_s18 + $0x418] sm:$0xff]  ;;  %v3023_v13 = vld [vmem:[%s13314_s18 + $0x890] sm:$0xff] }
 0x41a   :  { %3612 = vmatpush.msra.mxu3 %v2912_v53  ;;  %3459 = vmatmul.f32.gmra.mxu1 %v9659_v61  ;;  %v3120_v1 = vld [vmem:[%s13314_s18 + $0xb98] sm:$0xff] }
 0x41b   :  { %3541 = vmatpush.msra.mxu0 %v3055_v42  ;;  %3568 = vmatpush.msra.mxu1 %v3151_v7  ;;  %v2768_v53 = vld [vmem:[%s13314_s18 + $0x98] sm:$0xff]  ;;  %v3001_v42 = vld [vmem:[%s13314_s18 + $0x7e0] sm:$0xff] }
 0x41c   :  { %3587 = vmatpush.msrb.mxu2 %v2800_v9  ;;  %3613 = vmatpush.msra.mxu3 %v2904_v23  ;;  %v3112_v7 = vld [vmem:[%s13314_s18 + $0xb58] sm:$0xff]  ;;  %v3015_v9 = vld [vmem:[%s13314_s18 + $0x850] sm:$0xff] }
 0x41d   :  { %3542 = vmatpush.msra.mxu0 %v3047_v30  ;;  %3569 = vmatpush.msra.mxu1 %v3143_v5  ;;  %v2760_v23 = vld [vmem:[%s13314_s18 + $0x58] sm:$0xff]  ;;  %v2993_v30 = vld [vmem:[%s13314_s18 + $0x7a0] sm:$0xff] }
 0x41e   :  { %3588 = vmatpush.msrb.mxu2 %v2792_v36  ;;  %3614 = vmatpush.msra.mxu3 %v2896_v35  ;;  %v3104_v5 = vld [vmem:[%s13314_s18 + $0xb18] sm:$0xff]  ;;  %v3007_v36 = vld [vmem:[%s13314_s18 + $0x810] sm:$0xff] }
 0x41f   :  { %3543 = vmatpush.msra.mxu0 %v3039_v32  ;;  %3570 = vmatpush.msra.mxu1 %v3135_v28  ;;  %v2752_v35 = vld [vmem:[%s13314_s18 + $0x18] sm:$0xff]  ;;  %v2985_v32 = vld [vmem:[%s13314_s18 + $0x760] sm:$0xff] }
 0x420   :  { %3589 = vmatpush.msrb.mxu2 %v2784_v37  ;;  %3615 = vmatpush.msra.mxu3 %v2888_v26  ;;  %v3096_v28 = vld [vmem:[%s13314_s18 + $0xad8] sm:$0xff]  ;;  %v2873_v26 = vld [vmem:[%s13314_s18 + $0x3e0] sm:$0xff] }
 0x421   :  { %3624 = vmatpush.msrb.mxu1 %v3128_v14  ;;  %5905 = vmatmul.msk.f32.gmra.mxu0 %vm3271_vm0, %v9626_v49  ;;  %v3248_v37 = vld [vmem:[%s13314_s18 + $0xf98] sm:$0xf]  ;;  %v2977_v14 = vld [vmem:[%s13314_s18 + $0x720] sm:$0xff] }
 0x422   :  { %3544 = vmatpush.msra.mxu0 %v3031_v56  ;;  %3590 = vmatpush.msrb.mxu2 %v2776_v62  ;;  %v3088_v56 = vld [vmem:[%s13314_s18 + $0xa98] sm:$0xff] }
 0x423   :  { %3616 = vmatpush.msra.mxu3 %v2880_v11  ;;  %3625 = vmatpush.msrb.mxu1 %v3120_v1  ;;  %v3240_v62 = vld [vmem:[%s13314_s18 + $0xf58] sm:$0xff]  ;;  %v2865_v11 = vld [vmem:[%s13314_s18 + $0x3a0] sm:$0xff] }
 0x424   :  { %3545 = vmatpush.msra.mxu0 %v3023_v13  ;;  %5907 = vmatmul.msk.f32.vlgmr.msra.gmra.mxu1 %vm3271_vm0, %v9579_v12  ;;  %v2969_v1 = vld [vmem:[%s13314_s18 + $0x6e0] sm:$0xff]  ;;  %v3080_v13 = vld [vmem:[%s13314_s18 + $0xa58] sm:$0xff] }
 0x425   :  { %3617 = vmatmul.f32.vlgmr.msra.gmra.mxu3 %v9449_v17  ;;  %3591 = vmatpush.msrb.mxu2 %v2768_v53  ;;  %v3232_v53 = vld [vmem:[%s13314_s18 + $0xf18] sm:$0xff] }
 0x426   :  { %3693 = vmatpush.msrb.mxu3 %v3001_v42  ;;  %3626 = vmatpush.msrb.mxu1 %v3112_v7  ;;  %v2857_v42 = vld [vmem:[%s13314_s18 + $0x360] sm:$0xff] }
 0x427   :  { %3546 = vmatpush.msra.mxu0 %v3015_v9  ;;  %3592 = vmatpush.msrb.mxu2 %v2760_v23  ;;  %v2961_v7 = vld [vmem:[%s13314_s18 + $0x6a0] sm:$0xff]  ;;  %v3072_v9 = vld [vmem:[%s13314_s18 + $0xa18] sm:$0xff] }
 0x428   :  { %3694 = vmatpush.msrb.mxu3 %v2993_v30  ;;  %3627 = vmatpush.msrb.mxu1 %v3104_v5  ;;  %v3224_v23 = vld [vmem:[%s13314_s18 + $0xed8] sm:$0xff]  ;;  %v2849_v30 = vld [vmem:[%s13314_s18 + $0x320] sm:$0xff] }
 0x429   :  { %3547 = vmatpush.msra.mxu0 %v3007_v36  ;;  %3593 = vmatpush.msrb.mxu2 %v2752_v35  ;;  %v2953_v5 = vld [vmem:[%s13314_s18 + $0x660] sm:$0xff]  ;;  %v3064_v36 = vld [vmem:[%s13314_s18 + $0x9d8] sm:$0xff] }
 0x42a   :  { %3695 = vmatpush.msrb.mxu3 %v2985_v32  ;;  %3628 = vmatpush.msrb.mxu1 %v3096_v28  ;;  %v3216_v35 = vld [vmem:[%s13314_s18 + $0xe98] sm:$0xff]  ;;  %v2841_v32 = vld [vmem:[%s13314_s18 + $0x2e0] sm:$0xff] }
 0x42b   :  { %5909 = vmatpush.msk.msrb.mxu0 %vm1002_vm8, %v3248_v37  ;;  %3594 = vmatmul.f32.vlgmr.msrb.gmra.mxu2 %v9472_v59  ;;  %v2945_v28 = vld [vmem:[%s13314_s18 + $0x620] sm:$0xff]  ;;  %v3056_v37 = vld [vmem:[%s13314_s18 + $0x998] sm:$0xff] }
 0x42c   :  { %3548 = vmatmul.f32.vlgmr.msra.gmra.mxu0 %v9612_v21  ;;  %3670 = vmatpush.msra.mxu2 %v2873_v26  ;;  %v3208_v26 = vld [vmem:[%s13314_s18 + $0xe58] sm:$0xff] }
 0x42d   :  { %3696 = vmatpush.msrb.mxu3 %v2977_v14  ;;  %3629 = vmatpush.msrb.mxu1 %v3088_v56  ;;  %v2833_v14 = vld [vmem:[%s13314_s18 + $0x2a0] sm:$0xff] }
 0x42e   :  { %3649 = vmatpush.msrb.mxu0 %v3240_v62  ;;  %5908 = vmatmul.msk.f32.gmra.mxu1 %vm3271_vm0, %v9626_v49  ;;  %v2937_v56 = vld [vmem:[%s13314_s18 + $0x5e0] sm:$0xff]  ;;  %v3048_v62 = vld [vmem:[%s13314_s18 + $0x958] sm:$0xff] }
 0x42f   :  { %3620 = vmatmul.f32.gmra.mxu3 %v9490_v58  ;;  %3671 = vmatpush.msra.mxu2 %v2865_v11  ;;  %v3200_v11 = vld [vmem:[%s13314_s18 + $0xe18] sm:$0xff] }
 0x430   :  { %3697 = vmatpush.msrb.mxu3 %v2969_v1  ;;  %3630 = vmatpush.msrb.mxu1 %v3080_v13  ;;  %v2825_v1 = vld [vmem:[%s13314_s18 + $0x260] sm:$0xff] }
 0x431   :  { %3650 = vmatpush.msrb.mxu0 %v3232_v53  ;;  %3672 = vmatpush.msra.mxu2 %v2857_v42  ;;  %v2929_v13 = vld [vmem:[%s13314_s18 + $0x5a0] sm:$0xff]  ;;  %v3040_v53 = vld [vmem:[%s13314_s18 + $0x918] sm:$0xff] }
 0x432   :  { %3698 = vmatpush.msrb.mxu3 %v2961_v7  ;;  %3631 = vmatpush.msrb.mxu1 %v3072_v9  ;;  %v3192_v42 = vld [vmem:[%s13314_s18 + $0xdd8] sm:$0xff]  ;;  %v2817_v7 = vld [vmem:[%s13314_s18 + $0x220] sm:$0xff] }
 0x433   :  { %3651 = vmatpush.msrb.mxu0 %v3224_v23  ;;  %3673 = vmatpush.msra.mxu2 %v2849_v30  ;;  %v2921_v9 = vld [vmem:[%s13314_s18 + $0x560] sm:$0xff]  ;;  %v3032_v23 = vld [vmem:[%s13314_s18 + $0x8d8] sm:$0xff] }
 0x434   :  { %3699 = vmatpush.msrb.mxu3 %v2953_v5  ;;  %3632 = vmatpush.msrb.mxu1 %v3064_v36  ;;  %v3184_v30 = vld [vmem:[%s13314_s18 + $0xd98] sm:$0xff]  ;;  %v2809_v5 = vld [vmem:[%s13314_s18 + $0x1e0] sm:$0xff] }
 0x435   :  { %3652 = vmatpush.msrb.mxu0 %v3216_v35  ;;  %3597 = vmatmul.f32.gmra.mxu2 %v9508_v25  ;;  %v2913_v36 = vld [vmem:[%s13314_s18 + $0x520] sm:$0xff]  ;;  %v3024_v35 = vld [vmem:[%s13314_s18 + $0x898] sm:$0xff] }
 0x436   :  { %3551 = vmatmul.f32.gmra.mxu0 %v9659_v61  ;;  %3674 = vmatpush.msra.mxu2 %v2841_v32  ;;  %v3176_v32 = vld [vmem:[%s13314_s18 + $0xd58] sm:$0xff] }
 0x437   :  { %3700 = vmatpush.msrb.mxu3 %v2945_v28  ;;  %3633 = vmatpush.msrb.mxu1 %v3056_v37  ;;  %v2801_v28 = vld [vmem:[%s13314_s18 + $0x1a0] sm:$0xff] }
 0x438   :  { %3653 = vmatpush.msrb.mxu0 %v3208_v26  ;;  %3675 = vmatpush.msra.mxu2 %v2833_v14  ;;  %v2905_v37 = vld [vmem:[%s13314_s18 + $0x4e0] sm:$0xff]  ;;  %v3016_v26 = vld [vmem:[%s13314_s18 + $0x858] sm:$0xff] }
 0x439   :  { %3701 = vmatpush.msrb.mxu3 %v2937_v56  ;;  %3634 = vmatpush.msrb.mxu1 %v3048_v62  ;;  %v3168_v14 = vld [vmem:[%s13314_s18 + $0xd18] sm:$0xff]  ;;  %v2793_v56 = vld [vmem:[%s13314_s18 + $0x160] sm:$0xff] }
 0x43a   :  { %3654 = vmatpush.msrb.mxu0 %v3200_v11  ;;  %3676 = vmatpush.msra.mxu2 %v2825_v1  ;;  %v2897_v62 = vld [vmem:[%s13314_s18 + $0x4a0] sm:$0xff]  ;;  %v3008_v11 = vld [vmem:[%s13314_s18 + $0x818] sm:$0xff] }
 0x43b   :  { %3702 = vmatpush.msrb.mxu3 %v2929_v13  ;;  %3635 = vmatpush.msrb.mxu1 %v3040_v53  ;;  %v3160_v1 = vld [vmem:[%s13314_s18 + $0xcd8] sm:$0xff]  ;;  %v2785_v13 = vld [vmem:[%s13314_s18 + $0x120] sm:$0xff] }
 0x43c   :  { %3655 = vmatpush.msrb.mxu0 %v3192_v42  ;;  %3677 = vmatpush.msra.mxu2 %v2817_v7  ;;  %v2889_v53 = vld [vmem:[%s13314_s18 + $0x460] sm:$0xff]  ;;  %v3152_v7 = vld [vmem:[%s13314_s18 + $0xc98] sm:$0xff] }
 0x43d   :  { %3703 = vmatpush.msrb.mxu3 %v2921_v9  ;;  %3636 = vmatpush.msrb.mxu1 %v3032_v23  ;;  %v3249_v42 = vld [vmem:[%s13314_s18 + $0xfa0] sm:$0xf] }
 0x43e   :  { %3656 = vmatpush.msrb.mxu0 %v3184_v30  ;;  %3678 = vmatpush.msra.mxu2 %v2809_v5  ;;  %v2777_v9 = vld [vmem:[%s13314_s18 + $0xe0] sm:$0xff]  ;;  %v3144_v5 = vld [vmem:[%s13314_s18 + $0xc58] sm:$0xff] }
 0x43f   :  { %3704 = vmatpush.msrb.mxu3 %v2913_v36  ;;  %3637 = vmatpush.msrb.mxu1 %v3024_v35  ;;  %v2881_v23 = vld [vmem:[%s13314_s18 + $0x420] sm:$0xff]  ;;  %v3002_v35 = vld [vmem:[%s13314_s18 + $0x7e8] sm:$0xff] }
 0x440   :  { %3657 = vmatpush.msrb.mxu0 %v3176_v32  ;;  %3679 = vmatpush.msra.mxu2 %v2801_v28  ;;  %v3241_v30 = vld [vmem:[%s13314_s18 + $0xf60] sm:$0xff]  ;;  %v3136_v28 = vld [vmem:[%s13314_s18 + $0xc18] sm:$0xff] }
 0x441   :  { %3705 = vmatpush.msrb.mxu3 %v2905_v37  ;;  %3638 = vmatpush.msrb.mxu1 %v3016_v26  ;;  %v2769_v36 = vld [vmem:[%s13314_s18 + $0xa0] sm:$0xff]  ;;  %v2994_v26 = vld [vmem:[%s13314_s18 + $0x7a8] sm:$0xff] }
 0x442   :  { %3658 = vmatpush.msrb.mxu0 %v3168_v14  ;;  %3680 = vmatpush.msra.mxu2 %v2793_v56  ;;  %v3233_v32 = vld [vmem:[%s13314_s18 + $0xf20] sm:$0xff] }
 0x443   :  { %3706 = vmatpush.msrb.mxu3 %v2897_v62  ;;  %3639 = vmatpush.msrb.mxu1 %v3008_v11  ;;  %v2761_v37 = vld [vmem:[%s13314_s18 + $0x60] sm:$0xff]  ;;  %v2986_v62 = vld [vmem:[%s13314_s18 + $0x768] sm:$0xff] }
 0x444   :  { %3659 = vmatpush.msrb.mxu0 %v3160_v1  ;;  %3640 = vmatmul.f32.vlgmr.msrb.gmra.mxu1 %v9612_v21  ;;  %v3129_v14 = vld [vmem:[%s13314_s18 + $0xbe0] sm:$0xff] }
 0x445   :  { %3681 = vmatpush.msra.mxu2 %v2785_v13  ;;  %3707 = vmatpush.msrb.mxu3 %v2889_v53  ;;  %v3225_v56 = vld [vmem:[%s13314_s18 + $0xee0] sm:$0xff]  ;;  %v2874_v53 = vld [vmem:[%s13314_s18 + $0x3e8] sm:$0xff] }
 0x446   :  { %5912 = vmatpush.msk.msra.mxu1 %vm1002_vm8, %v3249_v42  ;;  %3660 = vmatpush.msrb.mxu0 %v3152_v7  ;;  %v2753_v11 = vld [vmem:[%s13314_s18 + $0x20] sm:$0xff]  ;;  %v2978_v42 = vld [vmem:[%s13314_s18 + $0x728] sm:$0xff] }
 0x447   :  { %3682 = vmatpush.msra.mxu2 %v2777_v9  ;;  %3708 = vmatpush.msrb.mxu3 %v2881_v23  ;;  %v3121_v1 = vld [vmem:[%s13314_s18 + $0xba0] sm:$0xff]  ;;  %v2866_v23 = vld [vmem:[%s13314_s18 + $0x3a8] sm:$0xff] }
 0x448   :  { %3741 = vmatpush.msra.mxu1 %v3241_v30  ;;  %3661 = vmatpush.msrb.mxu0 %v3144_v5  ;;  %v3217_v13 = vld [vmem:[%s13314_s18 + $0xea0] sm:$0xff]  ;;  %v2970_v30 = vld [vmem:[%s13314_s18 + $0x6e8] sm:$0xff] }
 0x449   :  { %3709 = vmatmul.f32.vlgmr.msrb.gmra.mxu3 %v9449_v17  ;;  %3683 = vmatpush.msra.mxu2 %v2769_v36  ;;  %v3113_v7 = vld [vmem:[%s13314_s18 + $0xb60] sm:$0xff] }
 0x44a   :  { %3785 = vmatpush.msra.mxu3 %v3002_v35  ;;  %3742 = vmatpush.msra.mxu1 %v3233_v32  ;;  %v3209_v9 = vld [vmem:[%s13314_s18 + $0xe60] sm:$0xff]  ;;  %v2858_v35 = vld [vmem:[%s13314_s18 + $0x368] sm:$0xff] }
 0x44b   :  { %3662 = vmatpush.msrb.mxu0 %v3136_v28  ;;  %3684 = vmatpush.msra.mxu2 %v2761_v37  ;;  %v3105_v5 = vld [vmem:[%s13314_s18 + $0xb20] sm:$0xff]  ;;  %v2962_v32 = vld [vmem:[%s13314_s18 + $0x6a8] sm:$0xff] }
 0x44c   :  { %3786 = vmatpush.msra.mxu3 %v2994_v26  ;;  %5910 = vmatmul.msk.f32.vlgmr.msrb.gmra.mxu0 %vm3271_vm0, %v9579_v12  ;;  %v3201_v36 = vld [vmem:[%s13314_s18 + $0xe20] sm:$0xff]  ;;  %v2850_v26 = vld [vmem:[%s13314_s18 + $0x328] sm:$0xff] }
 0x44d   :  { %3716 = vmatpush.msra.mxu0 %v3129_v14  ;;  %3743 = vmatpush.msra.mxu1 %v3225_v56  ;;  %v3097_v28 = vld [vmem:[%s13314_s18 + $0xae0] sm:$0xff]  ;;  %v2954_v14 = vld [vmem:[%s13314_s18 + $0x668] sm:$0xff] }
 0x44e   :  { %3787 = vmatpush.msra.mxu3 %v2986_v62  ;;  %3643 = vmatmul.f32.gmra.mxu1 %v9659_v61  ;;  %v3193_v37 = vld [vmem:[%s13314_s18 + $0xde0] sm:$0xff] }
 0x44f   :  { %3685 = vmatpush.msra.mxu2 %v2753_v11  ;;  %3717 = vmatpush.msra.mxu0 %v3121_v1  ;;  %v3089_v56 = vld [vmem:[%s13314_s18 + $0xaa0] sm:$0xff]  ;;  %v2946_v11 = vld [vmem:[%s13314_s18 + $0x628] sm:$0xff] }
 0x450   :  { %3744 = vmatpush.msra.mxu1 %v3217_v13  ;;  %3686 = vmatmul.f32.vlgmr.msra.gmra.mxu2 %v9472_v59  ;;  %v3185_v62 = vld [vmem:[%s13314_s18 + $0xda0] sm:$0xff]  ;;  %v2842_v1 = vld [vmem:[%s13314_s18 + $0x2e8] sm:$0xff] }
 0x451   :  { %3762 = vmatpush.msrb.mxu2 %v2874_v53  ;;  %3788 = vmatpush.msra.mxu3 %v2978_v42  ;;  %v3081_v13 = vld [vmem:[%s13314_s18 + $0xa60] sm:$0xff]  ;;  %v2938_v42 = vld [vmem:[%s13314_s18 + $0x5e8] sm:$0xff] }
 0x452   :  { %3718 = vmatpush.msra.mxu0 %v3113_v7  ;;  %3745 = vmatpush.msra.mxu1 %v3209_v9  ;;  %v3177_v53 = vld [vmem:[%s13314_s18 + $0xd60] sm:$0xff]  ;;  %v2834_v7 = vld [vmem:[%s13314_s18 + $0x2a8] sm:$0xff] }
 0x453   :  { %3712 = vmatmul.f32.gmra.mxu3 %v9490_v58  ;;  %3763 = vmatpush.msrb.mxu2 %v2866_v23  ;;  %v3073_v9 = vld [vmem:[%s13314_s18 + $0xa20] sm:$0xff] }
 0x454   :  { %3789 = vmatpush.msra.mxu3 %v2970_v30  ;;  %3719 = vmatpush.msra.mxu0 %v3105_v5  ;;  %v3169_v23 = vld [vmem:[%s13314_s18 + $0xd20] sm:$0xff]  ;;  %v2930_v30 = vld [vmem:[%s13314_s18 + $0x5a8] sm:$0xff] }
 0x455   :  { %3746 = vmatpush.msra.mxu1 %v3201_v36  ;;  %3764 = vmatpush.msrb.mxu2 %v2858_v35  ;;  %v2826_v5 = vld [vmem:[%s13314_s18 + $0x268] sm:$0xff]  ;;  %v3065_v36 = vld [vmem:[%s13314_s18 + $0x9e0] sm:$0xff] }
 0x456   :  { %3790 = vmatpush.msra.mxu3 %v2962_v32  ;;  %5911 = vmatmul.msk.f32.gmra.mxu0 %vm3271_vm0, %v9626_v49  ;;  %v3161_v35 = vld [vmem:[%s13314_s18 + $0xce0] sm:$0xff]  ;;  %v2922_v32 = vld [vmem:[%s13314_s18 + $0x568] sm:$0xff] }
 0x457   :  { %3720 = vmatpush.msra.mxu0 %v3097_v28  ;;  %3747 = vmatpush.msra.mxu1 %v3193_v37  ;;  %v2818_v28 = vld [vmem:[%s13314_s18 + $0x228] sm:$0xff]  ;;  %v3057_v37 = vld [vmem:[%s13314_s18 + $0x9a0] sm:$0xff] }
 0x458   :  { %3765 = vmatpush.msrb.mxu2 %v2850_v26  ;;  %3791 = vmatpush.msra.mxu3 %v2954_v14  ;;  %v3153_v26 = vld [vmem:[%s13314_s18 + $0xca0] sm:$0xff]  ;;  %v2914_v14 = vld [vmem:[%s13314_s18 + $0x528] sm:$0xff] }
 0x459   :  { %3721 = vmatpush.msra.mxu0 %v3089_v56  ;;  %3748 = vmatpush.msra.mxu1 %v3185_v62  ;;  %v2810_v56 = vld [vmem:[%s13314_s18 + $0x1e8] sm:$0xff]  ;;  %v3049_v62 = vld [vmem:[%s13314_s18 + $0x960] sm:$0xff] }
 0x45a   :  { %3689 = vmatmul.f32.gmra.mxu2 %v9508_v25  ;;  %3792 = vmatpush.msra.mxu3 %v2946_v11  ;;  %v3145_v11 = vld [vmem:[%s13314_s18 + $0xc60] sm:$0xff] }
 0x45b   :  { %3766 = vmatpush.msrb.mxu2 %v2842_v1  ;;  %3722 = vmatpush.msra.mxu0 %v3081_v13  ;;  %v2906_v1 = vld [vmem:[%s13314_s18 + $0x4e8] sm:$0xff] }
 0x45c   :  { %3749 = vmatpush.msra.mxu1 %v3177_v53  ;;  %3793 = vmatpush.msra.mxu3 %v2938_v42  ;;  %v2802_v13 = vld [vmem:[%s13314_s18 + $0x1a8] sm:$0xff]  ;;  %v3041_v53 = vld [vmem:[%s13314_s18 + $0x920] sm:$0xff] }
 0x45d   :  { %3767 = vmatpush.msrb.mxu2 %v2834_v7  ;;  %3723 = vmatpush.msra.mxu0 %v3073_v9  ;;  %v3137_v42 = vld [vmem:[%s13314_s18 + $0xc20] sm:$0xff]  ;;  %v2898_v7 = vld [vmem:[%s13314_s18 + $0x4a8] sm:$0xff] }
 0x45e   :  { %3750 = vmatpush.msra.mxu1 %v3169_v23  ;;  %3794 = vmatpush.msra.mxu3 %v2930_v30  ;;  %v2794_v9 = vld [vmem:[%s13314_s18 + $0x168] sm:$0xff]  ;;  %v3033_v30 = vld [vmem:[%s13314_s18 + $0x8e0] sm:$0xff] }
 0x45f   :  { %3768 = vmatpush.msrb.mxu2 %v2826_v5  ;;  %3724 = vmatpush.msra.mxu0 %v3065_v36  ;;  %v3130_v23 = vld [vmem:[%s13314_s18 + $0xbe8] sm:$0xff] }
 0x460   :  { %3751 = vmatpush.msra.mxu1 %v3161_v35  ;;  %3795 = vmatpush.msra.mxu3 %v2922_v32  ;;  %v2786_v5 = vld [vmem:[%s13314_s18 + $0x128] sm:$0xff]  ;;  %v3025_v32 = vld [vmem:[%s13314_s18 + $0x8a0] sm:$0xff] }
 0x461   :  { %3769 = vmatpush.msrb.mxu2 %v2818_v28  ;;  %3725 = vmatpush.msra.mxu0 %v3057_v37  ;;  %v2890_v36 = vld [vmem:[%s13314_s18 + $0x468] sm:$0xff] }
 0x462   :  { %3752 = vmatpush.msra.mxu1 %v3153_v26  ;;  %3796 = vmatpush.msra.mxu3 %v2914_v14  ;;  %v3122_v35 = vld [vmem:[%s13314_s18 + $0xba8] sm:$0xff]  ;;  %v3017_v14 = vld [vmem:[%s13314_s18 + $0x860] sm:$0xff] }
 0x463   :  { %3770 = vmatpush.msrb.mxu2 %v2810_v56  ;;  %3726 = vmatpush.msra.mxu0 %v3049_v62  ;;  %v2778_v28 = vld [vmem:[%s13314_s18 + $0xe8] sm:$0xff]  ;;  %v3003_v62 = vld [vmem:[%s13314_s18 + $0x7f0] sm:$0xff] }
 0x464   :  { %3753 = vmatpush.msra.mxu1 %v3145_v11  ;;  %3797 = vmatpush.msra.mxu3 %v2906_v1  ;;  %v2882_v37 = vld [vmem:[%s13314_s18 + $0x428] sm:$0xff]  ;;  %v3009_v1 = vld [vmem:[%s13314_s18 + $0x820] sm:$0xff] }
 0x465   :  { %3771 = vmatpush.msrb.mxu2 %v2802_v13  ;;  %3727 = vmatpush.msra.mxu0 %v3041_v53  ;;  %v3114_v26 = vld [vmem:[%s13314_s18 + $0xb68] sm:$0xff]  ;;  %v2995_v13 = vld [vmem:[%s13314_s18 + $0x7b0] sm:$0xff] }
 0x466   :  { %3754 = vmatpush.msra.mxu1 %v3137_v42  ;;  %3798 = vmatpush.msra.mxu3 %v2898_v7  ;;  %v2770_v56 = vld [vmem:[%s13314_s18 + $0xa8] sm:$0xff] }
 0x467   :  { %5913 = vmatmul.msk.f32.vlgmr.msra.gmra.mxu1 %vm3271_vm0, %v9579_v12  ;;  %3772 = vmatpush.msrb.mxu2 %v2794_v9  ;;  %v3106_v11 = vld [vmem:[%s13314_s18 + $0xb28] sm:$0xff]  ;;  %v2987_v9 = vld [vmem:[%s13314_s18 + $0x770] sm:$0xff] }
 0x468   :  { %3808 = vmatpush.msrb.mxu1 %v3130_v23  ;;  %3728 = vmatpush.msra.mxu0 %v3033_v30  ;;  %v2762_v53 = vld [vmem:[%s13314_s18 + $0x68] sm:$0xff] }
 0x469   :  { %3773 = vmatpush.msrb.mxu2 %v2786_v5  ;;  %3799 = vmatpush.msra.mxu3 %v2890_v36  ;;  %v3098_v42 = vld [vmem:[%s13314_s18 + $0xae8] sm:$0xff]  ;;  %v2875_v36 = vld [vmem:[%s13314_s18 + $0x3f0] sm:$0xff] }
 0x46a   :  { %3809 = vmatpush.msrb.mxu1 %v3122_v35  ;;  %3729 = vmatpush.msra.mxu0 %v3025_v32  ;;  %v3250_v7 = vld [vmem:[%s13314_s18 + $0xfa8] sm:$0xf]  ;;  %v2979_v35 = vld [vmem:[%s13314_s18 + $0x730] sm:$0xff] }
 0x46b   :  { %3774 = vmatpush.msrb.mxu2 %v2778_v28  ;;  %3800 = vmatpush.msra.mxu3 %v2882_v37  ;;  %v2754_v23 = vld [vmem:[%s13314_s18 + $0x28] sm:$0xff]  ;;  %v2867_v37 = vld [vmem:[%s13314_s18 + $0x3b0] sm:$0xff] }
 0x46c   :  { %3810 = vmatpush.msrb.mxu1 %v3114_v26  ;;  %3730 = vmatpush.msra.mxu0 %v3017_v14  ;;  %v3090_v30 = vld [vmem:[%s13314_s18 + $0xaa8] sm:$0xff]  ;;  %v2971_v26 = vld [vmem:[%s13314_s18 + $0x6f0] sm:$0xff] }
 0x46d   :  { %3801 = vmatmul.f32.vlgmr.msra.gmra.mxu3 %v9449_v17  ;;  %3775 = vmatpush.msrb.mxu2 %v2770_v56  ;;  %v3242_v5 = vld [vmem:[%s13314_s18 + $0xf68] sm:$0xff] }
 0x46e   :  { %3877 = vmatpush.msrb.mxu3 %v3003_v62  ;;  %3811 = vmatpush.msrb.mxu1 %v3106_v11  ;;  %v3082_v32 = vld [vmem:[%s13314_s18 + $0xa68] sm:$0xff]  ;;  %v2859_v62 = vld [vmem:[%s13314_s18 + $0x370] sm:$0xff] }
 0x46f   :  { %3731 = vmatpush.msra.mxu0 %v3009_v1  ;;  %5914 = vmatmul.msk.f32.gmra.mxu1 %vm3271_vm0, %v9626_v49  ;;  %v3234_v28 = vld [vmem:[%s13314_s18 + $0xf28] sm:$0xff]  ;;  %v2963_v11 = vld [vmem:[%s13314_s18 + $0x6b0] sm:$0xff] }
 0x470   :  { %3878 = vmatpush.msrb.mxu3 %v2995_v13  ;;  %3732 = vmatmul.f32.vlgmr.msra.gmra.mxu0 %v9612_v21  ;;  %v3074_v14 = vld [vmem:[%s13314_s18 + $0xa28] sm:$0xff] }
 0x471   :  { %3776 = vmatpush.msrb.mxu2 %v2762_v53  ;;  %3812 = vmatpush.msrb.mxu1 %v3098_v42  ;;  %v3226_v56 = vld [vmem:[%s13314_s18 + $0xee8] sm:$0xff]  ;;  %v2851_v53 = vld [vmem:[%s13314_s18 + $0x330] sm:$0xff] }
 0x472   :  { %5915 = vmatpush.msk.msrb.mxu0 %vm1002_vm8, %v3250_v7  ;;  %3879 = vmatpush.msrb.mxu3 %v2987_v9  ;;  %v3066_v1 = vld [vmem:[%s13314_s18 + $0x9e8] sm:$0xff]  ;;  %v2955_v42 = vld [vmem:[%s13314_s18 + $0x670] sm:$0xff] }
 0x473   :  { %3777 = vmatpush.msrb.mxu2 %v2754_v23  ;;  %3813 = vmatpush.msrb.mxu1 %v3090_v30  ;;  %v3218_v13 = vld [vmem:[%s13314_s18 + $0xea8] sm:$0xff]  ;;  %v2947_v23 = vld [vmem:[%s13314_s18 + $0x630] sm:$0xff] }
 0x474   :  { %3833 = vmatpush.msrb.mxu0 %v3242_v5  ;;  %3778 = vmatmul.f32.vlgmr.msrb.gmra.mxu2 %v9472_v59  ;;  %v3058_v7 = vld [vmem:[%s13314_s18 + $0x9a8] sm:$0xff]  ;;  %v2843_v30 = vld [vmem:[%s13314_s18 + $0x2f0] sm:$0xff] }
 0x475   :  { %3854 = vmatpush.msra.mxu2 %v2875_v36  ;;  %3880 = vmatpush.msrb.mxu3 %v2979_v35  ;;  %v3210_v9 = vld [vmem:[%s13314_s18 + $0xe68] sm:$0xff]  ;;  %v2939_v35 = vld [vmem:[%s13314_s18 + $0x5f0] sm:$0xff] }
 0x476   :  { %3814 = vmatpush.msrb.mxu1 %v3082_v32  ;;  %3834 = vmatpush.msrb.mxu0 %v3234_v28  ;;  %v3050_v5 = vld [vmem:[%s13314_s18 + $0x968] sm:$0xff]  ;;  %v2835_v32 = vld [vmem:[%s13314_s18 + $0x2b0] sm:$0xff] }
 0x477   :  { %3804 = vmatmul.f32.gmra.mxu3 %v9490_v58  ;;  %3855 = vmatpush.msra.mxu2 %v2867_v37  ;;  %v3202_v36 = vld [vmem:[%s13314_s18 + $0xe28] sm:$0xff] }
 0x478   :  { %3881 = vmatpush.msrb.mxu3 %v2971_v26  ;;  %3815 = vmatpush.msrb.mxu1 %v3074_v14  ;;  %v3042_v28 = vld [vmem:[%s13314_s18 + $0x928] sm:$0xff]  ;;  %v2931_v26 = vld [vmem:[%s13314_s18 + $0x5b0] sm:$0xff] }
 0x479   :  { %3835 = vmatpush.msrb.mxu0 %v3226_v56  ;;  %3856 = vmatpush.msra.mxu2 %v2859_v62  ;;  %v3194_v37 = vld [vmem:[%s13314_s18 + $0xde8] sm:$0xff]  ;;  %v2827_v14 = vld [vmem:[%s13314_s18 + $0x270] sm:$0xff] }
 0x47a   :  { %3882 = vmatpush.msrb.mxu3 %v2963_v11  ;;  %3735 = vmatmul.f32.gmra.mxu0 %v9659_v61  ;;  %v3034_v56 = vld [vmem:[%s13314_s18 + $0x8e8] sm:$0xff]  ;;  %v2923_v11 = vld [vmem:[%s13314_s18 + $0x570] sm:$0xff] }
 0x47b   :  { %3816 = vmatpush.msrb.mxu1 %v3066_v1  ;;  %3836 = vmatpush.msrb.mxu0 %v3218_v13  ;;  %v3186_v62 = vld [vmem:[%s13314_s18 + $0xda8] sm:$0xff]  ;;  %v2819_v1 = vld [vmem:[%s13314_s18 + $0x230] sm:$0xff] }
 0x47c   :  { %3857 = vmatpush.msra.mxu2 %v2851_v53  ;;  %3883 = vmatpush.msrb.mxu3 %v2955_v42  ;;  %v3026_v13 = vld [vmem:[%s13314_s18 + $0x8a8] sm:$0xff]  ;;  %v2915_v42 = vld [vmem:[%s13314_s18 + $0x530] sm:$0xff] }
 0x47d   :  { %3817 = vmatpush.msrb.mxu1 %v3058_v7  ;;  %3837 = vmatpush.msrb.mxu0 %v3210_v9  ;;  %v3178_v53 = vld [vmem:[%s13314_s18 + $0xd68] sm:$0xff]  ;;  %v2811_v7 = vld [vmem:[%s13314_s18 + $0x1f0] sm:$0xff] }
 0x47e   :  { %3781 = vmatmul.f32.gmra.mxu2 %v9508_v25  ;;  %3884 = vmatpush.msrb.mxu3 %v2947_v23  ;;  %v3018_v9 = vld [vmem:[%s13314_s18 + $0x868] sm:$0xff] }
 0x47f   :  { %3858 = vmatpush.msra.mxu2 %v2843_v30  ;;  %3818 = vmatpush.msrb.mxu1 %v3050_v5  ;;  %v3170_v23 = vld [vmem:[%s13314_s18 + $0xd28] sm:$0xff]  ;;  %v2907_v30 = vld [vmem:[%s13314_s18 + $0x4f0] sm:$0xff] }
 0x480   :  { %3838 = vmatpush.msrb.mxu0 %v3202_v36  ;;  %3885 = vmatpush.msrb.mxu3 %v2939_v35  ;;  %v2803_v5 = vld [vmem:[%s13314_s18 + $0x1b0] sm:$0xff]  ;;  %v3010_v36 = vld [vmem:[%s13314_s18 + $0x828] sm:$0xff] }
 0x481   :  { %3859 = vmatpush.msra.mxu2 %v2835_v32  ;;  %3819 = vmatpush.msrb.mxu1 %v3042_v28  ;;  %v3162_v35 = vld [vmem:[%s13314_s18 + $0xce8] sm:$0xff]  ;;  %v2795_v32 = vld [vmem:[%s13314_s18 + $0x170] sm:$0xff] }
 0x482   :  { %3839 = vmatpush.msrb.mxu0 %v3194_v37  ;;  %3886 = vmatpush.msrb.mxu3 %v2931_v26  ;;  %v2899_v28 = vld [vmem:[%s13314_s18 + $0x4b0] sm:$0xff]  ;;  %v3154_v26 = vld [vmem:[%s13314_s18 + $0xca8] sm:$0xff] }
 0x483   :  { %3860 = vmatpush.msra.mxu2 %v2827_v14  ;;  %3820 = vmatpush.msrb.mxu1 %v3034_v56  ;;  %v3251_v37 = vld [vmem:[%s13314_s18 + $0xfb0] sm:$0xf] }
 0x484   :  { %3840 = vmatpush.msrb.mxu0 %v3186_v62  ;;  %3887 = vmatpush.msrb.mxu3 %v2923_v11  ;;  %v2787_v14 = vld [vmem:[%s13314_s18 + $0x130] sm:$0xff]  ;;  %v3146_v11 = vld [vmem:[%s13314_s18 + $0xc68] sm:$0xff] }
 0x485   :  { %3861 = vmatpush.msra.mxu2 %v2819_v1  ;;  %3821 = vmatpush.msrb.mxu1 %v3026_v13  ;;  %v2891_v56 = vld [vmem:[%s13314_s18 + $0x470] sm:$0xff] }
 0x486   :  { %3841 = vmatpush.msrb.mxu0 %v3178_v53  ;;  %3888 = vmatpush.msrb.mxu3 %v2915_v42  ;;  %v3243_v62 = vld [vmem:[%s13314_s18 + $0xf70] sm:$0xff]  ;;  %v3138_v42 = vld [vmem:[%s13314_s18 + $0xc28] sm:$0xff] }
 0x487   :  { %3862 = vmatpush.msra.mxu2 %v2811_v7  ;;  %3822 = vmatpush.msrb.mxu1 %v3018_v9  ;;  %v2779_v1 = vld [vmem:[%s13314_s18 + $0xf0] sm:$0xff]  ;;  %v3004_v7 = vld [vmem:[%s13314_s18 + $0x7f8] sm:$0xff] }
 0x488   :  { %3842 = vmatpush.msrb.mxu0 %v3170_v23  ;;  %3889 = vmatpush.msrb.mxu3 %v2907_v30  ;;  %v2883_v13 = vld [vmem:[%s13314_s18 + $0x430] sm:$0xff] }
 0x489   :  { %3863 = vmatpush.msra.mxu2 %v2803_v5  ;;  %3823 = vmatpush.msrb.mxu1 %v3010_v36  ;;  %v3235_v53 = vld [vmem:[%s13314_s18 + $0xf30] sm:$0xff]  ;;  %v2996_v5 = vld [vmem:[%s13314_s18 + $0x7b8] sm:$0xff] }
 0x48a   :  { %3843 = vmatpush.msrb.mxu0 %v3162_v35  ;;  %3824 = vmatmul.f32.vlgmr.msrb.gmra.mxu1 %v9612_v21  ;;  %v2771_v9 = vld [vmem:[%s13314_s18 + $0xb0] sm:$0xff] }
 0x48b   :  { %3864 = vmatpush.msra.mxu2 %v2795_v32  ;;  %3890 = vmatpush.msrb.mxu3 %v2899_v28  ;;  %v3131_v23 = vld [vmem:[%s13314_s18 + $0xbf0] sm:$0xff]  ;;  %v2988_v28 = vld [vmem:[%s13314_s18 + $0x778] sm:$0xff] }
 0x48c   :  { %5918 = vmatpush.msk.msra.mxu1 %vm1002_vm8, %v3251_v37  ;;  %3844 = vmatpush.msrb.mxu0 %v3154_v26  ;;  %v3227_v30 = vld [vmem:[%s13314_s18 + $0xef0] sm:$0xff] }
 0x48d   :  { %3865 = vmatpush.msra.mxu2 %v2787_v14  ;;  %3891 = vmatpush.msrb.mxu3 %v2891_v56  ;;  %v2763_v36 = vld [vmem:[%s13314_s18 + $0x70] sm:$0xff]  ;;  %v2876_v56 = vld [vmem:[%s13314_s18 + $0x3f8] sm:$0xff] }
 0x48e   :  { %3925 = vmatpush.msra.mxu1 %v3243_v62  ;;  %3845 = vmatpush.msrb.mxu0 %v3146_v11  ;;  %v3123_v35 = vld [vmem:[%s13314_s18 + $0xbb0] sm:$0xff]  ;;  %v2980_v62 = vld [vmem:[%s13314_s18 + $0x738] sm:$0xff] }
 0x48f   :  { %3866 = vmatpush.msra.mxu2 %v2779_v1  ;;  %3892 = vmatpush.msrb.mxu3 %v2883_v13  ;;  %v3219_v32 = vld [vmem:[%s13314_s18 + $0xeb0] sm:$0xff]  ;;  %v2868_v13 = vld [vmem:[%s13314_s18 + $0x3b8] sm:$0xff] }
 0x490   :  { %3926 = vmatpush.msra.mxu1 %v3235_v53  ;;  %3846 = vmatpush.msrb.mxu0 %v3138_v42  ;;  %v2755_v37 = vld [vmem:[%s13314_s18 + $0x30] sm:$0xff]  ;;  %v2972_v53 = vld [vmem:[%s13314_s18 + $0x6f8] sm:$0xff] }
 0x491   :  { %3893 = vmatmul.f32.vlgmr.msrb.gmra.mxu3 %v9449_v17  ;;  %5916 = vmatmul.msk.f32.vlgmr.msrb.gmra.mxu0 %vm3271_vm0, %v9579_v12  ;;  %v3115_v26 = vld [vmem:[%s13314_s18 + $0xb70] sm:$0xff] }
 0x492   :  { %3969 = vmatpush.msra.mxu3 %v3004_v7  ;;  %3867 = vmatpush.msra.mxu2 %v2771_v9  ;;  %v3211_v14 = vld [vmem:[%s13314_s18 + $0xe70] sm:$0xff]  ;;  %v2860_v9 = vld [vmem:[%s13314_s18 + $0x378] sm:$0xff] }
 0x493   :  { %3900 = vmatpush.msra.mxu0 %v3131_v23  ;;  %3927 = vmatpush.msra.mxu1 %v3227_v30  ;;  %v3107_v11 = vld [vmem:[%s13314_s18 + $0xb30] sm:$0xff]  ;;  %v2964_v23 = vld [vmem:[%s13314_s18 + $0x6b8] sm:$0xff] }
 0x494   :  { %3970 = vmatpush.msra.mxu3 %v2996_v5  ;;  %3827 = vmatmul.f32.gmra.mxu1 %v9659_v61  ;;  %v3203_v1 = vld [vmem:[%s13314_s18 + $0xe30] sm:$0xff] }
 0x495   :  { %3868 = vmatpush.msra.mxu2 %v2763_v36  ;;  %3901 = vmatpush.msra.mxu0 %v3123_v35  ;;  %v3099_v42 = vld [vmem:[%s13314_s18 + $0xaf0] sm:$0xff]  ;;  %v2852_v36 = vld [vmem:[%s13314_s18 + $0x338] sm:$0xff] }
 0x496   :  { %3928 = vmatpush.msra.mxu1 %v3219_v32  ;;  %3971 = vmatpush.msra.mxu3 %v2988_v28  ;;  %v3195_v7 = vld [vmem:[%s13314_s18 + $0xdf0] sm:$0xff]  ;;  %v2956_v35 = vld [vmem:[%s13314_s18 + $0x678] sm:$0xff] }
 0x497   :  { %3869 = vmatpush.msra.mxu2 %v2755_v37  ;;  %3902 = vmatpush.msra.mxu0 %v3115_v26  ;;  %v3091_v30 = vld [vmem:[%s13314_s18 + $0xab0] sm:$0xff]  ;;  %v2948_v37 = vld [vmem:[%s13314_s18 + $0x638] sm:$0xff] }
 0x498   :  { %3929 = vmatpush.msra.mxu1 %v3211_v14  ;;  %3870 = vmatmul.f32.vlgmr.msra.gmra.mxu2 %v9472_v59  ;;  %v3187_v5 = vld [vmem:[%s13314_s18 + $0xdb0] sm:$0xff]  ;;  %v2844_v26 = vld [vmem:[%s13314_s18 + $0x2f8] sm:$0xff] }
 0x499   :  { %3946 = vmatpush.msrb.mxu2 %v2876_v56  ;;  %3972 = vmatpush.msra.mxu3 %v2980_v62  ;;  %v3083_v32 = vld [vmem:[%s13314_s18 + $0xa70] sm:$0xff]  ;;  %v2940_v62 = vld [vmem:[%s13314_s18 + $0x5f8] sm:$0xff] }
 0x49a   :  { %3903 = vmatpush.msra.mxu0 %v3107_v11  ;;  %3930 = vmatpush.msra.mxu1 %v3203_v1  ;;  %v3179_v28 = vld [vmem:[%s13314_s18 + $0xd70] sm:$0xff]  ;;  %v2836_v11 = vld [vmem:[%s13314_s18 + $0x2b8] sm:$0xff] }
 0x49b   :  { %3896 = vmatmul.f32.gmra.mxu3 %v9490_v58  ;;  %3947 = vmatpush.msrb.mxu2 %v2868_v13  ;;  %v3075_v14 = vld [vmem:[%s13314_s18 + $0xa30] sm:$0xff] }
 0x49c   :  { %3973 = vmatpush.msra.mxu3 %v2972_v53  ;;  %5917 = vmatmul.msk.f32.gmra.mxu0 %vm3271_vm0, %v9626_v49  ;;  %v3171_v56 = vld [vmem:[%s13314_s18 + $0xd30] sm:$0xff]  ;;  %v2932_v53 = vld [vmem:[%s13314_s18 + $0x5b8] sm:$0xff] }
 0x49d   :  { %3904 = vmatpush.msra.mxu0 %v3099_v42  ;;  %3931 = vmatpush.msra.mxu1 %v3195_v7  ;;  %v3067_v1 = vld [vmem:[%s13314_s18 + $0x9f0] sm:$0xff]  ;;  %v2828_v42 = vld [vmem:[%s13314_s18 + $0x278] sm:$0xff] }
 0x49e   :  { %3948 = vmatpush.msrb.mxu2 %v2860_v9  ;;  %3974 = vmatpush.msra.mxu3 %v2964_v23  ;;  %v3163_v13 = vld [vmem:[%s13314_s18 + $0xcf0] sm:$0xff]  ;;  %v2924_v23 = vld [vmem:[%s13314_s18 + $0x578] sm:$0xff] }
 0x49f   :  { %3905 = vmatpush.msra.mxu0 %v3091_v30  ;;  %3932 = vmatpush.msra.mxu1 %v3187_v5  ;;  %v3059_v7 = vld [vmem:[%s13314_s18 + $0x9b0] sm:$0xff]  ;;  %v2820_v30 = vld [vmem:[%s13314_s18 + $0x238] sm:$0xff] }
 0x4a0   :  { %3949 = vmatpush.msrb.mxu2 %v2852_v36  ;;  %3975 = vmatpush.msra.mxu3 %v2956_v35  ;;  %v3155_v9 = vld [vmem:[%s13314_s18 + $0xcb0] sm:$0xff]  ;;  %v2916_v35 = vld [vmem:[%s13314_s18 + $0x538] sm:$0xff] }
 0x4a1   :  { %3906 = vmatpush.msra.mxu0 %v3083_v32  ;;  %3933 = vmatpush.msra.mxu1 %v3179_v28  ;;  %v3051_v5 = vld [vmem:[%s13314_s18 + $0x970] sm:$0xff]  ;;  %v2812_v32 = vld [vmem:[%s13314_s18 + $0x1f8] sm:$0xff] }
 0x4a2   :  { %3873 = vmatmul.f32.gmra.mxu2 %v9508_v25  ;;  %3976 = vmatpush.msra.mxu3 %v2948_v37  ;;  %v3147_v36 = vld [vmem:[%s13314_s18 + $0xc70] sm:$0xff] }
 0x4a3   :  { %3950 = vmatpush.msrb.mxu2 %v2844_v26  ;;  %3907 = vmatpush.msra.mxu0 %v3075_v14  ;;  %v3043_v28 = vld [vmem:[%s13314_s18 + $0x930] sm:$0xff]  ;;  %v2908_v26 = vld [vmem:[%s13314_s18 + $0x4f8] sm:$0xff] }
 0x4a4   :  { %3934 = vmatpush.msra.mxu1 %v3171_v56  ;;  %3977 = vmatpush.msra.mxu3 %v2940_v62  ;;  %v3139_v37 = vld [vmem:[%s13314_s18 + $0xc30] sm:$0xff]  ;;  %v2804_v14 = vld [vmem:[%s13314_s18 + $0x1b8] sm:$0xff] }
 0x4a5   :  { %3951 = vmatpush.msrb.mxu2 %v2836_v11  ;;  %3908 = vmatpush.msra.mxu0 %v3067_v1  ;;  %v3132_v56 = vld [vmem:[%s13314_s18 + $0xbf8] sm:$0xff]  ;;  %v3035_v62 = vld [vmem:[%s13314_s18 + $0x8f0] sm:$0xff] }
 0x4a6   :  { %3935 = vmatpush.msra.mxu1 %v3163_v13  ;;  %3978 = vmatpush.msra.mxu3 %v2932_v53  ;;  %v2796_v11 = vld [vmem:[%s13314_s18 + $0x178] sm:$0xff]  ;;  %v3027_v53 = vld [vmem:[%s13314_s18 + $0x8b0] sm:$0xff] }
 0x4a7   :  { %3952 = vmatpush.msrb.mxu2 %v2828_v42  ;;  %3909 = vmatpush.msra.mxu0 %v3059_v7  ;;  %v2900_v1 = vld [vmem:[%s13314_s18 + $0x4b8] sm:$0xff] }
 0x4a8   :  { %3936 = vmatpush.msra.mxu1 %v3155_v9  ;;  %3979 = vmatpush.msra.mxu3 %v2924_v23  ;;  %v3124_v13 = vld [vmem:[%s13314_s18 + $0xbb8] sm:$0xff]  ;;  %v3019_v23 = vld [vmem:[%s13314_s18 + $0x870] sm:$0xff] }
 0x4a9   :  { %3953 = vmatpush.msrb.mxu2 %v2820_v30  ;;  %3910 = vmatpush.msra.mxu0 %v3051_v5  ;;  %v2788_v42 = vld [vmem:[%s13314_s18 + $0x138] sm:$0xff] }
 0x4aa   :  { %3937 = vmatpush.msra.mxu1 %v3147_v36  ;;  %3980 = vmatpush.msra.mxu3 %v2916_v35  ;;  %v2892_v7 = vld [vmem:[%s13314_s18 + $0x478] sm:$0xff]  ;;  %v3011_v35 = vld [vmem:[%s13314_s18 + $0x830] sm:$0xff] }
 0x4ab   :  { %3954 = vmatpush.msrb.mxu2 %v2812_v32  ;;  %3911 = vmatpush.msra.mxu0 %v3043_v28  ;;  %v3116_v9 = vld [vmem:[%s13314_s18 + $0xb78] sm:$0xff]  ;;  %v4302_v32 = vld [vmem:[%s13316_s20 + $0x7c0] sm:$0xff] }
 0x4ac   :  { %3938 = vmatpush.msra.mxu1 %v3139_v37  ;;  %3981 = vmatpush.msra.mxu3 %v2908_v26  ;;  %v2780_v30 = vld [vmem:[%s13314_s18 + $0xf8] sm:$0xff] }
 0x4ad   :  { %5919 = vmatmul.msk.f32.vlgmr.msra.gmra.mxu1 %vm3271_vm0, %v9579_v12  ;;  %3955 = vmatpush.msrb.mxu2 %v2804_v14  ;;  %v2884_v5 = vld [vmem:[%s13314_s18 + $0x438] sm:$0xff]  ;;  %v4294_v14 = vld [vmem:[%s13316_s20 + $0x780] sm:$0xff] }
 0x4ae   :  { %3992 = vmatpush.msrb.mxu1 %v3132_v56  ;;  %3912 = vmatpush.msra.mxu0 %v3035_v62  ;;  %v3108_v36 = vld [vmem:[%s13314_s18 + $0xb38] sm:$0xff] }
 0x4af   :  { %3956 = vmatpush.msrb.mxu2 %v2796_v11  ;;  %3982 = vmatpush.msra.mxu3 %v2900_v1  ;;  %v2772_v28 = vld [vmem:[%s13314_s18 + $0xb8] sm:$0xff]  ;;  %v4286_v1 = vld [vmem:[%s13316_s20 + $0x740] sm:$0xff] }
 0x4b0   :  { %3993 = vmatpush.msrb.mxu1 %v3124_v13  ;;  %3913 = vmatpush.msra.mxu0 %v3027_v53  ;;  %v3100_v37 = vld [vmem:[%s13314_s18 + $0xaf8] sm:$0xff] }
 0x4b1   :  { %3957 = vmatpush.msrb.mxu2 %v2788_v42  ;;  %3983 = vmatpush.msra.mxu3 %v2892_v7  ;;  %v3252_v26 = vld [vmem:[%s13314_s18 + $0xfb8] sm:$0xf]  ;;  %v4174_v7 = vld [vmem:[%s13316_s20 + $0x3c0] sm:$0xff] }
 0x4b2   :  { %3994 = vmatpush.msrb.mxu1 %v3116_v9  ;;  %3914 = vmatpush.msra.mxu0 %v3019_v23  ;;  %v2764_v56 = vld [vmem:[%s13314_s18 + $0x78] sm:$0xff]  ;;  %v4278_v9 = vld [vmem:[%s13316_s20 + $0x700] sm:$0xff] }
 0x4b3   :  { %3958 = vmatpush.msrb.mxu2 %v2780_v30  ;;  %3984 = vmatpush.msra.mxu3 %v2884_v5  ;;  %v3092_v62 = vld [vmem:[%s13314_s18 + $0xab8] sm:$0xff]  ;;  %v4166_v5 = vld [vmem:[%s13316_s20 + $0x380] sm:$0xff] }
 0x4b4   :  { %3995 = vmatpush.msrb.mxu1 %v3108_v36  ;;  %3915 = vmatpush.msra.mxu0 %v3011_v35  ;;  %v3244_v11 = vld [vmem:[%s13314_s18 + $0xf78] sm:$0xff]  ;;  %v10664_v36 = vpop.f32.mrf.mxu2  ;;  %v4270_v35 = vld [vmem:[%s13316_s20 + $0x6c0] sm:$0xff] }
 0x4b5   :  { %3985 = vmatmul.f32.vlgmr.msra.gmra.mxu3 %v9449_v17  ;;  %3916 = vmatmul.f32.vlgmr.msra.gmra.mxu0 %v9612_v21  ;;  %v2756_v13 = vld [vmem:[%s13314_s18 + $0x38] sm:$0xff] }
 0x4b6   :  { %4605 = vmatpush.msrb.mxu3 %v4302_v32  ;;  %5920 = vmatmul.msk.f32.gmra.mxu1 %vm3271_vm0, %v9626_v49  ;;  %v3084_v53 = vld [vmem:[%s13314_s18 + $0xa78] sm:$0xff] }
 0x4b7   :  { %3959 = vmatpush.msrb.mxu2 %v2772_v28  ;;  %3996 = vmatpush.msrb.mxu1 %v3100_v37  ;;  %v3236_v42 = vld [vmem:[%s13314_s18 + $0xf38] sm:$0xff]  ;;  %v10675_v37 = vpop.f32.mrf.mxu3 }
 0x4b8   :  { %5921 = vmatpush.msk.msrb.mxu0 %vm1002_vm8, %v3252_v26  ;;  %4606 = vmatpush.msrb.mxu3 %v4294_v14  ;;  %v3076_v23 = vld [vmem:[%s13314_s18 + $0xa38] sm:$0xff]  ;;  %v4158_v26 = vld [vmem:[%s13316_s20 + $0x340] sm:$0xff] }
 0x4b9   :  { %3960 = vmatpush.msrb.mxu2 %v2764_v56  ;;  %3997 = vmatpush.msrb.mxu1 %v3092_v62  ;;  %v3228_v30 = vld [vmem:[%s13314_s18 + $0xef8] sm:$0xff]  ;;  %v4262_v14 = vld [vmem:[%s13316_s20 + $0x680] sm:$0xff] }
 0x4ba   :  { %4017 = vmatpush.msrb.mxu0 %v3244_v11  ;;  %4607 = vmatpush.msrb.mxu3 %v4286_v1  ;;  %v3068_v32 = vld [vmem:[%s13314_s18 + $0x9f8] sm:$0xff]  ;;  %v4150_v11 = vld [vmem:[%s13316_s20 + $0x300] sm:$0xff] }
 0x4bb   :  { %3961 = vmatpush.msrb.mxu2 %v2756_v13  ;;  %3998 = vmatpush.msrb.mxu1 %v3084_v53  ;;  %v3220_v28 = vld [vmem:[%s13314_s18 + $0xeb8] sm:$0xff]  ;;  %v4254_v1 = vld [vmem:[%s13316_s20 + $0x640] sm:$0xff] }
 0x4bc   :  { %4018 = vmatpush.msrb.mxu0 %v3236_v42  ;;  %3962 = vmatmul.f32.vlgmr.msrb.gmra.mxu2 %v9472_v59  ;;  %v3060_v56 = vld [vmem:[%s13314_s18 + $0x9b8] sm:$0xff]  ;;  %v4246_v42 = vld [vmem:[%s13316_s20 + $0x600] sm:$0xff] }
 0x4bd   :  { %4582 = vmatpush.msra.mxu2 %v4174_v7  ;;  %4608 = vmatpush.msrb.mxu3 %v4278_v9  ;;  %v3212_v62 = vld [vmem:[%s13314_s18 + $0xe78] sm:$0xff]  ;;  %v4142_v7 = vld [vmem:[%s13316_s20 + $0x2c0] sm:$0xff] }
 0x4be   :  { %3999 = vmatpush.msrb.mxu1 %v3076_v23  ;;  %4019 = vmatpush.msrb.mxu0 %v3228_v30  ;;  %v3052_v13 = vld [vmem:[%s13314_s18 + $0x978] sm:$0xff]  ;;  %v4238_v30 = vld [vmem:[%s13316_s20 + $0x5c0] sm:$0xff] }
 0x4bf   :  { %3988 = vmatmul.f32.gmra.mxu3 %v9490_v58  ;;  %4583 = vmatpush.msra.mxu2 %v4166_v5  ;;  %v3204_v53 = vld [vmem:[%s13314_s18 + $0xe38] sm:$0xff]  ;;  %v4134_v5 = vld [vmem:[%s13316_s20 + $0x280] sm:$0xff] }
 0x4c0   :  { %4609 = vmatpush.msrb.mxu3 %v4270_v35  ;;  %3919 = vmatmul.f32.gmra.mxu0 %v9659_v61  ;;  %v3044_v9 = vld [vmem:[%s13314_s18 + $0x938] sm:$0xff] }
 0x4c1   :  { %4000 = vmatpush.msrb.mxu1 %v3068_v32  ;;  %4020 = vmatpush.msrb.mxu0 %v3220_v28  ;;  %v3196_v23 = vld [vmem:[%s13314_s18 + $0xdf8] sm:$0xff]  ;;  %v10725_v32 = vpop.f32.mrf.mxu2 }
 0x4c2   :  { %4584 = vmatpush.msra.mxu2 %v4158_v26  ;;  %4610 = vmatpush.msrb.mxu3 %v4262_v14  ;;  %v3036_v35 = vld [vmem:[%s13314_s18 + $0x8f8] sm:$0xff]  ;;  %v4230_v26 = vld [vmem:[%s13316_s20 + $0x580] sm:$0xff] }
 0x4c3   :  { %4001 = vmatpush.msrb.mxu1 %v3060_v56  ;;  %4021 = vmatpush.msrb.mxu0 %v3212_v62  ;;  %v3188_v28 = vld [vmem:[%s13314_s18 + $0xdb8] sm:$0xff]  ;;  %v4126_v14 = vld [vmem:[%s13316_s20 + $0x240] sm:$0xff]  ;;  %v10739_v62 = vpop.f32.mrf.mxu3 }
 0x4c4   :  { %4585 = vmatpush.msra.mxu2 %v4150_v11  ;;  %4611 = vmatpush.msrb.mxu3 %v4254_v1  ;;  %v3028_v56 = vld [vmem:[%s13314_s18 + $0x8b8] sm:$0xff]  ;;  %v4222_v1 = vld [vmem:[%s13316_s20 + $0x540] sm:$0xff] }
 0x4c5   :  { %4002 = vmatpush.msrb.mxu1 %v3052_v13  ;;  %4022 = vmatpush.msrb.mxu0 %v3204_v53  ;;  %v3180_v11 = vld [vmem:[%s13314_s18 + $0xd78] sm:$0xff]  ;;  %v4118_v13 = vld [vmem:[%s13316_s20 + $0x200] sm:$0xff] }
 0x4c6   :  { %3965 = vmatmul.f32.gmra.mxu2 %v9508_v25  ;;  %4612 = vmatpush.msrb.mxu3 %v4246_v42  ;;  %v3020_v53 = vld [vmem:[%s13314_s18 + $0x878] sm:$0xff] }
 0x4c7   :  { %4586 = vmatpush.msra.mxu2 %v4142_v7  ;;  %4003 = vmatpush.msrb.mxu1 %v3044_v9  ;;  %v3172_v42 = vld [vmem:[%s13314_s18 + $0xd38] sm:$0xff]  ;;  %v4214_v7 = vld [vmem:[%s13316_s20 + $0x500] sm:$0xff] }
 0x4c8   :  { %4023 = vmatpush.msrb.mxu0 %v3196_v23  ;;  %4613 = vmatpush.msrb.mxu3 %v4238_v30  ;;  %v4110_v9 = vld [vmem:[%s13316_s20 + $0x1c0] sm:$0xff]  ;;  %v3012_v23 = vld [vmem:[%s13314_s18 + $0x838] sm:$0xff] }
 0x4c9   :  { %4587 = vmatpush.msra.mxu2 %v4134_v5  ;;  %4004 = vmatpush.msrb.mxu1 %v3036_v35  ;;  %v3164_v30 = vld [vmem:[%s13314_s18 + $0xcf8] sm:$0xff]  ;;  %v10768_v5 = vpop.f32.mrf.mxu1  ;;  %v4102_v35 = vld [vmem:[%s13316_s20 + $0x180] sm:$0xff] }
 0x4ca   :  { %4024 = vmatpush.msrb.mxu0 %v3188_v28  ;;  %4614 = vmatpush.msrb.mxu3 %v4230_v26  ;;  %v4206_v28 = vld [vmem:[%s13316_s20 + $0x4c0] sm:$0xff] }
 0x4cb   :  { %4588 = vmatpush.msra.mxu2 %v4126_v14  ;;  %4005 = vmatpush.msrb.mxu1 %v3028_v56  ;;  %v4550_v26 = vld [vmem:[%s13316_s20 + $0xf80] sm:$0xf]  ;;  %v3156_v14 = vld [vmem:[%s13314_s18 + $0xcb8] sm:$0xff] }
 0x4cc   :  { %4025 = vmatpush.msrb.mxu0 %v3180_v11  ;;  %4615 = vmatpush.msrb.mxu3 %v4222_v1  ;;  %v4094_v56 = vld [vmem:[%s13316_s20 + $0x140] sm:$0xff]  ;;  %v10789_v1 = vpop.f32.mrf.mxu2 }
 0x4cd   :  { %4589 = vmatpush.msra.mxu2 %v4118_v13  ;;  %4006 = vmatpush.msrb.mxu1 %v3020_v53  ;;  %v4198_v11 = vld [vmem:[%s13316_s20 + $0x480] sm:$0xff]  ;;  %v3148_v53 = vld [vmem:[%s13314_s18 + $0xc78] sm:$0xff] }
 0x4ce   :  { %4026 = vmatpush.msrb.mxu0 %v3172_v42  ;;  %4616 = vmatpush.msrb.mxu3 %v4214_v7  ;;  %v4542_v13 = vld [vmem:[%s13316_s20 + $0xf40] sm:$0xff]  ;;  %v10797_v42 = vpop.f32.mrf.mxu0 }
 0x4cf   :  { %4590 = vmatpush.msra.mxu2 %v4110_v9  ;;  %4007 = vmatpush.msrb.mxu1 %v3012_v23  ;;  %v4086_v7 = vld [vmem:[%s13316_s20 + $0x100] sm:$0xff]  ;;  %v10806_v23 = vpop.f32.mrf.mxu3 }
 0x4d0   :  { %4027 = vmatpush.msrb.mxu0 %v3164_v30  ;;  %4008 = vmatmul.f32.vlgmr.msrb.gmra.mxu1 %v9612_v21  ;;  %v4190_v9 = vld [vmem:[%s13316_s20 + $0x440] sm:$0xff] }
 0x4d1   :  { %4591 = vmatpush.msra.mxu2 %v4102_v35  ;;  %4617 = vmatpush.msrb.mxu3 %v4206_v28  ;;  %v4534_v30 = vld [vmem:[%s13316_s20 + $0xf00] sm:$0xff]  ;;  %v3140_v35 = vld [vmem:[%s13314_s18 + $0xc38] sm:$0xff] }
 0x4d2   :  { %5924 = vmatpush.msk.msra.mxu1 %vm1002_vm8, %v4550_v26  ;;  %4028 = vmatpush.msrb.mxu0 %v3156_v14  ;;  %v4078_v28 = vld [vmem:[%s13316_s20 + $0xc0] sm:$0xff] }
 0x4d3   :  { %4592 = vmatpush.msra.mxu2 %v4094_v56  ;;  %4618 = vmatpush.msrb.mxu3 %v4198_v11  ;;  %v4182_v26 = vld [vmem:[%s13316_s20 + $0x400] sm:$0xff]  ;;  %v4303_v11 = vld [vmem:[%s13316_s20 + $0x7c8] sm:$0xff] }
 0x4d4   :  { %4653 = vmatpush.msra.mxu1 %v4542_v13  ;;  %4029 = vmatpush.msrb.mxu0 %v3148_v53  ;;  %v4430_v14 = vld [vmem:[%s13316_s20 + $0xbc0] sm:$0xff]  ;;  %v10831_v13 = vpop.f32.mrf.mxu1 }
 0x4d5   :  { %4593 = vmatpush.msra.mxu2 %v4086_v7  ;;  %4619 = vmatpush.msrb.mxu3 %v4190_v9  ;;  %v4526_v56 = vld [vmem:[%s13316_s20 + $0xec0] sm:$0xff] }
 0x4d6   :  { %4654 = vmatpush.msra.mxu1 %v4534_v30  ;;  %4030 = vmatpush.msrb.mxu0 %v3140_v35  ;;  %v4070_v53 = vld [vmem:[%s13316_s20 + $0x80] sm:$0xff]  ;;  %v4295_v30 = vld [vmem:[%s13316_s20 + $0x788] sm:$0xff] }
 0x4d7   :  { %5922 = vmatmul.msk.f32.vlgmr.msrb.gmra.mxu0 %vm3271_vm0, %v9579_v12  ;;  %4594 = vmatpush.msra.mxu2 %v4078_v28  ;;  %v4422_v7 = vld [vmem:[%s13316_s20 + $0xb80] sm:$0xff] }
 0x4d8   :  { %4620 = vmatpush.msrb.mxu3 %v4182_v26  ;;  %4628 = vmatpush.msra.mxu0 %v4430_v14  ;;  %v4518_v9 = vld [vmem:[%s13316_s20 + $0xe80] sm:$0xff]  ;;  %v10853_v26 = vpop.f32.mrf.mxu2 }
 0x4d9   :  { %4655 = vmatpush.msra.mxu1 %v4526_v56  ;;  %4621 = vmatmul.f32.vlgmr.msrb.gmra.mxu3 %v9449_v17  ;;  %v4062_v35 = vld [vmem:[%s13316_s20 + $0x40] sm:$0xff]  ;;  %v4287_v56 = vld [vmem:[%s13316_s20 + $0x748] sm:$0xff] }
 0x4da   :  { %4697 = vmatpush.msra.mxu3 %v4303_v11  ;;  %4011 = vmatmul.f32.gmra.mxu1 %v9659_v61  ;;  %v4414_v28 = vld [vmem:[%s13316_s20 + $0xb40] sm:$0xff]  ;;  %v10861_v11 = vpop.f32.mrf.mxu0 }
 0x4db   :  { %4595 = vmatpush.msra.mxu2 %v4070_v53  ;;  %4629 = vmatpush.msra.mxu0 %v4422_v7  ;;  %v4510_v14 = vld [vmem:[%s13316_s20 + $0xe40] sm:$0xff]  ;;  %v10869_v7 = vpop.f32.mrf.mxu3 }
 0x4dc   :  { %4656 = vmatpush.msra.mxu1 %v4518_v9  ;;  %4698 = vmatpush.msra.mxu3 %v4295_v30  ;;  %v4406_v53 = vld [vmem:[%s13316_s20 + $0xb00] sm:$0xff]  ;;  %v4175_v9 = vld [vmem:[%s13316_s20 + $0x3c8] sm:$0xff] }
 0x4dd   :  { %4596 = vmatpush.msra.mxu2 %v4062_v35  ;;  %4630 = vmatpush.msra.mxu0 %v4414_v28  ;;  %v4279_v30 = vld [vmem:[%s13316_s20 + $0x708] sm:$0xff]  ;;  %v4494_v35 = vld [vmem:[%s13316_s20 + $0xdc0] sm:$0xff] }
 0x4de   :  { %4657 = vmatpush.msra.mxu1 %v4510_v14  ;;  %4699 = vmatpush.msra.mxu3 %v4287_v56  ;;  %v4398_v28 = vld [vmem:[%s13316_s20 + $0xac0] sm:$0xff]  ;;  %v4167_v14 = vld [vmem:[%s13316_s20 + $0x388] sm:$0xff]  ;;  %v10893_v56 = vpop.f32.mrf.mxu1 }
 0x4df   :  { %4597 = vmatpush.msra.mxu2 %v4054_v29  ;;  %4631 = vmatpush.msra.mxu0 %v4406_v53  ;;  %v4271_v29 = vld [vmem:[%s13316_s20 + $0x6c8] sm:$0xff]  ;;  %v4486_v53 = vld [vmem:[%s13316_s20 + $0xd80] sm:$0xff] }
 0x4e0   :  { %4658 = vmatpush.msra.mxu1 %v4502_v55  ;;  %4598 = vmatmul.f32.vlgmr.msra.gmra.mxu2 %v9472_v59  ;;  %v4390_v55 = vld [vmem:[%s13316_s20 + $0xa80] sm:$0xff]  ;;  %v10916_v10 = vpop.f32.mrf.mxu2 }
 0x4e1   :  { %4674 = vmatpush.msrb.mxu2 %v4175_v9  ;;  %4700 = vmatpush.msra.mxu3 %v4279_v30  ;;  %v4159_v9 = vld [vmem:[%s13316_s20 + $0x348] sm:$0xff] }
 0x4e2   :  { %5923 = vmatmul.msk.f32.gmra.mxu0 %vm3271_vm0, %v9626_v49  ;;  %4659 = vmatpush.msra.mxu1 %v4494_v35  ;;  %v4263_v30 = vld [vmem:[%s13316_s20 + $0x688] sm:$0xff]  ;;  %v4382_v35 = vld [vmem:[%s13316_s20 + $0xa40] sm:$0xff] }
 0x4e3   :  { %4632 = vmatpush.msra.mxu0 %v4398_v28  ;;  %4624 = vmatmul.f32.gmra.mxu3 %v9490_v58  ;;  %v4478_v28 = vld [vmem:[%s13316_s20 + $0xd40] sm:$0xff] }
 0x4e4   :  { %4675 = vmatpush.msrb.mxu2 %v4167_v14  ;;  %4701 = vmatpush.msra.mxu3 %v4271_v29  ;;  %v4255_v14 = vld [vmem:[%s13316_s20 + $0x648] sm:$0xff]  ;;  %v10924_v29 = vpop.f32.mrf.mxu0 }
 0x4e5   :  { %4633 = vmatpush.msra.mxu0 %v4390_v55  ;;  %4660 = vmatpush.msra.mxu1 %v4486_v53  ;;  %v4470_v55 = vld [vmem:[%s13316_s20 + $0xd00] sm:$0xff]  ;;  %v10932_v53 = vpop.f32.mrf.mxu3 }
 0x4e6   :  { %4676 = vmatpush.msrb.mxu2 %v4159_v9  ;;  %4702 = vmatpush.msra.mxu3 %v4263_v30  ;;  %v4143_v9 = vld [vmem:[%s13316_s20 + $0x2c8] sm:$0xff]  ;;  %v4366_v30 = vld [vmem:[%s13316_s20 + $0x9c0] sm:$0xff]  ;;  %v10962_v20 = vpop.f32.mrf.mxu1 }
 0x4e7   :  { %4634 = vmatpush.msra.mxu0 %v4382_v35  ;;  %4661 = vmatpush.msra.mxu1 %v4478_v28  ;;  %v4462_v35 = vld [vmem:[%s13316_s20 + $0xcc0] sm:$0xff]  ;;  %v4239_v28 = vld [vmem:[%s13316_s20 + $0x5c8] sm:$0xff] }
 0x4e8   :  { %4677 = vmatpush.msrb.mxu2 %v4151_v38  ;;  %4703 = vmatpush.msra.mxu3 %v4255_v14  ;;  %v4135_v38 = vld [vmem:[%s13316_s20 + $0x288] sm:$0xff]  ;;  %v4454_v14 = vld [vmem:[%s13316_s20 + $0xc80] sm:$0xff] }
 0x4e9   :  { %4635 = vmatpush.msra.mxu0 %v4374_v57  ;;  %4662 = vmatpush.msra.mxu1 %v4470_v55  ;;  %v4358_v57 = vld [vmem:[%s13316_s20 + $0x980] sm:$0xff]  ;;  %v4231_v55 = vld [vmem:[%s13316_s20 + $0x588] sm:$0xff] }
 0x4ea   :  { %4601 = vmatmul.f32.gmra.mxu2 %v9508_v25  ;;  %4704 = vmatpush.msra.mxu3 %v4247_v41  ;;  %v4127_v41 = vld [vmem:[%s13316_s20 + $0x248] sm:$0xff] }
 0x4eb   :  { %4678 = vmatpush.msrb.mxu2 %v4143_v9  ;;  %4636 = vmatpush.msra.mxu0 %v4366_v30  ;;  %v4350_v9 = vld [vmem:[%s13316_s20 + $0x940] sm:$0xff] }
 0x4ec   :  { %4663 = vmatpush.msra.mxu1 %v4462_v35  ;;  %4705 = vmatpush.msra.mxu3 %v4239_v28  ;;  %v4446_v30 = vld [vmem:[%s13316_s20 + $0xc40] sm:$0xff]  ;;  %v4119_v35 = vld [vmem:[%s13316_s20 + $0x208] sm:$0xff] }
 0x4ed   :  { %4679 = vmatpush.msrb.mxu2 %v4135_v38  ;;  %4637 = vmatpush.msra.mxu0 %v4358_v57  ;;  %v4342_v28 = vld [vmem:[%s13316_s20 + $0x900] sm:$0xff]  ;;  %v10982_v38 = vpop.f32.mrf.mxu2  ;;  %v10995_v48 = vpop.f32.mrf.mxu3 }
 0x4ee   :  { %4664 = vmatpush.msra.mxu1 %v4454_v14  ;;  %4706 = vmatpush.msra.mxu3 %v4231_v55  ;;  %v4438_v57 = vld [vmem:[%s13316_s20 + $0xc00] sm:$0xff]  ;;  %v4215_v14 = vld [vmem:[%s13316_s20 + $0x508] sm:$0xff]  ;;  %v10990_v55 = vpop.f32.mrf.mxu0  ;;  %13410 = vst [vmem:[#allocation68_spill] sm:$0xff] %v10995_v48 }
 0x4ef   :  { %4680 = vmatpush.msrb.mxu2 %v4127_v41  ;;  %4638 = vmatpush.msra.mxu0 %v4350_v9  ;;  %v4431_v41 = vld [vmem:[%s13316_s20 + $0xbc8] sm:$0xff]  ;;  %v4334_v9 = vld [vmem:[%s13316_s20 + $0x8c0] sm:$0xff] }
 0x4f0   :  { %4665 = vmatpush.msra.mxu1 %v4446_v30  ;;  %4707 = vmatpush.msra.mxu3 %v4223_v34  ;;  %v4103_v34 = vld [vmem:[%s13316_s20 + $0x188] sm:$0xff] }
 0x4f1   :  { %4681 = vmatpush.msrb.mxu2 %v4119_v35  ;;  %4639 = vmatpush.msra.mxu0 %v4342_v28  ;;  %v4207_v30 = vld [vmem:[%s13316_s20 + $0x4c8] sm:$0xff]  ;;  %v4326_v28 = vld [vmem:[%s13316_s20 + $0x880] sm:$0xff] }
 0x4f2   :  { %4666 = vmatpush.msra.mxu1 %v4438_v57  ;;  %4708 = vmatpush.msra.mxu3 %v4215_v14  ;;  %v4423_v35 = vld [vmem:[%s13316_s20 + $0xb88] sm:$0xff] }
 0x4f3   :  { %5925 = vmatmul.msk.f32.vlgmr.msra.gmra.mxu1 %vm3271_vm0, %v9579_v12  ;;  %4682 = vmatpush.msrb.mxu2 %v4111_v22  ;;  %v4095_v57 = vld [vmem:[%s13316_s20 + $0x148] sm:$0xff] }
 0x4f4   :  { %4720 = vmatpush.msrb.mxu1 %v4431_v41  ;;  %4640 = vmatpush.msra.mxu0 %v4334_v9  ;;  %v4199_v14 = vld [vmem:[%s13316_s20 + $0x488] sm:$0xff]  ;;  %v11029_v41 = vpop.f32.mrf.mxu1 }
 0x4f5   :  { %4683 = vmatpush.msrb.mxu2 %v4103_v34  ;;  %4709 = vmatpush.msra.mxu3 %v4207_v30  ;;  %v4415_v22 = vld [vmem:[%s13316_s20 + $0xb48] sm:$0xff]  ;;  %v11037_v30 = vpop.f32.mrf.mxu2 }
 0x4f6   :  { %4721 = vmatpush.msrb.mxu1 %v4423_v35  ;;  %4641 = vmatpush.msra.mxu0 %v4326_v28  ;;  %v4087_v9 = vld [vmem:[%s13316_s20 + $0x108] sm:$0xff]  ;;  %v4310_v35 = vld [vmem:[%s13316_s20 + $0x800] sm:$0xff]  ;;  %v11045_v28 = vpop.f32.mrf.mxu3 }
 0x4f7   :  { %v4191_v34 = vld [vmem:[%s13316_s20 + $0x448] sm:$0xff]  ;;  %4684 = vmatpush.msrb.mxu2 %v4095_v57  ;;  %4710 = vmatpush.msra.mxu3 %v4199_v14  ;;  %v11053_v14 = vpop.f32.mrf.mxu0 }
 0x4f8   :  { %4722 = vmatpush.msrb.mxu1 %v4415_v22  ;;  %4642 = vmatpush.msra.mxu0 %v4318_v52  ;;  %v4183_v57 = vld [vmem:[%s13316_s20 + $0x408] sm:$0xff] }
 0x4f9   :  { %4685 = vmatpush.msrb.mxu2 %v4087_v9  ;;  %4711 = vmatpush.msra.mxu3 %v4191_v34  ;;  %v4399_v52 = vld [vmem:[%s13316_s20 + $0xac8] sm:$0xff] }
 0x4fa   :  { %4723 = vmatpush.msrb.mxu1 %v4407_v40  ;;  %4643 = vmatpush.msra.mxu0 %v4310_v35  ;;  %v4551_v22 = vld [vmem:[%s13316_s20 + $0xf88] sm:$0xf]  ;;  %v4304_v40 = vld [vmem:[%s13316_s20 + $0x7d0] sm:$0xff] }
 0x4fb   :  { %4644 = vmatmul.f32.vlgmr.msra.gmra.mxu0 %v9612_v21  ;;  %5926 = vmatmul.msk.f32.gmra.mxu1 %vm3271_vm0, %v9626_v49  ;;  %v4071_v9 = vld [vmem:[%s13316_s20 + $0x88] sm:$0xff] }
 0x4fc   :  { %4686 = vmatpush.msrb.mxu2 %v4079_v45  ;;  %4712 = vmatpush.msra.mxu3 %v4183_v57  ;;  %v4391_v34 = vld [vmem:[%s13316_s20 + $0xa88] sm:$0xff]  ;;  %v4296_v57 = vld [vmem:[%s13316_s20 + $0x790] sm:$0xff]  ;;  %v11093_v31 = vpop.f32.mrf.mxu1 }
 0x4fd   :  { %4724 = vmatpush.msrb.mxu1 %v4399_v52  ;;  %5927 = vmatpush.msk.msrb.mxu0 %vm1002_vm8, %v4551_v22  ;;  %v4543_v35 = vld [vmem:[%s13316_s20 + $0xf48] sm:$0xff]  ;;  %13411 = vst [vmem:[#allocation69_spill] sm:$0xff] %v11093_v31 }
 0x4fe   :  { %v4063_v45 = vld [vmem:[%s13316_s20 + $0x48] sm:$0xff]  ;;  %4713 = vmatmul.f32.vlgmr.msra.gmra.mxu3 %v9449_v17  ;;  %4687 = vmatpush.msrb.mxu2 %v4071_v9  ;;  %v4288_v9 = vld [vmem:[%s13316_s20 + $0x750] sm:$0xff]  ;;  %v11112_v4 = vpop.f32.mrf.mxu3 }
 0x4ff   :  { %v4383_v52 = vld [vmem:[%s13316_s20 + $0xa48] sm:$0xff]  ;;  %4789 = vmatpush.msrb.mxu3 %v4304_v40  ;;  %4725 = vmatpush.msrb.mxu1 %v4391_v34  ;;  %v11101_v34 = vpop.f32.mrf.mxu2 }
 0x500   :  { %v4535_v22 = vld [vmem:[%s13316_s20 + $0xf08] sm:$0xff]  ;;  %4745 = vmatpush.msrb.mxu0 %v4543_v35  ;;  %4688 = vmatpush.msrb.mxu2 %v4063_v45  ;;  %v4176_v35 = vld [vmem:[%s13316_s20 + $0x3d0] sm:$0xff] }
 0x501   :  { %v4375_v40 = vld [vmem:[%s13316_s20 + $0xa08] sm:$0xff]  ;;  %4790 = vmatpush.msrb.mxu3 %v4296_v57  ;;  %4726 = vmatpush.msrb.mxu1 %v4383_v52  ;;  %v4280_v45 = vld [vmem:[%s13316_s20 + $0x710] sm:$0xff]  ;;  %v11117_v52 = vpop.f32.mrf.mxu0 }
 0x502   :  { %4746 = vmatpush.msrb.mxu0 %v4535_v22  ;;  %4689 = vmatpush.msrb.mxu2 %v4055_v19  ;;  %v4367_v57 = vld [vmem:[%s13316_s20 + $0x9c8] sm:$0xff]  ;;  %13412 = vst [vmem:[#allocation70_spill] sm:$0xff] %v11117_v52  ;;  %v4168_v22 = vld [vmem:[%s13316_s20 + $0x390] sm:$0xff]  ;;  %v5358_v52 = vld [vmem:[%s13317_s21 + $0xc0] sm:$0xff] }
 0x503   :  { %4791 = vmatpush.msrb.mxu3 %v4288_v9  ;;  %4727 = vmatpush.msrb.mxu1 %v4375_v40  ;;  %v4519_v19 = vld [vmem:[%s13316_s20 + $0xe88] sm:$0xff]  ;;  %v4272_v9 = vld [vmem:[%s13316_s20 + $0x6d0] sm:$0xff] }
 0x504   :  { %4747 = vmatpush.msrb.mxu0 %v4527_v24  ;;  %4690 = vmatmul.f32.vlgmr.msrb.gmra.mxu2 %v9472_v59  ;;  %v4359_v24 = vld [vmem:[%s13316_s20 + $0x988] sm:$0xff] }
 0x505   :  { %4766 = vmatpush.msra.mxu2 %v4176_v35  ;;  %4792 = vmatpush.msrb.mxu3 %v4280_v45  ;;  %v4511_v40 = vld [vmem:[%s13316_s20 + $0xe48] sm:$0xff]  ;;  %v4160_v35 = vld [vmem:[%s13316_s20 + $0x350] sm:$0xff] }
 0x506   :  { %4647 = vmatmul.f32.gmra.mxu0 %v9659_v61  ;;  %4728 = vmatpush.msrb.mxu1 %v4367_v57  ;;  %v4264_v45 = vld [vmem:[%s13316_s20 + $0x690] sm:$0xff]  ;;  %v11143_v57 = vpop.f32.mrf.mxu1 }
 0x507   :  { %4748 = vmatpush.msrb.mxu0 %v4519_v19  ;;  %4716 = vmatmul.f32.gmra.mxu3 %v9490_v58  ;;  %v4503_v19 = vld [vmem:[%s13316_s20 + $0xe08] sm:$0xff]  ;;  %v11151_v8 = vpop.f32.mrf.mxu2 }
 0x508   :  { %4767 = vmatpush.msra.mxu2 %v4168_v22  ;;  %4793 = vmatpush.msrb.mxu3 %v4272_v9  ;;  %v4256_v22 = vld [vmem:[%s13316_s20 + $0x650] sm:$0xff]  ;;  %v4343_v9 = vld [vmem:[%s13316_s20 + $0x908] sm:$0xff] }
 0x509   :  { %4729 = vmatpush.msrb.mxu1 %v4359_v24  ;;  %4749 = vmatpush.msrb.mxu0 %v4511_v40  ;;  %v11165_v24 = vpop.f32.mrf.mxu3  ;;  %v4248_v40 = vld [vmem:[%s13316_s20 + $0x610] sm:$0xff]  ;;  %v11170_v46 = vpop.f32.mrf.mxu0 }
 0x50a   :  { %4768 = vmatpush.msra.mxu2 %v4160_v35  ;;  %4794 = vmatpush.msrb.mxu3 %v4264_v45  ;;  %13413 = vst [vmem:[#allocation71_spill] sm:$0xff] %v11165_v24  ;;  %v4144_v35 = vld [vmem:[%s13316_s20 + $0x2d0] sm:$0xff]  ;;  %v4335_v45 = vld [vmem:[%s13316_s20 + $0x8c8] sm:$0xff] }
 0x50b   :  { %4730 = vmatpush.msrb.mxu1 %v4351_v2  ;;  %4750 = vmatpush.msrb.mxu0 %v4503_v19  ;;  %v4487_v2 = vld [vmem:[%s13316_s20 + $0xd88] sm:$0xff]  ;;  %v4240_v19 = vld [vmem:[%s13316_s20 + $0x5d0] sm:$0xff] }
 0x50c   :  { %4769 = vmatpush.msra.mxu2 %v4152_v54  ;;  %4795 = vmatpush.msrb.mxu3 %v4256_v22  ;;  %v4136_v54 = vld [vmem:[%s13316_s20 + $0x290] sm:$0xff]  ;;  %v4327_v22 = vld [vmem:[%s13316_s20 + $0x888] sm:$0xff] }
 0x50d   :  { %4731 = vmatpush.msrb.mxu1 %v4343_v9  ;;  %4751 = vmatpush.msrb.mxu0 %v4495_v63  ;;  %v4479_v63 = vld [vmem:[%s13316_s20 + $0xd48] sm:$0xff]  ;;  %v4232_v9 = vld [vmem:[%s13316_s20 + $0x590] sm:$0xff] }
 0x50e   :  { %4693 = vmatmul.f32.gmra.mxu2 %v9508_v25  ;;  %4796 = vmatpush.msrb.mxu3 %v4248_v40  ;;  %v4128_v40 = vld [vmem:[%s13316_s20 + $0x250] sm:$0xff] }
 0x50f   :  { %4770 = vmatpush.msra.mxu2 %v4144_v35  ;;  %4732 = vmatpush.msrb.mxu1 %v4335_v45  ;;  %v4471_v35 = vld [vmem:[%s13316_s20 + $0xd08] sm:$0xff]  ;;  %v4224_v45 = vld [vmem:[%s13316_s20 + $0x550] sm:$0xff] }
 0x510   :  { %4752 = vmatpush.msrb.mxu0 %v4487_v2  ;;  %4797 = vmatpush.msrb.mxu3 %v4240_v19  ;;  %v11209_v2 = vpop.f32.mrf.mxu1  ;;  %v4120_v19 = vld [vmem:[%s13316_s20 + $0x210] sm:$0xff] }
 0x511   :  { %4771 = vmatpush.msra.mxu2 %v4136_v54  ;;  %4733 = vmatpush.msrb.mxu1 %v4327_v22  ;;  %v4311_v54 = vld [vmem:[%s13316_s20 + $0x808] sm:$0xff]  ;;  %v11217_v22 = vpop.f32.mrf.mxu2  ;;  %v11228_v15 = vpop.f32.mrf.mxu3 }
 0x512   :  { %4753 = vmatpush.msrb.mxu0 %v4479_v63  ;;  %4798 = vmatpush.msrb.mxu3 %v4232_v9  ;;  %13414 = vst [vmem:[#allocation72_spill] sm:$0xff] %v11217_v22  ;;  %v4112_v63 = vld [vmem:[%s13316_s20 + $0x1d0] sm:$0xff]  ;;  %v4237_v22 = vld [vmem:[%s13316_s20 + $0x5b8] sm:$0xff] }
 0x513   :  { %4772 = vmatpush.msra.mxu2 %v4128_v40  ;;  %4734 = vmatpush.msrb.mxu1 %v4319_v0  ;;  %v4216_v9 = vld [vmem:[%s13316_s20 + $0x510] sm:$0xff]  ;;  %13415 = vst [vmem:[#allocation73_spill] sm:$0xff] %v11228_v15  ;;  %v4455_v40 = vld [vmem:[%s13316_s20 + $0xc88] sm:$0xff]  ;;  %v4445_v15 = vld [vmem:[%s13316_s20 + $0xc38] sm:$0xff] }
 0x514   :  { %4754 = vmatpush.msrb.mxu0 %v4471_v35  ;;  %4799 = vmatpush.msrb.mxu3 %v4224_v45  ;;  %v4552_v0 = vld [vmem:[%s13316_s20 + $0xf90] sm:$0xf]  ;;  %v11236_v35 = vpop.f32.mrf.mxu0 }
 0x515   :  { %4773 = vmatpush.msra.mxu2 %v4120_v19  ;;  %4735 = vmatpush.msrb.mxu1 %v4311_v54  ;;  %13416 = vst [vmem:[#allocation74_spill] sm:$0xff] %v11236_v35  ;;  %v4104_v45 = vld [vmem:[%s13316_s20 + $0x190] sm:$0xff] }
 0x516   :  { %4755 = vmatpush.msrb.mxu0 %v4463_v44  ;;  %4736 = vmatmul.f32.vlgmr.msrb.gmra.mxu1 %v9612_v21  ;;  %v4208_v19 = vld [vmem:[%s13316_s20 + $0x4d0] sm:$0xff]  ;;  %v4447_v44 = vld [vmem:[%s13316_s20 + $0xc48] sm:$0xff] }
 0x517   :  { %4774 = vmatpush.msra.mxu2 %v4112_v63  ;;  %4800 = vmatpush.msrb.mxu3 %v4216_v9  ;;  %v4544_v54 = vld [vmem:[%s13316_s20 + $0xf50] sm:$0xff] }
 0x518   :  { %5930 = vmatpush.msk.msra.mxu1 %vm1002_vm8, %v4552_v0  ;;  %4756 = vmatpush.msrb.mxu0 %v4455_v40  ;;  %v4200_v63 = vld [vmem:[%s13316_s20 + $0x490] sm:$0xff]  ;;  %v11264_v0 = vpop.f32.mrf.mxu1 }
 0x519   :  { %4775 = vmatpush.msra.mxu2 %v4104_v45  ;;  %4801 = vmatpush.msrb.mxu3 %v4208_v19  ;;  %v4536_v9 = vld [vmem:[%s13316_s20 + $0xf10] sm:$0xff]  ;;  %13417 = vst [vmem:[#allocation75_spill] sm:$0xff] %v11264_v0  ;;  %v11269_v27 = vpop.f32.mrf.mxu2  ;;  %v5362_v0 = vld [vmem:[%s13317_s21 + $0xe0] sm:$0xff] }
 0x51a   :  { %4837 = vmatpush.msra.mxu1 %v4544_v54  ;;  %4757 = vmatpush.msrb.mxu0 %v4447_v44  ;;  %v4088_v40 = vld [vmem:[%s13316_s20 + $0x110] sm:$0xff]  ;;  %13418 = vst [vmem:[#allocation76_spill] sm:$0xff] %v11269_v27  ;;  %v4285_v27 = vld [vmem:[%s13316_s20 + $0x738] sm:$0xff] }
 0x51b   :  { %4776 = vmatpush.msra.mxu2 %v4096_v18  ;;  %4802 = vmatpush.msrb.mxu3 %v4200_v63  ;;  %v4192_v45 = vld [vmem:[%s13316_s20 + $0x450] sm:$0xff]  ;;  %v11283_v18 = vpop.f32.mrf.mxu3 }
 0x51c   :  { %v4432_v19 = vld [vmem:[%s13316_s20 + $0xbd0] sm:$0xff]  ;;  %4838 = vmatpush.msra.mxu1 %v4536_v9  ;;  %4758 = vmatpush.msrb.mxu0 %v4439_v3  ;;  %13419 = vst [vmem:[#allocation77_spill] sm:$0xff] %v11283_v18  ;;  %v11290_v9 = vpop.f32.mrf.mxu0 }
 0x51d   :  { %v4528_v54 = vld [vmem:[%s13316_s20 + $0xed0] sm:$0xff]  ;;  %5928 = vmatmul.msk.f32.vlgmr.msrb.gmra.mxu0 %vm3271_vm0, %v9579_v12  ;;  %4777 = vmatpush.msra.mxu2 %v4088_v40  ;;  %13420 = vst [vmem:[#allocation78_spill] sm:$0xff] %v11290_v9 }
 0x51e   :  { %v4080_v44 = vld [vmem:[%s13316_s20 + $0xd0] sm:$0xff]  ;;  %4803 = vmatpush.msrb.mxu3 %v4192_v45  ;;  %4812 = vmatpush.msra.mxu0 %v4432_v19  ;;  %v4305_v45 = vld [vmem:[%s13316_s20 + $0x7d8] sm:$0xff] }
 0x51f   :  { %v4184_v63 = vld [vmem:[%s13316_s20 + $0x410] sm:$0xff]  ;;  %4839 = vmatpush.msra.mxu1 %v4528_v54  ;;  %4778 = vmatpush.msra.mxu2 %v4080_v44 }
 0x520   :  { %v4424_v3 = vld [vmem:[%s13316_s20 + $0xb90] sm:$0xff]  ;;  %4739 = vmatmul.f32.gmra.mxu1 %v9659_v61  ;;  %4804 = vmatpush.msrb.mxu3 %v4184_v63  ;;  %v4297_v63 = vld [vmem:[%s13316_s20 + $0x798] sm:$0xff]  ;;  %v11324_v39 = vpop.f32.mrf.mxu1 }
 0x521   :  { %v4072_v40 = vld [vmem:[%s13316_s20 + $0x90] sm:$0xff]  ;;  %4813 = vmatpush.msra.mxu0 %v4424_v3  ;;  %4840 = vmatpush.msra.mxu1 %v4520_v60  ;;  %13421 = vst [vmem:[#allocation79_spill] sm:$0xff] %v11324_v39  ;;  %v11332_v6 = vpop.f32.mrf.mxu2  ;;  %v4397_v39 = vld [vmem:[%s13316_s20 + $0xab8] sm:$0xff] }
 0x522   :  { %v4416_v19 = vld [vmem:[%s13316_s20 + $0xb50] sm:$0xff]  ;;  %4805 = vmatmul.f32.vlgmr.msrb.gmra.mxu3 %v9449_v17  ;;  %4779 = vmatpush.msra.mxu2 %v4072_v40  ;;  %v4289_v40 = vld [vmem:[%s13316_s20 + $0x758] sm:$0xff]  ;;  %13422 = vst [vmem:[#allocation80_spill] sm:$0xff] %v11332_v6 }
 0x523   :  { %v4512_v54 = vld [vmem:[%s13316_s20 + $0xe50] sm:$0xff]  ;;  %4881 = vmatpush.msra.mxu3 %v4305_v45  ;;  %4814 = vmatpush.msra.mxu0 %v4416_v19 }
 0x524   :  { %v4064_v44 = vld [vmem:[%s13316_s20 + $0x50] sm:$0xff]  ;;  %4841 = vmatpush.msra.mxu1 %v4512_v54  ;;  %v4281_v54 = vld [vmem:[%s13316_s20 + $0x718] sm:$0xff] }
 0x525   :  { %v4408_v3 = vld [vmem:[%s13316_s20 + $0xb10] sm:$0xff]  ;;  %4780 = vmatpush.msra.mxu2 %v4064_v44  ;;  %4882 = vmatpush.msra.mxu3 %v4297_v63  ;;  %v11345_v44 = vpop.f32.mrf.mxu3  ;;  %v4177_v63 = vld [vmem:[%s13316_s20 + $0x3d8] sm:$0xff] }
 0x526   :  { %v4504_v60 = vld [vmem:[%s13316_s20 + $0xe10] sm:$0xff]  ;;  %4815 = vmatpush.msra.mxu0 %v4408_v3  ;;  %13423 = vst [vmem:[#allocation81_spill] sm:$0xff] %v11345_v44 }
 0x527   :  { %v4400_v45 = vld [vmem:[%s13316_s20 + $0xad0] sm:$0xff]  ;;  %4842 = vmatpush.msra.mxu1 %v4504_v60  ;;  %5929 = vmatmul.msk.f32.gmra.mxu0 %vm3271_vm0, %v9626_v49  ;;  %v11353_v60 = vpop.f32.mrf.mxu0 }
 0x528   :  { %v4496_v19 = vld [vmem:[%s13316_s20 + $0xdd0] sm:$0xff]  ;;  %4883 = vmatpush.msra.mxu3 %v4289_v40  ;;  %4781 = vmatpush.msra.mxu2 %v4056_v47  ;;  %13424 = vst [vmem:[#allocation82_spill] sm:$0xff] %v11353_v60  ;;  %v4169_v47 = vld [vmem:[%s13316_s20 + $0x398] sm:$0xff] }
 0x529   :  { %v4392_v3 = vld [vmem:[%s13316_s20 + $0xa90] sm:$0xff]  ;;  %4816 = vmatpush.msra.mxu0 %v4400_v45  ;;  %4843 = vmatpush.msra.mxu1 %v4496_v19  ;;  %v4273_v40 = vld [vmem:[%s13316_s20 + $0x6d8] sm:$0xff] }
 0x52a   :  { %4782 = vmatmul.f32.vlgmr.msra.gmra.mxu2 %v9472_v59  ;;  %4884 = vmatpush.msra.mxu3 %v4281_v54  ;;  %v4384_v45 = vld [vmem:[%s13316_s20 + $0xa50] sm:$0xff]  ;;  %v4161_v54 = vld [vmem:[%s13316_s20 + $0x358] sm:$0xff] }
 0x52b   :  { %4858 = vmatpush.msrb.mxu2 %v4177_v63  ;;  %4817 = vmatpush.msra.mxu0 %v4392_v3  ;;  %v4480_v19 = vld [vmem:[%s13316_s20 + $0xd50] sm:$0xff]  ;;  %v4265_v63 = vld [vmem:[%s13316_s20 + $0x698] sm:$0xff]  ;;  %v11378_v3 = vpop.f32.mrf.mxu1 }
 0x52c   :  { %4844 = vmatpush.msra.mxu1 %v4488_v43  ;;  %4808 = vmatmul.f32.gmra.mxu3 %v9490_v58  ;;  %13425 = vst [vmem:[#allocation83_spill] sm:$0xff] %v11378_v3  ;;  %v4472_v43 = vld [vmem:[%s13316_s20 + $0xd10] sm:$0xff]  ;;  %v4385_v3 = vld [vmem:[%s13316_s20 + $0xa58] sm:$0xff] }
 0x52d   :  { %4859 = vmatpush.msrb.mxu2 %v4169_v47  ;;  %4885 = vmatpush.msra.mxu3 %v4273_v40  ;;  %v11392_v47 = vpop.f32.mrf.mxu2  ;;  %v4368_v40 = vld [vmem:[%s13316_s20 + $0x9d0] sm:$0xff] }
 0x52e   :  { %4818 = vmatpush.msra.mxu0 %v4384_v45  ;;  %4845 = vmatpush.msra.mxu1 %v4480_v19  ;;  %13426 = vst [vmem:[#allocation84_spill] sm:$0xff] %v11392_v47  ;;  %v4464_v45 = vld [vmem:[%s13316_s20 + $0xcd0] sm:$0xff]  ;;  %v11400_v19 = vpop.f32.mrf.mxu3 }
 0x52f   :  { %4860 = vmatpush.msrb.mxu2 %v4161_v54  ;;  %4886 = vmatpush.msra.mxu3 %v4265_v63  ;;  %13427 = vst [vmem:[#allocation85_spill] sm:$0xff] %v11400_v19  ;;  %v11405_v44 = vpop.f32.mrf.mxu0  ;;  %v4145_v54 = vld [vmem:[%s13316_s20 + $0x2d8] sm:$0xff]  ;;  %v4360_v63 = vld [vmem:[%s13316_s20 + $0x990] sm:$0xff] }
 0x530   :  { %4819 = vmatpush.msra.mxu0 %v4376_v51  ;;  %4846 = vmatpush.msra.mxu1 %v4472_v43  ;;  %13428 = vst [vmem:[#allocation86_spill] sm:$0xff] %v11405_v44  ;;  %v4456_v51 = vld [vmem:[%s13316_s20 + $0xc90] sm:$0xff]  ;;  %v4241_v43 = vld [vmem:[%s13316_s20 + $0x5d8] sm:$0xff] }
 0x531   :  { %4861 = vmatpush.msrb.mxu2 %v4153_v16  ;;  %4887 = vmatpush.msra.mxu3 %v4257_v33  ;;  %v4137_v16 = vld [vmem:[%s13316_s20 + $0x298] sm:$0xff]  ;;  %v4352_v33 = vld [vmem:[%s13316_s20 + $0x950] sm:$0xff] }
 0x532   :  { %4820 = vmatpush.msra.mxu0 %v4368_v40  ;;  %4847 = vmatpush.msra.mxu1 %v4464_v45  ;;  %v4448_v40 = vld [vmem:[%s13316_s20 + $0xc50] sm:$0xff]  ;;  %v4233_v45 = vld [vmem:[%s13316_s20 + $0x598] sm:$0xff] }
 0x533   :  { %4785 = vmatmul.f32.gmra.mxu2 %v9508_v25  ;;  %4888 = vmatpush.msra.mxu3 %v4249_v50  ;;  %v4129_v50 = vld [vmem:[%s13316_s20 + $0x258] sm:$0xff]  ;;  %v4344_v19 = vld [vmem:[%s13316_s20 + $0x910] sm:$0xff] }
 0x534   :  { %4862 = vmatpush.msrb.mxu2 %v4145_v54  ;;  %4821 = vmatpush.msra.mxu0 %v4360_v63  ;;  %v4440_v54 = vld [vmem:[%s13316_s20 + $0xc10] sm:$0xff]  ;;  %v4225_v63 = vld [vmem:[%s13316_s20 + $0x558] sm:$0xff] }
 0x535   :  { %4848 = vmatpush.msra.mxu1 %v4456_v51  ;;  %4889 = vmatpush.msra.mxu3 %v4241_v43  ;;  %v11444_v51 = vpop.f32.mrf.mxu1  ;;  %v4121_v43 = vld [vmem:[%s13316_s20 + $0x218] sm:$0xff]  ;;  %v4336_v47 = vld [vmem:[%s13316_s20 + $0x8d0] sm:$0xff] }
 0x536   :  { %4863 = vmatpush.msrb.mxu2 %v4137_v16  ;;  %4822 = vmatpush.msra.mxu0 %v4352_v33  ;;  %13429 = vst [vmem:[#allocation87_spill] sm:$0xff] %v11444_v51  ;;  %v4433_v16 = vld [vmem:[%s13316_s20 + $0xbd8] sm:$0xff]  ;;  %v11452_v33 = vpop.f32.mrf.mxu2 }
 0x537   :  { %4849 = vmatpush.msra.mxu1 %v4448_v40  ;;  %4890 = vmatpush.msra.mxu3 %v4233_v45  ;;  %13430 = vst [vmem:[#allocation88_spill] sm:$0xff] %v11452_v33  ;;  %v4113_v40 = vld [vmem:[%s13316_s20 + $0x1d8] sm:$0xff]  ;;  %v11463_v45 = vpop.f32.mrf.mxu3  ;;  %v11484_v33 = vld [vmem:[%s13315_s19] sm:$0xff] }
 0x538   :  { %4864 = vmatpush.msrb.mxu2 %v4129_v50  ;;  %4823 = vmatpush.msra.mxu0 %v4344_v19  ;;  %v4217_v19 = vld [vmem:[%s13316_s20 + $0x518] sm:$0xff]  ;;  %13431 = vst [vmem:[#allocation89_spill] sm:$0xff] %v11463_v45 }
 0x539   :  { %4850 = vmatpush.msra.mxu1 %v4440_v54  ;;  %4891 = vmatpush.msra.mxu3 %v4225_v63  ;;  %v4425_v50 = vld [vmem:[%s13316_s20 + $0xb98] sm:$0xff]  ;;  %v4328_v54 = vld [vmem:[%s13316_s20 + $0x890] sm:$0xff]  ;;  %v11473_v63 = vpop.f32.mrf.mxu0 }
 0x53a   :  { %5931 = vmatmul.msk.f32.vlgmr.msra.gmra.mxu1 %vm3271_vm0, %v9579_v12  ;;  %4865 = vmatpush.msrb.mxu2 %v4121_v43  ;;  %13432 = vst [vmem:[#allocation90_spill] sm:$0xff] %v11473_v63  ;;  %v4105_v45 = vld [vmem:[%s13316_s20 + $0x198] sm:$0xff] }
 0x53b   :  { %4904 = vmatpush.msrb.mxu1 %v4433_v16  ;;  %4824 = vmatpush.msra.mxu0 %v4336_v47  ;;  %v4209_v43 = vld [vmem:[%s13316_s20 + $0x4d8] sm:$0xff]  ;;  %v4320_v47 = vld [vmem:[%s13316_s20 + $0x850] sm:$0xff] }
 0x53c   :  { %4866 = vmatpush.msrb.mxu2 %v4113_v40  ;;  %4892 = vmatpush.msra.mxu3 %v4217_v19  ;;  %v4417_v16 = vld [vmem:[%s13316_s20 + $0xb58] sm:$0xff]  ;;  %v3262_v40 = vperm.slane %v11484_v33, 7 }
 0x53d   :  { %4905 = vmatpush.msrb.mxu1 %v4425_v50  ;;  %4825 = vmatpush.msra.mxu0 %v4328_v54  ;;  %v4097_v63 = vld [vmem:[%s13316_s20 + $0x158] sm:$0xff]  ;;  %v4312_v50 = vld [vmem:[%s13316_s20 + $0x810] sm:$0xff]  ;;  %v11505_v54 = vpop.f32.mrf.mxu1 }
 0x53e   :  { %v4201_v51 = vld [vmem:[%s13316_s20 + $0x498] sm:$0xff]  ;;  %4867 = vmatpush.msrb.mxu2 %v4105_v45  ;;  %4893 = vmatpush.msra.mxu3 %v4209_v43  ;;  %13433 = vst [vmem:[#allocation91_spill] sm:$0xff] %v11505_v54 }
 0x53f   :  { %v4409_v19 = vld [vmem:[%s13316_s20 + $0xb18] sm:$0xff]  ;;  %4906 = vmatpush.msrb.mxu1 %v4417_v16  ;;  %4826 = vmatpush.msra.mxu0 %v4320_v47  ;;  %v3963_v43 = vpop.f32.mrf.mxu2 }
 0x540   :  { %4868 = vmatpush.msrb.mxu2 %v4097_v63  ;;  %4894 = vmatpush.msra.mxu3 %v4201_v51  ;;  %v4089_v33 = vld [vmem:[%s13316_s20 + $0x118] sm:$0xff]  ;;  %v3964_v51 = vadd.f32 %v3963_v43, %v3262_v40 }
 0x541   :  { %v4193_v45 = vld [vmem:[%s13316_s20 + $0x458] sm:$0xff]  ;;  %4907 = vmatpush.msrb.mxu1 %v4409_v19  ;;  %4827 = vmatpush.msra.mxu0 %v4312_v50  ;;  %v3986_v50 = vpop.f32.mrf.mxu3  ;;  %v11534_v6 = vpop.f32.mrf.mxu0 }
 0x542   :  { %v4401_v16 = vld [vmem:[%s13316_s20 + $0xad8] sm:$0xff]  ;;  %4828 = vmatmul.f32.vlgmr.msra.gmra.mxu0 %v9612_v21  ;;  %5932 = vmatmul.msk.f32.gmra.mxu1 %vm3271_vm0, %v9626_v49  ;;  %13434 = vst [vmem:[#allocation92_spill] sm:$0xff] %v11534_v6  ;;  %v11536_v44 = vadd.f32 %v3986_v50, %v3964_v51  ;;  %v4298_v51 = vld [vmem:[%s13316_s20 + $0x7a0] sm:$0xff] }
 0x543   :  { %v4553_v63 = vld [vmem:[%s13316_s20 + $0xf98] sm:$0xf]  ;;  %4869 = vmatpush.msrb.mxu2 %v4089_v33  ;;  %4895 = vmatpush.msra.mxu3 %v4193_v45  ;;  %v4306_v45 = vld [vmem:[%s13316_s20 + $0x7e0] sm:$0xff] }
 0x544   :  { %v4081_v47 = vld [vmem:[%s13316_s20 + $0xd8] sm:$0xff]  ;;  %4908 = vmatpush.msrb.mxu1 %v4401_v16  ;;  %5933 = vmatpush.msk.msrb.mxu0 %vm1002_vm8, %v4553_v63 }
 0x545   :  { %v4185_v19 = vld [vmem:[%s13316_s20 + $0x418] sm:$0xff]  ;;  %4870 = vmatpush.msrb.mxu2 %v4081_v47  ;;  %v11567_v50 = vpop.f32.mrf.mxu1 }
 0x546   :  { %v4393_v43 = vld [vmem:[%s13316_s20 + $0xa98] sm:$0xff]  ;;  %4896 = vmatpush.msra.mxu3 %v4185_v19  ;;  %13435 = vst [vmem:[#allocation93_spill] sm:$0xff] %v11567_v50 }
 0x547   :  { %v4545_v54 = vld [vmem:[%s13316_s20 + $0xf58] sm:$0xff]  ;;  %4909 = vmatpush.msrb.mxu1 %v4393_v43  ;;  %4897 = vmatmul.f32.vlgmr.msra.gmra.mxu3 %v9449_v17  ;;  %v4290_v43 = vld [vmem:[%s13316_s20 + $0x760] sm:$0xff] }
 0x548   :  { %v4073_v33 = vld [vmem:[%s13316_s20 + $0x98] sm:$0xff]  ;;  %4929 = vmatpush.msrb.mxu0 %v4545_v54  ;;  %4973 = vmatpush.msrb.mxu3 %v4306_v45 }
 0x549   :  { %v4537_v16 = vld [vmem:[%s13316_s20 + $0xf18] sm:$0xff]  ;;  %4871 = vmatpush.msrb.mxu2 %v4073_v33  ;;  %4910 = vmatpush.msrb.mxu1 %v4385_v3  ;;  %v3966_v45 = vpop.f32.mrf.mxu2  ;;  %v3989_v50 = vpop.f32.mrf.mxu3 }
 0x54a   :  { %v4065_v63 = vld [vmem:[%s13316_s20 + $0x58] sm:$0xff]  ;;  %4930 = vmatpush.msrb.mxu0 %v4537_v16  ;;  %4974 = vmatpush.msrb.mxu3 %v4298_v51  ;;  %v4282_v16 = vld [vmem:[%s13316_s20 + $0x720] sm:$0xff] }
 0x54b   :  { %v4377_v47 = vld [vmem:[%s13316_s20 + $0xa18] sm:$0xff]  ;;  %4872 = vmatpush.msrb.mxu2 %v4065_v63  ;;  %v3967_v63 = vadd.f32 %v3966_v45, %v3262_v40  ;;  %4831 = vmatmul.f32.gmra.mxu0 %v9659_v61  ;;  %v4178_v51 = vld [vmem:[%s13316_s20 + $0x3e0] sm:$0xff] }
 0x54c   :  { %v4529_v54 = vld [vmem:[%s13316_s20 + $0xed8] sm:$0xff]  ;;  %4911 = vmatpush.msrb.mxu1 %v4377_v47  ;;  %4975 = vmatpush.msrb.mxu3 %v4290_v43  ;;  %v4170_v43 = vld [vmem:[%s13316_s20 + $0x3a0] sm:$0xff] }
 0x54d   :  { %v4057_v19 = vld [vmem:[%s13316_s20 + $0x18] sm:$0xff]  ;;  %4931 = vmatpush.msrb.mxu0 %v4529_v54  ;;  %v11593_v40 = vadd.f32 %v3989_v50, %v3967_v63  ;;  %v4162_v45 = vld [vmem:[%s13316_s20 + $0x360] sm:$0xff] }
 0x54e   :  { %v4369_v3 = vld [vmem:[%s13316_s20 + $0x9d8] sm:$0xff]  ;;  %4873 = vmatpush.msrb.mxu2 %v4057_v19  ;;  %v11591_v19 = vpop.f32.mrf.mxu0  ;;  %4976 = vmatpush.msrb.mxu3 %v4282_v16  ;;  %v4266_v16 = vld [vmem:[%s13316_s20 + $0x6a0] sm:$0xff] }
 0x54f   :  { %v4521_v33 = vld [vmem:[%s13316_s20 + $0xe98] sm:$0xff]  ;;  %4912 = vmatpush.msrb.mxu1 %v4369_v3  ;;  %13436 = vst [vmem:[#allocation94_spill] sm:$0xff] %v11591_v19  ;;  %4874 = vmatmul.f32.vlgmr.msrb.gmra.mxu2 %v9472_v59  ;;  %v4274_v3 = vld [vmem:[%s13316_s20 + $0x6e0] sm:$0xff] }
 0x550   :  { %v4361_v47 = vld [vmem:[%s13316_s20 + $0x998] sm:$0xff]  ;;  %4932 = vmatpush.msrb.mxu0 %v4521_v33  ;;  %4950 = vmatpush.msra.mxu2 %v4178_v51 }
 0x551   :  { %v4513_v54 = vld [vmem:[%s13316_s20 + $0xe58] sm:$0xff]  ;;  %4913 = vmatpush.msrb.mxu1 %v4361_v47  ;;  %4900 = vmatmul.f32.gmra.mxu3 %v9490_v58  ;;  %v4009_v47 = vpop.f32.mrf.mxu1 }
 0x552   :  { %v4353_v33 = vld [vmem:[%s13316_s20 + $0x958] sm:$0xff]  ;;  %4933 = vmatpush.msrb.mxu0 %v4513_v54  ;;  %4951 = vmatpush.msra.mxu2 %v4170_v43  ;;  %v4154_v54 = vld [vmem:[%s13316_s20 + $0x320] sm:$0xff] }
 0x553   :  { %v4505_v50 = vld [vmem:[%s13316_s20 + $0xe18] sm:$0xff]  ;;  %4977 = vmatpush.msrb.mxu3 %v4274_v3  ;;  %4914 = vmatpush.msrb.mxu1 %v4353_v33  ;;  %v4258_v43 = vld [vmem:[%s13316_s20 + $0x660] sm:$0xff] }
 0x554   :  { %v4345_v63 = vld [vmem:[%s13316_s20 + $0x918] sm:$0xff]  ;;  %4934 = vmatpush.msrb.mxu0 %v4505_v50  ;;  %4952 = vmatpush.msra.mxu2 %v4162_v45  ;;  %v4250_v33 = vld [vmem:[%s13316_s20 + $0x620] sm:$0xff]  ;;  %v4010_v50 = vadd.f32 %v4009_v47, %v11536_v44 }
 0x555   :  { %v4497_v51 = vld [vmem:[%s13316_s20 + $0xdd8] sm:$0xff]  ;;  %4978 = vmatpush.msrb.mxu3 %v4266_v16  ;;  %4915 = vmatpush.msrb.mxu1 %v4345_v63  ;;  %v4146_v45 = vld [vmem:[%s13316_s20 + $0x2e0] sm:$0xff] }
 0x556   :  { %v4337_v3 = vld [vmem:[%s13316_s20 + $0x8d8] sm:$0xff]  ;;  %4935 = vmatpush.msrb.mxu0 %v4497_v51  ;;  %4953 = vmatpush.msra.mxu2 %v4154_v54  ;;  %v4032_v6 = vpop.f32.mrf.mxu0  ;;  %v4242_v44 = vld [vmem:[%s13316_s20 + $0x5e0] sm:$0xff] }
 0x557   :  { %v4489_v19 = vld [vmem:[%s13316_s20 + $0xd98] sm:$0xff]  ;;  %4979 = vmatpush.msrb.mxu3 %v4258_v43  ;;  %4916 = vmatpush.msrb.mxu1 %v4337_v3  ;;  %v11649_v51 = vadd.f32 %v4032_v6, %v4010_v50  ;;  %v4138_v47 = vld [vmem:[%s13316_s20 + $0x2a0] sm:$0xff] }
 0x558   :  { %v4329_v16 = vld [vmem:[%s13316_s20 + $0x898] sm:$0xff]  ;;  %4936 = vmatpush.msrb.mxu0 %v4489_v19  ;;  %4877 = vmatmul.f32.gmra.mxu2 %v9508_v25  ;;  %v4234_v6 = vld [vmem:[%s13316_s20 + $0x5a0] sm:$0xff] }
 0x559   :  { %v4481_v63 = vld [vmem:[%s13316_s20 + $0xd58] sm:$0xff]  ;;  %13437 = vst [vmem:[#allocation95_spill] sm:$0xff] %v11649_v51  ;;  %4980 = vmatpush.msrb.mxu3 %v4250_v33  ;;  %4954 = vmatpush.msra.mxu2 %v4146_v45  ;;  %v4130_v43 = vld [vmem:[%s13316_s20 + $0x260] sm:$0xff] }
 0x55a   :  { %v4321_v19 = vld [vmem:[%s13316_s20 + $0x858] sm:$0xff]  ;;  %4917 = vmatpush.msrb.mxu1 %v4329_v16  ;;  %4937 = vmatpush.msrb.mxu0 %v4481_v63  ;;  %v4122_v50 = vld [vmem:[%s13316_s20 + $0x220] sm:$0xff] }
 0x55b   :  { %v4473_v54 = vld [vmem:[%s13316_s20 + $0xd18] sm:$0xff]  ;;  %4981 = vmatpush.msrb.mxu3 %v4242_v44  ;;  %4955 = vmatpush.msra.mxu2 %v4138_v47  ;;  %v4226_v45 = vld [vmem:[%s13316_s20 + $0x560] sm:$0xff]  ;;  %v4012_v44 = vpop.f32.mrf.mxu1 }
 0x55c   :  { %v4313_v3 = vld [vmem:[%s13316_s20 + $0x818] sm:$0xff]  ;;  %4918 = vmatpush.msrb.mxu1 %v4321_v19  ;;  %4938 = vmatpush.msrb.mxu0 %v4473_v54  ;;  %v4554_v16 = vld [vmem:[%s13316_s20 + $0xfa0] sm:$0xf] }
 0x55d   :  { %v4465_v33 = vld [vmem:[%s13316_s20 + $0xcd8] sm:$0xff]  ;;  %4982 = vmatpush.msrb.mxu3 %v4234_v6  ;;  %4956 = vmatpush.msra.mxu2 %v4130_v43  ;;  %v4114_v47 = vld [vmem:[%s13316_s20 + $0x1e0] sm:$0xff] }
 0x55e   :  { %4919 = vmatpush.msrb.mxu1 %v4313_v3  ;;  %v4457_v63 = vld [vmem:[%s13316_s20 + $0xc98] sm:$0xff]  ;;  %4939 = vmatpush.msrb.mxu0 %v4465_v33  ;;  %v4218_v19 = vld [vmem:[%s13316_s20 + $0x520] sm:$0xff]  ;;  %v4013_v33 = vadd.f32 %v4012_v44, %v11593_v40 }
 0x55f   :  { %4920 = vmatmul.f32.vlgmr.msrb.gmra.mxu1 %v9612_v21  ;;  %4957 = vmatpush.msra.mxu2 %v4122_v50  ;;  %v4546_v54 = vld [vmem:[%s13316_s20 + $0xf60] sm:$0xff]  ;;  %v4449_v6 = vld [vmem:[%s13316_s20 + $0xc58] sm:$0xff] }
 0x560   :  { %4983 = vmatpush.msrb.mxu3 %v4226_v45  ;;  %5936 = vmatpush.msk.msra.mxu1 %vm1002_vm8, %v4554_v16  ;;  %v4106_v43 = vld [vmem:[%s13316_s20 + $0x1a0] sm:$0xff]  ;;  %v4441_v45 = vld [vmem:[%s13316_s20 + $0xc18] sm:$0xff]  ;;  %v4035_v16 = vpop.f32.mrf.mxu0 }
 0x561   :  { %4940 = vmatpush.msrb.mxu0 %v4457_v63  ;;  %v4210_v3 = vld [vmem:[%s13316_s20 + $0x4e0] sm:$0xff]  ;;  %4958 = vmatpush.msra.mxu2 %v4114_v47  ;;  %v11715_v51 = vadd.f32 %v4035_v16, %v4013_v33 }
 0x562   :  { %4984 = vmatpush.msrb.mxu3 %v4218_v19  ;;  %v4538_v50 = vld [vmem:[%s13316_s20 + $0xf20] sm:$0xff]  ;;  %5021 = vmatpush.msra.mxu1 %v4546_v54 }
 0x563   :  { %4941 = vmatpush.msrb.mxu0 %v4449_v6  ;;  %v4098_v63 = vld [vmem:[%s13316_s20 + $0x160] sm:$0xff]  ;;  %13438 = vst [vmem:[#allocation96_spill] sm:$0xff] %v11715_v51  ;;  %4959 = vmatpush.msra.mxu2 %v4106_v43  ;;  %v4060_v51 = vld [vmem:[%s13316_s20 + $0x30] sm:$0xff] }
 0x564   :  { %4985 = vmatpush.msrb.mxu3 %v4210_v3  ;;  %v4202_v40 = vld [vmem:[%s13316_s20 + $0x4a0] sm:$0xff]  ;;  %5022 = vmatpush.msra.mxu1 %v4538_v50 }
 0x565   :  { %v4434_v44 = vld [vmem:[%s13316_s20 + $0xbe0] sm:$0xff]  ;;  %4942 = vmatpush.msrb.mxu0 %v4441_v45  ;;  %4960 = vmatpush.msra.mxu2 %v4098_v63  ;;  %v4435_v63 = vld [vmem:[%s13316_s20 + $0xbe8] sm:$0xff] }
 0x566   :  { %v4530_v47 = vld [vmem:[%s13316_s20 + $0xee0] sm:$0xff]  ;;  %5934 = vmatmul.msk.f32.vlgmr.msrb.gmra.mxu0 %vm3271_vm0, %v9579_v12  ;;  %4986 = vmatpush.msrb.mxu3 %v4202_v40 }
 0x567   :  { %v4090_v19 = vld [vmem:[%s13316_s20 + $0x120] sm:$0xff]  ;;  %4996 = vmatpush.msra.mxu0 %v4434_v44  ;;  %5023 = vmatpush.msra.mxu1 %v4530_v47  ;;  %v4427_v47 = vld [vmem:[%s13316_s20 + $0xba8] sm:$0xff] }
 0x568   :  { %v4194_v54 = vld [vmem:[%s13316_s20 + $0x460] sm:$0xff]  ;;  %4961 = vmatpush.msra.mxu2 %v4090_v19  ;;  %4923 = vmatmul.f32.gmra.mxu1 %v9659_v61 }
 0x569   :  { %v4426_v6 = vld [vmem:[%s13316_s20 + $0xba0] sm:$0xff]  ;;  %4987 = vmatpush.msrb.mxu3 %v4194_v54 }
 0x56a   :  { %v4522_v43 = vld [vmem:[%s13316_s20 + $0xea0] sm:$0xff]  ;;  %4997 = vmatpush.msra.mxu0 %v4426_v6 }
 0x56b   :  { %v4082_v3 = vld [vmem:[%s13316_s20 + $0xe0] sm:$0xff]  ;;  %5024 = vmatpush.msra.mxu1 %v4522_v43  ;;  %v4419_v43 = vld [vmem:[%s13316_s20 + $0xb68] sm:$0xff] }
 0x56c   :  { %v4186_v33 = vld [vmem:[%s13316_s20 + $0x420] sm:$0xff]  ;;  %4962 = vmatpush.msra.mxu2 %v4082_v3 }
 0x56d   :  { %v4418_v50 = vld [vmem:[%s13316_s20 + $0xb60] sm:$0xff]  ;;  %4988 = vmatpush.msrb.mxu3 %v4186_v33 }
 0x56e   :  { %v4514_v45 = vld [vmem:[%s13316_s20 + $0xe60] sm:$0xff]  ;;  %4998 = vmatpush.msra.mxu0 %v4418_v50  ;;  %4989 = vmatmul.f32.vlgmr.msrb.gmra.mxu3 %v9449_v17 }
 0x56f   :  { %v4074_v16 = vld [vmem:[%s13316_s20 + $0xa0] sm:$0xff]  ;;  %5025 = vmatpush.msra.mxu1 %v4514_v45  ;;  %5088 = vmatpush.msra.mxu3 %v4435_v63  ;;  %v4411_v45 = vld [vmem:[%s13316_s20 + $0xb28] sm:$0xff] }
 0x570   :  { %v4410_v40 = vld [vmem:[%s13316_s20 + $0xb20] sm:$0xff]  ;;  %4963 = vmatpush.msra.mxu2 %v4074_v16  ;;  %5935 = vmatmul.msk.f32.gmra.mxu0 %vm3271_vm0, %v9626_v49  ;;  %v4307_v16 = vld [vmem:[%s13316_s20 + $0x7e8] sm:$0xff] }
 0x571   :  { %v4506_v44 = vld [vmem:[%s13316_s20 + $0xe20] sm:$0xff]  ;;  %4999 = vmatpush.msra.mxu0 %v4410_v40  ;;  %5089 = vmatpush.msra.mxu3 %v4427_v47  ;;  %v4403_v47 = vld [vmem:[%s13316_s20 + $0xae8] sm:$0xff] }
 0x572   :  { %v4066_v19 = vld [vmem:[%s13316_s20 + $0x60] sm:$0xff]  ;;  %5026 = vmatpush.msra.mxu1 %v4506_v44  ;;  %v4299_v44 = vld [vmem:[%s13316_s20 + $0x7a8] sm:$0xff] }
 0x573   :  { %v4402_v54 = vld [vmem:[%s13316_s20 + $0xae0] sm:$0xff]  ;;  %4964 = vmatpush.msra.mxu2 %v4066_v19  ;;  %5090 = vmatpush.msra.mxu3 %v4419_v43  ;;  %v4395_v43 = vld [vmem:[%s13316_s20 + $0xaa8] sm:$0xff] }
 0x574   :  { %v4498_v6 = vld [vmem:[%s13316_s20 + $0xde0] sm:$0xff]  ;;  %5000 = vmatpush.msra.mxu0 %v4402_v54 }
 0x575   :  { %v4058_v3 = vld [vmem:[%s13316_s20 + $0x20] sm:$0xff]  ;;  %5027 = vmatpush.msra.mxu1 %v4498_v6  ;;  %5091 = vmatpush.msra.mxu3 %v4411_v45  ;;  %v4291_v6 = vld [vmem:[%s13316_s20 + $0x768] sm:$0xff] }
 0x576   :  { %v4394_v33 = vld [vmem:[%s13316_s20 + $0xaa0] sm:$0xff]  ;;  %4965 = vmatpush.msra.mxu2 %v4058_v3  ;;  %4992 = vmatmul.f32.gmra.mxu3 %v9490_v58  ;;  %v4387_v45 = vld [vmem:[%s13316_s20 + $0xa68] sm:$0xff] }
 0x577   :  { %v4490_v50 = vld [vmem:[%s13316_s20 + $0xda0] sm:$0xff]  ;;  %5001 = vmatpush.msra.mxu0 %v4394_v33  ;;  %4966 = vmatmul.f32.vlgmr.msra.gmra.mxu2 %v9472_v59 }
 0x578   :  { %v4386_v63 = vld [vmem:[%s13316_s20 + $0xa60] sm:$0xff]  ;;  %5028 = vmatpush.msra.mxu1 %v4490_v50  ;;  %5065 = vmatpush.msrb.mxu2 %v4307_v16  ;;  %v4283_v50 = vld [vmem:[%s13316_s20 + $0x728] sm:$0xff] }
 0x579   :  { %v4482_v40 = vld [vmem:[%s13316_s20 + $0xd60] sm:$0xff]  ;;  %5002 = vmatpush.msra.mxu0 %v4386_v63  ;;  %5092 = vmatpush.msra.mxu3 %v4403_v47 }
 0x57a   :  { %v4378_v19 = vld [vmem:[%s13316_s20 + $0xa20] sm:$0xff]  ;;  %5029 = vmatpush.msra.mxu1 %v4482_v40  ;;  %5066 = vmatpush.msrb.mxu2 %v4299_v44  ;;  %v4379_v40 = vld [vmem:[%s13316_s20 + $0xa28] sm:$0xff] }
 0x57b   :  { %v4474_v54 = vld [vmem:[%s13316_s20 + $0xd20] sm:$0xff]  ;;  %5003 = vmatpush.msra.mxu0 %v4378_v19  ;;  %5093 = vmatpush.msra.mxu3 %v4395_v43  ;;  %v4275_v44 = vld [vmem:[%s13316_s20 + $0x6e8] sm:$0xff] }
 0x57c   :  { %v4370_v3 = vld [vmem:[%s13316_s20 + $0x9e0] sm:$0xff]  ;;  %5030 = vmatpush.msra.mxu1 %v4474_v54  ;;  %5067 = vmatpush.msrb.mxu2 %v4291_v6  ;;  %v4371_v54 = vld [vmem:[%s13316_s20 + $0x9e8] sm:$0xff] }
 0x57d   :  { %v4466_v33 = vld [vmem:[%s13316_s20 + $0xce0] sm:$0xff]  ;;  %5004 = vmatpush.msra.mxu0 %v4370_v3  ;;  %5094 = vmatpush.msra.mxu3 %v4387_v45  ;;  %v4267_v6 = vld [vmem:[%s13316_s20 + $0x6a8] sm:$0xff] }
 0x57e   :  { %v4362_v16 = vld [vmem:[%s13316_s20 + $0x9a0] sm:$0xff]  ;;  %5031 = vmatpush.msra.mxu1 %v4466_v33  ;;  %5068 = vmatpush.msrb.mxu2 %v4283_v50  ;;  %v4363_v33 = vld [vmem:[%s13316_s20 + $0x9a8] sm:$0xff] }
 0x57f   :  { %v4458_v63 = vld [vmem:[%s13316_s20 + $0xca0] sm:$0xff]  ;;  %5005 = vmatpush.msra.mxu0 %v4362_v16  ;;  %4969 = vmatmul.f32.gmra.mxu2 %v9508_v25  ;;  %v4259_v50 = vld [vmem:[%s13316_s20 + $0x668] sm:$0xff] }
 0x580   :  { %v4354_v47 = vld [vmem:[%s13316_s20 + $0x960] sm:$0xff]  ;;  %5032 = vmatpush.msra.mxu1 %v4458_v63  ;;  %5095 = vmatpush.msra.mxu3 %v4379_v40  ;;  %v4179_v45 = vld [vmem:[%s13316_s20 + $0x3e8] sm:$0xff] }
 0x581   :  { %v4450_v19 = vld [vmem:[%s13316_s20 + $0xc60] sm:$0xff]  ;;  %5069 = vmatpush.msrb.mxu2 %v4275_v44  ;;  %5006 = vmatpush.msra.mxu0 %v4354_v47  ;;  %v4251_v63 = vld [vmem:[%s13316_s20 + $0x628] sm:$0xff] }
 0x582   :  { %v4346_v43 = vld [vmem:[%s13316_s20 + $0x920] sm:$0xff]  ;;  %5033 = vmatpush.msra.mxu1 %v4450_v19  ;;  %5096 = vmatpush.msra.mxu3 %v4371_v54  ;;  %v4355_v40 = vld [vmem:[%s13316_s20 + $0x968] sm:$0xff] }
 0x583   :  { %v4442_v3 = vld [vmem:[%s13316_s20 + $0xc20] sm:$0xff]  ;;  %5070 = vmatpush.msrb.mxu2 %v4267_v6  ;;  %5007 = vmatpush.msra.mxu0 %v4346_v43  ;;  %v4171_v44 = vld [vmem:[%s13316_s20 + $0x3a8] sm:$0xff] }
 0x584   :  { %v4338_v16 = vld [vmem:[%s13316_s20 + $0x8e0] sm:$0xff]  ;;  %5034 = vmatpush.msra.mxu1 %v4442_v3  ;;  %5097 = vmatpush.msra.mxu3 %v4363_v33  ;;  %v4243_v19 = vld [vmem:[%s13316_s20 + $0x5e8] sm:$0xff] }
 0x585   :  { %5937 = vmatmul.msk.f32.vlgmr.msra.gmra.mxu1 %vm3271_vm0, %v9579_v12  ;;  %5071 = vmatpush.msrb.mxu2 %v4259_v50  ;;  %v4330_v47 = vld [vmem:[%s13316_s20 + $0x8a0] sm:$0xff]  ;;  %v4347_v54 = vld [vmem:[%s13316_s20 + $0x928] sm:$0xff] }
 0x586   :  { %5042 = vmatpush.msrb.mxu1 %v4179_v45  ;;  %5008 = vmatpush.msra.mxu0 %v4338_v16  ;;  %v4163_v6 = vld [vmem:[%s13316_s20 + $0x368] sm:$0xff]  ;;  %v4322_v43 = vld [vmem:[%s13316_s20 + $0x860] sm:$0xff] }
 0x587   :  { %5072 = vmatpush.msrb.mxu2 %v4251_v63  ;;  %5098 = vmatpush.msra.mxu3 %v4355_v40  ;;  %v4235_v3 = vld [vmem:[%s13316_s20 + $0x5a8] sm:$0xff]  ;;  %v4314_v45 = vld [vmem:[%s13316_s20 + $0x820] sm:$0xff] }
 0x588   :  { %5043 = vmatpush.msrb.mxu1 %v4171_v44  ;;  %5009 = vmatpush.msra.mxu0 %v4330_v47  ;;  %v4339_v33 = vld [vmem:[%s13316_s20 + $0x8e8] sm:$0xff] }
 0x589   :  { %5073 = vmatpush.msrb.mxu2 %v4243_v19  ;;  %5099 = vmatpush.msra.mxu3 %v4347_v54  ;;  %v4155_v50 = vld [vmem:[%s13316_s20 + $0x328] sm:$0xff] }
 0x58a   :  { %5044 = vmatpush.msrb.mxu1 %v4163_v6  ;;  %5010 = vmatpush.msra.mxu0 %v4322_v43  ;;  %v4147_v16 = vld [vmem:[%s13316_s20 + $0x2e8] sm:$0xff] }
 0x58b   :  { %5074 = vmatpush.msrb.mxu2 %v4235_v3  ;;  %5100 = vmatpush.msra.mxu3 %v4339_v33  ;;  %v4227_v63 = vld [vmem:[%s13316_s20 + $0x568] sm:$0xff] }
 0x58c   :  { %5045 = vmatpush.msrb.mxu1 %v4155_v50  ;;  %5011 = vmatpush.msra.mxu0 %v4314_v45  ;;  %v4331_v40 = vld [vmem:[%s13316_s20 + $0x8a8] sm:$0xff] }
 0x58d   :  { %v4555_v44 = vld [vmem:[%s13316_s20 + $0xfa8] sm:$0xf]  ;;  %5012 = vmatmul.f32.vlgmr.msra.gmra.mxu0 %v9612_v21  ;;  %5938 = vmatmul.msk.f32.gmra.mxu1 %vm3271_vm0, %v9626_v49 }
 0x58e   :  { %v4139_v47 = vld [vmem:[%s13316_s20 + $0x2a8] sm:$0xff]  ;;  %5046 = vmatpush.msrb.mxu1 %v4147_v16  ;;  %5075 = vmatpush.msrb.mxu2 %v4227_v63  ;;  %v4556_v16 = vld [vmem:[%s13316_s20 + $0xfb0] sm:$0xf] }
 0x58f   :  { %v4219_v19 = vld [vmem:[%s13316_s20 + $0x528] sm:$0xff]  ;;  %5101 = vmatpush.msra.mxu3 %v4331_v40  ;;  %5939 = vmatpush.msk.msrb.mxu0 %vm1002_vm8, %v4555_v44 }
 0x590   :  { %v4323_v54 = vld [vmem:[%s13316_s20 + $0x868] sm:$0xff]  ;;  %5047 = vmatpush.msrb.mxu1 %v4139_v47  ;;  %5076 = vmatpush.msrb.mxu2 %v4219_v19  ;;  %v4548_v47 = vld [vmem:[%s13316_s20 + $0xf70] sm:$0xff] }
 0x591   :  { %v4547_v6 = vld [vmem:[%s13316_s20 + $0xf68] sm:$0xff]  ;;  %5102 = vmatpush.msra.mxu3 %v4323_v54 }
 0x592   :  { %v4131_v43 = vld [vmem:[%s13316_s20 + $0x268] sm:$0xff]  ;;  %5113 = vmatpush.msrb.mxu0 %v4547_v6  ;;  %v4540_v6 = vld [vmem:[%s13316_s20 + $0xf30] sm:$0xff] }
 0x593   :  { %v4211_v3 = vld [vmem:[%s13316_s20 + $0x4e8] sm:$0xff]  ;;  %5048 = vmatpush.msrb.mxu1 %v4131_v43 }
 0x594   :  { %v4315_v33 = vld [vmem:[%s13316_s20 + $0x828] sm:$0xff]  ;;  %5077 = vmatpush.msrb.mxu2 %v4211_v3 }
 0x595   :  { %v4539_v50 = vld [vmem:[%s13316_s20 + $0xf28] sm:$0xff]  ;;  %5103 = vmatpush.msra.mxu3 %v4315_v33  ;;  %5015 = vmatmul.f32.gmra.mxu0 %v9659_v61 }
 0x596   :  { %v4123_v45 = vld [vmem:[%s13316_s20 + $0x228] sm:$0xff]  ;;  %5114 = vmatpush.msrb.mxu0 %v4539_v50  ;;  %5104 = vmatmul.f32.vlgmr.msra.gmra.mxu3 %v9612_v21  ;;  %v4532_v50 = vld [vmem:[%s13316_s20 + $0xef0] sm:$0xff] }
 0x597   :  { %v4203_v63 = vld [vmem:[%s13316_s20 + $0x4a8] sm:$0xff]  ;;  %5049 = vmatpush.msrb.mxu1 %v4123_v45  ;;  %5942 = vmatpush.msk.msrb.mxu3 %vm1002_vm8, %v4556_v16  ;;  %v4436_v45 = vld [vmem:[%s13316_s20 + $0xbf0] sm:$0xff] }
 0x598   :  { %v4531_v40 = vld [vmem:[%s13316_s20 + $0xee8] sm:$0xff]  ;;  %5078 = vmatpush.msrb.mxu2 %v4203_v63 }
 0x599   :  { %v4115_v44 = vld [vmem:[%s13316_s20 + $0x1e8] sm:$0xff]  ;;  %5115 = vmatpush.msrb.mxu0 %v4531_v40  ;;  %5205 = vmatpush.msrb.mxu3 %v4548_v47  ;;  %v4428_v40 = vld [vmem:[%s13316_s20 + $0xbb0] sm:$0xff] }
 0x59a   :  { %v4195_v19 = vld [vmem:[%s13316_s20 + $0x468] sm:$0xff]  ;;  %5050 = vmatpush.msrb.mxu1 %v4115_v44  ;;  %v4524_v44 = vld [vmem:[%s13316_s20 + $0xeb0] sm:$0xff] }
 0x59b   :  { %v4523_v54 = vld [vmem:[%s13316_s20 + $0xea8] sm:$0xff]  ;;  %5079 = vmatpush.msrb.mxu2 %v4195_v19  ;;  %5206 = vmatpush.msrb.mxu3 %v4540_v6  ;;  %v4516_v6 = vld [vmem:[%s13316_s20 + $0xe70] sm:$0xff] }
 0x59c   :  { %v4107_v43 = vld [vmem:[%s13316_s20 + $0x1a8] sm:$0xff]  ;;  %5116 = vmatpush.msrb.mxu0 %v4523_v54  ;;  %v4420_v54 = vld [vmem:[%s13316_s20 + $0xb70] sm:$0xff] }
 0x59d   :  { %v4187_v3 = vld [vmem:[%s13316_s20 + $0x428] sm:$0xff]  ;;  %5051 = vmatpush.msrb.mxu1 %v4107_v43  ;;  %5207 = vmatpush.msrb.mxu3 %v4532_v50  ;;  %v4508_v50 = vld [vmem:[%s13316_s20 + $0xe30] sm:$0xff] }
 0x59e   :  { %v4515_v33 = vld [vmem:[%s13316_s20 + $0xe68] sm:$0xff]  ;;  %5080 = vmatpush.msrb.mxu2 %v4187_v3  ;;  %5107 = vmatmul.f32.gmra.mxu3 %v9659_v61 }
 0x59f   :  { %v4099_v16 = vld [vmem:[%s13316_s20 + $0x168] sm:$0xff]  ;;  %5117 = vmatpush.msrb.mxu0 %v4515_v33  ;;  %5081 = vmatmul.f32.vlgmr.msrb.gmra.mxu2 %v9449_v17  ;;  %v4412_v33 = vld [vmem:[%s13316_s20 + $0xb30] sm:$0xff] }
 0x5a0   :  { %v4507_v63 = vld [vmem:[%s13316_s20 + $0xe28] sm:$0xff]  ;;  %5180 = vmatpush.msra.mxu2 %v4436_v45  ;;  %5052 = vmatpush.msrb.mxu1 %v4099_v16 }
 0x5a1   :  { %v4091_v47 = vld [vmem:[%s13316_s20 + $0x128] sm:$0xff]  ;;  %5118 = vmatpush.msrb.mxu0 %v4507_v63  ;;  %5208 = vmatpush.msrb.mxu3 %v4524_v44  ;;  %v4500_v63 = vld [vmem:[%s13316_s20 + $0xdf0] sm:$0xff] }
 0x5a2   :  { %v4499_v19 = vld [vmem:[%s13316_s20 + $0xde8] sm:$0xff]  ;;  %5181 = vmatpush.msra.mxu2 %v4428_v40  ;;  %5053 = vmatpush.msrb.mxu1 %v4091_v47  ;;  %v4404_v40 = vld [vmem:[%s13316_s20 + $0xaf0] sm:$0xff] }
 0x5a3   :  { %v4083_v43 = vld [vmem:[%s13316_s20 + $0xe8] sm:$0xff]  ;;  %5119 = vmatpush.msrb.mxu0 %v4499_v19  ;;  %5209 = vmatpush.msrb.mxu3 %v4516_v6  ;;  %v4492_v19 = vld [vmem:[%s13316_s20 + $0xdb0] sm:$0xff] }
 0x5a4   :  { %v4491_v3 = vld [vmem:[%s13316_s20 + $0xda8] sm:$0xff]  ;;  %5182 = vmatpush.msra.mxu2 %v4420_v54  ;;  %5054 = vmatpush.msrb.mxu1 %v4083_v43  ;;  %v4396_v54 = vld [vmem:[%s13316_s20 + $0xab0] sm:$0xff] }
 0x5a5   :  { %v4075_v45 = vld [vmem:[%s13316_s20 + $0xa8] sm:$0xff]  ;;  %5120 = vmatpush.msrb.mxu0 %v4491_v3  ;;  %5210 = vmatpush.msrb.mxu3 %v4508_v50  ;;  %v4308_v3 = vld [vmem:[%s13316_s20 + $0x7f0] sm:$0xff] }
 0x5a6   :  { %v4483_v16 = vld [vmem:[%s13316_s20 + $0xd68] sm:$0xff]  ;;  %5183 = vmatpush.msra.mxu2 %v4412_v33  ;;  %5055 = vmatpush.msrb.mxu1 %v4075_v45  ;;  %v4388_v33 = vld [vmem:[%s13316_s20 + $0xa70] sm:$0xff] }
 0x5a7   :  { %v4067_v44 = vld [vmem:[%s13316_s20 + $0x68] sm:$0xff]  ;;  %5121 = vmatpush.msrb.mxu0 %v4483_v16  ;;  %5084 = vmatmul.f32.gmra.mxu2 %v9490_v58  ;;  %v4484_v50 = vld [vmem:[%s13316_s20 + $0xd70] sm:$0xff] }
 0x5a8   :  { %v4475_v47 = vld [vmem:[%s13316_s20 + $0xd28] sm:$0xff]  ;;  %5211 = vmatpush.msrb.mxu3 %v4500_v63  ;;  %5184 = vmatpush.msra.mxu2 %v4404_v40  ;;  %v4300_v16 = vld [vmem:[%s13316_s20 + $0x7b0] sm:$0xff] }
 0x5a9   :  { %v4059_v6 = vld [vmem:[%s13316_s20 + $0x28] sm:$0xff]  ;;  %5056 = vmatpush.msrb.mxu1 %v4067_v44  ;;  %5122 = vmatpush.msrb.mxu0 %v4475_v47  ;;  %v4380_v63 = vld [vmem:[%s13316_s20 + $0xa30] sm:$0xff] }
 0x5aa   :  { %v4467_v43 = vld [vmem:[%s13316_s20 + $0xce8] sm:$0xff]  ;;  %5212 = vmatpush.msrb.mxu3 %v4492_v19  ;;  %5185 = vmatpush.msra.mxu2 %v4396_v54  ;;  %v4476_v40 = vld [vmem:[%s13316_s20 + $0xd30] sm:$0xff] }
 0x5ab   :  { %5057 = vmatpush.msrb.mxu1 %v4059_v6  ;;  %v4459_v45 = vld [vmem:[%s13316_s20 + $0xca8] sm:$0xff]  ;;  %5123 = vmatpush.msrb.mxu0 %v4467_v43  ;;  %v4292_v47 = vld [vmem:[%s13316_s20 + $0x770] sm:$0xff] }
 0x5ac   :  { %5058 = vmatmul.f32.vlgmr.msrb.gmra.mxu1 %v9472_v59  ;;  %5186 = vmatpush.msra.mxu2 %v4388_v33  ;;  %v4451_v44 = vld [vmem:[%s13316_s20 + $0xc68] sm:$0xff]  ;;  %v4372_v19 = vld [vmem:[%s13316_s20 + $0x9f0] sm:$0xff] }
 0x5ad   :  { %5157 = vmatpush.msra.mxu1 %v4308_v3  ;;  %5213 = vmatpush.msrb.mxu3 %v4484_v50  ;;  %v4468_v54 = vld [vmem:[%s13316_s20 + $0xcf0] sm:$0xff]  ;;  %v4443_v6 = vld [vmem:[%s13316_s20 + $0xc28] sm:$0xff] }
 0x5ae   :  { %5124 = vmatpush.msrb.mxu0 %v4459_v45  ;;  %5187 = vmatpush.msra.mxu2 %v4380_v63  ;;  %v4284_v43 = vld [vmem:[%s13316_s20 + $0x730] sm:$0xff] }
 0x5af   :  { %5158 = vmatpush.msra.mxu1 %v4300_v16  ;;  %5214 = vmatpush.msrb.mxu3 %v4476_v40  ;;  %v4180_v3 = vld [vmem:[%s13316_s20 + $0x3f0] sm:$0xff] }
 0x5b0   :  { %5125 = vmatpush.msrb.mxu0 %v4451_v44  ;;  %5188 = vmatpush.msra.mxu2 %v4372_v19  ;;  %v4364_v33 = vld [vmem:[%s13316_s20 + $0x9b0] sm:$0xff] }
 0x5b1   :  { %5159 = vmatpush.msra.mxu1 %v4292_v47  ;;  %5215 = vmatpush.msrb.mxu3 %v4468_v54  ;;  %v4460_v50 = vld [vmem:[%s13316_s20 + $0xcb0] sm:$0xff] }
 0x5b2   :  { %5126 = vmatpush.msrb.mxu0 %v4443_v6  ;;  %v4172_v45 = vld [vmem:[%s13316_s20 + $0x3b0] sm:$0xff]  ;;  %5189 = vmatpush.msra.mxu2 %v4364_v33 }
 0x5b3   :  { %5940 = vmatmul.msk.f32.vlgmr.msrb.gmra.mxu0 %vm3271_vm0, %v9579_v12  ;;  %5160 = vmatpush.msra.mxu1 %v4284_v43  ;;  %v4276_v16 = vld [vmem:[%s13316_s20 + $0x6f0] sm:$0xff]  ;;  %v4181_v43 = vld [vmem:[%s13316_s20 + $0x3f8] sm:$0xff] }
 0x5b4   :  { %5134 = vmatpush.msra.mxu0 %v4180_v3  ;;  %v4356_v63 = vld [vmem:[%s13316_s20 + $0x970] sm:$0xff]  ;;  %5216 = vmatpush.msrb.mxu3 %v4460_v50  ;;  %v4173_v50 = vld [vmem:[%s13316_s20 + $0x3b8] sm:$0xff] }
 0x5b5   :  { %v4452_v40 = vld [vmem:[%s13316_s20 + $0xc70] sm:$0xff]  ;;  %5061 = vmatmul.f32.gmra.mxu1 %v9508_v25  ;;  %5190 = vmatpush.msra.mxu2 %v4356_v63 }
 0x5b6   :  { %v4164_v44 = vld [vmem:[%s13316_s20 + $0x370] sm:$0xff]  ;;  %5135 = vmatpush.msra.mxu0 %v4172_v45  ;;  %5161 = vmatpush.msra.mxu1 %v4276_v16 }
 0x5b7   :  { %v4268_v47 = vld [vmem:[%s13316_s20 + $0x6b0] sm:$0xff]  ;;  %5217 = vmatpush.msrb.mxu3 %v4452_v40  ;;  %v4165_v40 = vld [vmem:[%s13316_s20 + $0x378] sm:$0xff] }
 0x5b8   :  { %v4348_v19 = vld [vmem:[%s13316_s20 + $0x930] sm:$0xff]  ;;  %5136 = vmatpush.msra.mxu0 %v4164_v44  ;;  %5162 = vmatpush.msra.mxu1 %v4268_v47 }
 0x5b9   :  { %v4444_v54 = vld [vmem:[%s13316_s20 + $0xc30] sm:$0xff]  ;;  %5191 = vmatpush.msra.mxu2 %v4348_v19 }
 0x5ba   :  { %v4156_v6 = vld [vmem:[%s13316_s20 + $0x330] sm:$0xff]  ;;  %5218 = vmatpush.msrb.mxu3 %v4444_v54  ;;  %v4157_v54 = vld [vmem:[%s13316_s20 + $0x338] sm:$0xff] }
 0x5bb   :  { %v4260_v3 = vld [vmem:[%s13316_s20 + $0x670] sm:$0xff]  ;;  %5943 = vmatmul.msk.f32.vlgmr.msrb.gmra.mxu3 %vm3271_vm0, %v9579_v12  ;;  %5137 = vmatpush.msra.mxu0 %v4156_v6 }
 0x5bc   :  { %v4340_v33 = vld [vmem:[%s13316_s20 + $0x8f0] sm:$0xff]  ;;  %5226 = vmatpush.msra.mxu3 %v4181_v43  ;;  %5163 = vmatpush.msra.mxu1 %v4260_v3 }
 0x5bd   :  { %v4148_v45 = vld [vmem:[%s13316_s20 + $0x2f0] sm:$0xff]  ;;  %5192 = vmatpush.msra.mxu2 %v4340_v33  ;;  %5941 = vmatmul.msk.f32.gmra.mxu0 %vm3271_vm0, %v9626_v49  ;;  %v4149_v33 = vld [vmem:[%s13316_s20 + $0x2f8] sm:$0xff] }
 0x5be   :  { %v4252_v16 = vld [vmem:[%s13316_s20 + $0x630] sm:$0xff]  ;;  %5227 = vmatpush.msra.mxu3 %v4173_v50  ;;  %5138 = vmatpush.msra.mxu0 %v4148_v45  ;;  %v4557_v50 = vld [vmem:[%s13316_s20 + $0xfb8] sm:$0xf] }
 0x5bf   :  { %v4332_v63 = vld [vmem:[%s13316_s20 + $0x8b0] sm:$0xff]  ;;  %5164 = vmatpush.msra.mxu1 %v4252_v16 }
 0x5c0   :  { %v4140_v44 = vld [vmem:[%s13316_s20 + $0x2b0] sm:$0xff]  ;;  %5193 = vmatpush.msra.mxu2 %v4332_v63  ;;  %5228 = vmatpush.msra.mxu3 %v4165_v40  ;;  %v4141_v63 = vld [vmem:[%s13316_s20 + $0x2b8] sm:$0xff] }
 0x5c1   :  { %v4244_v47 = vld [vmem:[%s13316_s20 + $0x5f0] sm:$0xff]  ;;  %5139 = vmatpush.msra.mxu0 %v4140_v44  ;;  %v4549_v40 = vld [vmem:[%s13316_s20 + $0xf78] sm:$0xff] }
 0x5c2   :  { %v4324_v19 = vld [vmem:[%s13316_s20 + $0x870] sm:$0xff]  ;;  %5165 = vmatpush.msra.mxu1 %v4244_v47  ;;  %5229 = vmatpush.msra.mxu3 %v4157_v54  ;;  %v4541_v54 = vld [vmem:[%s13316_s20 + $0xf38] sm:$0xff] }
 0x5c3   :  { %v4132_v6 = vld [vmem:[%s13316_s20 + $0x270] sm:$0xff]  ;;  %5194 = vmatpush.msra.mxu2 %v4324_v19  ;;  %5944 = vmatmul.msk.f32.gmra.mxu3 %vm3271_vm0, %v9626_v49  ;;  %v4133_v19 = vld [vmem:[%s13316_s20 + $0x278] sm:$0xff] }
 0x5c4   :  { %v4236_v43 = vld [vmem:[%s13316_s20 + $0x5b0] sm:$0xff]  ;;  %5140 = vmatpush.msra.mxu0 %v4132_v6  ;;  %5230 = vmatpush.msra.mxu3 %v4149_v33  ;;  %v4533_v33 = vld [vmem:[%s13316_s20 + $0xef8] sm:$0xff] }
 0x5c5   :  { %v4316_v3 = vld [vmem:[%s13316_s20 + $0x830] sm:$0xff]  ;;  %5166 = vmatpush.msra.mxu1 %v4236_v43 }
 0x5c6   :  { %5195 = vmatpush.msra.mxu2 %v4316_v3  ;;  %v4124_v45 = vld [vmem:[%s13316_s20 + $0x230] sm:$0xff]  ;;  %5231 = vmatpush.msra.mxu3 %v4141_v63  ;;  %v4125_v3 = vld [vmem:[%s13316_s20 + $0x238] sm:$0xff] }
 0x5c7   :  { %v4228_v16 = vld [vmem:[%s13316_s20 + $0x570] sm:$0xff]  ;;  %5196 = vmatmul.f32.vlgmr.msra.gmra.mxu2 %v9612_v21  ;;  %5141 = vmatpush.msra.mxu0 %v4124_v45  ;;  %v4525_v63 = vld [vmem:[%s13316_s20 + $0xeb8] sm:$0xff] }
 0x5c8   :  { %5945 = vmatpush.msk.msrb.mxu2 %vm1002_vm8, %v4557_v50  ;;  %v4116_v44 = vld [vmem:[%s13316_s20 + $0x1f0] sm:$0xff]  ;;  %5167 = vmatpush.msra.mxu1 %v4228_v16  ;;  %v4117_v16 = vld [vmem:[%s13316_s20 + $0x1f8] sm:$0xff] }
 0x5c9   :  { %v4220_v47 = vld [vmem:[%s13316_s20 + $0x530] sm:$0xff]  ;;  %5142 = vmatpush.msra.mxu0 %v4116_v44  ;;  %5232 = vmatpush.msra.mxu3 %v4133_v19  ;;  %v4517_v19 = vld [vmem:[%s13316_s20 + $0xe78] sm:$0xff] }
 0x5ca   :  { %5297 = vmatpush.msrb.mxu2 %v4549_v40  ;;  %v4108_v6 = vld [vmem:[%s13316_s20 + $0x1b0] sm:$0xff]  ;;  %5168 = vmatpush.msra.mxu1 %v4220_v47  ;;  %v4109_v47 = vld [vmem:[%s13316_s20 + $0x1b8] sm:$0xff] }
 0x5cb   :  { %v4212_v43 = vld [vmem:[%s13316_s20 + $0x4f0] sm:$0xff]  ;;  %5143 = vmatpush.msra.mxu0 %v4108_v6  ;;  %5233 = vmatpush.msra.mxu3 %v4125_v3  ;;  %v12273_v6 = vpop.f32.mrf.mxu2  ;;  %v4101_v3 = vld [vmem:[%s13316_s20 + $0x178] sm:$0xff] }
 0x5cc   :  { %5298 = vmatpush.msrb.mxu2 %v4541_v54  ;;  %v4100_v50 = vld [vmem:[%s13316_s20 + $0x170] sm:$0xff]  ;;  %5169 = vmatpush.msra.mxu1 %v4212_v43 }
 0x5cd   :  { %v4204_v45 = vld [vmem:[%s13316_s20 + $0x4b0] sm:$0xff]  ;;  %5144 = vmatpush.msra.mxu0 %v4100_v50  ;;  %5234 = vmatpush.msra.mxu3 %v4117_v16  ;;  %v4509_v50 = vld [vmem:[%s13316_s20 + $0xe38] sm:$0xff]  ;;  %v12288_v16 = vpop.f32.mrf.mxu0 }
 0x5ce   :  { %5299 = vmatpush.msrb.mxu2 %v4533_v33  ;;  %v4092_v40 = vld [vmem:[%s13316_s20 + $0x130] sm:$0xff]  ;;  %5170 = vmatpush.msra.mxu1 %v4204_v45  ;;  %v12281_v33 = vpop.f32.mrf.mxu3  ;;  %v12286_v45 = vpop.f32.mrf.mxu1 }
 0x5cf   :  { %v4196_v44 = vld [vmem:[%s13316_s20 + $0x470] sm:$0xff]  ;;  %5199 = vmatmul.f32.gmra.mxu2 %v9659_v61  ;;  %5145 = vmatpush.msra.mxu0 %v4092_v40 }
 0x5d0   :  { %v4084_v54 = vld [vmem:[%s13316_s20 + $0xf0] sm:$0xff]  ;;  %5300 = vmatpush.msrb.mxu2 %v4525_v63  ;;  %5171 = vmatpush.msra.mxu1 %v4196_v44  ;;  %v4437_v63 = vld [vmem:[%s13316_s20 + $0xbf8] sm:$0xff] }
 0x5d1   :  { %v4188_v43 = vld [vmem:[%s13316_s20 + $0x430] sm:$0xff]  ;;  %5235 = vmatpush.msra.mxu3 %v4109_v47  ;;  %5146 = vmatpush.msra.mxu0 %v4084_v54  ;;  %v4093_v44 = vld [vmem:[%s13316_s20 + $0x138] sm:$0xff] }
 0x5d2   :  { %5301 = vmatpush.msrb.mxu2 %v4517_v19  ;;  %v4076_v40 = vld [vmem:[%s13316_s20 + $0xb0] sm:$0xff]  ;;  %5172 = vmatpush.msra.mxu1 %v4188_v43  ;;  %v4501_v47 = vld [vmem:[%s13316_s20 + $0xdf8] sm:$0xff] }
 0x5d3   :  { %5236 = vmatpush.msra.mxu3 %v4101_v3  ;;  %5173 = vmatmul.f32.vlgmr.msra.gmra.mxu1 %v9449_v17  ;;  %v4429_v19 = vld [vmem:[%s13316_s20 + $0xbb8] sm:$0xff]  ;;  %v4068_v54 = vld [vmem:[%s13316_s20 + $0x70] sm:$0xff] }
 0x5d4   :  { %5302 = vmatpush.msrb.mxu2 %v4509_v50  ;;  %5272 = vmatpush.msrb.mxu1 %v4437_v63  ;;  %v4085_v43 = vld [vmem:[%s13316_s20 + $0xf8] sm:$0xff] }
 0x5d5   :  { %5147 = vmatpush.msra.mxu0 %v4076_v40  ;;  %v4493_v3 = vld [vmem:[%s13316_s20 + $0xdb8] sm:$0xff]  ;;  %5237 = vmatpush.msra.mxu3 %v4093_v44  ;;  %v12352_v18 = vpop.f32.mrf.mxu0 }
 0x5d6   :  { %5303 = vmatpush.msrb.mxu2 %v4501_v47  ;;  %v4421_v50 = vld [vmem:[%s13316_s20 + $0xb78] sm:$0xff]  ;;  %5273 = vmatpush.msrb.mxu1 %v4429_v19  ;;  %v12333_v19 = vpop.f32.mrf.mxu2 }
 0x5d7   :  { %5148 = vmatpush.msra.mxu0 %v4068_v54  ;;  %v4077_v63 = vld [vmem:[%s13316_s20 + $0xb8] sm:$0xff]  ;;  %5238 = vmatpush.msra.mxu3 %v4085_v43 }
 0x5d8   :  { %5304 = vmatpush.msrb.mxu2 %v4493_v3  ;;  %v4309_v40 = vld [vmem:[%s13316_s20 + $0x7f8] sm:$0xff]  ;;  %5274 = vmatpush.msrb.mxu1 %v4421_v50  ;;  %v12342_v3 = vpop.f32.mrf.mxu3 }
 0x5d9   :  { %v4413_v44 = vld [vmem:[%s13316_s20 + $0xb38] sm:$0xff]  ;;  %5149 = vmatpush.msra.mxu0 %v4060_v51  ;;  %5239 = vmatpush.msra.mxu3 %v4077_v63  ;;  %v12350_v63 = vpop.f32.mrf.mxu1 }
 0x5da   :  { %v4485_v47 = vld [vmem:[%s13316_s20 + $0xd78] sm:$0xff]  ;;  %5150 = vmatmul.f32.vlgmr.msra.gmra.mxu0 %v9472_v59  ;;  %5275 = vmatpush.msrb.mxu1 %v4413_v44 }
 0x5db   :  { %v4069_v54 = vld [vmem:[%s13316_s20 + $0x78] sm:$0xff]  ;;  %5249 = vmatpush.msrb.mxu0 %v4309_v40  ;;  %5305 = vmatpush.msrb.mxu2 %v4485_v47 }
 0x5dc   :  { %v4301_v43 = vld [vmem:[%s13316_s20 + $0x7b8] sm:$0xff]  ;;  %5176 = vmatmul.f32.gmra.mxu1 %v9490_v58  ;;  %5240 = vmatpush.msra.mxu3 %v4069_v54 }
 0x5dd   :  { %v4405_v51 = vld [vmem:[%s13316_s20 + $0xaf8] sm:$0xff]  ;;  %5250 = vmatpush.msrb.mxu0 %v4301_v43  ;;  %v12405_v60 = vpop.f32.mrf.mxu0 }
 0x5de   :  { %v4477_v50 = vld [vmem:[%s13316_s20 + $0xd38] sm:$0xff]  ;;  %5276 = vmatpush.msrb.mxu1 %v4405_v51 }
 0x5df   :  { %v4061_v40 = vld [vmem:[%s13316_s20 + $0x38] sm:$0xff]  ;;  %5306 = vmatpush.msrb.mxu2 %v4477_v50  ;;  %v5364_v50 = vld [vmem:[%s13317_s21 + $0xf0] sm:$0xff] }
 0x5e0   :  { %v4293_v44 = vld [vmem:[%s13316_s20 + $0x778] sm:$0xff]  ;;  %5241 = vmatpush.msra.mxu3 %v4061_v40  ;;  %5277 = vmatpush.msrb.mxu1 %v4397_v39 }
 0x5e1   :  { %v4469_v47 = vld [vmem:[%s13316_s20 + $0xcf8] sm:$0xff]  ;;  %5251 = vmatpush.msrb.mxu0 %v4293_v44  ;;  %5242 = vmatmul.f32.vlgmr.msra.gmra.mxu3 %v9472_v59  ;;  %v12386_v44 = vpop.f32.mrf.mxu2  ;;  %v12394_v59 = vpop.f32.mrf.mxu3 }
 0x5e2   :  { %v5365_v54 = vld [vmem:[%s13317_s21 + $0xf8] sm:$0xff]  ;;  %5307 = vmatpush.msrb.mxu2 %v4469_v47  ;;  %5153 = vmatmul.f32.gmra.mxu0 %v9508_v25  ;;  %v5363_v47 = vld [vmem:[%s13317_s21 + $0xe8] sm:$0xff] }
 0x5e3   :  { %v4389_v43 = vld [vmem:[%s13316_s20 + $0xa78] sm:$0xff]  ;;  %5252 = vmatpush.msrb.mxu0 %v4285_v27  ;;  %5489 = vmatpush.msrb.mxu3 %v5365_v54 }
 0x5e4   :  { %v4461_v51 = vld [vmem:[%s13316_s20 + $0xcb8] sm:$0xff]  ;;  %5278 = vmatpush.msrb.mxu1 %v4389_v43  ;;  %v12403_v43 = vpop.f32.mrf.mxu1 }
 0x5e5   :  { %v4277_v40 = vld [vmem:[%s13316_s20 + $0x6f8] sm:$0xff]  ;;  %5308 = vmatpush.msrb.mxu2 %v4461_v51  ;;  %5490 = vmatpush.msrb.mxu3 %v5364_v50  ;;  %v12476_v9 = vpop.f32.mrf.mxu0 }
 0x5e6   :  { %v4381_v39 = vld [vmem:[%s13316_s20 + $0xa38] sm:$0xff]  ;;  %5253 = vmatpush.msrb.mxu0 %v4277_v40 }
 0x5e7   :  { %v4453_v27 = vld [vmem:[%s13316_s20 + $0xc78] sm:$0xff]  ;;  %5279 = vmatpush.msrb.mxu1 %v4381_v39  ;;  %5491 = vmatpush.msrb.mxu3 %v5363_v47 }
 0x5e8   :  { %v4269_v54 = vld [vmem:[%s13316_s20 + $0x6b8] sm:$0xff]  ;;  %5309 = vmatpush.msrb.mxu2 %v4453_v27  ;;  %v5348_v27 = vld [vmem:[%s13317_s21 + $0x70] sm:$0xff] }
 0x5e9   :  { %v4373_v51 = vld [vmem:[%s13316_s20 + $0x9f8] sm:$0xff]  ;;  %5254 = vmatpush.msrb.mxu0 %v4269_v54  ;;  %5492 = vmatpush.msrb.mxu3 %v5362_v0  ;;  %v5360_v0 = vld [vmem:[%s13317_s21 + $0xd0] sm:$0xff]  ;;  %v12466_v31 = vpop.f32.mrf.mxu3 }
 0x5ea   :  { %v5349_v50 = vld [vmem:[%s13317_s21 + $0x78] sm:$0xff]  ;;  %5280 = vmatpush.msrb.mxu1 %v4373_v51  ;;  %5310 = vmatpush.msrb.mxu2 %v4445_v15 }
 0x5eb   :  { %v4261_v40 = vld [vmem:[%s13316_s20 + $0x678] sm:$0xff]  ;;  %5946 = vmatmul.msk.f32.vlgmr.msrb.gmra.mxu2 %vm3271_vm0, %v9579_v12  ;;  %5245 = vmatmul.f32.gmra.mxu3 %v9508_v25  ;;  %v5347_v12 = vld [vmem:[%s13317_s21 + $0x68] sm:$0xff]  ;;  %v12455_v25 = vld [vmem:[%s13315_s19] sm:$0xff] }
 0x5ec   :  { %v4365_v39 = vld [vmem:[%s13316_s20 + $0x9b8] sm:$0xff]  ;;  %5466 = vmatpush.msra.mxu2 %v5349_v50  ;;  %5255 = vmatpush.msrb.mxu0 %v4261_v40  ;;  %v3256_v40 = vperm.slane %v12455_v25, 1  ;;  %v3255_v24 = vperm.slane %v12455_v25, 0 }
 0x5ed   :  { %v5361_v47 = vld [vmem:[%s13317_s21 + $0xd8] sm:$0xff]  ;;  %5281 = vmatpush.msrb.mxu1 %v4365_v39  ;;  %v12458_v39 = vpop.f32.mrf.mxu2 }
 0x5ee   :  { %v4253_v15 = vld [vmem:[%s13316_s20 + $0x638] sm:$0xff]  ;;  %5467 = vmatpush.msra.mxu2 %v5348_v27  ;;  %5493 = vmatpush.msrb.mxu3 %v5361_v47  ;;  %v5346_v27 = vld [vmem:[%s13317_s21 + $0x60] sm:$0xff]  ;;  %v5359_v47 = vld [vmem:[%s13317_s21 + $0xc8] sm:$0xff]  ;;  %v3412_v35 = vadd.f32 %v10789_v1, %v3256_v40 }
 0x5ef   :  { %v4357_v54 = vld [vmem:[%s13316_s20 + $0x978] sm:$0xff]  ;;  %5256 = vmatpush.msrb.mxu0 %v4253_v15 }
 0x5f0   :  { %v4245_v51 = vld [vmem:[%s13316_s20 + $0x5f8] sm:$0xff]  ;;  %5282 = vmatpush.msrb.mxu1 %v4357_v54  ;;  %5468 = vmatpush.msra.mxu2 %v5347_v12  ;;  %v12474_v54 = vpop.f32.mrf.mxu1 }
 0x5f1   :  { %v4349_v50 = vld [vmem:[%s13316_s20 + $0x938] sm:$0xff]  ;;  %5494 = vmatpush.msrb.mxu3 %v5360_v0  ;;  %5257 = vmatpush.msrb.mxu0 %v4245_v51  ;;  %v12525_v48 = vpop.f32.mrf.mxu3 }
 0x5f2   :  { %v4341_v15 = vld [vmem:[%s13316_s20 + $0x8f8] sm:$0xff]  ;;  %5283 = vmatpush.msrb.mxu1 %v4349_v50  ;;  %5469 = vmatpush.msra.mxu2 %v5346_v27  ;;  %v5344_v27 = vld [vmem:[%s13317_s21 + $0x50] sm:$0xff] }
 0x5f3   :  { %5495 = vmatpush.msrb.mxu3 %v5359_v47  ;;  %v5345_v12 = vld [vmem:[%s13317_s21 + $0x58] sm:$0xff]  ;;  %5258 = vmatpush.msrb.mxu0 %v4237_v22  ;;  %v5356_v47 = vld [vmem:[%s13317_s21 + $0xb0] sm:$0xff] }
 0x5f4   :  { %v4229_v0 = vld [vmem:[%s13316_s20 + $0x578] sm:$0xff]  ;;  %5284 = vmatpush.msrb.mxu1 %v4341_v15  ;;  %5947 = vmatmul.msk.f32.gmra.mxu2 %vm3271_vm0, %v9626_v49  ;;  %v5343_v49 = vld [vmem:[%s13317_s21 + $0x48] sm:$0xff]  ;;  %v3320_v15 = vadd.f32 %v10664_v36, %v3255_v24  ;;  %v5342_v36 = vld [vmem:[%s13317_s21 + $0x40] sm:$0xff] }
 0x5f5   :  { %v4333_v51 = vld [vmem:[%s13316_s20 + $0x8b8] sm:$0xff]  ;;  %5496 = vmatpush.msrb.mxu3 %v5358_v52  ;;  %5470 = vmatpush.msra.mxu2 %v5345_v12  ;;  %v3435_v12 = vadd.f32 %v10806_v23, %v3412_v35 }
 0x5f6   :  { %v5357_v50 = vld [vmem:[%s13317_s21 + $0xb8] sm:$0xff]  ;;  %5259 = vmatpush.msrb.mxu0 %v4229_v0  ;;  %5285 = vmatpush.msrb.mxu1 %v4333_v51  ;;  %v12517_v0 = vpop.f32.mrf.mxu2 }
 0x5f7   :  { %v4221_v1 = vld [vmem:[%s13316_s20 + $0x538] sm:$0xff]  ;;  %5497 = vmatpush.msrb.mxu3 %v5357_v50  ;;  %5471 = vmatpush.msra.mxu2 %v5344_v27  ;;  %v5355_v50 = vld [vmem:[%s13317_s21 + $0xa8] sm:$0xff]  ;;  %v3458_v23 = vadd.f32 %v10893_v56, %v3435_v12  ;;  %v12533_v27 = vpop.f32.mrf.mxu0 }
 0x5f8   :  { %v4325_v22 = vld [vmem:[%s13316_s20 + $0x878] sm:$0xff]  ;;  %5260 = vmatpush.msrb.mxu0 %v4221_v1  ;;  %v12531_v35 = vpop.f32.mrf.mxu1 }
 0x5f9   :  { %v4213_v52 = vld [vmem:[%s13316_s20 + $0x4f8] sm:$0xff]  ;;  %5286 = vmatpush.msrb.mxu1 %v4325_v22  ;;  %5498 = vmatpush.msrb.mxu3 %v5356_v47  ;;  %v5354_v47 = vld [vmem:[%s13317_s21 + $0xa0] sm:$0xff]  ;;  %v3481_v12 = vadd.f32 %v10924_v29, %v3458_v23  ;;  %v5395_v29 = vld [vmem:[%s13317_s21 + $0x1e8] sm:$0xff] }
 0x5fa   :  { %v4317_v51 = vld [vmem:[%s13316_s20 + $0x838] sm:$0xff]  ;;  %5472 = vmatpush.msra.mxu2 %v5343_v49  ;;  %5261 = vmatpush.msrb.mxu0 %v4213_v52  ;;  %v3343_v49 = vadd.f32 %v10675_v37, %v3320_v15  ;;  %v3415_v52 = vadd.f32 %v10853_v26, %v3256_v40  ;;  %v5340_v37 = vld [vmem:[%s13317_s21 + $0x30] sm:$0xff]  ;;  %v4715_v15 = vadd.f32 %v12394_v59, %v12386_v44 }
 0x5fb   :  { %v5397_v1 = vld [vmem:[%s13317_s21 + $0x1f8] sm:$0xff]  ;;  %5287 = vmatpush.msrb.mxu1 %v4317_v51  ;;  %5499 = vmatpush.msrb.mxu3 %v5355_v50  ;;  %v5396_v51 = vld [vmem:[%s13317_s21 + $0x1f0] sm:$0xff]  ;;  %6018 = vtanh.f32 %v3481_v12 }
 0x5fc   :  { %v4205_v22 = vld [vmem:[%s13316_s20 + $0x4b8] sm:$0xff]  ;;  %5288 = vmatmul.f32.vlgmr.msrb.gmra.mxu1 %v9612_v21  ;;  %5473 = vmatpush.msra.mxu2 %v5342_v36  ;;  %v3366_v21 = vadd.f32 %v10797_v42, %v3343_v49  ;;  %v5339_v36 = vld [vmem:[%s13317_s21 + $0x28] sm:$0xff]  ;;  %v3323_v42 = vadd.f32 %v10725_v32, %v3255_v24  ;;  %v3438_v23 = vadd.f32 %v10869_v7, %v3415_v52  ;;  %v5394_v32 = vld [vmem:[%s13317_s21 + $0x1e0] sm:$0xff]  ;;  %v12601_v52 = vpop.f32.mrf.mxu3 }
 0x5fd   :  { %v5341_v56 = vld [vmem:[%s13317_s21 + $0x38] sm:$0xff]  ;;  %5535 = vmatpush.msra.mxu1 %v5397_v1  ;;  %5262 = vmatpush.msrb.mxu0 %v4205_v22  ;;  %v5352_v1 = vld [vmem:[%s13317_s21 + $0x90] sm:$0xff]  ;;  %v4738_v59 = vadd.f32 %v12403_v43, %v4715_v15  ;;  %v5338_v7 = vld [vmem:[%s13317_s21 + $0x20] sm:$0xff]  ;;  %v3257_v15 = vperm.slane %v12455_v25, 2 }
 0x5fe   :  { %v4197_v50 = vld [vmem:[%s13316_s20 + $0x478] sm:$0xff]  ;;  %5474 = vmatpush.msra.mxu2 %v5341_v56  ;;  %5500 = vmatpush.msrb.mxu3 %v5354_v47  ;;  %v3389_v24 = vadd.f32 %v10768_v5, %v3366_v21  ;;  %v3461_v22 = vadd.f32 %v10962_v20, %v3438_v23  ;;  %v12592_v56 = vpop.f32.mrf.mxu2  ;;  %v5351_v43 = vld [vmem:[%s13317_s21 + $0x88] sm:$0xff]  ;;  %v4623_v47 = vadd.f32 %v12281_v33, %v12273_v6  ;;  %v5380_v20 = vld [vmem:[%s13317_s21 + $0x170] sm:$0xff] }
 0x5ff   :  { %v5353_v26 = vld [vmem:[%s13317_s21 + $0x98] sm:$0xff]  ;;  %5536 = vmatpush.msra.mxu1 %v5396_v51  ;;  %5263 = vmatpush.msrb.mxu0 %v4197_v50  ;;  %v4761_v49 = vadd.f32 %v12405_v60, %v4738_v59  ;;  %v3346_v5 = vadd.f32 %v10739_v62, %v3323_v42  ;;  %v12613_v6 = vpop.f32.mrf.mxu0  ;;  %v5350_v33 = vld [vmem:[%s13317_s21 + $0x80] sm:$0xff]  ;;  %v3258_v50 = vperm.slane %v12455_v25, 3 }
 0x600   :  { %v4189_v40 = vld [vmem:[%s13316_s20 + $0x438] sm:$0xff]  ;;  %5475 = vmatpush.msra.mxu2 %v5340_v37  ;;  %5501 = vmatpush.msrb.mxu3 %v5353_v26  ;;  %v3484_v12 = vadd.f32 %v10990_v55, %v3461_v22  ;;  %v12611_v51 = vpop.f32.mrf.mxu1  ;;  %v4646_v62 = vadd.f32 %v12288_v16, %v4623_v47  ;;  %v5379_v55 = vld [vmem:[%s13317_s21 + $0x168] sm:$0xff]  ;;  %v5392_v37 = vld [vmem:[%s13317_s21 + $0x1d0] sm:$0xff]  ;;  %6020 = vtanh.f32 %v3389_v24 }
 0x601   :  { %v5381_v44 = vld [vmem:[%s13317_s21 + $0x178] sm:$0xff]  ;;  %5537 = vmatpush.msra.mxu1 %v5395_v29  ;;  %5264 = vmatpush.msrb.mxu0 %v4189_v40  ;;  %v6019_v26 = vpop.eup %6018  ;;  %v3369_v21 = vadd.f32 %v10861_v11, %v3346_v5  ;;  %v5336_v16 = vld [vmem:[%s13317_s21 + $0x10] sm:$0xff]  ;;  %v5378_v40 = vld [vmem:[%s13317_s21 + $0x160] sm:$0xff] }
 0x602   :  { %5265 = vmatmul.f32.vlgmr.msrb.gmra.mxu0 %v9449_v17  ;;  %5476 = vmatpush.msra.mxu2 %v5339_v36  ;;  %v5393_v17 = vld [vmem:[%s13317_s21 + $0x1d8] sm:$0xff]  ;;  %v5319_v29 = vadd.f32 %v6019_v26, %v4761_v49  ;;  %v5391_v11 = vld [vmem:[%s13317_s21 + $0x1c8] sm:$0xff]  ;;  %6022 = vtanh.f32 %v3484_v12  ;;  %v4669_v36 = vadd.f32 %v12286_v45, %v4646_v62  ;;  %v5412_v12 = vld [vmem:[%s13317_s21 + $0x270] sm:$0xff] }
 0x603   :  { %5502 = vmatpush.msrb.mxu3 %v5352_v1  ;;  %5512 = vmatpush.msra.mxu0 %v5381_v44  ;;  %v5337_v60 = vld [vmem:[%s13317_s21 + $0x18] sm:$0xff]  ;;  %v5390_v1 = vld [vmem:[%s13317_s21 + $0x1c0] sm:$0xff]  ;;  %v3392_v44 = vadd.f32 %v10831_v13, %v3369_v21  ;;  %v5376_v13 = vld [vmem:[%s13317_s21 + $0x150] sm:$0xff] }
 0x604   :  { %5538 = vmatpush.msra.mxu1 %v5394_v32  ;;  %5477 = vmatpush.msra.mxu2 %v5338_v7  ;;  %v5377_v23 = vld [vmem:[%s13317_s21 + $0x158] sm:$0xff]  ;;  %v4898_v7 = vpop.f32.mrf.mxu3  ;;  %v5387_v62 = vld [vmem:[%s13317_s21 + $0x1a8] sm:$0xff] }
 0x605   :  { %5291 = vmatmul.f32.gmra.mxu1 %v9659_v61  ;;  %5503 = vmatpush.msrb.mxu3 %v5351_v43  ;;  %v4718_v61 = vadd.f32 %v12466_v31, %v12458_v39  ;;  %v5335_v31 = vld [vmem:[%s13317_s21 + $0x8] sm:$0xff]  ;;  %v3596_v39 = vadd.f32 %v11037_v30, %v3258_v50  ;;  %v5334_v30 = vld [vmem:[%s13317_s21] sm:$0xff]  ;;  %v5429_v45 = vld [vmem:[%s13317_s21 + $0x2f8] sm:$0xff]  ;;  %v3504_v43 = vadd.f32 %v10916_v10, %v3257_v15  ;;  %6024 = vtanh.f32 %v3392_v44 }
 0x606   :  { %5513 = vmatpush.msra.mxu0 %v5380_v20  ;;  %5539 = vmatpush.msra.mxu1 %v5393_v17  ;;  %v4875_v59 = vpop.f32.mrf.mxu2  ;;  %v5389_v24 = vld [vmem:[%s13317_s21 + $0x1b8] sm:$0xff]  ;;  %v6021_v22 = vpop.eup %6020  ;;  %v5375_v10 = vld [vmem:[%s13317_s21 + $0x148] sm:$0xff] }
 0x607   :  { %5478 = vmatpush.msra.mxu2 %v5337_v60  ;;  %5504 = vmatpush.msrb.mxu3 %v5350_v33  ;;  %v4741_v42 = vadd.f32 %v12474_v54, %v4718_v61  ;;  %v4626_v54 = vadd.f32 %v12342_v3, %v12333_v19  ;;  %v12677_v3 = vpop.f32.mrf.mxu0  ;;  %v5318_v47 = vadd.f32 %v6021_v22, %v4669_v36  ;;  %v5413_v20 = vld [vmem:[%s13317_s21 + $0x278] sm:$0xff]  ;;  %v5374_v60 = vld [vmem:[%s13317_s21 + $0x140] sm:$0xff]  ;;  %v5372_v61 = vld [vmem:[%s13317_s21 + $0x130] sm:$0xff] }
 0x608   :  { %5514 = vmatpush.msra.mxu0 %v5379_v55  ;;  %5540 = vmatpush.msra.mxu1 %v5392_v37  ;;  %v4921_v19 = vpop.f32.mrf.mxu1  ;;  %v6023_v17 = vpop.eup %6022  ;;  %v3527_v33 = vadd.f32 %v10932_v53, %v3504_v43  ;;  %v3599_v55 = vadd.f32 %v11101_v34, %v3258_v50  ;;  %v5411_v53 = vld [vmem:[%s13317_s21 + $0x268] sm:$0xff]  ;;  %v5373_v21 = vld [vmem:[%s13317_s21 + $0x138] sm:$0xff]  ;;  %v5426_v34 = vld [vmem:[%s13317_s21 + $0x2e0] sm:$0xff] }
 0x609   :  { %5505 = vmatmul.f32.vlgmr.msrb.gmra.mxu3 %v5319_v29  ;;  %5479 = vmatpush.msra.mxu2 %v5336_v16  ;;  %v4764_v32 = vadd.f32 %v12476_v9, %v4741_v42  ;;  %v3619_v9 = vadd.f32 %v11045_v28, %v3596_v39  ;;  %v4649_v49 = vadd.f32 %v12352_v18, %v4626_v54  ;;  %v5388_v28 = vld [vmem:[%s13317_s21 + $0x1b0] sm:$0xff]  ;;  %v3259_v16 = vperm.slane %v12455_v25, 4  ;;  %v5410_v50 = vld [vmem:[%s13317_s21 + $0x260] sm:$0xff] }
 0x60a   :  { %5515 = vmatpush.msra.mxu0 %v5378_v40  ;;  %5541 = vmatpush.msra.mxu1 %v5391_v11  ;;  %v4899_v40 = vadd.f32 %v4898_v7, %v4875_v59  ;;  %v3622_v39 = vadd.f32 %v11112_v4, %v3599_v55  ;;  %v5384_v4 = vld [vmem:[%s13317_s21 + $0x190] sm:$0xff]  ;;  %v4807_v7 = vadd.f32 %v12525_v48, %v12517_v0  ;;  %v5407_v48 = vld [vmem:[%s13317_s21 + $0x248] sm:$0xff]  ;;  %v5369_v0 = vld [vmem:[%s13317_s21 + $0x118] sm:$0xff] }
 0x60b   :  { %5268 = vmatmul.f32.gmra.mxu0 %v9490_v58  ;;  %5480 = vmatpush.msra.mxu2 %v5335_v31  ;;  %v5428_v58 = vld [vmem:[%s13317_s21 + $0x2f0] sm:$0xff]  ;;  %v3642_v18 = vadd.f32 %v11143_v57, %v3619_v9  ;;  %v5327_v5 = vadd.f32 %v6023_v17, %v4764_v32  ;;  %v5427_v57 = vld [vmem:[%s13317_s21 + $0x2e8] sm:$0xff]  ;;  %v4672_v26 = vadd.f32 %v12350_v63, %v4649_v49  ;;  %v6025_v29 = vpop.eup %6024  ;;  %v5385_v31 = vld [vmem:[%s13317_s21 + $0x198] sm:$0xff] }
 0x60c   :  { %5516 = vmatpush.msra.mxu0 %v5377_v23  ;;  %5542 = vmatpush.msra.mxu1 %v5390_v1  ;;  %v3550_v63 = vadd.f32 %v11053_v14, %v3527_v33  ;;  %v3507_v14 = vadd.f32 %v10982_v38, %v3257_v15  ;;  %v4901_v36 = vpop.f32.mrf.mxu3  ;;  %v5409_v23 = vld [vmem:[%s13317_s21 + $0x258] sm:$0xff]  ;;  %v5371_v1 = vld [vmem:[%s13317_s21 + $0x128] sm:$0xff]  ;;  %v3688_v44 = vadd.f32 %v11151_v8, %v3259_v16  ;;  %v5408_v8 = vld [vmem:[%s13317_s21 + $0x250] sm:$0xff] }
 0x60d   :  { %5481 = vmatpush.msra.mxu2 %v5334_v30  ;;  %5581 = vmatpush.msra.mxu3 %v5429_v45  ;;  %v3665_v37 = vadd.f32 %v11170_v46, %v3642_v18  ;;  %v5386_v46 = vld [vmem:[%s13317_s21 + $0x1a0] sm:$0xff]  ;;  %v5326_v42 = vadd.f32 %v6025_v29, %v4672_v26  ;;  %v4922_v38 = vadd.f32 %v4921_v19, %v4899_v40  ;;  %v5425_v30 = vld [vmem:[%s13317_s21 + $0x2d8] sm:$0xff]  ;;  %v13440_v43 = vld [vmem:[#allocation74_spill] sm:$0xff] }
 0x60e   :  { %5517 = vmatpush.msra.mxu0 %v5376_v13  ;;  %5543 = vmatpush.msra.mxu1 %v5389_v24  ;;  %v4878_v11 = vpop.f32.mrf.mxu2  ;;  %v3573_v45 = vadd.f32 %v11029_v41, %v3550_v63  ;;  %v3645_v54 = vadd.f32 %v11209_v2, %v3622_v39  ;;  %v5370_v32 = vld [vmem:[%s13317_s21 + $0x120] sm:$0xff]  ;;  %v5383_v41 = vld [vmem:[%s13317_s21 + $0x188] sm:$0xff]  ;;  %v5424_v2 = vld [vmem:[%s13317_s21 + $0x2d0] sm:$0xff]  ;;  %v4830_v9 = vadd.f32 %v12533_v27, %v4807_v7 }
 0x60f   :  { %5482 = vmatmul.f32.vlgmr.msra.gmra.mxu2 %v5318_v47  ;;  %5582 = vmatpush.msra.mxu3 %v5428_v58  ;;  %6026 = vtanh.f32 %v3665_v37  ;;  %v12748_v59 = vpop.f32.mrf.mxu0  ;;  %v4945_v13 = vadd.f32 %v12677_v3, %v4922_v38  ;;  %v13439_v24 = vld [vmem:[#allocation68_spill] sm:$0xff]  ;;  %v13441_v3 = vld [vmem:[#allocation71_spill] sm:$0xff]  ;;  %v5423_v49 = vld [vmem:[%s13317_s21 + $0x2c8] sm:$0xff] }
 0x610   :  { %5558 = vmatpush.msrb.mxu2 %v5413_v20  ;;  %5518 = vmatpush.msra.mxu0 %v5375_v10  ;;  %v4924_v15 = vpop.f32.mrf.mxu1  ;;  %v3530_v22 = vadd.f32 %v13439_v24, %v3507_v14  ;;  %v3668_v19 = vadd.f32 %v13440_v43, %v3645_v54  ;;  %v3711_v58 = vadd.f32 %v13441_v3, %v3688_v44  ;;  %v5382_v47 = vld [vmem:[%s13317_s21 + $0x180] sm:$0xff]  ;;  %6028 = vtanh.f32 %v3573_v45  ;;  %v13442_v10 = vld [vmem:[#allocation70_spill] sm:$0xff]  ;;  %v5405_v55 = vld [vmem:[%s13317_s21 + $0x238] sm:$0xff] }
 0x611   :  { %5544 = vmatpush.msra.mxu1 %v5388_v28  ;;  %5508 = vmatmul.f32.gmra.mxu3 %v5327_v5  ;;  %v5406_v28 = vld [vmem:[%s13317_s21 + $0x240] sm:$0xff]  ;;  %v13443_v27 = vld [vmem:[#allocation78_spill] sm:$0xff]  ;;  %v4902_v5 = vadd.f32 %v4901_v36, %v4878_v11  ;;  %v4810_v11 = vadd.f32 %v12601_v52, %v12592_v56  ;;  %v13447_v56 = vld [vmem:[#allocation73_spill] sm:$0xff] }
 0x612   :  { %5559 = vmatpush.msrb.mxu2 %v5412_v12  ;;  %5519 = vmatpush.msra.mxu0 %v5374_v60  ;;  %v3553_v17 = vadd.f32 %v13442_v10, %v3530_v22  ;;  %v3734_v18 = vadd.f32 %v13443_v27, %v3711_v58  ;;  %v5368_v33 = vld [vmem:[%s13317_s21 + $0x110] sm:$0xff]  ;;  %6030 = vtanh.f32 %v3668_v19  ;;  %v13444_v37 = vld [vmem:[#allocation72_spill] sm:$0xff]  ;;  %v5419_v38 = vld [vmem:[%s13317_s21 + $0x2a8] sm:$0xff] }
 0x613   :  { %5545 = vmatpush.msra.mxu1 %v5387_v62  ;;  %5583 = vmatpush.msra.mxu3 %v5427_v57  ;;  %v5422_v62 = vld [vmem:[%s13317_s21 + $0x2c0] sm:$0xff]  ;;  %v3691_v26 = vadd.f32 %v13444_v37, %v3259_v16  ;;  %v13446_v16 = vld [vmem:[#allocation75_spill] sm:$0xff]  ;;  %v5420_v39 = vld [vmem:[%s13317_s21 + $0x2b0] sm:$0xff]  ;;  %v4833_v44 = vadd.f32 %v12613_v6, %v4810_v11 }
 0x614   :  { %5560 = vmatpush.msrb.mxu2 %v5411_v53  ;;  %5520 = vmatpush.msra.mxu0 %v5373_v21  ;;  %v4990_v57 = vpop.f32.mrf.mxu3  ;;  %v4853_v53 = vadd.f32 %v12531_v35, %v4830_v9  ;;  %v4925_v21 = vadd.f32 %v4924_v15, %v4902_v5  ;;  %v5404_v35 = vld [vmem:[%s13317_s21 + $0x230] sm:$0xff]  ;;  %v3757_v40 = vadd.f32 %v13446_v16, %v3734_v18  ;;  %v5366_v14 = vld [vmem:[%s13317_s21 + $0x100] sm:$0xff]  ;;  %v5445_v15 = vld [vmem:[%s13317_s21 + $0x378] sm:$0xff] }
 0x615   :  { %5546 = vmatpush.msra.mxu1 %v5386_v46  ;;  %5584 = vmatpush.msra.mxu3 %v5426_v34  ;;  %v6027_v20 = vpop.eup %6026  ;;  %v5367_v34 = vld [vmem:[%s13317_s21 + $0x108] sm:$0xff]  ;;  %v3714_v52 = vadd.f32 %v13447_v56, %v3691_v26  ;;  %v13448_v6 = vld [vmem:[#allocation82_spill] sm:$0xff]  ;;  %v5417_v24 = vld [vmem:[%s13317_s21 + $0x298] sm:$0xff] }
 0x616   :  { %5561 = vmatpush.msrb.mxu2 %v5410_v50  ;;  %5521 = vmatpush.msra.mxu0 %v5372_v61  ;;  %v5321_v12 = vadd.f32 %v6027_v20, %v4945_v13  ;;  %v4967_v60 = vpop.f32.mrf.mxu2  ;;  %v5421_v50 = vld [vmem:[%s13317_s21 + $0x2b8] sm:$0xff]  ;;  %v13445_v61 = vld [vmem:[#allocation69_spill] sm:$0xff]  ;;  %v6029_v36 = vpop.eup %6028  ;;  %v5444_v7 = vld [vmem:[%s13317_s21 + $0x370] sm:$0xff] }
 0x617   :  { %5547 = vmatpush.msra.mxu1 %v5385_v31  ;;  %5485 = vmatmul.f32.gmra.mxu2 %v5326_v42  ;;  %v5013_v63 = vpop.f32.mrf.mxu0  ;;  %v3576_v29 = vadd.f32 %v13445_v61, %v3553_v17  ;;  %v4948_v31 = vadd.f32 %v12748_v59, %v4925_v21  ;;  %v4991_v42 = vadd.f32 %v4990_v57, %v4967_v60  ;;  %v5401_v13 = vld [vmem:[%s13317_s21 + $0x218] sm:$0xff]  ;;  %v5443_v22 = vld [vmem:[%s13317_s21 + $0x368] sm:$0xff]  ;;  %v13449_v43 = vld [vmem:[#allocation76_spill] sm:$0xff] }
 0x618   :  { %5562 = vmatpush.msrb.mxu2 %v5409_v23  ;;  %5522 = vmatpush.msra.mxu0 %v5371_v1  ;;  %v5036_v46 = vpop.f32.mrf.mxu1  ;;  %v5403_v23 = vld [vmem:[%s13317_s21 + $0x228] sm:$0xff]  ;;  %v5320_v1 = vadd.f32 %v6029_v36, %v4853_v53  ;;  %v6031_v59 = vpop.eup %6030  ;;  %v3737_v54 = vadd.f32 %v13448_v6, %v3714_v52  ;;  %v13450_v3 = vld [vmem:[#allocation79_spill] sm:$0xff]  ;;  %v5442_v20 = vld [vmem:[%s13317_s21 + $0x360] sm:$0xff] }
 0x619   :  { %5548 = vmatpush.msra.mxu1 %v5384_v4  ;;  %5585 = vmatpush.msra.mxu3 %v5425_v30  ;;  %6032 = vtanh.f32 %v3576_v29  ;;  %v3260_v4 = vperm.slane %v12455_v25, 5  ;;  %v5402_v30 = vld [vmem:[%s13317_s21 + $0x220] sm:$0xff]  ;;  %v5014_v45 = vadd.f32 %v5013_v63, %v4991_v42  ;;  %v5415_v5 = vld [vmem:[%s13317_s21 + $0x288] sm:$0xff]  ;;  %v13452_v26 = vld [vmem:[#allocation83_spill] sm:$0xff] }
 0x61a   :  { %5563 = vmatpush.msrb.mxu2 %v5408_v8  ;;  %5523 = vmatpush.msra.mxu0 %v5370_v32  ;;  %6034 = vtanh.f32 %v3757_v40  ;;  %v5329_v8 = vadd.f32 %v6031_v59, %v4948_v31  ;;  %v5418_v32 = vld [vmem:[%s13317_s21 + $0x2a0] sm:$0xff]  ;;  %v3760_v58 = vadd.f32 %v13450_v3, %v3737_v54  ;;  %v13451_v60 = vld [vmem:[#allocation77_spill] sm:$0xff]  ;;  %v1964_v21 = vld [vmem:[%s13308_s12 + $0xf8] sm:$0xff] }
 0x61b   :  { %5549 = vmatpush.msra.mxu1 %v5383_v41  ;;  %5586 = vmatpush.msra.mxu3 %v5424_v2  ;;  %v4856_v41 = vadd.f32 %v12611_v51, %v4833_v44  ;;  %v3780_v19 = vadd.f32 %v13449_v43, %v3260_v4  ;;  %v5400_v51 = vld [vmem:[%s13317_s21 + $0x210] sm:$0xff]  ;;  %v5398_v57 = vld [vmem:[%s13317_s21 + $0x200] sm:$0xff]  ;;  %v1978_v36 = vld [vmem:[%s13308_s12 + $0x168] sm:$0xff] }
 0x61c   :  { %5564 = vmatpush.msrb.mxu2 %v5407_v48  ;;  %5524 = vmatpush.msra.mxu0 %v5369_v0  ;;  %v4993_v48 = vpop.f32.mrf.mxu3  ;;  %v5037_v0 = vadd.f32 %v5036_v46, %v5014_v45  ;;  %6036 = vtanh.f32 %v3760_v58  ;;  %v5414_v37 = vld [vmem:[%s13317_s21 + $0x280] sm:$0xff]  ;;  %v1980_v46 = vld [vmem:[%s13308_s12 + $0x178] sm:$0xff]  ;;  %v13453_v63 = vld [vmem:[#allocation86_spill] sm:$0xff] }
 0x61d   :  { %5550 = vmatpush.msra.mxu1 %v5382_v47  ;;  %5587 = vmatpush.msra.mxu3 %v5423_v49  ;;  %v5416_v49 = vld [vmem:[%s13317_s21 + $0x290] sm:$0xff]  ;;  %v13454_v16 = vld [vmem:[#allocation80_spill] sm:$0xff]  ;;  %v1960_v45 = vld [vmem:[%s13308_s12 + $0xd8] sm:$0xff] }
 0x61e   :  { %5551 = vmatmul.f32.vlgmr.msra.gmra.mxu1 %v5321_v12  ;;  %5565 = vmatpush.msrb.mxu2 %v5406_v28  ;;  %v4970_v2 = vpop.f32.mrf.mxu2  ;;  %v5399_v28 = vld [vmem:[%s13317_s21 + $0x208] sm:$0xff]  ;;  %v5441_v12 = vld [vmem:[%s13317_s21 + $0x358] sm:$0xff]  ;;  %v1963_v29 = vld [vmem:[%s13308_s12 + $0xf0] sm:$0xff]  ;;  %v3783_v40 = vadd.f32 %v13454_v16, %v3260_v4 }
 0x61f   :  { %5525 = vmatpush.msra.mxu0 %v5368_v33  ;;  %5588 = vmatpush.msra.mxu3 %v5422_v62  ;;  %v5016_v47 = vpop.f32.mrf.mxu0  ;;  %v6033_v10 = vpop.eup %6032  ;;  %v4994_v17 = vadd.f32 %v4993_v48, %v4970_v2  ;;  %v3803_v33 = vadd.f32 %v13451_v60, %v3780_v19  ;;  %v5438_v56 = vld [vmem:[%s13317_s21 + $0x340] sm:$0xff]  ;;  %v5437_v4 = vld [vmem:[%s13317_s21 + $0x338] sm:$0xff]  ;;  %v1959_v2 = vld [vmem:[%s13308_s12 + $0xd0] sm:$0xff] }
 0x620   :  { %5566 = vmatpush.msrb.mxu2 %v5405_v55  ;;  %v5039_v9 = vpop.f32.mrf.mxu1  ;;  %v6035_v27 = vpop.eup %6034  ;;  %v5328_v18 = vadd.f32 %v6033_v10, %v4856_v41  ;;  %v1961_v52 = vld [vmem:[%s13308_s12 + $0xe0] sm:$0xff]  ;;  %v1976_v6 = vld [vmem:[%s13308_s12 + $0x158] sm:$0xff]  ;;  %v13457_v43 = vld [vmem:[#allocation90_spill] sm:$0xff] }
 0x621   :  { %5526 = vmatpush.msra.mxu0 %v5367_v34  ;;  %5589 = vmatpush.msra.mxu3 %v5421_v50  ;;  %v5322_v62 = vadd.f32 %v6035_v27, %v5037_v0  ;;  %v5017_v55 = vadd.f32 %v5016_v47, %v4994_v17  ;;  %v3826_v53 = vadd.f32 %v13452_v26, %v3803_v33  ;;  %v5440_v34 = vld [vmem:[%s13317_s21 + $0x350] sm:$0xff]  ;;  %v1977_v44 = vld [vmem:[%s13308_s12 + $0x160] sm:$0xff]  ;;  %v5435_v0 = vld [vmem:[%s13317_s21 + $0x328] sm:$0xff] }
 0x622   :  { %5567 = vmatpush.msrb.mxu2 %v5404_v35  ;;  %v1979_v35 = vld [vmem:[%s13308_s12 + $0x170] sm:$0xff]  ;;  %v6037_v42 = vpop.eup %6036  ;;  %v1958_v58 = vld [vmem:[%s13308_s12 + $0xc8] sm:$0xff]  ;;  %v5434_v27 = vld [vmem:[%s13317_s21 + $0x320] sm:$0xff] }
 0x623   :  { %5527 = vmatpush.msra.mxu0 %v5366_v14  ;;  %5590 = vmatpush.msra.mxu3 %v5420_v39  ;;  %v3849_v50 = vadd.f32 %v13453_v63, %v3826_v53  ;;  %v5040_v61 = vadd.f32 %v5039_v9, %v5017_v55  ;;  %v5439_v14 = vld [vmem:[%s13317_s21 + $0x348] sm:$0xff]  ;;  %v1973_v33 = vld [vmem:[%s13308_s12 + $0x140] sm:$0xff]  ;;  %v1956_v26 = vld [vmem:[%s13308_s12 + $0xb8] sm:$0xff] }
 0x624   :  { %5528 = vmatmul.f32.vlgmr.msra.gmra.mxu0 %v5320_v1  ;;  %5568 = vmatpush.msrb.mxu2 %v5403_v23  ;;  %v1962_v39 = vld [vmem:[%s13308_s12 + $0xe8] sm:$0xff]  ;;  %v5105_v59 = vpop.f32.mrf.mxu3  ;;  %v13460_v55 = vld [vmem:[#allocation40_spill] sm:$0xff]  ;;  %v1972_v53 = vld [vmem:[%s13308_s12 + $0x138] sm:$0xff] }
 0x625   :  { %5591 = vmatpush.msra.mxu3 %v5419_v38  ;;  %5604 = vmatpush.msrb.mxu0 %v5445_v15  ;;  %6038 = vtanh.f32 %v3849_v50  ;;  %v5330_v1 = vadd.f32 %v6037_v42, %v5040_v61  ;;  %v13455_v38 = vld [vmem:[#allocation81_spill] sm:$0xff]  ;;  %v5432_v63 = vld [vmem:[%s13317_s21 + $0x310] sm:$0xff] }
 0x626   :  { %5554 = vmatmul.f32.gmra.mxu1 %v5329_v8  ;;  %5569 = vmatpush.msrb.mxu2 %v5402_v30  ;;  %v5082_v11 = vpop.f32.mrf.mxu2  ;;  %v3806_v15 = vadd.f32 %v13455_v38, %v3783_v40  ;;  %v12933_v30 = vld [vmem:[%s13306_s10] sm:$0x1f]  ;;  %v13456_v8 = vld [vmem:[#allocation87_spill] sm:$0xff]  ;;  %v1974_v47 = vld [vmem:[%s13308_s12 + $0x148] sm:$0xff] }
 0x627   :  { %5592 = vmatpush.msra.mxu3 %v5418_v32  ;;  %5605 = vmatpush.msrb.mxu0 %v5444_v7  ;;  %v987_v54 = vperm.slane %v12933_v30, 2  ;;  %v986_v41 = vperm.slane %v12933_v30, 1  ;;  %v1955_v50 = vld [vmem:[%s13308_s12 + $0xb0] sm:$0xff]  ;;  %v5431_v16 = vld [vmem:[%s13317_s21 + $0x308] sm:$0xff]  ;;  %v13462_v40 = vld [vmem:[#allocation12_spill] sm:$0xff] }
 0x628   :  { %5570 = vmatpush.msrb.mxu2 %v5401_v13  ;;  %v3829_v32 = vadd.f32 %v13456_v8, %v3806_v15  ;;  %v5436_v13 = vld [vmem:[%s13317_s21 + $0x330] sm:$0xff]  ;;  %v13463_v42 = vld [vmem:[#allocation45_spill] sm:$0xff]  ;;  %v13465_v38 = vld [vmem:[#allocation43_spill] sm:$0xff] }
 0x629   :  { %5593 = vmatpush.msra.mxu3 %v5417_v24  ;;  %5606 = vmatpush.msrb.mxu0 %v5443_v22  ;;  %v5059_v31 = vpop.f32.mrf.mxu1  ;;  %v1975_v22 = vld [vmem:[%s13308_s12 + $0x150] sm:$0xff]  ;;  %v1108_v15 = vadd.f32 %v13465_v38, %v986_v41 }
 0x62a   :  { %5571 = vmatpush.msrb.mxu2 %v5400_v51  ;;  %v5083_v23 = vadd.f32 %v5082_v11, %v5059_v31  ;;  %v3852_v19 = vadd.f32 %v13457_v43, %v3829_v32  ;;  %v5458_v51 = vld [vmem:[%s13317_s21 + $0x3e0] sm:$0xff]  ;;  %v1954_v31 = vld [vmem:[%s13308_s12 + $0xa8] sm:$0xff]  ;;  %v1996_v32 = vld [vmem:[%s13308_s12 + $0x1f8] sm:$0xff] }
 0x62b   :  { %5594 = vmatpush.msra.mxu3 %v5416_v49  ;;  %5607 = vmatpush.msrb.mxu0 %v5442_v20  ;;  %v6039_v3 = vpop.eup %6038  ;;  %v5457_v49 = vld [vmem:[%s13317_s21 + $0x3d8] sm:$0xff]  ;;  %v13458_v20 = vld [vmem:[#allocation13_spill] sm:$0xff]  ;;  %v5448_v38 = vld [vmem:[%s13317_s21 + $0x390] sm:$0xff] }
 0x62c   :  { %5531 = vmatmul.f32.gmra.mxu0 %v5328_v18  ;;  %5572 = vmatpush.msrb.mxu2 %v5399_v28  ;;  %v5106_v7 = vadd.f32 %v5105_v59, %v5083_v23  ;;  %v1174_v10 = vadd.f32 %v13458_v20, %v987_v54  ;;  %v13459_v18 = vld [vmem:[#allocation41_spill] sm:$0xff]  ;;  %6040 = vtanh.f32 %v3852_v19  ;;  %v1953_v59 = vld [vmem:[%s13308_s12 + $0xa0] sm:$0xff]  ;;  %v1952_v43 = vld [vmem:[%s13308_s12 + $0x98] sm:$0xff] }
 0x62d   :  { %5595 = vmatpush.msra.mxu3 %v5415_v5  ;;  %5608 = vmatpush.msrb.mxu0 %v5441_v12  ;;  %v1105_v5 = vadd.f32 %v13459_v18, %v986_v41  ;;  %v1957_v12 = vld [vmem:[%s13308_s12 + $0xc0] sm:$0xff]  ;;  %v1968_v19 = vld [vmem:[%s13308_s12 + $0x118] sm:$0xff]  ;;  %v1994_v20 = vld [vmem:[%s13308_s12 + $0x1e8] sm:$0xff] }
 0x62e   :  { %5573 = vmatpush.msrb.mxu2 %v5398_v57  ;;  %5630 = vmatpush.msrb.mxu1 %v5458_v51  ;;  %v5085_v17 = vpop.f32.mrf.mxu2  ;;  %v5456_v57 = vld [vmem:[%s13317_s21 + $0x3d0] sm:$0xff] }
 0x62f   :  { %5574 = vmatmul.f32.vlgmr.msrb.gmra.mxu2 %v5322_v62  ;;  %5596 = vmatpush.msra.mxu3 %v5414_v37  ;;  %v5433_v62 = vld [vmem:[%s13317_s21 + $0x318] sm:$0xff]  ;;  %v1128_v37 = vadd.f32 %v13460_v55, %v1105_v5  ;;  %v1995_v51 = vld [vmem:[%s13308_s12 + $0x1f0] sm:$0xff]  ;;  %v3261_v5 = vperm.slane %v12455_v25, 6  ;;  %v5451_v25 = vld [vmem:[%s13317_s21 + $0x3a8] sm:$0xff] }
 0x630   :  { %5680 = vmatpush.msra.mxu2 %v1964_v21  ;;  %5609 = vmatpush.msrb.mxu0 %v5440_v34  ;;  %v5128_v24 = vpop.f32.mrf.mxu0  ;;  %v13461_v21 = vld [vmem:[#allocation16_spill] sm:$0xff]  ;;  %v5108_v34 = vpop.f32.mrf.mxu3 }
 0x631   :  { %5703 = vmatpush.msrb.mxu3 %v1980_v46  ;;  %v5129_v48 = vadd.f32 %v5128_v24, %v5106_v7  ;;  %5631 = vmatpush.msrb.mxu1 %v5457_v49  ;;  %v1197_v46 = vadd.f32 %v13461_v21, %v1174_v10  ;;  %v1151_v11 = vadd.f32 %v13462_v40, %v1128_v37  ;;  %v5454_v7 = vld [vmem:[%s13317_s21 + $0x3c0] sm:$0xff]  ;;  %v13470_v24 = vld [vmem:[#allocation61_spill] sm:$0xff]  ;;  %v5452_v10 = vld [vmem:[%s13317_s21 + $0x3b0] sm:$0xff] }
 0x632   :  { %5681 = vmatpush.msra.mxu2 %v1963_v29  ;;  %5610 = vmatpush.msrb.mxu0 %v5439_v14  ;;  %v5062_v9 = vpop.f32.mrf.mxu1  ;;  %v1971_v29 = vld [vmem:[%s13308_s12 + $0x130] sm:$0xff]  ;;  %v1949_v37 = vld [vmem:[%s13308_s12 + $0x80] sm:$0xff] }
 0x633   :  { %5704 = vmatpush.msrb.mxu3 %v1979_v35  ;;  %v5323_v28 = vadd.f32 %v6039_v3, %v5129_v48  ;;  %v5086_v60 = vadd.f32 %v5085_v17, %v5062_v9  ;;  %5632 = vmatpush.msrb.mxu1 %v5456_v57  ;;  %v1220_v23 = vadd.f32 %v13463_v42, %v1197_v46  ;;  %6042 = vtanh.f32 %v1151_v11  ;;  %v13471_v48 = vld [vmem:[#allocation18_spill] sm:$0xff]  ;;  %v5453_v3 = vld [vmem:[%s13317_s21 + $0x3b8] sm:$0xff]  ;;  %v1993_v57 = vld [vmem:[%s13308_s12 + $0x1e0] sm:$0xff] }
 0x634   :  { %5682 = vmatpush.msra.mxu2 %v1962_v39  ;;  %5611 = vmatpush.msrb.mxu0 %v5438_v56  ;;  %v1970_v39 = vld [vmem:[%s13308_s12 + $0x128] sm:$0xff]  ;;  %v13464_v56 = vld [vmem:[#allocation15_spill] sm:$0xff]  ;;  %v1967_v9 = vld [vmem:[%s13308_s12 + $0x110] sm:$0xff] }
 0x635   :  { %5705 = vmatpush.msrb.mxu3 %v1978_v36  ;;  %v5109_v61 = vadd.f32 %v5108_v34, %v5086_v60  ;;  %v6041_v36 = vpop.eup %6040  ;;  %6044 = vtanh.f32 %v1220_v23  ;;  %v13473_v17 = vld [vmem:[#allocation14_spill] sm:$0xff]  ;;  %v1966_v60 = vld [vmem:[%s13308_s12 + $0x108] sm:$0xff]  ;;  %v13476_v46 = vld [vmem:[#allocation27_spill] sm:$0xff] }
 0x636   :  { %5683 = vmatpush.msra.mxu2 %v1961_v52  ;;  %5612 = vmatpush.msrb.mxu0 %v5437_v4  ;;  %v1177_v52 = vadd.f32 %v13464_v56, %v987_v54  ;;  %v13467_v54 = vld [vmem:[#allocation28_spill] sm:$0xff]  ;;  %v13477_v34 = vld [vmem:[#allocation30_spill] sm:$0xff]  ;;  %v1992_v11 = vld [vmem:[%s13308_s12 + $0x1d8] sm:$0xff] }
 0x637   :  { %5706 = vmatpush.msrb.mxu3 %v1977_v44  ;;  %5577 = vmatmul.f32.gmra.mxu2 %v5330_v1  ;;  %v5430_v1 = vld [vmem:[%s13317_s21 + $0x300] sm:$0xff]  ;;  %v5455_v44 = vld [vmem:[%s13317_s21 + $0x3c8] sm:$0xff]  ;;  %v13482_v23 = vld [vmem:[#allocation31_spill] sm:$0xff] }
 0x638   :  { %5684 = vmatpush.msra.mxu2 %v1960_v45  ;;  %5613 = vmatpush.msrb.mxu0 %v5436_v13  ;;  %v1969_v45 = vld [vmem:[%s13308_s12 + $0x120] sm:$0xff]  ;;  %v13468_v13 = vld [vmem:[#allocation42_spill] sm:$0xff] }
 0x639   :  { %5707 = vmatpush.msrb.mxu3 %v1976_v6  ;;  %5633 = vmatpush.msrb.mxu1 %v5455_v44  ;;  %v13466_v6 = vld [vmem:[#allocation25_spill] sm:$0xff]  ;;  %v1131_v41 = vadd.f32 %v13468_v13, %v1108_v15  ;;  %v6043_v55 = vpop.eup %6042  ;;  %v5446_v13 = vld [vmem:[%s13317_s21 + $0x380] sm:$0xff] }
 0x63a   :  { %5685 = vmatpush.msra.mxu2 %v1959_v2  ;;  %5614 = vmatpush.msrb.mxu0 %v5435_v0  ;;  %v5131_v35 = vpop.f32.mrf.mxu0  ;;  %v1688_v8 = vadd.f32 %v13467_v54, %v13466_v6  ;;  %v13469_v2 = vld [vmem:[#allocation56_spill] sm:$0xff]  ;;  %v1200_v0 = vadd.f32 %v13471_v48, %v1177_v52  ;;  %v13483_v52 = vld [vmem:[#allocation85_spill] sm:$0xff]  ;;  %v1947_v48 = vld [vmem:[%s13308_s12 + $0x70] sm:$0xff] }
 0x63b   :  { %5708 = vmatpush.msrb.mxu3 %v1975_v22  ;;  %v5132_v14 = vadd.f32 %v5131_v35, %v5109_v61  ;;  %v1757_v22 = vadd.f32 %v13470_v24, %v13469_v2  ;;  %5634 = vmatpush.msrb.mxu1 %v5454_v7  ;;  %v13478_v61 = vld [vmem:[#allocation58_spill] sm:$0xff]  ;;  %v1990_v44 = vld [vmem:[%s13308_s12 + $0x1c8] sm:$0xff]  ;;  %v1988_v7 = vld [vmem:[%s13308_s12 + $0x1b8] sm:$0xff] }
 0x63c   :  { %5686 = vmatpush.msra.mxu2 %v1958_v58  ;;  %5597 = vmatmul.f32.vlgmr.msra.gmra.mxu3 %v5323_v28  ;;  %v1951_v58 = vld [vmem:[%s13308_s12 + $0x90] sm:$0xff]  ;;  %v1154_v28 = vadd.f32 %v13473_v17, %v1131_v41  ;;  %v5447_v6 = vld [vmem:[%s13317_s21 + $0x388] sm:$0xff]  ;;  %v13485_v41 = vld [vmem:[#allocation88_spill] sm:$0xff] }
 0x63d   :  { %5709 = vmatpush.msrb.mxu3 %v1974_v47  ;;  %5615 = vmatpush.msrb.mxu0 %v5434_v27  ;;  %v5331_v4 = vadd.f32 %v6041_v36, %v5132_v14  ;;  %v13472_v47 = vld [vmem:[#allocation57_spill] sm:$0xff]  ;;  %v1991_v14 = vld [vmem:[%s13308_s12 + $0x1d0] sm:$0xff]  ;;  %v13481_v36 = vld [vmem:[#allocation59_spill] sm:$0xff]  ;;  %v3875_v2 = vadd.f32 %v13485_v41, %v3261_v5 }
 0x63e   :  { %5687 = vmatpush.msra.mxu2 %v1957_v12  ;;  %v1711_v49 = vadd.f32 %v13472_v47, %v1688_v8  ;;  %v13474_v27 = vld [vmem:[#allocation29_spill] sm:$0xff]  ;;  %5635 = vmatpush.msrb.mxu1 %v5453_v3  ;;  %6046 = vtanh.f32 %v1154_v28  ;;  %v1948_v24 = vld [vmem:[%s13308_s12 + $0x78] sm:$0xff] }
 0x63f   :  { %5710 = vmatpush.msrb.mxu3 %v1973_v33  ;;  %5616 = vmatpush.msrb.mxu0 %v5433_v62  ;;  %v1780_v18 = vadd.f32 %v13474_v27, %v1757_v22  ;;  %v1950_v12 = vld [vmem:[%s13308_s12 + $0x88] sm:$0xff]  ;;  %v13475_v33 = vld [vmem:[#allocation47_spill] sm:$0xff]  ;;  %v1945_v27 = vld [vmem:[%s13308_s12 + $0x60] sm:$0xff] }
 0x640   :  { %5688 = vmatpush.msra.mxu2 %v1956_v26  ;;  %v1223_v62 = vadd.f32 %v13475_v33, %v1200_v0  ;;  %v1965_v26 = vld [vmem:[%s13308_s12 + $0x100] sm:$0xff]  ;;  %5636 = vmatpush.msrb.mxu1 %v5452_v10  ;;  %v1924_v21 = vadd.f32 %v6043_v55, %v1711_v49  ;;  %v13486_v22 = vld [vmem:[#allocation91_spill] sm:$0xff]  ;;  %v1986_v0 = vld [vmem:[%s13308_s12 + $0x1a8] sm:$0xff] }
 0x641   :  { %5711 = vmatpush.msrb.mxu3 %v1972_v53  ;;  %5617 = vmatpush.msrb.mxu0 %v5432_v63  ;;  %v6045_v53 = vpop.eup %6044  ;;  %v1691_v63 = vadd.f32 %v13477_v34, %v13476_v46  ;;  %v1985_v49 = vld [vmem:[%s13308_s12 + $0x1a0] sm:$0xff]  ;;  %v1944_v33 = vld [vmem:[%s13308_s12 + $0x58] sm:$0xff]  ;;  %v1982_v34 = vld [vmem:[%s13308_s12 + $0x188] sm:$0xff] }
 0x642   :  { %5689 = vmatpush.msra.mxu2 %v1955_v50  ;;  %v1925_v50 = vadd.f32 %v6045_v53, %v1780_v18  ;;  %5637 = vmatpush.msrb.mxu1 %v5451_v25  ;;  %6048 = vtanh.f32 %v1223_v62  ;;  %v1984_v18 = vld [vmem:[%s13308_s12 + $0x198] sm:$0xff]  ;;  %v1983_v62 = vld [vmem:[%s13308_s12 + $0x190] sm:$0xff]  ;;  %v13490_v53 = vld [vmem:[#allocation44_spill] sm:$0xff] }
 0x643   :  { %5712 = vmatpush.msrb.mxu3 %v1971_v29  ;;  %5618 = vmatpush.msrb.mxu0 %v5431_v16  ;;  %v13479_v29 = vld [vmem:[#allocation63_spill] sm:$0xff]  ;;  %v13480_v16 = vld [vmem:[#allocation84_spill] sm:$0xff]  ;;  %v1714_v42 = vadd.f32 %v13481_v36, %v1691_v63  ;;  %v1942_v63 = vld [vmem:[%s13308_s12 + $0x48] sm:$0xff] }
 0x644   :  { %5690 = vmatpush.msra.mxu2 %v1954_v31  ;;  %5600 = vmatmul.f32.gmra.mxu3 %v5331_v4  ;;  %v1760_v35 = vadd.f32 %v13479_v29, %v13478_v61  ;;  %v3872_v40 = vadd.f32 %v13480_v16, %v3261_v5  ;;  %v5450_v31 = vld [vmem:[%s13317_s21 + $0x3a0] sm:$0xff]  ;;  %v6047_v15 = vpop.eup %6046  ;;  %v988_v5 = vperm.slane %v12933_v30, 3  ;;  %v13492_v36 = vld [vmem:[#allocation17_spill] sm:$0xff]  ;;  %v1936_v41 = vld [vmem:[%s13308_s12 + $0x18] sm:$0xff] }
 0x645   :  { %5713 = vmatpush.msrb.mxu3 %v1970_v39  ;;  %5619 = vmatpush.msrb.mxu0 %v5430_v1  ;;  %v5449_v39 = vld [vmem:[%s13317_s21 + $0x398] sm:$0xff]  ;;  %v1929_v8 = vadd.f32 %v6047_v15, %v1714_v42  ;;  %v1981_v29 = vld [vmem:[%s13308_s12 + $0x180] sm:$0xff] }
 0x646   :  { %5691 = vmatpush.msra.mxu2 %v1953_v59  ;;  %5638 = vmatpush.msrb.mxu1 %v5450_v31  ;;  %v1783_v56 = vadd.f32 %v13482_v23, %v1760_v35  ;;  %v3895_v1 = vadd.f32 %v13483_v52, %v3872_v40  ;;  %v13484_v59 = vld [vmem:[#allocation92_spill] sm:$0xff]  ;;  %v13491_v40 = vld [vmem:[#allocation49_spill] sm:$0xff] }
 0x647   :  { %5714 = vmatpush.msrb.mxu3 %v1969_v45  ;;  %5726 = vmatpush.msra.mxu0 %v1996_v32  ;;  %v1989_v45 = vld [vmem:[%s13308_s12 + $0x1c0] sm:$0xff] }
 0x648   :  { %5692 = vmatpush.msra.mxu2 %v1952_v43  ;;  %5639 = vmatpush.msrb.mxu1 %v5449_v39  ;;  %v3918_v4 = vadd.f32 %v13484_v59, %v3895_v1  ;;  %v6049_v54 = vpop.eup %6048  ;;  %v1941_v16 = vld [vmem:[%s13308_s12 + $0x40] sm:$0xff]  ;;  %v13495_v59 = vld [vmem:[#allocation33_spill] sm:$0xff] }
 0x649   :  { %5715 = vmatpush.msrb.mxu3 %v1968_v19  ;;  %5727 = vmatpush.msra.mxu0 %v1995_v51  ;;  %v1930_v32 = vadd.f32 %v6049_v54, %v1783_v56  ;;  %v1987_v19 = vld [vmem:[%s13308_s12 + $0x1b0] sm:$0xff]  ;;  %v13487_v51 = vld [vmem:[#allocation89_spill] sm:$0xff]  ;;  %v13494_v15 = vld [vmem:[#allocation32_spill] sm:$0xff] }
 0x64a   :  { %5693 = vmatpush.msra.mxu2 %v1951_v58  ;;  %5640 = vmatpush.msrb.mxu1 %v5448_v38  ;;  %v3941_v43 = vadd.f32 %v13486_v22, %v3918_v4  ;;  %v3898_v3 = vadd.f32 %v13487_v51, %v3875_v2  ;;  %v5197_v17 = vpop.f32.mrf.mxu2  ;;  %v1939_v56 = vld [vmem:[%s13308_s12 + $0x30] sm:$0xff]  ;;  %v1826_v4 = vadd.f32 %v13495_v59, %v13494_v15  ;;  %v1937_v54 = vld [vmem:[%s13308_s12 + $0x20] sm:$0xff]  ;;  %v13498_v2 = vld [vmem:[#allocation19_spill] sm:$0xff] }
 0x64b   :  { %5716 = vmatpush.msrb.mxu3 %v1967_v9  ;;  %5728 = vmatpush.msra.mxu0 %v1994_v20  ;;  %v1946_v9 = vld [vmem:[%s13308_s12 + $0x68] sm:$0xff]  ;;  %v13488_v20 = vld [vmem:[#allocation94_spill] sm:$0xff] }
 0x64c   :  { %5694 = vmatpush.msra.mxu2 %v1950_v12  ;;  %5641 = vmatpush.msrb.mxu1 %v5447_v6  ;;  %6050 = vtanh.f32 %v3941_v43  ;;  %v3921_v10 = vadd.f32 %v13488_v20, %v3898_v3  ;;  %v5220_v12 = vpop.f32.mrf.mxu3  ;;  %v1938_v6 = vld [vmem:[%s13308_s12 + $0x28] sm:$0xff]  ;;  %v1935_v22 = vld [vmem:[%s13308_s12 + $0x10] sm:$0xff] }
 0x64d   :  { %5717 = vmatpush.msrb.mxu3 %v1966_v60  ;;  %5729 = vmatpush.msra.mxu0 %v1993_v57  ;;  %v13489_v57 = vld [vmem:[#allocation93_spill] sm:$0xff] }
 0x64e   :  { %5695 = vmatpush.msra.mxu2 %v1949_v37  ;;  %5642 = vmatpush.msrb.mxu1 %v5446_v13  ;;  %v3944_v25 = vadd.f32 %v13489_v57, %v3921_v10  ;;  %v1943_v37 = vld [vmem:[%s13308_s12 + $0x50] sm:$0xff]  ;;  %v1934_v3 = vld [vmem:[%s13308_s12 + $0x8] sm:$0xff]  ;;  %v13503_v57 = vld [vmem:[#allocation8_spill] sm:$0xff] }
 0x64f   :  { %5718 = vmatpush.msrb.mxu3 %v1965_v26  ;;  %5696 = vmatmul.f32.vlgmr.msra.gmra.mxu2 %v1924_v21  ;;  %v1243_v21 = vadd.f32 %v13490_v53, %v988_v5  ;;  %v2002_v59 = vld [vmem:[%s13308_s12 + $0x228] sm:$0xff] }
 0x650   :  { %5719 = vmatmul.f32.vlgmr.msrb.gmra.mxu3 %v1925_v50  ;;  %5730 = vmatpush.msra.mxu0 %v1992_v11  ;;  %v5174_v58 = vpop.f32.mrf.mxu1  ;;  %6052 = vtanh.f32 %v3944_v25 }
 0x651   :  { %5657 = vmatpush.msra.mxu1 %v1948_v24  ;;  %v1266_v11 = vadd.f32 %v13491_v40, %v1243_v21  ;;  %v13505_v21 = vld [vmem:[#allocation96_spill] sm:$0xff] }
 0x652   :  { %5731 = vmatpush.msra.mxu0 %v1991_v14  ;;  %v6051_v26 = vpop.eup %6050  ;;  %v5200_v31 = vpop.f32.mrf.mxu2  ;;  %v1940_v14 = vld [vmem:[%s13308_s12 + $0x38] sm:$0xff] }
 0x653   :  { %5658 = vmatpush.msra.mxu1 %v1947_v48  ;;  %v1289_v42 = vadd.f32 %v13492_v36, %v1266_v11  ;;  %v13499_v48 = vld [vmem:[#allocation34_spill] sm:$0xff] }
 0x654   :  { %5732 = vmatpush.msra.mxu0 %v1990_v44  ;;  %v5223_v23 = vpop.f32.mrf.mxu3  ;;  %v13493_v44 = vld [vmem:[#allocation46_spill] sm:$0xff] }
 0x655   :  { %5659 = vmatpush.msra.mxu1 %v1946_v9  ;;  %v1246_v38 = vadd.f32 %v13493_v44, %v988_v5  ;;  %6054 = vtanh.f32 %v1289_v42  ;;  %v13501_v9 = vld [vmem:[#allocation62_spill] sm:$0xff]  ;;  %v985_v5 = vperm.slane %v12933_v30, 0 }
 0x656   :  { %5733 = vmatpush.msra.mxu0 %v1989_v45  ;;  %v6053_v1 = vpop.eup %6052  ;;  %v13507_v36 = vld [vmem:[#allocation10_spill] sm:$0xff] }
 0x657   :  { %5699 = vmatmul.f32.gmra.mxu2 %v1929_v8  ;;  %v5151_v47 = vpop.f32.mrf.mxu0  ;;  %5660 = vmatpush.msra.mxu1 %v1945_v27  ;;  %v13496_v8 = vld [vmem:[#allocation51_spill] sm:$0xff]  ;;  %v1036_v25 = vadd.f32 %v13503_v57, %v985_v5  ;;  %v1039_v42 = vadd.f32 %v13507_v36, %v985_v5  ;;  %v2003_v44 = vld [vmem:[%s13308_s12 + $0x230] sm:$0xff] }
 0x658   :  { %5722 = vmatmul.f32.gmra.mxu3 %v1930_v32  ;;  %5734 = vmatpush.msra.mxu0 %v1988_v7  ;;  %v5175_v28 = vadd.f32 %v5174_v58, %v5151_v47  ;;  %v1269_v32 = vadd.f32 %v13496_v8, %v1246_v38  ;;  %v13497_v7 = vld [vmem:[#allocation60_spill] sm:$0xff]  ;;  %v13510_v38 = vld [vmem:[#allocation11_spill] sm:$0xff]  ;;  %v13524_v57 = vld [vmem:[#allocation50_spill] sm:$0xff] }
 0x659   :  { %5661 = vmatpush.msra.mxu1 %v1944_v33  ;;  %v5177_v50 = vpop.f32.mrf.mxu1  ;;  %v1849_v13 = vadd.f32 %v13497_v7, %v1826_v4  ;;  %v1933_v58 = vld [vmem:[%s13308_s12] sm:$0xff]  ;;  %v1062_v15 = vadd.f32 %v13510_v38, %v1039_v42  ;;  %v989_v4 = vperm.slane %v12933_v30, 4  ;;  %v13512_v8 = vld [vmem:[#allocation39_spill] sm:$0xff] }
 0x65a   :  { %5735 = vmatpush.msra.mxu0 %v1987_v19  ;;  %v5198_v60 = vadd.f32 %v5197_v17, %v5175_v28  ;;  %v1292_v24 = vadd.f32 %v13498_v2, %v1269_v32  ;;  %v13502_v17 = vld [vmem:[#allocation95_spill] sm:$0xff] }
 0x65b   :  { %5662 = vmatpush.msra.mxu1 %v1943_v37  ;;  %v6055_v43 = vpop.eup %6054  ;;  %v2007_v37 = vld [vmem:[%s13308_s12 + $0x250] sm:$0xff]  ;;  %v1085_v32 = vadd.f32 %v13512_v8, %v1062_v15  ;;  %v2000_v7 = vld [vmem:[%s13308_s12 + $0x218] sm:$0xff] }
 0x65c   :  { %5736 = vmatpush.msra.mxu0 %v1986_v0  ;;  %v5221_v55 = vadd.f32 %v5220_v12, %v5198_v60  ;;  %v1926_v19 = vadd.f32 %v6055_v43, %v1849_v13  ;;  %v13500_v0 = vld [vmem:[#allocation35_spill] sm:$0xff]  ;;  %6056 = vtanh.f32 %v1292_v24 }
 0x65d   :  { %5663 = vmatpush.msra.mxu1 %v1942_v63  ;;  %v1829_v51 = vadd.f32 %v13500_v0, %v13499_v48  ;;  %6058 = vtanh.f32 %v13502_v17  ;;  %v2006_v63 = vld [vmem:[%s13308_s12 + $0x248] sm:$0xff]  ;;  %v13514_v30 = vld [vmem:[#allocation55_spill] sm:$0xff] }
 0x65e   :  { %5737 = vmatpush.msra.mxu0 %v1985_v49  ;;  %v5324_v46 = vadd.f32 %v6051_v26, %v5221_v55  ;;  %v13504_v26 = vld [vmem:[#allocation9_spill] sm:$0xff]  ;;  %6060 = vtanh.f32 %v13505_v21 }
 0x65f   :  { %v5154_v61 = vpop.f32.mrf.mxu0  ;;  %5664 = vmatpush.msra.mxu1 %v1941_v16  ;;  %v1852_v47 = vadd.f32 %v13501_v9, %v1829_v51  ;;  %v1059_v53 = vadd.f32 %v13504_v26, %v1036_v25  ;;  %v13506_v16 = vld [vmem:[#allocation37_spill] sm:$0xff]  ;;  %v1997_v9 = vld [vmem:[%s13308_s12 + $0x200] sm:$0xff]  ;;  %v13525_v26 = vld [vmem:[#allocation67_spill] sm:$0xff] }
 0x660   :  { %5738 = vmatpush.msra.mxu0 %v1984_v18  ;;  %v5178_v35 = vadd.f32 %v5177_v50, %v5154_v61  ;;  %v13516_v48 = vld [vmem:[#allocation21_spill] sm:$0xff] }
 0x661   :  { %5620 = vmatmul.f32.vlgmr.msrb.gmra.mxu0 %v5324_v46  ;;  %5665 = vmatpush.msra.mxu1 %v1940_v14  ;;  %v1082_v40 = vadd.f32 %v13506_v16, %v1059_v53  ;;  %v1998_v51 = vld [vmem:[%s13308_s12 + $0x208] sm:$0xff]  ;;  %v13526_v53 = vld [vmem:[#allocation66_spill] sm:$0xff] }
 0x662   :  { %5739 = vmatpush.msra.mxu0 %v1983_v62  ;;  %v5201_v39 = vadd.f32 %v5200_v31, %v5178_v35  ;;  %v6057_v49 = vpop.eup %6056  ;;  %v2004_v31 = vld [vmem:[%s13308_s12 + $0x238] sm:$0xff]  ;;  %v1898_v21 = vadd.f32 %v13526_v53, %v13525_v26 }
 0x663   :  { %5666 = vmatpush.msra.mxu1 %v1939_v56  ;;  %v1931_v20 = vadd.f32 %v6057_v49, %v1852_v47  ;;  %v6059_v62 = vpop.eup %6058  ;;  %v13509_v56 = vld [vmem:[#allocation52_spill] sm:$0xff]  ;;  %6062 = vtanh.f32 %v1082_v40 }
 0x664   :  { %5740 = vmatpush.msra.mxu0 %v1982_v34  ;;  %v5224_v52 = vadd.f32 %v5223_v23, %v5201_v39  ;;  %v5243_v10 = vpop.f32.mrf.mxu3  ;;  %v6061_v39 = vpop.eup %6060  ;;  %v13508_v23 = vld [vmem:[#allocation53_spill] sm:$0xff]  ;;  %6064 = vtanh.f32 %v1085_v32  ;;  %v13518_v47 = vld [vmem:[#allocation48_spill] sm:$0xff] }
 0x665   :  { %5667 = vmatpush.msra.mxu1 %v1938_v6 }
 0x666   :  { %5741 = vmatpush.msra.mxu0 %v1981_v29  ;;  %v5332_v45 = vadd.f32 %v6053_v1, %v5224_v52  ;;  %v2005_v29 = vld [vmem:[%s13308_s12 + $0x240] sm:$0xff]  ;;  %v1619_v52 = vadd.f32 %v13509_v56, %v13508_v23 }
 0x667   :  { %5668 = vmatpush.msra.mxu1 %v1937_v54  ;;  %v2001_v54 = vld [vmem:[%s13308_s12 + $0x220] sm:$0xff] }
 0x669   :  { %5623 = vmatmul.f32.gmra.mxu0 %v5332_v45  ;;  %5669 = vmatpush.msra.mxu1 %v1936_v41  ;;  %v13511_v45 = vld [vmem:[#allocation24_spill] sm:$0xff]  ;;  %v6063_v13 = vpop.eup %6062 }
 0x66a   :  { %v1642_v6 = vadd.f32 %v13511_v45, %v1619_v52  ;;  %v13513_v41 = vld [vmem:[#allocation20_spill] sm:$0xff] }
 0x66b   :  { %5670 = vmatpush.msra.mxu1 %v1935_v22  ;;  %v1312_v2 = vadd.f32 %v13513_v41, %v989_v4  ;;  %v13515_v22 = vld [vmem:[#allocation54_spill] sm:$0xff] }
 0x66c   :  { %v1923_v24 = vadd.f32 %v6063_v13, %v1642_v6  ;;  %v1622_v43 = vadd.f32 %v13515_v22, %v13514_v30 }
 0x66d   :  { %5671 = vmatpush.msra.mxu1 %v1934_v3  ;;  %v1335_v0 = vadd.f32 %v13516_v48, %v1312_v2  ;;  %v13517_v3 = vld [vmem:[#allocation26_spill] sm:$0xff] }
 0x66e   :  { %v5312_v12 = vpop.f32.mrf.mxu2  ;;  %v5246_v46 = vpop.f32.mrf.mxu3 }
 0x66f   :  { %5672 = vmatpush.msra.mxu1 %v1933_v58  ;;  %v1645_v58 = vadd.f32 %v13517_v3, %v1622_v43  ;;  %v1358_v49 = vadd.f32 %v13518_v47, %v1335_v0 }
 0x671   :  { %5742 = vmatmul.f32.vlgmr.msra.gmra.mxu0 %v1926_v19  ;;  %v1999_v19 = vld [vmem:[%s13308_s12 + $0x210] sm:$0xff]  ;;  %6066 = vtanh.f32 %v1358_v49  ;;  %s6126_s12 = smov [#allocation4]  }
 0x672   :  { %s5791_s25 = sshll.u32 %s6126_s12, 4  ;;  %s5792_s25 = int_to_ptr.vmem [resolvable:$true] %s5791_s25 }
 0x673   :  { %5799 = dma.vmem_to_hbm [thread:$0]  %s5792_s25, 256, %s5794_s1, [#allocation5], %s6127_s15, %s6127_s15, %s6128_s26  }
 0x677   :  { %v5315_v11 = vpop.f32.mrf.mxu2 }
 0x679   :  { %5745 = vmatmul.f32.gmra.mxu0 %v1931_v20  ;;  %v5289_v27 = vpop.f32.mrf.mxu1  ;;  %v6065_v20 = vpop.eup %6064 }
 0x67a   :  { %v1928_v5 = vadd.f32 %v6065_v20, %v1645_v58 }
 0x67f   :  { %v5266_v28 = vpop.f32.mrf.mxu0 }
 0x680   :  { %v5267_v18 = vadd.f32 %v5266_v28, %v5243_v10  ;;  %v13519_v10 = vld [vmem:[#allocation22_spill] sm:$0xff]  ;;  %v13520_v28 = vld [vmem:[#allocation65_spill] sm:$0xff] }
 0x681   :  { %v1315_v17 = vadd.f32 %v13519_v10, %v989_v4 }
 0x682   :  { %v5290_v60 = vadd.f32 %v5289_v27, %v5267_v18  ;;  %v5292_v61 = vpop.f32.mrf.mxu1  ;;  %v13521_v27 = vld [vmem:[#allocation64_spill] sm:$0xff] }
 0x683   :  { %v1895_v18 = vadd.f32 %v13521_v27, %v13520_v28 }
 0x684   :  { %v5313_v33 = vadd.f32 %v5312_v12, %v5290_v60  ;;  %v13522_v12 = vld [vmem:[#allocation23_spill] sm:$0xff] }
 0x685   :  { %v1338_v60 = vadd.f32 %v13522_v12, %v1315_v17 }
 0x686   :  { %v5325_v55 = vadd.f32 %v6059_v62, %v5313_v33  ;;  %v13523_v33 = vld [vmem:[#allocation36_spill] sm:$0xff] }
 0x687   :  { %v1918_v62 = vadd.f32 %v13523_v33, %v1895_v18  ;;  %v1361_v25 = vadd.f32 %v13524_v57, %v1338_v60 }
 0x688   :  { %v5269_v34 = vpop.f32.mrf.mxu0  ;;  %5948 = vmatmul.msk.f32.vlgmr.msrb.gmra.mxu1 %vm5459_vm3, %v5325_v55  ;;  %v6067_v55 = vpop.eup %6066 }
 0x689   :  { %v5270_v50 = vadd.f32 %v5269_v34, %v5246_v46  ;;  %5754 = vmatpush.msrb.mxu1 %v2007_v37  ;;  %v1927_v37 = vadd.f32 %v6067_v55, %v1918_v62  ;;  %6068 = vtanh.f32 %v1361_v25  ;;  %v13527_v46 = vld [vmem:[#allocation38_spill] sm:$0xff] }
 0x68a   :  { %v1921_v34 = vadd.f32 %v13527_v46, %v1898_v21 }
 0x68b   :  { %v5293_v35 = vadd.f32 %v5292_v61, %v5270_v50  ;;  %5755 = vmatpush.msrb.mxu1 %v2006_v63 }
 0x68d   :  { %v5316_v14 = vadd.f32 %v5315_v11, %v5293_v35  ;;  %5756 = vmatpush.msrb.mxu1 %v2005_v29  ;;  %v5506_v35 = vpop.f32.mrf.mxu3 }
 0x68f   :  { %v5333_v1 = vadd.f32 %v6061_v39, %v5316_v14  ;;  %5757 = vmatpush.msrb.mxu1 %v2004_v31  ;;  %v6069_v63 = vpop.eup %6068 }
 0x690   :  { %v1932_v50 = vadd.f32 %v6069_v63, %v1921_v34 }
 0x691   :  { %5949 = vmatmul.msk.f32.gmra.mxu1 %vm5459_vm3, %v5333_v1 }
 0x692   :  { %5758 = vmatpush.msrb.mxu1 %v2003_v44  ;;  %v5483_v29 = vpop.f32.mrf.mxu2 }
 0x693   :  { %v5507_v42 = vadd.f32 %v5506_v35, %v5483_v29 }
 0x694   :  { %5759 = vmatpush.msrb.mxu1 %v2002_v59 }
 0x695   :  { %v5509_v31 = vpop.f32.mrf.mxu3 }
 0x696   :  { %5760 = vmatpush.msrb.mxu1 %v2001_v54 }
 0x698   :  { %5761 = vmatpush.msrb.mxu1 %v2000_v7 }
 0x699   :  { %5673 = vmatmul.f32.vlgmr.msra.gmra.mxu1 %v1923_v24 }
 0x69a   :  { %5762 = vmatpush.msrb.mxu1 %v1999_v19  ;;  %v5486_v11 = vpop.f32.mrf.mxu2 }
 0x69b   :  { %v5552_v61 = vpop.f32.mrf.mxu1  ;;  %v5510_v38 = vadd.f32 %v5509_v31, %v5486_v11 }
 0x69c   :  { %5763 = vmatpush.msrb.mxu1 %v1998_v51 }
 0x69e   :  { %5764 = vmatpush.msrb.mxu1 %v1997_v9 }
 0x6a1   :  { %5676 = vmatmul.f32.gmra.mxu1 %v1928_v5  ;;  %v5529_v16 = vpop.f32.mrf.mxu0 }
 0x6a2   :  { %v5530_v56 = vadd.f32 %v5529_v16, %v5507_v42 }
 0x6a3   :  { %v5555_v40 = vpop.f32.mrf.mxu1 }
 0x6a4   :  { %v5553_v44 = vadd.f32 %v5552_v61, %v5530_v56 }
 0x6a9   :  { %5950 = vmatmul.msk.f32.vlgmr.msrb.gmra.mxu1 %vm5650_vm4, %v1927_v37  ;;  %v5532_v39 = vpop.f32.mrf.mxu0 }
 0x6aa   :  { %v5533_v4 = vadd.f32 %v5532_v39, %v5510_v38 }
 0x6ac   :  { %v5556_v32 = vadd.f32 %v5555_v40, %v5533_v4 }
 0x6b1   :  { %5951 = vmatmul.msk.f32.gmra.mxu1 %vm5650_vm4, %v1932_v50 }
 0x6b2   :  { %v5575_v36 = vpop.f32.mrf.mxu2 }
 0x6b3   :  { %v5576_v15 = vadd.f32 %v5575_v36, %v5553_v44 }
 0x6ba   :  { %v5578_v59 = vpop.f32.mrf.mxu2 }
 0x6bb   :  { %v5579_v41 = vadd.f32 %v5578_v59, %v5556_v32 }
 0x6bf   :  { %v5598_v23 = vpop.f32.mrf.mxu3 }
 0x6c0   :  { %v5599_v45 = vadd.f32 %v5598_v23, %v5576_v15 }
 0x6c7   :  { %v5601_v6 = vpop.f32.mrf.mxu3 }
 0x6c8   :  { %v5602_v30 = vadd.f32 %v5601_v6, %v5579_v41 }
 0x6d2   :  { %v5697_v24 = vpop.f32.mrf.mxu2 }
 0x6d3   :  { %v5720_v19 = vpop.f32.mrf.mxu3 }
 0x6da   :  { %v5700_v9 = vpop.f32.mrf.mxu2 }
 0x6db   :  { %v5723_v17 = vpop.f32.mrf.mxu3 }
 0x6de   :  { %v5621_v52 = vpop.f32.mrf.mxu0 }
 0x6df   :  { %v5622_v54 = vadd.f32 %v5621_v52, %v5599_v45 }
 0x6e6   :  { %v5624_v13 = vpop.f32.mrf.mxu0 }
 0x6e7   :  { %v5625_v22 = vadd.f32 %v5624_v13, %v5602_v30 }
 0x6ee   :  { %v5743_v58 = vpop.f32.mrf.mxu0 }
 0x6f6   :  { %v5746_v27 = vpop.f32.mrf.mxu0 }
 0x705   :  { %v5644_v14 = vpop.f32.mrf.mxu1 }
 0x706   :  { %v5645_v7 = vadd.f32 %v5644_v14, %v5622_v54 }
 0x70e   :  { %v5647_v1 = vpop.f32.mrf.mxu1 }
 0x70f   :  { %v5648_v0 = vadd.f32 %v5647_v1, %v5625_v22 }
 0x716   :  { %v5674_v8 = vpop.f32.mrf.mxu1 }
 0x717   :  { %v5675_v2 = vadd.f32 %v5674_v8, %v5645_v7 }
 0x719   :  { %v5698_v43 = vadd.f32 %v5697_v24, %v5675_v2 }
 0x71b   :  { %v5721_v3 = vadd.f32 %v5720_v19, %v5698_v43 }
 0x71d   :  { %v5744_v49 = vadd.f32 %v5743_v58, %v5721_v3 }
 0x71e   :  { %v5677_v48 = vpop.f32.mrf.mxu1 }
 0x71f   :  { %v5678_v51 = vadd.f32 %v5677_v48, %v5648_v0 }
 0x721   :  { %v5701_v47 = vadd.f32 %v5700_v9, %v5678_v51 }
 0x723   :  { %v5724_v28 = vadd.f32 %v5723_v17, %v5701_v47 }
 0x725   :  { %v5747_v18 = vadd.f32 %v5746_v27, %v5724_v28 }
 0x726   :  { %v5766_v20 = vpop.f32.mrf.mxu1 }
 0x727   :  { %v5767_v10 = vadd.f32 %v5766_v20, %v5744_v49 }
 0x729   :  { %5772 = vst [vmem:[#allocation2] sm:$0xff] %v5767_v10 }
 0x72e   :  { %v5769_v5 = vpop.f32.mrf.mxu1 }
 0x72f   :  { %v5770_v12 = vadd.f32 %v5769_v5, %v5747_v18 }
 0x731   :  { %5773 = vst [vmem:[#allocation2 + $0x8] sm:$0xff] %v5770_v12 }
 0x732   :  { %5786 = dma.vmem_to_hbm [thread:$0]  %s5779_s2, 256, %s5781_s6, [#allocation3], %s6127_s15, %s6127_s15, %s6128_s26  }
 0x733   :  { %6119 = dma.done.wait [#allocation3], 256  }
 0x734   :  { %6120 = vsyncadd [#allocation3], 4294967040 }
 0x735   :  { %6121 = dma.done.wait [#allocation5], 256  }
 0x736   :  { %6122 = vsyncadd [#allocation5], 4294967040 }
 0x737   :  { %5808 = vsyncpa [#allocation3], 1 }
 0x738   :  { %5809 = vsyncpa [#allocation5], 1 }

</bundles_post_ra>
